<compile_context>
chip_gen: v5e
topology: v5e:2x2
jax: 0.10.0
libtpu: 0.0.40
codegen_flags: <defaults>
</compile_context>

<pallas_src>
import functools

import jax
import jax.numpy as jnp
from jax import lax
from jax.experimental import pallas as pl
from jax.experimental.pallas import tpu as pltpu

LEAKY_SLOPE = 0.01   # nn.LeakyReLU() default negative_slope
BN_EPS = 1e-5        # nn.BatchNorm2d default eps
SUBLANE = 8


def _round_up(x, m):
    return (x + m - 1) // m * m


def _conv_bn_lrelu(pad_ref, x_chw, w_ref, shift_ref, H, W):
    """One stage: 3x3 reflect conv (9 per-tap matmuls) + folded-BN shift + LeakyReLU.

    pad_ref:   (C, H+2, W+2) f32 VMEM scratch
    x_chw:     (C, H, W) value (bf16 or f32)
    w_ref:     (9, Cout, C) bf16 ref, BN scale folded in; tap t = ky*3 + kx
    shift_ref: (Cout, 1) f32 ref, BN shift
    returns:   (Cout, H*W) f32, lane-dense
    """
    C = x_chw.shape[0]
    Cout = w_ref.shape[1]

    # ---- reflect pad into the VMEM scratch: interior once, then 4 border strips
    xf = x_chw.astype(jnp.float32)
    pad_ref[0:C, 1:H + 1, 1:W + 1] = xf
    pad_ref[0:C, 0:1, 1:W + 1] = xf[:, 1:2, :]                 # top row  <- row 1
    pad_ref[0:C, H + 1:H + 2, 1:W + 1] = xf[:, H - 2:H - 1, :]  # bottom  <- row H-2
    pad_ref[0:C, :, 0:1] = pad_ref[0:C, :, 2:3]                 # left col (incl. corners)
    pad_ref[0:C, :, W + 1:W + 2] = pad_ref[0:C, :, W - 1:W]     # right col (incl. corners)

    # ---- 9 per-tap accumulating matmuls, channel-major (Cout, C) @ (C, H*W).
    # Accumulator is lane-dense (last dim = H*W); BN shift folded into the init.
    acc = jnp.broadcast_to(shift_ref[...], (Cout, H * W))
    t = 0
    for dy in range(3):
        for dx in range(3):
            xt = pad_ref[0:C, dy:dy + H, dx:dx + W].reshape(C, H * W)
            acc = acc + jnp.dot(w_ref[t], xt.astype(jnp.bfloat16),
                                preferred_element_type=jnp.float32)
            t += 1

    # LeakyReLU; Dropout2d(0.3) is identity in eval mode.
    return jnp.where(acc > 0, acc, LEAKY_SLOPE * acc)


def conv_block_kernel(x_ref, w1_ref, b1_ref, w2_ref, b2_ref, o_ref,
                      pad1_ref, pad2_ref):
    """Fused [conv3x3(reflect) + folded-BN + LeakyReLU] x 2 for one batch block.

    x_ref:  (BB, Cin_p, H, W)   bf16
    w1_ref: (9, Cmid_p, Cin_p)  bf16     b1_ref: (Cmid_p, 1) f32
    w2_ref: (9, Cout_p, Cmid_p) bf16     b2_ref: (Cout_p, 1) f32
    o_ref:  (BB, Cout_p, H*W)
    """
    BB, _, H, W = x_ref.shape
    Cmid = w1_ref.shape[1]
    for b in range(BB):  # static unroll over frames in this grid step
        x = x_ref[b]                                              # (Cin_p, H, W)
        y1 = _conv_bn_lrelu(pad1_ref, x, w1_ref, b1_ref, H, W)    # (Cmid_p, H*W) f32
        # stage-1 activation stays in VMEM/vregs; never touches HBM
        y1 = y1.reshape(Cmid, H, W)
        y2 = _conv_bn_lrelu(pad2_ref, y1, w2_ref, b2_ref, H, W)   # (Cout_p, H*W) f32
        o_ref[b] = y2.astype(o_ref.dtype)


def conv_block_pallas(x_nchw, params, *, out_channels=None, out_dtype=jnp.float32):
    """x_nchw: (N, Cin, H, W).  Returns (N, Cout, H, W) in `out_dtype` (NCHW end-to-end)."""
    w1, b1, w2, b2 = params["w1"], params["b1"], params["w2"], params["b2"]
    N, Cin, H, W = x_nchw.shape
    Cin_p = w1.shape[2]
    Cmid_p = w1.shape[1]
    Cout_p = w2.shape[1]
    Cout = Cout_p if out_channels is None else out_channels
    assert H >= 2 and W >= 2

    # zero-pad input channels to the sublane-aligned count baked into the folded
    # weights and cast to bf16 (single cheap fused XLA op; no transposes).
    x = x_nchw.astype(jnp.bfloat16)
    if Cin_p != Cin:
        x = jnp.pad(x, ((0, 0), (0, Cin_p - Cin), (0, 0), (0, 0)))

    # Batch-block, but keep >= 2 grid steps so the "parallel" axis can shard
    # across both v7x TensorCores (for N=2 this is one frame per step).
    bb = 1
    for cand in range(N // 2, 0, -1):
        if N % cand == 0:
            bb = cand
            break
    n_steps = N // bb

    out = pl.pallas_call(
        conv_block_kernel,
        out_shape=jax.ShapeDtypeStruct((N, Cout_p, H * W), out_dtype),
        grid=(n_steps,),
        in_specs=[
            pl.BlockSpec((bb, Cin_p, H, W), lambda n: (n, 0, 0, 0)),
            pl.BlockSpec((9, Cmid_p, Cin_p), lambda n: (0, 0, 0)),
            pl.BlockSpec((Cmid_p, 1), lambda n: (0, 0)),
            pl.BlockSpec((9, Cout_p, Cmid_p), lambda n: (0, 0, 0)),
            pl.BlockSpec((Cout_p, 1), lambda n: (0, 0)),
        ],
        out_specs=pl.BlockSpec((bb, Cout_p, H * W), lambda n: (n, 0, 0)),
        scratch_shapes=[
            pltpu.VMEM((Cin_p, H + 2, W + 2), jnp.float32),
            pltpu.VMEM((Cmid_p, H + 2, W + 2), jnp.float32),
        ],
        compiler_params=pltpu.CompilerParams(
            dimension_semantics=("parallel",),        # shard batch across TCs (v7x)
            vmem_limit_bytes=32 * 1024 * 1024,        # safe on v5e/v6e/v7x
        ),
    )(x, w1, b1, w2, b2)

    if Cout_p != Cout:
        out = out[:, :Cout]
    return out.reshape(N, Cout, H, W)


def init_raw_params(key, in_channel, out_channel, dtype=jnp.float32):
    """Deterministic synthetic params mirroring Conv_Block.__init__ shapes (PyTorch layout)."""
    ks = jax.random.split(key, 10)

    def bn(kg, kb, km, kv, c):
        g = 1.0 + 0.1 * jax.random.normal(kg, (c,), dtype)
        b = 0.1 * jax.random.normal(kb, (c,), dtype)
        m = 0.1 * jax.random.normal(km, (c,), dtype)
        v = jnp.abs(jax.random.normal(kv, (c,), dtype)) + 0.5
        return g, b, m, v

    w1 = 0.1 * jax.random.normal(ks[0], (out_channel, in_channel, 3, 3), dtype)
    g1, b1, m1, v1 = bn(ks[1], ks[2], ks[3], ks[4], out_channel)
    w2 = 0.1 * jax.random.normal(ks[5], (out_channel, out_channel, 3, 3), dtype)
    g2, b2, m2, v2 = bn(ks[6], ks[7], ks[8], ks[9], out_channel)
    return dict(w1=w1, g1=g1, b1=b1, m1=m1, v1=v1,
                w2=w2, g2=g2, b2=b2, m2=m2, v2=v2)


def prepare_kernel_params(raw):
    """Fold eval-mode BN into conv weights; lay out per-tap channel-major
    (9, Cout_p, Cin_p) bf16 weights and (Cout_p, 1) f32 shifts, with channel
    counts zero-padded to sublane multiples."""
    def fold(w_oihw, g, b, m, v, cout_pad, cin_pad):
        cout, cin = w_oihw.shape[0], w_oihw.shape[1]
        scale = g / jnp.sqrt(v + BN_EPS)                       # (Cout,)
        shift = b - m * scale                                  # (Cout,)
        w = w_oihw * scale[:, None, None, None]                # fold BN scale
        w = jnp.transpose(w, (2, 3, 0, 1)).reshape(9, cout, cin)   # tap-major (ky*3+kx)
        w = jnp.pad(w, ((0, 0), (0, cout_pad - cout), (0, cin_pad - cin)))
        shift = jnp.pad(shift, (0, cout_pad - cout)).reshape(-1, 1)
        return w.astype(jnp.bfloat16), shift.astype(jnp.float32)

    cin = raw["w1"].shape[1]
    cmid = raw["w1"].shape[0]
    cout = raw["w2"].shape[0]
    cin_p = _round_up(cin, SUBLANE)
    cmid_p = _round_up(cmid, SUBLANE)
    cout_p = _round_up(cout, SUBLANE)

    w1, b1 = fold(raw["w1"], raw["g1"], raw["b1"], raw["m1"], raw["v1"], cmid_p, cin_p)
    w2, b2 = fold(raw["w2"], raw["g2"], raw["b2"], raw["m2"], raw["v2"], cout_p, cmid_p)
    return dict(w1=w1, b1=b1, w2=w2, b2=b2)


def reference_forward(x_nchw, raw):
    """Pure-JAX (XLA) f32 reference of the eval-mode Conv_Block forward."""
    def stage(x, w, g, b, m, v):
        xp = jnp.pad(x, ((0, 0), (0, 0), (1, 1), (1, 1)), mode="reflect")
        y = lax.conv_general_dilated(
            xp, w, window_strides=(1, 1), padding="VALID",
            dimension_numbers=("NCHW", "OIHW", "NCHW"))
        scale = (g / jnp.sqrt(v + BN_EPS))[None, :, None, None]
        shift = (b - m * g / jnp.sqrt(v + BN_EPS))[None, :, None, None]
        y = y * scale + shift
        return jnp.where(y > 0, y, LEAKY_SLOPE * y)

    x = stage(x_nchw, raw["w1"], raw["g1"], raw["b1"], raw["m1"], raw["v1"])
    x = stage(x, raw["w2"], raw["g2"], raw["b2"], raw["m2"], raw["v2"])
    return x


if __name__ == "__main__":
    import numpy as np

    key = jax.random.PRNGKey(0)
    k_x, k_p = jax.random.split(key)

    N, Cin, Cout, H, W = 2, 4, 8, 16, 16
    x = jax.random.normal(k_x, (N, Cin, H, W), jnp.float32)
    raw = init_raw_params(k_p, Cin, Cout)
    kparams = prepare_kernel_params(raw)

    fwd = jax.jit(functools.partial(conv_block_pallas,
                                    out_channels=Cout, out_dtype=jnp.float32))
    y = fwd(x, kparams)
    jax.block_until_ready(y)
    assert y.shape == (N, Cout, H, W), y.shape

    # Loose tolerance: kernel uses bf16 activations/weights with f32 accumulation.
    y_ref = reference_forward(x, raw)
    np.testing.assert_allclose(np.asarray(y), np.asarray(y_ref), rtol=0.1, atol=0.1)

    print("KERNEL_OK")
</pallas_src>

<mosaic_0001>
module attributes {stable_mosaic.version = 11 : i64} {
  func.func @conv_block_kernel(%arg0: i32, %arg1: memref<1x8x16x16xbf16, #tpu.memory_space<vmem>>, %arg2: memref<9x8x8xbf16, #tpu.memory_space<vmem>>, %arg3: memref<8x1xf32, #tpu.memory_space<vmem>>, %arg4: memref<9x8x8xbf16, #tpu.memory_space<vmem>>, %arg5: memref<8x1xf32, #tpu.memory_space<vmem>>, %arg6: memref<1x8x256xf32, #tpu.memory_space<vmem>>, %arg7: memref<8x18x18xf32, #tpu.memory_space<vmem>>, %arg8: memref<8x18x18xf32, #tpu.memory_space<vmem>>) attributes {dimension_semantics = [#tpu.dimension_semantics<parallel>], iteration_bounds = array<i64: 2>, scalar_prefetch = 0 : i64, scratch_operands = 2 : i64, tpu.core_type = #tpu.core_type<tc>, window_params = [{transform_indices = @transform_0, window_bounds = array<i64: 1, 8, 16, 16>}, {pipeline_mode = #tpu.pipeline_mode<synchronous>, transform_indices = @transform_1, window_bounds = array<i64: 9, 8, 8>}, {pipeline_mode = #tpu.pipeline_mode<synchronous>, transform_indices = @transform_2, window_bounds = array<i64: 8, 1>}, {pipeline_mode = #tpu.pipeline_mode<synchronous>, transform_indices = @transform_3, window_bounds = array<i64: 9, 8, 8>}, {pipeline_mode = #tpu.pipeline_mode<synchronous>, transform_indices = @transform_4, window_bounds = array<i64: 8, 1>}, {transform_indices = @transform_5, window_bounds = array<i64: 1, 8, 256>}]} {
    %c0 = arith.constant 0 : index
    %c0_0 = arith.constant 0 : index
    %c0_1 = arith.constant 0 : index
    %c0_2 = arith.constant 0 : index
    %0 = vector.load %arg1[%c0, %c0_0, %c0_1, %c0_2] : memref<1x8x16x16xbf16, #tpu.memory_space<vmem>>, vector<1x8x16x16xbf16>
    %1 = vector.shape_cast %0 : vector<1x8x16x16xbf16> to vector<8x16x16xbf16>
    %2 = arith.extf %1 : vector<8x16x16xbf16> to vector<8x16x16xf32>
    %c0_3 = arith.constant 0 : index
    %c1 = arith.constant 1 : index
    %c1_4 = arith.constant 1 : index
    %3 = vector.load %arg7[%c0_3, %c1, %c1_4] : memref<8x18x18xf32, #tpu.memory_space<vmem>>, vector<8x16x16xf32>
    tpu.vector_store %arg7[%c0_3, %c1, %c1_4], %2 {strides = array<i32>} : memref<8x18x18xf32, #tpu.memory_space<vmem>>, vector<8x16x16xf32>,
    %4 = vector.extract_strided_slice %2 {offsets = [0, 1, 0], sizes = [8, 1, 16], strides = [1, 1, 1]} : vector<8x16x16xf32> to vector<8x1x16xf32>
    %c0_5 = arith.constant 0 : index
    %c0_6 = arith.constant 0 : index
    %c1_7 = arith.constant 1 : index
    %5 = vector.load %arg7[%c0_5, %c0_6, %c1_7] : memref<8x18x18xf32, #tpu.memory_space<vmem>>, vector<8x1x16xf32>
    tpu.vector_store %arg7[%c0_5, %c0_6, %c1_7], %4 {strides = array<i32>} : memref<8x18x18xf32, #tpu.memory_space<vmem>>, vector<8x1x16xf32>,
    %6 = vector.extract_strided_slice %2 {offsets = [0, 14, 0], sizes = [8, 1, 16], strides = [1, 1, 1]} : vector<8x16x16xf32> to vector<8x1x16xf32>
    %c0_8 = arith.constant 0 : index
    %c17 = arith.constant 17 : index
    %c1_9 = arith.constant 1 : index
    %7 = vector.load %arg7[%c0_8, %c17, %c1_9] : memref<8x18x18xf32, #tpu.memory_space<vmem>>, vector<8x1x16xf32>
    tpu.vector_store %arg7[%c0_8, %c17, %c1_9], %6 {strides = array<i32>} : memref<8x18x18xf32, #tpu.memory_space<vmem>>, vector<8x1x16xf32>,
    %c0_10 = arith.constant 0 : index
    %c0_11 = arith.constant 0 : index
    %c2 = arith.constant 2 : index
    %8 = vector.load %arg7[%c0_10, %c0_11, %c2] : memref<8x18x18xf32, #tpu.memory_space<vmem>>, vector<8x18x1xf32>
    %c0_12 = arith.constant 0 : index
    %c0_13 = arith.constant 0 : index
    %c0_14 = arith.constant 0 : index
    %9 = vector.load %arg7[%c0_12, %c0_13, %c0_14] : memref<8x18x18xf32, #tpu.memory_space<vmem>>, vector<8x18x1xf32>
    tpu.vector_store %arg7[%c0_12, %c0_13, %c0_14], %8 {strides = array<i32>} : memref<8x18x18xf32, #tpu.memory_space<vmem>>, vector<8x18x1xf32>,
    %c0_15 = arith.constant 0 : index
    %c0_16 = arith.constant 0 : index
    %c15 = arith.constant 15 : index
    %10 = vector.load %arg7[%c0_15, %c0_16, %c15] : memref<8x18x18xf32, #tpu.memory_space<vmem>>, vector<8x18x1xf32>
    %c0_17 = arith.constant 0 : index
    %c0_18 = arith.constant 0 : index
    %c17_19 = arith.constant 17 : index
    %11 = vector.load %arg7[%c0_17, %c0_18, %c17_19] : memref<8x18x18xf32, #tpu.memory_space<vmem>>, vector<8x18x1xf32>
    tpu.vector_store %arg7[%c0_17, %c0_18, %c17_19], %10 {strides = array<i32>} : memref<8x18x18xf32, #tpu.memory_space<vmem>>, vector<8x18x1xf32>,
    %c0_20 = arith.constant 0 : index
    %c0_21 = arith.constant 0 : index
    %12 = vector.load %arg3[%c0_20, %c0_21] : memref<8x1xf32, #tpu.memory_space<vmem>>, vector<8x1xf32>
    %13 = vector.shape_cast %12 : vector<8x1xf32> to vector<8x1xf32>
    %14 = vector.broadcast %13 : vector<8x1xf32> to vector<8x256xf32>
    %c0_22 = arith.constant 0 : index
    %c0_23 = arith.constant 0 : index
    %c0_24 = arith.constant 0 : index
    %15 = vector.load %arg7[%c0_22, %c0_23, %c0_24] : memref<8x18x18xf32, #tpu.memory_space<vmem>>, vector<8x16x16xf32>
    %16 = vector.shape_cast %15 : vector<8x16x16xf32> to vector<8x256xf32>
    %c0_25 = arith.constant 0 : index
    %c0_26 = arith.constant 0 : index
    %c0_27 = arith.constant 0 : index
    %17 = vector.load %arg2[%c0_25, %c0_26, %c0_27] : memref<9x8x8xbf16, #tpu.memory_space<vmem>>, vector<1x8x8xbf16>
    %18 = vector.shape_cast %17 : vector<1x8x8xbf16> to vector<8x8xbf16>
    %19 = arith.truncf %16 : vector<8x256xf32> to vector<8x256xbf16>
    %cst = arith.constant dense<0.000000e+00> : vector<8x256xf32>
    %20 = tpu.matmul %18, %19, %cst {dimension_numbers = #tpu.dot_dimension_numbers<[1], [0], [0], [1], [0, 0, 1, 1], [], []>} : vector<8x8xbf16>, vector<8x256xbf16>, vector<8x256xf32> -> vector<8x256xf32>
    %21 = arith.addf %14, %20 : vector<8x256xf32>
    %c0_28 = arith.constant 0 : index
    %c0_29 = arith.constant 0 : index
    %c1_30 = arith.constant 1 : index
    %22 = vector.load %arg7[%c0_28, %c0_29, %c1_30] : memref<8x18x18xf32, #tpu.memory_space<vmem>>, vector<8x16x16xf32>
    %23 = vector.shape_cast %22 : vector<8x16x16xf32> to vector<8x256xf32>
    %c1_31 = arith.constant 1 : index
    %c0_32 = arith.constant 0 : index
    %c0_33 = arith.constant 0 : index
    %24 = vector.load %arg2[%c1_31, %c0_32, %c0_33] : memref<9x8x8xbf16, #tpu.memory_space<vmem>>, vector<1x8x8xbf16>
    %25 = vector.shape_cast %24 : vector<1x8x8xbf16> to vector<8x8xbf16>
    %26 = arith.truncf %23 : vector<8x256xf32> to vector<8x256xbf16>
    %cst_34 = arith.constant dense<0.000000e+00> : vector<8x256xf32>
    %27 = tpu.matmul %25, %26, %cst_34 {dimension_numbers = #tpu.dot_dimension_numbers<[1], [0], [0], [1], [0, 0, 1, 1], [], []>} : vector<8x8xbf16>, vector<8x256xbf16>, vector<8x256xf32> -> vector<8x256xf32>
    %28 = arith.addf %21, %27 : vector<8x256xf32>
    %c0_35 = arith.constant 0 : index
    %c0_36 = arith.constant 0 : index
    %c2_37 = arith.constant 2 : index
    %29 = vector.load %arg7[%c0_35, %c0_36, %c2_37] : memref<8x18x18xf32, #tpu.memory_space<vmem>>, vector<8x16x16xf32>
    %30 = vector.shape_cast %29 : vector<8x16x16xf32> to vector<8x256xf32>
    %c2_38 = arith.constant 2 : index
    %c0_39 = arith.constant 0 : index
    %c0_40 = arith.constant 0 : index
    %31 = vector.load %arg2[%c2_38, %c0_39, %c0_40] : memref<9x8x8xbf16, #tpu.memory_space<vmem>>, vector<1x8x8xbf16>
    %32 = vector.shape_cast %31 : vector<1x8x8xbf16> to vector<8x8xbf16>
    %33 = arith.truncf %30 : vector<8x256xf32> to vector<8x256xbf16>
    %cst_41 = arith.constant dense<0.000000e+00> : vector<8x256xf32>
    %34 = tpu.matmul %32, %33, %cst_41 {dimension_numbers = #tpu.dot_dimension_numbers<[1], [0], [0], [1], [0, 0, 1, 1], [], []>} : vector<8x8xbf16>, vector<8x256xbf16>, vector<8x256xf32> -> vector<8x256xf32>
    %35 = arith.addf %28, %34 : vector<8x256xf32>
    %c0_42 = arith.constant 0 : index
    %c1_43 = arith.constant 1 : index
    %c0_44 = arith.constant 0 : index
    %36 = vector.load %arg7[%c0_42, %c1_43, %c0_44] : memref<8x18x18xf32, #tpu.memory_space<vmem>>, vector<8x16x16xf32>
    %37 = vector.shape_cast %36 : vector<8x16x16xf32> to vector<8x256xf32>
    %c3 = arith.constant 3 : index
    %c0_45 = arith.constant 0 : index
    %c0_46 = arith.constant 0 : index
    %38 = vector.load %arg2[%c3, %c0_45, %c0_46] : memref<9x8x8xbf16, #tpu.memory_space<vmem>>, vector<1x8x8xbf16>
    %39 = vector.shape_cast %38 : vector<1x8x8xbf16> to vector<8x8xbf16>
    %40 = arith.truncf %37 : vector<8x256xf32> to vector<8x256xbf16>
    %cst_47 = arith.constant dense<0.000000e+00> : vector<8x256xf32>
    %41 = tpu.matmul %39, %40, %cst_47 {dimension_numbers = #tpu.dot_dimension_numbers<[1], [0], [0], [1], [0, 0, 1, 1], [], []>} : vector<8x8xbf16>, vector<8x256xbf16>, vector<8x256xf32> -> vector<8x256xf32>
    %42 = arith.addf %35, %41 : vector<8x256xf32>
    %c0_48 = arith.constant 0 : index
    %c1_49 = arith.constant 1 : index
    %c1_50 = arith.constant 1 : index
    %43 = vector.load %arg7[%c0_48, %c1_49, %c1_50] : memref<8x18x18xf32, #tpu.memory_space<vmem>>, vector<8x16x16xf32>
    %44 = vector.shape_cast %43 : vector<8x16x16xf32> to vector<8x256xf32>
    %c4 = arith.constant 4 : index
    %c0_51 = arith.constant 0 : index
    %c0_52 = arith.constant 0 : index
    %45 = vector.load %arg2[%c4, %c0_51, %c0_52] : memref<9x8x8xbf16, #tpu.memory_space<vmem>>, vector<1x8x8xbf16>
    %46 = vector.shape_cast %45 : vector<1x8x8xbf16> to vector<8x8xbf16>
    %47 = arith.truncf %44 : vector<8x256xf32> to vector<8x256xbf16>
    %cst_53 = arith.constant dense<0.000000e+00> : vector<8x256xf32>
    %48 = tpu.matmul %46, %47, %cst_53 {dimension_numbers = #tpu.dot_dimension_numbers<[1], [0], [0], [1], [0, 0, 1, 1], [], []>} : vector<8x8xbf16>, vector<8x256xbf16>, vector<8x256xf32> -> vector<8x256xf32>
    %49 = arith.addf %42, %48 : vector<8x256xf32>
    %c0_54 = arith.constant 0 : index
    %c1_55 = arith.constant 1 : index
    %c2_56 = arith.constant 2 : index
    %50 = vector.load %arg7[%c0_54, %c1_55, %c2_56] : memref<8x18x18xf32, #tpu.memory_space<vmem>>, vector<8x16x16xf32>
    %51 = vector.shape_cast %50 : vector<8x16x16xf32> to vector<8x256xf32>
    %c5 = arith.constant 5 : index
    %c0_57 = arith.constant 0 : index
    %c0_58 = arith.constant 0 : index
    %52 = vector.load %arg2[%c5, %c0_57, %c0_58] : memref<9x8x8xbf16, #tpu.memory_space<vmem>>, vector<1x8x8xbf16>
    %53 = vector.shape_cast %52 : vector<1x8x8xbf16> to vector<8x8xbf16>
    %54 = arith.truncf %51 : vector<8x256xf32> to vector<8x256xbf16>
    %cst_59 = arith.constant dense<0.000000e+00> : vector<8x256xf32>
    %55 = tpu.matmul %53, %54, %cst_59 {dimension_numbers = #tpu.dot_dimension_numbers<[1], [0], [0], [1], [0, 0, 1, 1], [], []>} : vector<8x8xbf16>, vector<8x256xbf16>, vector<8x256xf32> -> vector<8x256xf32>
    %56 = arith.addf %49, %55 : vector<8x256xf32>
    %c0_60 = arith.constant 0 : index
    %c2_61 = arith.constant 2 : index
    %c0_62 = arith.constant 0 : index
    %57 = vector.load %arg7[%c0_60, %c2_61, %c0_62] : memref<8x18x18xf32, #tpu.memory_space<vmem>>, vector<8x16x16xf32>
    %58 = vector.shape_cast %57 : vector<8x16x16xf32> to vector<8x256xf32>
    %c6 = arith.constant 6 : index
    %c0_63 = arith.constant 0 : index
    %c0_64 = arith.constant 0 : index
    %59 = vector.load %arg2[%c6, %c0_63, %c0_64] : memref<9x8x8xbf16, #tpu.memory_space<vmem>>, vector<1x8x8xbf16>
    %60 = vector.shape_cast %59 : vector<1x8x8xbf16> to vector<8x8xbf16>
    %61 = arith.truncf %58 : vector<8x256xf32> to vector<8x256xbf16>
    %cst_65 = arith.constant dense<0.000000e+00> : vector<8x256xf32>
    %62 = tpu.matmul %60, %61, %cst_65 {dimension_numbers = #tpu.dot_dimension_numbers<[1], [0], [0], [1], [0, 0, 1, 1], [], []>} : vector<8x8xbf16>, vector<8x256xbf16>, vector<8x256xf32> -> vector<8x256xf32>
    %63 = arith.addf %56, %62 : vector<8x256xf32>
    %c0_66 = arith.constant 0 : index
    %c2_67 = arith.constant 2 : index
    %c1_68 = arith.constant 1 : index
    %64 = vector.load %arg7[%c0_66, %c2_67, %c1_68] : memref<8x18x18xf32, #tpu.memory_space<vmem>>, vector<8x16x16xf32>
    %65 = vector.shape_cast %64 : vector<8x16x16xf32> to vector<8x256xf32>
    %c7 = arith.constant 7 : index
    %c0_69 = arith.constant 0 : index
    %c0_70 = arith.constant 0 : index
    %66 = vector.load %arg2[%c7, %c0_69, %c0_70] : memref<9x8x8xbf16, #tpu.memory_space<vmem>>, vector<1x8x8xbf16>
    %67 = vector.shape_cast %66 : vector<1x8x8xbf16> to vector<8x8xbf16>
    %68 = arith.truncf %65 : vector<8x256xf32> to vector<8x256xbf16>
    %cst_71 = arith.constant dense<0.000000e+00> : vector<8x256xf32>
    %69 = tpu.matmul %67, %68, %cst_71 {dimension_numbers = #tpu.dot_dimension_numbers<[1], [0], [0], [1], [0, 0, 1, 1], [], []>} : vector<8x8xbf16>, vector<8x256xbf16>, vector<8x256xf32> -> vector<8x256xf32>
    %70 = arith.addf %63, %69 : vector<8x256xf32>
    %c0_72 = arith.constant 0 : index
    %c2_73 = arith.constant 2 : index
    %c2_74 = arith.constant 2 : index
    %71 = vector.load %arg7[%c0_72, %c2_73, %c2_74] : memref<8x18x18xf32, #tpu.memory_space<vmem>>, vector<8x16x16xf32>
    %72 = vector.shape_cast %71 : vector<8x16x16xf32> to vector<8x256xf32>
    %c8 = arith.constant 8 : index
    %c0_75 = arith.constant 0 : index
    %c0_76 = arith.constant 0 : index
    %73 = vector.load %arg2[%c8, %c0_75, %c0_76] : memref<9x8x8xbf16, #tpu.memory_space<vmem>>, vector<1x8x8xbf16>
    %74 = vector.shape_cast %73 : vector<1x8x8xbf16> to vector<8x8xbf16>
    %75 = arith.truncf %72 : vector<8x256xf32> to vector<8x256xbf16>
    %cst_77 = arith.constant dense<0.000000e+00> : vector<8x256xf32>
    %76 = tpu.matmul %74, %75, %cst_77 {dimension_numbers = #tpu.dot_dimension_numbers<[1], [0], [0], [1], [0, 0, 1, 1], [], []>} : vector<8x8xbf16>, vector<8x256xbf16>, vector<8x256xf32> -> vector<8x256xf32>
    %77 = arith.addf %70, %76 : vector<8x256xf32>
    %cst_78 = arith.constant 0.000000e+00 : f32
    %78 = vector.broadcast %cst_78 : f32 to vector<8x256xf32>
    %79 = arith.cmpf ogt, %77, %78 : vector<8x256xf32>
    %cst_79 = arith.constant 0.00999999977 : f32
    %80 = vector.broadcast %cst_79 : f32 to vector<8x256xf32>
    %81 = arith.mulf %80, %77 : vector<8x256xf32>
    %82 = arith.select %79, %77, %81 : vector<8x256xi1>, vector<8x256xf32>
    %83 = vector.shape_cast %82 : vector<8x256xf32> to vector<8x16x16xf32>
    %c0_80 = arith.constant 0 : index
    %c1_81 = arith.constant 1 : index
    %c1_82 = arith.constant 1 : index
    %84 = vector.load %arg8[%c0_80, %c1_81, %c1_82] : memref<8x18x18xf32, #tpu.memory_space<vmem>>, vector<8x16x16xf32>
    tpu.vector_store %arg8[%c0_80, %c1_81, %c1_82], %83 {strides = array<i32>} : memref<8x18x18xf32, #tpu.memory_space<vmem>>, vector<8x16x16xf32>,
    %85 = vector.extract_strided_slice %83 {offsets = [0, 1, 0], sizes = [8, 1, 16], strides = [1, 1, 1]} : vector<8x16x16xf32> to vector<8x1x16xf32>
    %c0_83 = arith.constant 0 : index
    %c0_84 = arith.constant 0 : index
    %c1_85 = arith.constant 1 : index
    %86 = vector.load %arg8[%c0_83, %c0_84, %c1_85] : memref<8x18x18xf32, #tpu.memory_space<vmem>>, vector<8x1x16xf32>
    tpu.vector_store %arg8[%c0_83, %c0_84, %c1_85], %85 {strides = array<i32>} : memref<8x18x18xf32, #tpu.memory_space<vmem>>, vector<8x1x16xf32>,
    %87 = vector.extract_strided_slice %83 {offsets = [0, 14, 0], sizes = [8, 1, 16], strides = [1, 1, 1]} : vector<8x16x16xf32> to vector<8x1x16xf32>
    %c0_86 = arith.constant 0 : index
    %c17_87 = arith.constant 17 : index
    %c1_88 = arith.constant 1 : index
    %88 = vector.load %arg8[%c0_86, %c17_87, %c1_88] : memref<8x18x18xf32, #tpu.memory_space<vmem>>, vector<8x1x16xf32>
    tpu.vector_store %arg8[%c0_86, %c17_87, %c1_88], %87 {strides = array<i32>} : memref<8x18x18xf32, #tpu.memory_space<vmem>>, vector<8x1x16xf32>,
    %c0_89 = arith.constant 0 : index
    %c0_90 = arith.constant 0 : index
    %c2_91 = arith.constant 2 : index
    %89 = vector.load %arg8[%c0_89, %c0_90, %c2_91] : memref<8x18x18xf32, #tpu.memory_space<vmem>>, vector<8x18x1xf32>
    %c0_92 = arith.constant 0 : index
    %c0_93 = arith.constant 0 : index
    %c0_94 = arith.constant 0 : index
    %90 = vector.load %arg8[%c0_92, %c0_93, %c0_94] : memref<8x18x18xf32, #tpu.memory_space<vmem>>, vector<8x18x1xf32>
    tpu.vector_store %arg8[%c0_92, %c0_93, %c0_94], %89 {strides = array<i32>} : memref<8x18x18xf32, #tpu.memory_space<vmem>>, vector<8x18x1xf32>,
    %c0_95 = arith.constant 0 : index
    %c0_96 = arith.constant 0 : index
    %c15_97 = arith.constant 15 : index
    %91 = vector.load %arg8[%c0_95, %c0_96, %c15_97] : memref<8x18x18xf32, #tpu.memory_space<vmem>>, vector<8x18x1xf32>
    %c0_98 = arith.constant 0 : index
    %c0_99 = arith.constant 0 : index
    %c17_100 = arith.constant 17 : index
    %92 = vector.load %arg8[%c0_98, %c0_99, %c17_100] : memref<8x18x18xf32, #tpu.memory_space<vmem>>, vector<8x18x1xf32>
    tpu.vector_store %arg8[%c0_98, %c0_99, %c17_100], %91 {strides = array<i32>} : memref<8x18x18xf32, #tpu.memory_space<vmem>>, vector<8x18x1xf32>,
    %c0_101 = arith.constant 0 : index
    %c0_102 = arith.constant 0 : index
    %93 = vector.load %arg5[%c0_101, %c0_102] : memref<8x1xf32, #tpu.memory_space<vmem>>, vector<8x1xf32>
    %94 = vector.shape_cast %93 : vector<8x1xf32> to vector<8x1xf32>
    %95 = vector.broadcast %94 : vector<8x1xf32> to vector<8x256xf32>
    %c0_103 = arith.constant 0 : index
    %c0_104 = arith.constant 0 : index
    %c0_105 = arith.constant 0 : index
    %96 = vector.load %arg8[%c0_103, %c0_104, %c0_105] : memref<8x18x18xf32, #tpu.memory_space<vmem>>, vector<8x16x16xf32>
    %97 = vector.shape_cast %96 : vector<8x16x16xf32> to vector<8x256xf32>
    %c0_106 = arith.constant 0 : index
    %c0_107 = arith.constant 0 : index
    %c0_108 = arith.constant 0 : index
    %98 = vector.load %arg4[%c0_106, %c0_107, %c0_108] : memref<9x8x8xbf16, #tpu.memory_space<vmem>>, vector<1x8x8xbf16>
    %99 = vector.shape_cast %98 : vector<1x8x8xbf16> to vector<8x8xbf16>
    %100 = arith.truncf %97 : vector<8x256xf32> to vector<8x256xbf16>
    %cst_109 = arith.constant dense<0.000000e+00> : vector<8x256xf32>
    %101 = tpu.matmul %99, %100, %cst_109 {dimension_numbers = #tpu.dot_dimension_numbers<[1], [0], [0], [1], [0, 0, 1, 1], [], []>} : vector<8x8xbf16>, vector<8x256xbf16>, vector<8x256xf32> -> vector<8x256xf32>
    %102 = arith.addf %95, %101 : vector<8x256xf32>
    %c0_110 = arith.constant 0 : index
    %c0_111 = arith.constant 0 : index
    %c1_112 = arith.constant 1 : index
    %103 = vector.load %arg8[%c0_110, %c0_111, %c1_112] : memref<8x18x18xf32, #tpu.memory_space<vmem>>, vector<8x16x16xf32>
    %104 = vector.shape_cast %103 : vector<8x16x16xf32> to vector<8x256xf32>
    %c1_113 = arith.constant 1 : index
    %c0_114 = arith.constant 0 : index
    %c0_115 = arith.constant 0 : index
    %105 = vector.load %arg4[%c1_113, %c0_114, %c0_115] : memref<9x8x8xbf16, #tpu.memory_space<vmem>>, vector<1x8x8xbf16>
    %106 = vector.shape_cast %105 : vector<1x8x8xbf16> to vector<8x8xbf16>
    %107 = arith.truncf %104 : vector<8x256xf32> to vector<8x256xbf16>
    %cst_116 = arith.constant dense<0.000000e+00> : vector<8x256xf32>
    %108 = tpu.matmul %106, %107, %cst_116 {dimension_numbers = #tpu.dot_dimension_numbers<[1], [0], [0], [1], [0, 0, 1, 1], [], []>} : vector<8x8xbf16>, vector<8x256xbf16>, vector<8x256xf32> -> vector<8x256xf32>
    %109 = arith.addf %102, %108 : vector<8x256xf32>
    %c0_117 = arith.constant 0 : index
    %c0_118 = arith.constant 0 : index
    %c2_119 = arith.constant 2 : index
    %110 = vector.load %arg8[%c0_117, %c0_118, %c2_119] : memref<8x18x18xf32, #tpu.memory_space<vmem>>, vector<8x16x16xf32>
    %111 = vector.shape_cast %110 : vector<8x16x16xf32> to vector<8x256xf32>
    %c2_120 = arith.constant 2 : index
    %c0_121 = arith.constant 0 : index
    %c0_122 = arith.constant 0 : index
    %112 = vector.load %arg4[%c2_120, %c0_121, %c0_122] : memref<9x8x8xbf16, #tpu.memory_space<vmem>>, vector<1x8x8xbf16>
    %113 = vector.shape_cast %112 : vector<1x8x8xbf16> to vector<8x8xbf16>
    %114 = arith.truncf %111 : vector<8x256xf32> to vector<8x256xbf16>
    %cst_123 = arith.constant dense<0.000000e+00> : vector<8x256xf32>
    %115 = tpu.matmul %113, %114, %cst_123 {dimension_numbers = #tpu.dot_dimension_numbers<[1], [0], [0], [1], [0, 0, 1, 1], [], []>} : vector<8x8xbf16>, vector<8x256xbf16>, vector<8x256xf32> -> vector<8x256xf32>
    %116 = arith.addf %109, %115 : vector<8x256xf32>
    %c0_124 = arith.constant 0 : index
    %c1_125 = arith.constant 1 : index
    %c0_126 = arith.constant 0 : index
    %117 = vector.load %arg8[%c0_124, %c1_125, %c0_126] : memref<8x18x18xf32, #tpu.memory_space<vmem>>, vector<8x16x16xf32>
    %118 = vector.shape_cast %117 : vector<8x16x16xf32> to vector<8x256xf32>
    %c3_127 = arith.constant 3 : index
    %c0_128 = arith.constant 0 : index
    %c0_129 = arith.constant 0 : index
    %119 = vector.load %arg4[%c3_127, %c0_128, %c0_129] : memref<9x8x8xbf16, #tpu.memory_space<vmem>>, vector<1x8x8xbf16>
    %120 = vector.shape_cast %119 : vector<1x8x8xbf16> to vector<8x8xbf16>
    %121 = arith.truncf %118 : vector<8x256xf32> to vector<8x256xbf16>
    %cst_130 = arith.constant dense<0.000000e+00> : vector<8x256xf32>
    %122 = tpu.matmul %120, %121, %cst_130 {dimension_numbers = #tpu.dot_dimension_numbers<[1], [0], [0], [1], [0, 0, 1, 1], [], []>} : vector<8x8xbf16>, vector<8x256xbf16>, vector<8x256xf32> -> vector<8x256xf32>
    %123 = arith.addf %116, %122 : vector<8x256xf32>
    %c0_131 = arith.constant 0 : index
    %c1_132 = arith.constant 1 : index
    %c1_133 = arith.constant 1 : index
    %124 = vector.load %arg8[%c0_131, %c1_132, %c1_133] : memref<8x18x18xf32, #tpu.memory_space<vmem>>, vector<8x16x16xf32>
    %125 = vector.shape_cast %124 : vector<8x16x16xf32> to vector<8x256xf32>
    %c4_134 = arith.constant 4 : index
    %c0_135 = arith.constant 0 : index
    %c0_136 = arith.constant 0 : index
    %126 = vector.load %arg4[%c4_134, %c0_135, %c0_136] : memref<9x8x8xbf16, #tpu.memory_space<vmem>>, vector<1x8x8xbf16>
    %127 = vector.shape_cast %126 : vector<1x8x8xbf16> to vector<8x8xbf16>
    %128 = arith.truncf %125 : vector<8x256xf32> to vector<8x256xbf16>
    %cst_137 = arith.constant dense<0.000000e+00> : vector<8x256xf32>
    %129 = tpu.matmul %127, %128, %cst_137 {dimension_numbers = #tpu.dot_dimension_numbers<[1], [0], [0], [1], [0, 0, 1, 1], [], []>} : vector<8x8xbf16>, vector<8x256xbf16>, vector<8x256xf32> -> vector<8x256xf32>
    %130 = arith.addf %123, %129 : vector<8x256xf32>
    %c0_138 = arith.constant 0 : index
    %c1_139 = arith.constant 1 : index
    %c2_140 = arith.constant 2 : index
    %131 = vector.load %arg8[%c0_138, %c1_139, %c2_140] : memref<8x18x18xf32, #tpu.memory_space<vmem>>, vector<8x16x16xf32>
    %132 = vector.shape_cast %131 : vector<8x16x16xf32> to vector<8x256xf32>
    %c5_141 = arith.constant 5 : index
    %c0_142 = arith.constant 0 : index
    %c0_143 = arith.constant 0 : index
    %133 = vector.load %arg4[%c5_141, %c0_142, %c0_143] : memref<9x8x8xbf16, #tpu.memory_space<vmem>>, vector<1x8x8xbf16>
    %134 = vector.shape_cast %133 : vector<1x8x8xbf16> to vector<8x8xbf16>
    %135 = arith.truncf %132 : vector<8x256xf32> to vector<8x256xbf16>
    %cst_144 = arith.constant dense<0.000000e+00> : vector<8x256xf32>
    %136 = tpu.matmul %134, %135, %cst_144 {dimension_numbers = #tpu.dot_dimension_numbers<[1], [0], [0], [1], [0, 0, 1, 1], [], []>} : vector<8x8xbf16>, vector<8x256xbf16>, vector<8x256xf32> -> vector<8x256xf32>
    %137 = arith.addf %130, %136 : vector<8x256xf32>
    %c0_145 = arith.constant 0 : index
    %c2_146 = arith.constant 2 : index
    %c0_147 = arith.constant 0 : index
    %138 = vector.load %arg8[%c0_145, %c2_146, %c0_147] : memref<8x18x18xf32, #tpu.memory_space<vmem>>, vector<8x16x16xf32>
    %139 = vector.shape_cast %138 : vector<8x16x16xf32> to vector<8x256xf32>
    %c6_148 = arith.constant 6 : index
    %c0_149 = arith.constant 0 : index
    %c0_150 = arith.constant 0 : index
    %140 = vector.load %arg4[%c6_148, %c0_149, %c0_150] : memref<9x8x8xbf16, #tpu.memory_space<vmem>>, vector<1x8x8xbf16>
    %141 = vector.shape_cast %140 : vector<1x8x8xbf16> to vector<8x8xbf16>
    %142 = arith.truncf %139 : vector<8x256xf32> to vector<8x256xbf16>
    %cst_151 = arith.constant dense<0.000000e+00> : vector<8x256xf32>
    %143 = tpu.matmul %141, %142, %cst_151 {dimension_numbers = #tpu.dot_dimension_numbers<[1], [0], [0], [1], [0, 0, 1, 1], [], []>} : vector<8x8xbf16>, vector<8x256xbf16>, vector<8x256xf32> -> vector<8x256xf32>
    %144 = arith.addf %137, %143 : vector<8x256xf32>
    %c0_152 = arith.constant 0 : index
    %c2_153 = arith.constant 2 : index
    %c1_154 = arith.constant 1 : index
    %145 = vector.load %arg8[%c0_152, %c2_153, %c1_154] : memref<8x18x18xf32, #tpu.memory_space<vmem>>, vector<8x16x16xf32>
    %146 = vector.shape_cast %145 : vector<8x16x16xf32> to vector<8x256xf32>
    %c7_155 = arith.constant 7 : index
    %c0_156 = arith.constant 0 : index
    %c0_157 = arith.constant 0 : index
    %147 = vector.load %arg4[%c7_155, %c0_156, %c0_157] : memref<9x8x8xbf16, #tpu.memory_space<vmem>>, vector<1x8x8xbf16>
    %148 = vector.shape_cast %147 : vector<1x8x8xbf16> to vector<8x8xbf16>
    %149 = arith.truncf %146 : vector<8x256xf32> to vector<8x256xbf16>
    %cst_158 = arith.constant dense<0.000000e+00> : vector<8x256xf32>
    %150 = tpu.matmul %148, %149, %cst_158 {dimension_numbers = #tpu.dot_dimension_numbers<[1], [0], [0], [1], [0, 0, 1, 1], [], []>} : vector<8x8xbf16>, vector<8x256xbf16>, vector<8x256xf32> -> vector<8x256xf32>
    %151 = arith.addf %144, %150 : vector<8x256xf32>
    %c0_159 = arith.constant 0 : index
    %c2_160 = arith.constant 2 : index
    %c2_161 = arith.constant 2 : index
    %152 = vector.load %arg8[%c0_159, %c2_160, %c2_161] : memref<8x18x18xf32, #tpu.memory_space<vmem>>, vector<8x16x16xf32>
    %153 = vector.shape_cast %152 : vector<8x16x16xf32> to vector<8x256xf32>
    %c8_162 = arith.constant 8 : index
    %c0_163 = arith.constant 0 : index
    %c0_164 = arith.constant 0 : index
    %154 = vector.load %arg4[%c8_162, %c0_163, %c0_164] : memref<9x8x8xbf16, #tpu.memory_space<vmem>>, vector<1x8x8xbf16>
    %155 = vector.shape_cast %154 : vector<1x8x8xbf16> to vector<8x8xbf16>
    %156 = arith.truncf %153 : vector<8x256xf32> to vector<8x256xbf16>
    %cst_165 = arith.constant dense<0.000000e+00> : vector<8x256xf32>
    %157 = tpu.matmul %155, %156, %cst_165 {dimension_numbers = #tpu.dot_dimension_numbers<[1], [0], [0], [1], [0, 0, 1, 1], [], []>} : vector<8x8xbf16>, vector<8x256xbf16>, vector<8x256xf32> -> vector<8x256xf32>
    %158 = arith.addf %151, %157 : vector<8x256xf32>
    %cst_166 = arith.constant 0.000000e+00 : f32
    %159 = vector.broadcast %cst_166 : f32 to vector<8x256xf32>
    %160 = arith.cmpf ogt, %158, %159 : vector<8x256xf32>
    %cst_167 = arith.constant 0.00999999977 : f32
    %161 = vector.broadcast %cst_167 : f32 to vector<8x256xf32>
    %162 = arith.mulf %161, %158 : vector<8x256xf32>
    %163 = arith.select %160, %158, %162 : vector<8x256xi1>, vector<8x256xf32>
    %c0_168 = arith.constant 0 : index
    %c0_169 = arith.constant 0 : index
    %c0_170 = arith.constant 0 : index
    %164 = vector.load %arg6[%c0_168, %c0_169, %c0_170] : memref<1x8x256xf32, #tpu.memory_space<vmem>>, vector<1x8x256xf32>
    %165 = vector.shape_cast %164 : vector<1x8x256xf32> to vector<8x256xf32>
    %166 = vector.shape_cast %163 : vector<8x256xf32> to vector<1x8x256xf32>
    tpu.vector_store %arg6[%c0_168, %c0_169, %c0_170], %166 {strides = array<i32>} : memref<1x8x256xf32, #tpu.memory_space<vmem>>, vector<1x8x256xf32>,
    return
  }
  func.func @transform_0(%arg0: i32) -> (i32, i32, i32, i32) {
    %c0_i32 = arith.constant 0 : i32
    %c0_i32_0 = arith.constant 0 : i32
    %c0_i32_1 = arith.constant 0 : i32
    %c0_i32_2 = arith.constant 0 : i32
    return %arg0, %c0_i32, %c0_i32_0, %c0_i32_1 : i32, i32, i32, i32
  }
  func.func @transform_1(%arg0: i32) -> (i32, i32, i32) {
    %c0_i32 = arith.constant 0 : i32
    %c0_i32_0 = arith.constant 0 : i32
    %c0_i32_1 = arith.constant 0 : i32
    %c0_i32_2 = arith.constant 0 : i32
    return %c0_i32, %c0_i32_0, %c0_i32_1 : i32, i32, i32
  }
  func.func @transform_2(%arg0: i32) -> (i32, i32) {
    %c0_i32 = arith.constant 0 : i32
    %c0_i32_0 = arith.constant 0 : i32
    %c0_i32_1 = arith.constant 0 : i32
    return %c0_i32, %c0_i32_0 : i32, i32
  }
  func.func @transform_3(%arg0: i32) -> (i32, i32, i32) {
    %c0_i32 = arith.constant 0 : i32
    %c0_i32_0 = arith.constant 0 : i32
    %c0_i32_1 = arith.constant 0 : i32
    %c0_i32_2 = arith.constant 0 : i32
    return %c0_i32, %c0_i32_0, %c0_i32_1 : i32, i32, i32
  }
  func.func @transform_4(%arg0: i32) -> (i32, i32) {
    %c0_i32 = arith.constant 0 : i32
    %c0_i32_0 = arith.constant 0 : i32
    %c0_i32_1 = arith.constant 0 : i32
    return %c0_i32, %c0_i32_0 : i32, i32
  }
  func.func @transform_5(%arg0: i32) -> (i32, i32, i32) {
    %c0_i32 = arith.constant 0 : i32
    %c0_i32_0 = arith.constant 0 : i32
    %c0_i32_1 = arith.constant 0 : i32
    return %arg0, %c0_i32, %c0_i32_0 : i32, i32, i32
  }
}

</mosaic_0001>

<bundles_post_ra>
// kernel: conv_block_pallas.1
= control target key start
LH: loop header
LB: loop body
LE: loop exit
PB: predicated region body
PF: predicated region fallthrough
CT: control target
= control target key end

     0   :  { %s9806_s18 = smov 0   ;;  %s15970_s0 = inlined_call_operand.vmem [shape: bf16[2,8,16,16], index: 0, kind: input, shape index: {}]   ;;  %s15971_s1 = inlined_call_operand.vmem [shape: bf16[9,8,8], index: 1, kind: input, shape index: {}]   ;;  %s15972_s2 = inlined_call_operand.vmem [shape: f32[8,1], index: 2, kind: input, shape index: {}]   ;;  %s15973_s3 = inlined_call_operand.vmem [shape: bf16[9,8,8], index: 3, kind: input, shape index: {}]   ;;  %s15974_s4 = inlined_call_operand.vmem [shape: f32[8,1], index: 4, kind: input, shape index: {}]   ;;  %s15975_s5 = inlined_call_operand.vmem [shape: f32[2,8,256], index: 5, kind: output, shape index: {}]  }
   0x1 LB: > { %s8476_s19 = sadd.s32 4294967295, %s9760_s18   ;;  %p8480_p0 = scmp.ge.s32.totalorder %s9760_s18, 1  ;;  %s9760_s18 = sphi %s9806_s18, %s15_s18  }
   0x2   : > { %p187_p1 = scmp.lt.s32.totalorder %s9760_s18, 3 }
   0x4   : > { %p188_p2 = pnand %p8480_p0, %p187_p1 }
   0x6   : > { %191 = sbr.rel (%p188_p2) target bundleno = 2307 (0x903), region = 40 }
   0xb   : > { %p215_p3 = scmp.lt.s32.totalorder %s8476_s19, 1  ;;  %s9762_s24 = smov 1   ;;  %v9763_v32 = vmov 0   ;;  %v649_v33 = vld [vmem:[%s15972_s2] sm:$0xff]  ;;  %vm322_vm0 = vcmask 138248   ;;  %vm348_vm1 = vcmask 137230  }
   0xc   : > { %8643 = vset.pattern.permute.xlu0 %v9763_v32  ;;  %8642 = vset.pattern.permute.xlu2 %v9763_v32  ;;  %v4865_v34 = vld [vmem:[%s15974_s4] sm:$0xff]  ;;  %vm339_vm2 = vcmask 132105   ;;  %s9764_s29 = smov 126   ;;  %vm477_vm3 = vcmask 7168   ;;  %s9765_s30 = smov 2   ;;  %vm480_vm4 = vcmask 1024  }
   0xd   : > { %s16879_s19 = smov (!%p215_p3, %s8476_s19), 1  ;;  %vm16096_vm5 = vcmask 146568   ;;  %vm672_vm6 = vcmask 1047556   ;;  %vm626_vm7 = vcmask 140424   ;;  %s9768_s6 = smov 127   ;;  %vm952_vm8 = vcmask 130048  }
   0xe   : > { %s8539_s20 = sshll.u32 %s16879_s19, 6  ;;  %s9769_s7 = smov 32   ;;  %vm954_vm9 = vcmask 261120   ;;  %vm956_vm10 = vcmask 392192   ;;  %vm958_vm11 = vcmask 523264   ;;  %vm960_vm12 = vcmask 654336  }
   0xf   : > { %s219_s23 = scalar_lea.vmem %s15970_s0, %s8539_s20  ;;  %s9770_s8 = smov 16   ;;  %vm962_vm13 = vcmask 785408   ;;  %vm964_vm14 = vcmask 916480   ;;  %vm16098_vm15 = vcmask 1043456  }
  0x10   : > { %v8542_v0 = vld [vmem:[%s219_s23] sm:$0xff]   ;;  %v8574_v1 = vld [vmem:[%s219_s23 + $0x10] sm:$0xff]   ;;  %v8573_v5 = vld [vmem:[%s219_s23 + $0x8] sm:$0xff]   ;;  %s9771_s9 = smov 80   ;;  %s9772_s10 = smov 64  }
  0x11   : > { %v8543_v2 = vunpack.c.l.bf16 %v8542_v0  ;;  %v8544_v3 = vunpack.c.h.bf16 %v8542_v0  ;;  %v8576_v4 = vld [vmem:[%s219_s23 + $0x20] sm:$0xff]   ;;  %v8551_v6 = vunpack.c.l.bf16 %v8574_v1  ;;  %v8552_v7 = vunpack.c.h.bf16 %v8574_v1  ;;  %v8575_v9 = vld [vmem:[%s219_s23 + $0x18] sm:$0xff]   ;;  %v8577_v15 = vld [vmem:[%s219_s23 + $0x28] sm:$0xff]   ;;  %s9773_s11 = smov 48   ;;  %s9774_s12 = smov 112  }
  0x12   : > { %v8559_v11 = vunpack.c.l.bf16 %v8576_v4  ;;  %v8560_v12 = vunpack.c.h.bf16 %v8576_v4  ;;  %v8547_v13 = vunpack.c.l.bf16 %v8573_v5  ;;  %v8548_v14 = vunpack.c.h.bf16 %v8573_v5  ;;  %v8578_v23 = vld [vmem:[%s219_s23 + $0x30] sm:$0xff]   ;;  %v8579_v24 = vld [vmem:[%s219_s23 + $0x38] sm:$0xff]   ;;  %s9775_s13 = smov 96   ;;  %s8540_s15 = sshll.u32 %s16879_s19, 4 }
  0x13   : > { %v8602_v8 = vpack.i.bf16 %v8544_v3, %v8543_v2  ;;  %v8612_v10 = vpack.i.bf16 %v8552_v7, %v8551_v6  ;;  %v8555_v16 = vunpack.c.l.bf16 %v8575_v9  ;;  %v8556_v17 = vunpack.c.h.bf16 %v8575_v9  ;;  %s224_s20 = scalar_lea.vmem %s15975_s5, %s8540_s15 }
  0x14   : > { %v8622_v18 = vpack.i.bf16 %v8560_v12, %v8559_v11  ;;  %v8563_v19 = vunpack.c.l.bf16 %v8577_v15  ;;  %v8564_v20 = vunpack.c.h.bf16 %v8577_v15  ;;  %v8607_v21 = vpack.i.bf16 %v8548_v14, %v8547_v13 }
  0x15   : > { %8603 = vrot.lane.b32.xlu0 %v8602_v8, %s9762_s24  ;;  %8613 = vrot.lane.b32.xlu1 %v8612_v10, %s9762_s24  ;;  %v8617_v22 = vpack.i.bf16 %v8556_v17, %v8555_v16  ;;  %v8567_v26 = vunpack.c.l.bf16 %v8578_v23  ;;  %v8568_v27 = vunpack.c.h.bf16 %v8578_v23  ;;  %v8571_v28 = vunpack.c.l.bf16 %v8579_v24 }
  0x16   : > { %8623 = vrot.lane.b32.xlu2 %v8622_v18, %s9762_s24  ;;  %v8627_v25 = vpack.i.bf16 %v8564_v20, %v8563_v19  ;;  %v8572_v29 = vunpack.c.h.bf16 %v8579_v24 }
  0x17   : > { %v8632_v30 = vpack.i.bf16 %v8568_v27, %v8567_v26 }
  0x18   : > { %v8637_v31 = vpack.i.bf16 %v8572_v29, %v8571_v28 }
  0x1d   : > { %8608 = vrot.lane.b32.xlu0 %v8607_v21, %s9762_s24  ;;  %8618 = vrot.lane.b32.xlu1 %v8617_v22, %s9762_s24 }
  0x1e   : > { %8628 = vrot.lane.b32.xlu2 %v8627_v25, %s9762_s24 }
  0x25   : > { %8633 = vrot.lane.b32.xlu0 %v8632_v30, %s9762_s24  ;;  %8638 = vrot.lane.b32.xlu1 %v8637_v31, %s9762_s24 }
  0x26   : > { %652 = vperm.xlu2 %8642, %v649_v33  }
  0x2d   : > { %4868 = vperm.xlu0 %8643, %v4865_v34  }
  0x70   : > { %v8624_v35 = vpop.permute.xlu2 %8623 }
  0x71   : > { %v8626_v36 = vunpack.i.h.bf16 %v8624_v35  ;;  %v8625_v53 = vunpack.i.l.bf16 %v8624_v35 }
  0x73   : > { %332 = vst.msk [vmem:[#allocation2 + $0x69] sm:$0xff] %vm322_vm0, %v8626_v36 }
  0x74   : > { %353 = vst.msk [vmem:[#allocation2 + $0x6b] sm:$0x40] %vm348_vm1, %v8626_v36 }
  0x75   : > { %331 = vst.msk [vmem:[#allocation2 + $0x61] sm:$0xff] %vm322_vm0, %v8625_v53 }
  0x76   : > { %344 = vst.msk [vmem:[#allocation2 + $0x5f] sm:$0x2] %vm339_vm2, %v8625_v53 }
  0x78   : > { %v8629_v52 = vpop.permute.xlu2 %8628 }
  0x79   : > { %v8631_v54 = vunpack.i.h.bf16 %v8629_v52  ;;  %v8630_v57 = vunpack.i.l.bf16 %v8629_v52 }
  0x7b   : > { %334 = vst.msk [vmem:[#allocation2 + $0x81] sm:$0xff] %vm322_vm0, %v8631_v54  ;;  %v371_v7 = vld [vmem:[#allocation2 + $0x70] sm:$0x3] }
  0x7c   : > { %354 = vst.msk [vmem:[#allocation2 + $0x83] sm:$0x40] %vm348_vm1, %v8631_v54  ;;  %v370_v8 = vld [vmem:[#allocation2 + $0x68] sm:$0xff] }
  0x7d   : > { %333 = vst.msk [vmem:[#allocation2 + $0x79] sm:$0xff] %vm322_vm0, %v8630_v57  ;;  %v369_v9 = vld [vmem:[#allocation2 + $0x60] sm:$0xff] }
  0x7e   : > { %345 = vst.msk [vmem:[#allocation2 + $0x77] sm:$0x2] %vm339_vm2, %v8630_v57 }
  0x80   : > { %v9890_v19 = vpop.permute.xlu2 %652 }
  0x81   : > { %16213 = vst [vmem:[#allocation4_spill] sm:$0xff] %v9890_v19 }
  0x83   : > { %v374_v10 = vld [vmem:[#allocation2 + $0x88] sm:$0x3] }
  0x84   : > { %v373_v11 = vld [vmem:[#allocation2 + $0x80] sm:$0xff] }
  0x85   : > { %v372_v12 = vld [vmem:[#allocation2 + $0x78] sm:$0xff] }
  0x87   : > { %v8604_v37 = vpop.permute.xlu0 %8603  ;;  %v8614_v40 = vpop.permute.xlu1 %8613 }
  0x88   : > { %v8606_v38 = vunpack.i.h.bf16 %v8604_v37  ;;  %v8605_v39 = vunpack.i.l.bf16 %v8604_v37  ;;  %v8616_v41 = vunpack.i.h.bf16 %v8614_v40  ;;  %v8615_v42 = vunpack.i.l.bf16 %v8614_v40 }
  0x8a   : > { %324 = vst.msk [vmem:[#allocation2 + $0x9] sm:$0xff] %vm322_vm0, %v8606_v38 }
  0x8b   : > { %349 = vst.msk [vmem:[#allocation2 + $0xb] sm:$0x40] %vm348_vm1, %v8606_v38 }
  0x8c   : > { %323 = vst.msk [vmem:[#allocation2 + $0x1] sm:$0xff] %vm322_vm0, %v8605_v39 }
  0x8d   : > { %340 = vst.msk [vmem:[#allocation2 - $0x1] sm:$0x2] %vm339_vm2, %v8605_v39 }
  0x8e   : > { %328 = vst.msk [vmem:[#allocation2 + $0x39] sm:$0xff] %vm322_vm0, %v8616_v41 }
  0x8f   : > { %v8609_v43 = vpop.permute.xlu0 %8608  ;;  %351 = vst.msk [vmem:[#allocation2 + $0x3b] sm:$0x40] %vm348_vm1, %v8616_v41  ;;  %v8619_v46 = vpop.permute.xlu1 %8618 }
  0x90   : > { %v8611_v44 = vunpack.i.h.bf16 %v8609_v43  ;;  %v8610_v45 = vunpack.i.l.bf16 %v8609_v43  ;;  %327 = vst.msk [vmem:[#allocation2 + $0x31] sm:$0xff] %vm322_vm0, %v8615_v42  ;;  %v8621_v48 = vunpack.i.h.bf16 %v8619_v46  ;;  %v8620_v51 = vunpack.i.l.bf16 %v8619_v46 }
  0x91   : > { %342 = vst.msk [vmem:[#allocation2 + $0x2f] sm:$0x2] %vm339_vm2, %v8615_v42 }
  0x92   : > { %326 = vst.msk [vmem:[#allocation2 + $0x21] sm:$0xff] %vm322_vm0, %v8611_v44  ;;  %v359_v47 = vld [vmem:[#allocation2 + $0x10] sm:$0x3] }
  0x93   : > { %350 = vst.msk [vmem:[#allocation2 + $0x23] sm:$0x40] %vm348_vm1, %v8611_v44  ;;  %409 = vrot.lane.b32.xlu1 %v359_v47, %s9764_s29  ;;  %v358_v49 = vld [vmem:[#allocation2 + $0x8] sm:$0xff] }
  0x94   : > { %325 = vst.msk [vmem:[#allocation2 + $0x19] sm:$0xff] %vm322_vm0, %v8610_v45  ;;  %407 = vrot.lane.b32.xlu0 %v358_v49, %s9764_s29  ;;  %v357_v50 = vld [vmem:[#allocation2] sm:$0xff] }
  0x95   : > { %341 = vst.msk [vmem:[#allocation2 + $0x17] sm:$0x2] %vm339_vm2, %v8610_v45  ;;  %405 = vrot.lane.b32.xlu2 %v357_v50, %s9764_s29 }
  0x96   : > { %330 = vst.msk [vmem:[#allocation2 + $0x51] sm:$0xff] %vm322_vm0, %v8621_v48  ;;  %v365_v63 = vld [vmem:[#allocation2 + $0x40] sm:$0x3] }
  0x97   : > { %352 = vst.msk [vmem:[#allocation2 + $0x53] sm:$0x40] %vm348_vm1, %v8621_v48  ;;  %v8634_v55 = vpop.permute.xlu0 %8633  ;;  %v8639_v61 = vpop.permute.xlu1 %8638  ;;  %v364_v1 = vld [vmem:[#allocation2 + $0x38] sm:$0xff] }
  0x98   : > { %329 = vst.msk [vmem:[#allocation2 + $0x49] sm:$0xff] %vm322_vm0, %v8620_v51  ;;  %v8636_v60 = vunpack.i.h.bf16 %v8634_v55  ;;  %v8635_v62 = vunpack.i.l.bf16 %v8634_v55  ;;  %v8641_v0 = vunpack.i.h.bf16 %v8639_v61  ;;  %v363_v2 = vld [vmem:[#allocation2 + $0x30] sm:$0xff]  ;;  %v8640_v3 = vunpack.i.l.bf16 %v8639_v61 }
  0x99   : > { %343 = vst.msk [vmem:[#allocation2 + $0x47] sm:$0x2] %vm339_vm2, %v8620_v51 }
  0x9a   : > { %v362_v56 = vld [vmem:[#allocation2 + $0x28] sm:$0x3]  ;;  %336 = vst.msk [vmem:[#allocation2 + $0x99] sm:$0xff] %vm322_vm0, %v8636_v60 }
  0x9b   : > { %415 = vrot.lane.b32.xlu1 %v362_v56, %s9764_s29  ;;  %v361_v58 = vld [vmem:[#allocation2 + $0x20] sm:$0xff]  ;;  %355 = vst.msk [vmem:[#allocation2 + $0x9b] sm:$0x40] %vm348_vm1, %v8636_v60 }
  0x9c   : > { %413 = vrot.lane.b32.xlu0 %v361_v58, %s9764_s29  ;;  %v360_v59 = vld [vmem:[#allocation2 + $0x18] sm:$0xff]  ;;  %335 = vst.msk [vmem:[#allocation2 + $0x91] sm:$0xff] %vm322_vm0, %v8635_v62 }
  0x9d   : > { %411 = vrot.lane.b32.xlu2 %v360_v59, %s9764_s29  ;;  %346 = vst.msk [vmem:[#allocation2 + $0x8f] sm:$0x2] %vm339_vm2, %v8635_v62 }
  0x9e   : > { %338 = vst.msk [vmem:[#allocation2 + $0xb1] sm:$0xff] %vm322_vm0, %v8641_v0  ;;  %v368_v4 = vld [vmem:[#allocation2 + $0x58] sm:$0x3] }
  0x9f   : > { %356 = vst.msk [vmem:[#allocation2 + $0xb3] sm:$0x40] %vm348_vm1, %v8641_v0  ;;  %v367_v5 = vld [vmem:[#allocation2 + $0x50] sm:$0xff]  ;;  %v9895_v23 = vpop.permute.xlu0 %4868 }
  0xa0   : > { %337 = vst.msk [vmem:[#allocation2 + $0xa9] sm:$0xff] %vm322_vm0, %v8640_v3  ;;  %v366_v6 = vld [vmem:[#allocation2 + $0x48] sm:$0xff] }
  0xa1   : > { %347 = vst.msk [vmem:[#allocation2 + $0xa7] sm:$0x2] %vm339_vm2, %v8640_v3 }
  0xa2   : > { %v377_v13 = vld [vmem:[#allocation2 + $0xa0] sm:$0x3]  ;;  %16214 = vst [vmem:[#allocation5_spill] sm:$0xff] %v9895_v23 }
  0xa3   : > { %421 = vrot.lane.b32.xlu1 %v365_v63, %s9764_s29  ;;  %v376_v14 = vld [vmem:[#allocation2 + $0x98] sm:$0xff] }
  0xa4   : > { %419 = vrot.lane.b32.xlu0 %v364_v1, %s9764_s29  ;;  %v375_v15 = vld [vmem:[#allocation2 + $0x90] sm:$0xff] }
  0xa5   : > { %417 = vrot.lane.b32.xlu2 %v363_v2, %s9764_s29 }
  0xa6   : > { %v380_v16 = vld [vmem:[#allocation2 + $0xb8] sm:$0x3] }
  0xa7   : > { %v379_v17 = vld [vmem:[#allocation2 + $0xb0] sm:$0xff] }
  0xa8   : > { %v378_v18 = vld [vmem:[#allocation2 + $0xa8] sm:$0xff] }
  0xab   : > { %427 = vrot.lane.b32.xlu1 %v368_v4, %s9764_s29 }
  0xac   : > { %425 = vrot.lane.b32.xlu0 %v367_v5, %s9764_s29 }
  0xad   : > { %423 = vrot.lane.b32.xlu2 %v366_v6, %s9764_s29 }
  0xb3   : > { %433 = vrot.lane.b32.xlu1 %v371_v7, %s9764_s29 }
  0xb4   : > { %431 = vrot.lane.b32.xlu0 %v370_v8, %s9764_s29 }
  0xb5   : > { %429 = vrot.lane.b32.xlu2 %v369_v9, %s9764_s29  ;;  %v9766_v9 = vmov 1983009808  }
  0xbb   : > { %439 = vrot.lane.b32.xlu1 %v374_v10, %s9764_s29  ;;  %v677_v10 = vunpack.c.l.s4 %v9766_v9 }
  0xbc   : > { %437 = vrot.lane.b32.xlu0 %v373_v11, %s9764_s29 }
  0xbd   : > { %435 = vrot.lane.b32.xlu2 %v372_v12, %s9764_s29 }
  0xc3   : > { %445 = vrot.lane.b32.xlu1 %v377_v13, %s9764_s29 }
  0xc4   : > { %443 = vrot.lane.b32.xlu0 %v376_v14, %s9764_s29 }
  0xc5   : > { %441 = vrot.lane.b32.xlu2 %v375_v15, %s9764_s29 }
  0xcb   : > { %451 = vrot.lane.b32.xlu1 %v380_v16, %s9764_s29  ;;  %v9951_v16 = vunpack.c.0.s8 %v677_v10 }
  0xcc   : > { %449 = vrot.lane.b32.xlu0 %v379_v17, %s9764_s29 }
  0xcd   : > { %447 = vrot.lane.b32.xlu2 %v378_v18, %s9764_s29 }
  0xef   : > { %v406_v20 = vpop.permute.xlu2 %405 }
  0xf0   : > { %478 = vst.msk [vmem:[#allocation2] sm:$0xff] %vm477_vm3, %v406_v20 }
  0xf7   : > { %v412_v21 = vpop.permute.xlu2 %411  ;;  %v503_v22 = vld [vmem:[#allocation2] sm:$0xff] }
  0xf8   : > { %482 = vst.msk [vmem:[#allocation2 + $0x18] sm:$0xff] %vm477_vm3, %v412_v21  ;;  %551 = vrot.lane.b32.xlu2 %v503_v22, %s9765_s30 }
  0xff   : > { %v418_v24 = vpop.permute.xlu2 %417  ;;  %v506_v25 = vld [vmem:[#allocation2 + $0x18] sm:$0xff] }
 0x100   : > { %485 = vst.msk [vmem:[#allocation2 + $0x30] sm:$0xff] %vm477_vm3, %v418_v24  ;;  %557 = vrot.lane.b32.xlu2 %v506_v25, %s9765_s30 }
 0x105   : > { %v410_v26 = vpop.permute.xlu1 %409 }
 0x106   : > { %481 = vst.msk [vmem:[#allocation2 + $0x10] sm:$0x3] %vm480_vm4, %v410_v26  ;;  %v408_v27 = vpop.permute.xlu0 %407 }
 0x107   : > { %479 = vst.msk [vmem:[#allocation2 + $0x8] sm:$0xff] %vm477_vm3, %v408_v27  ;;  %v424_v28 = vpop.permute.xlu2 %423  ;;  %v509_v29 = vld [vmem:[#allocation2 + $0x30] sm:$0xff] }
 0x108   : > { %488 = vst.msk [vmem:[#allocation2 + $0x48] sm:$0xff] %vm477_vm3, %v424_v28  ;;  %563 = vrot.lane.b32.xlu2 %v509_v29, %s9765_s30 }
 0x10d   : > { %v416_v30 = vpop.permute.xlu1 %415  ;;  %v505_v31 = vld [vmem:[#allocation2 + $0x10] sm:$0x3] }
 0x10e   : > { %484 = vst.msk [vmem:[#allocation2 + $0x28] sm:$0x3] %vm480_vm4, %v416_v30  ;;  %v414_v32 = vpop.permute.xlu0 %413  ;;  %555 = vrot.lane.b32.xlu1 %v505_v31, %s9765_s30  ;;  %v504_v33 = vld [vmem:[#allocation2 + $0x8] sm:$0xff] }
 0x10f   : > { %483 = vst.msk [vmem:[#allocation2 + $0x20] sm:$0xff] %vm477_vm3, %v414_v32  ;;  %v430_v34 = vpop.permute.xlu2 %429  ;;  %553 = vrot.lane.b32.xlu0 %v504_v33, %s9765_s30  ;;  %v512_v35 = vld [vmem:[#allocation2 + $0x48] sm:$0xff] }
 0x110   : > { %491 = vst.msk [vmem:[#allocation2 + $0x60] sm:$0xff] %vm477_vm3, %v430_v34  ;;  %569 = vrot.lane.b32.xlu2 %v512_v35, %s9765_s30 }
 0x115   : > { %v422_v36 = vpop.permute.xlu1 %421  ;;  %v508_v37 = vld [vmem:[#allocation2 + $0x28] sm:$0x3] }
 0x116   : > { %487 = vst.msk [vmem:[#allocation2 + $0x40] sm:$0x3] %vm480_vm4, %v422_v36  ;;  %v420_v38 = vpop.permute.xlu0 %419  ;;  %561 = vrot.lane.b32.xlu1 %v508_v37, %s9765_s30  ;;  %v507_v39 = vld [vmem:[#allocation2 + $0x20] sm:$0xff] }
 0x117   : > { %486 = vst.msk [vmem:[#allocation2 + $0x38] sm:$0xff] %vm477_vm3, %v420_v38  ;;  %v436_v40 = vpop.permute.xlu2 %435  ;;  %559 = vrot.lane.b32.xlu0 %v507_v39, %s9765_s30  ;;  %v515_v41 = vld [vmem:[#allocation2 + $0x60] sm:$0xff] }
 0x118   : > { %494 = vst.msk [vmem:[#allocation2 + $0x78] sm:$0xff] %vm477_vm3, %v436_v40  ;;  %575 = vrot.lane.b32.xlu2 %v515_v41, %s9765_s30 }
 0x11d   : > { %v428_v42 = vpop.permute.xlu1 %427  ;;  %v511_v43 = vld [vmem:[#allocation2 + $0x40] sm:$0x3] }
 0x11e   : > { %490 = vst.msk [vmem:[#allocation2 + $0x58] sm:$0x3] %vm480_vm4, %v428_v42  ;;  %v426_v44 = vpop.permute.xlu0 %425  ;;  %567 = vrot.lane.b32.xlu1 %v511_v43, %s9765_s30  ;;  %v510_v45 = vld [vmem:[#allocation2 + $0x38] sm:$0xff] }
 0x11f   : > { %489 = vst.msk [vmem:[#allocation2 + $0x50] sm:$0xff] %vm477_vm3, %v426_v44  ;;  %v442_v46 = vpop.permute.xlu2 %441  ;;  %565 = vrot.lane.b32.xlu0 %v510_v45, %s9765_s30  ;;  %v518_v47 = vld [vmem:[#allocation2 + $0x78] sm:$0xff] }
 0x120   : > { %497 = vst.msk [vmem:[#allocation2 + $0x90] sm:$0xff] %vm477_vm3, %v442_v46  ;;  %581 = vrot.lane.b32.xlu2 %v518_v47, %s9765_s30 }
 0x125   : > { %v434_v48 = vpop.permute.xlu1 %433  ;;  %v514_v49 = vld [vmem:[#allocation2 + $0x58] sm:$0x3] }
 0x126   : > { %493 = vst.msk [vmem:[#allocation2 + $0x70] sm:$0x3] %vm480_vm4, %v434_v48  ;;  %v432_v50 = vpop.permute.xlu0 %431  ;;  %573 = vrot.lane.b32.xlu1 %v514_v49, %s9765_s30  ;;  %v513_v51 = vld [vmem:[#allocation2 + $0x50] sm:$0xff] }
 0x127   : > { %492 = vst.msk [vmem:[#allocation2 + $0x68] sm:$0xff] %vm477_vm3, %v432_v50  ;;  %v448_v52 = vpop.permute.xlu2 %447  ;;  %571 = vrot.lane.b32.xlu0 %v513_v51, %s9765_s30  ;;  %v521_v53 = vld [vmem:[#allocation2 + $0x90] sm:$0xff] }
 0x128   : > { %500 = vst.msk [vmem:[#allocation2 + $0xa8] sm:$0xff] %vm477_vm3, %v448_v52  ;;  %587 = vrot.lane.b32.xlu2 %v521_v53, %s9765_s30  ;;  %v9767_v52 = vmov 1934713408  }
 0x129   : > { %v725_v53 = vunpack.c.l.s4 %v9767_v52 }
 0x12d   : > { %v440_v54 = vpop.permute.xlu1 %439  ;;  %v517_v55 = vld [vmem:[#allocation2 + $0x70] sm:$0x3] }
 0x12e   : > { %496 = vst.msk [vmem:[#allocation2 + $0x88] sm:$0x3] %vm480_vm4, %v440_v54  ;;  %v438_v56 = vpop.permute.xlu0 %437  ;;  %579 = vrot.lane.b32.xlu1 %v517_v55, %s9765_s30  ;;  %v516_v57 = vld [vmem:[#allocation2 + $0x68] sm:$0xff] }
 0x12f   : > { %495 = vst.msk [vmem:[#allocation2 + $0x80] sm:$0xff] %vm477_vm3, %v438_v56  ;;  %577 = vrot.lane.b32.xlu0 %v516_v57, %s9765_s30  ;;  %v524_v58 = vld [vmem:[#allocation2 + $0xa8] sm:$0xff]  ;;  %v9997_v57 = vunpack.c.0.s8 %v725_v53 }
 0x130   : > { %593 = vrot.lane.b32.xlu2 %v524_v58, %s9765_s30 }
 0x135   : > { %v446_v59 = vpop.permute.xlu1 %445  ;;  %v520_v60 = vld [vmem:[#allocation2 + $0x88] sm:$0x3] }
 0x136   : > { %499 = vst.msk [vmem:[#allocation2 + $0xa0] sm:$0x3] %vm480_vm4, %v446_v59  ;;  %v444_v61 = vpop.permute.xlu0 %443  ;;  %585 = vrot.lane.b32.xlu1 %v520_v60, %s9765_s30  ;;  %v519_v62 = vld [vmem:[#allocation2 + $0x80] sm:$0xff] }
 0x137   : > { %498 = vst.msk [vmem:[#allocation2 + $0x98] sm:$0xff] %vm477_vm3, %v444_v61  ;;  %583 = vrot.lane.b32.xlu0 %v519_v62, %s9765_s30 }
 0x13d   : > { %v452_v63 = vpop.permute.xlu1 %451  ;;  %v523_v0 = vld [vmem:[#allocation2 + $0xa0] sm:$0x3] }
 0x13e   : > { %502 = vst.msk [vmem:[#allocation2 + $0xb8] sm:$0x3] %vm480_vm4, %v452_v63  ;;  %v450_v1 = vpop.permute.xlu0 %449  ;;  %591 = vrot.lane.b32.xlu1 %v523_v0, %s9765_s30  ;;  %v522_v2 = vld [vmem:[#allocation2 + $0x98] sm:$0xff] }
 0x13f   : > { %501 = vst.msk [vmem:[#allocation2 + $0xb0] sm:$0xff] %vm477_vm3, %v450_v1  ;;  %589 = vrot.lane.b32.xlu0 %v522_v2, %s9765_s30 }
 0x145   : > { %v526_v3 = vld [vmem:[#allocation2 + $0xb8] sm:$0x3] }
 0x146   : > { %597 = vrot.lane.b32.xlu1 %v526_v3, %s9765_s30  ;;  %v525_v4 = vld [vmem:[#allocation2 + $0xb0] sm:$0xff] }
 0x147   : > { %595 = vrot.lane.b32.xlu0 %v525_v4, %s9765_s30 }
 0x152   : > { %v552_v5 = vpop.permute.xlu2 %551 }
 0x153   : > { %624 = vst.msk [vmem:[#allocation2] sm:$0xff] %vm16096_vm5, %v552_v5 }
 0x15a   : > { %v558_v6 = vpop.permute.xlu2 %557  ;;  %v1015_v8 = vld [vmem:[#allocation2] sm:$0xff] }
 0x15b   : > { %628 = vst.msk [vmem:[#allocation2 + $0x18] sm:$0xff] %vm16096_vm5, %v558_v6  ;;  %v674_v11 = vrot.slane %v1015_v8, 4 }
 0x162   : > { %v564_v7 = vpop.permute.xlu2 %563  ;;  %v1017_v18 = vld [vmem:[#allocation2 + $0x18] sm:$0xff] }
 0x163   : > { %631 = vst.msk [vmem:[#allocation2 + $0x30] sm:$0xff] %vm16096_vm5, %v564_v7  ;;  %v686_v21 = vrot.slane %v1017_v18, 4 }
 0x16a   : > { %v570_v12 = vpop.permute.xlu2 %569  ;;  %v9945_v13 = vld [vmem:[#allocation2 + $0x30] sm:$0xff] }
 0x16b   : > { %634 = vst.msk [vmem:[#allocation2 + $0x48] sm:$0xff] %vm16096_vm5, %v570_v12  ;;  %v671_v14 = vrot.slane %v9945_v13, 4  ;;  %v675_v15 = vsel %vm672_vm6, %v9945_v13, %v674_v11 }
 0x16c   : > { %v683_v20 = vperm.slane %v675_v15, %v9951_v16 }
 0x16d   : > { %v673_v17 = vsel %vm672_vm6, %v671_v14, %v1015_v8 }
 0x16e   : > { %v679_v25 = vperm.slane %v673_v17, %v9951_v16  ;;  %v734_v29 = vrot.slane %v683_v20, 4 }
 0x170   : > { %v722_v32 = vrot.slane %v679_v25, 4 }
 0x172   : > { %v576_v22 = vpop.permute.xlu2 %575  ;;  %v9955_v24 = vld [vmem:[#allocation2 + $0x48] sm:$0xff] }
 0x173   : > { %637 = vst.msk [vmem:[#allocation2 + $0x60] sm:$0xff] %vm16096_vm5, %v576_v22  ;;  %v684_v26 = vrot.slane %v9955_v24, 4  ;;  %v687_v27 = vsel %vm672_vm6, %v9955_v24, %v686_v21 }
 0x174   : > { %v695_v28 = vperm.slane %v687_v27, %v9951_v16 }
 0x175   : > { %v685_v30 = vsel %vm672_vm6, %v684_v26, %v1017_v18 }
 0x176   : > { %v691_v31 = vperm.slane %v685_v30, %v9951_v16  ;;  %v732_v33 = vrot.slane %v695_v28, 4  ;;  %v735_v34 = vsel %vm672_vm6, %v695_v28, %v734_v29 }
 0x177   : > { %v743_v5 = vperm.slane %v735_v34, %v9997_v57 }
 0x178   : > { %v723_v35 = vsel %vm672_vm6, %v691_v31, %v722_v32  ;;  %v720_v36 = vrot.slane %v691_v31, 4  ;;  %v733_v37 = vsel %vm672_vm6, %v732_v33, %v683_v20 }
 0x179   : > { %v731_v3 = vperm.slane %v723_v35, %v9997_v57  ;;  %v739_v7 = vperm.slane %v733_v37, %v9997_v57 }
 0x17a   : > { %v582_v38 = vpop.permute.xlu2 %581  ;;  %v9969_v39 = vsel %vm672_vm6, %v720_v36, %v679_v25  ;;  %v9975_v43 = vld [vmem:[#allocation2 + $0x60] sm:$0xff] }
 0x17b   : > { %640 = vst.msk [vmem:[#allocation2 + $0x78] sm:$0xff] %vm16096_vm5, %v582_v38  ;;  %v698_v47 = vrot.slane %v9975_v43, 4  ;;  %v774_v15 = vrot.slane %v731_v3, 4  ;;  %v778_v26 = vrot.slane %v739_v7, 4 }
 0x180   : > { %v556_v40 = vpop.permute.xlu1 %555 }
 0x181   : > { %627 = vst.msk [vmem:[#allocation2 + $0x10] sm:$0x3] %vm626_vm7, %v556_v40  ;;  %v554_v41 = vpop.permute.xlu0 %553 }
 0x182   : > { %625 = vst.msk [vmem:[#allocation2 + $0x8] sm:$0xff] %vm16096_vm5, %v554_v41  ;;  %v588_v42 = vpop.permute.xlu2 %587  ;;  %v9995_v56 = vld [vmem:[#allocation2 + $0x78] sm:$0xff] }
 0x183   : > { %643 = vst.msk [vmem:[#allocation2 + $0x90] sm:$0xff] %vm16096_vm5, %v588_v42  ;;  %v710_v62 = vrot.slane %v9995_v56, 4 }
 0x188   : > { %v562_v44 = vpop.permute.xlu1 %561 }
 0x189   : > { %630 = vst.msk [vmem:[#allocation2 + $0x28] sm:$0x3] %vm626_vm7, %v562_v44  ;;  %v560_v45 = vpop.permute.xlu0 %559  ;;  %v9978_v46 = vld [vmem:[#allocation2 + $0x8] sm:$0xff] }
 0x18a   : > { %629 = vst.msk [vmem:[#allocation2 + $0x20] sm:$0xff] %vm16096_vm5, %v560_v45  ;;  %v594_v48 = vpop.permute.xlu2 %593  ;;  %v9983_v49 = vpack.i.bf16 %v9978_v46, %v1015_v8  ;;  %v9985_v50 = vld [vmem:[#allocation2 + $0x90] sm:$0xff]  ;;  %v786_v30 = vrot.slane %v9978_v46, 4  ;;  %v10038_v34 = vld [vmem:[#allocation2 + $0x1] sm:$0xff] }
 0x18b   : > { %646 = vst.msk [vmem:[#allocation2 + $0xa8] sm:$0xff] %vm16096_vm5, %v594_v48  ;;  %v696_v51 = vrot.slane %v9985_v50, 4  ;;  %v699_v54 = vsel %vm672_vm6, %v9985_v50, %v698_v47  ;;  %v10040_v35 = vld [vmem:[#allocation2 + $0x9] sm:$0xff]  ;;  %v1863_v52 = vrot.slane %v10038_v34, 4 }
 0x18c   : > { %8645 = vrot.lane.b32.xlu1 %v9983_v49, %s9768_s6  ;;  %v707_v59 = vperm.slane %v699_v54, %v9951_v16  ;;  %v1975_v53 = vrot.slane %v10040_v35, 4 }
 0x18d   : > { %v697_v55 = vsel %vm672_vm6, %v696_v51, %v9975_v43 }
 0x18e   : > { %v703_v1 = vperm.slane %v697_v55, %v9951_v16  ;;  %v758_v8 = vrot.slane %v707_v59, 4 }
 0x190   : > { %v568_v58 = vpop.permute.xlu1 %567  ;;  %v746_v11 = vrot.slane %v703_v1, 4 }
 0x191   : > { %633 = vst.msk [vmem:[#allocation2 + $0x40] sm:$0x3] %vm626_vm7, %v568_v58  ;;  %v566_v60 = vpop.permute.xlu0 %565  ;;  %v10001_v61 = vld [vmem:[#allocation2 + $0x20] sm:$0xff] }
 0x192   : > { %632 = vst.msk [vmem:[#allocation2 + $0x38] sm:$0xff] %vm16096_vm5, %v566_v60  ;;  %v10006_v63 = vpack.i.bf16 %v10001_v61, %v1017_v18  ;;  %v10008_v0 = vld [vmem:[#allocation2 + $0xa8] sm:$0xff]  ;;  %v782_v18 = vrot.slane %v743_v5, 4  ;;  %v10065_v54 = vld [vmem:[#allocation2 + $0x19] sm:$0xff] }
 0x193   : > { %v708_v2 = vrot.slane %v10008_v0, 4  ;;  %v711_v4 = vsel %vm672_vm6, %v10008_v0, %v710_v62 }
 0x194   : > { %8650 = vrot.lane.b32.xlu2 %v10006_v63, %s9768_s6  ;;  %v719_v6 = vperm.slane %v711_v4, %v9951_v16  ;;  %v798_v4 = vrot.slane %v10001_v61, 4 }
 0x195   : > { %v709_v9 = vsel %vm672_vm6, %v708_v2, %v9995_v56 }
 0x196   : > { %v715_v10 = vperm.slane %v709_v9, %v9951_v16  ;;  %v756_v12 = vrot.slane %v719_v6, 4  ;;  %v759_v14 = vsel %vm672_vm6, %v719_v6, %v758_v8 }
 0x197   : > { %v767_v17 = vperm.slane %v759_v14, %v9997_v57 }
 0x198   : > { %v574_v20 = vpop.permute.xlu1 %573  ;;  %v747_v21 = vsel %vm672_vm6, %v715_v10, %v746_v11  ;;  %v744_v22 = vrot.slane %v715_v10, 4  ;;  %v757_v25 = vsel %vm672_vm6, %v756_v12, %v707_v59  ;;  %v1875_v11 = vrot.slane %v10065_v54, 4 }
 0x199   : > { %636 = vst.msk [vmem:[#allocation2 + $0x58] sm:$0x3] %vm626_vm7, %v574_v20  ;;  %v572_v27 = vpop.permute.xlu0 %571  ;;  %v1020_v28 = vld [vmem:[#allocation2 + $0x38] sm:$0xff]  ;;  %v755_v29 = vperm.slane %v747_v21, %v9997_v57  ;;  %v763_v31 = vperm.slane %v757_v25, %v9997_v57  ;;  %v10032_v32 = vsel %vm672_vm6, %v767_v17, %v782_v18  ;;  %v780_v38 = vrot.slane %v767_v17, 4 }
 0x19a   : > { %16215 = vst [vmem:[#allocation6_spill] sm:$0xff] %v10032_v32  ;;  %v10036_v33 = vpack.i.bf16 %v1020_v28, %v9945_v13  ;;  %v784_v36 = vrot.slane %v1020_v28, 4  ;;  %v10043_v37 = vsel %vm672_vm6, %v744_v22, %v703_v1  ;;  %v10045_v40 = vld [vmem:[#allocation2 + $0x31] sm:$0xff]  ;;  %v10052_v13 = vld [vmem:[#allocation2 + $0x39] sm:$0xff]  ;;  %v787_v47 = vsel %vm672_vm6, %v1020_v28, %v786_v30  ;;  %v2199_v28 = vld [vmem:[#allocation2 + $0x21] sm:$0xff] }
 0x19b   : > { %635 = vst.msk [vmem:[#allocation2 + $0x50] sm:$0xff] %vm16096_vm5, %v572_v27  ;;  %v772_v41 = vrot.slane %v755_v29, 4  ;;  %v10048_v42 = vsel %vm672_vm6, %v755_v29, %v774_v15  ;;  %v10057_v45 = vsel %vm672_vm6, %v763_v31, %v778_v26  ;;  %v776_v48 = vrot.slane %v763_v31, 4 }
 0x19c   : > { %8655 = vrot.lane.b32.xlu0 %v10036_v33, %s9768_s6  ;;  %v785_v44 = vsel %vm672_vm6, %v784_v36, %v9978_v46  ;;  %v10071_v46 = vsel %vm672_vm6, %v780_v38, %v743_v5  ;;  %v1861_v58 = vrot.slane %v10045_v40, 4  ;;  %v795_v59 = vperm.slane %v787_v47, %v9951_v16 }
 0x19d   : > { %v10061_v51 = vsel %vm672_vm6, %v772_v41, %v731_v3  ;;  %v10068_v55 = vsel %vm672_vm6, %v776_v48, %v739_v7  ;;  %16216 = vst [vmem:[#allocation7_spill] sm:$0xff] %v10071_v46  ;;  %v1973_v60 = vrot.slane %v10052_v13, 4  ;;  %v1864_v62 = vsel %vm672_vm6, %v10045_v40, %v1863_v52 }
 0x19e   : > { %v1976_v1 = vsel %vm672_vm6, %v10052_v13, %v1975_v53  ;;  %v791_v3 = vperm.slane %v785_v44, %v9951_v16  ;;  %v1862_v5 = vsel %vm672_vm6, %v1861_v58, %v10038_v34  ;;  %v846_v20 = vrot.slane %v795_v59, 4 }
 0x19f   : > { %v1974_v10 = vsel %vm672_vm6, %v1973_v60, %v10040_v35  ;;  %v1868_v17 = vperm.slane %v1862_v5, %v9951_v16 }
 0x1a0   : > { %v580_v2 = vpop.permute.xlu1 %579  ;;  %v1980_v22 = vperm.slane %v1974_v10, %v9951_v16 }
 0x1a1   : > { %639 = vst.msk [vmem:[#allocation2 + $0x70] sm:$0x3] %vm626_vm7, %v580_v2  ;;  %v578_v6 = vpop.permute.xlu0 %577 }
 0x1a2   : > { %v1022_v7 = vld [vmem:[#allocation2 + $0x50] sm:$0xff]  ;;  %638 = vst.msk [vmem:[#allocation2 + $0x68] sm:$0xff] %vm16096_vm5, %v578_v6  ;;  %v2023_v44 = vrot.slane %v1980_v22, 4 }
 0x1a3   : > { %v10085_v8 = vld [vmem:[#allocation2 + $0x49] sm:$0xff]  ;;  %v10087_v9 = vld [vmem:[#allocation2 + $0x51] sm:$0xff]  ;;  %v10094_v12 = vpack.i.bf16 %v1022_v7, %v9955_v24  ;;  %v796_v14 = vrot.slane %v1022_v7, 4  ;;  %v799_v15 = vsel %vm672_vm6, %v1022_v7, %v798_v4  ;;  %v834_v24 = vrot.slane %v791_v3, 4 }
 0x1a4   : > { %16217 = vst [vmem:[#allocation8_spill] sm:$0xff] %v10087_v9  ;;  %v807_v18 = vperm.slane %v799_v15, %v9951_v16  ;;  %v1873_v21 = vrot.slane %v10085_v8, 4  ;;  %v1985_v26 = vrot.slane %v10087_v9, 4  ;;  %v1876_v27 = vsel %vm672_vm6, %v10085_v8, %v1875_v11 }
 0x1a5   : > { %8660 = vrot.lane.b32.xlu1 %v10094_v12, %s9768_s6  ;;  %v797_v25 = vsel %vm672_vm6, %v796_v14, %v10001_v61  ;;  %v1911_v61 = vrot.slane %v1868_v17, 4  ;;  %v1872_v11 = vperm.slane %v1864_v62, %v9951_v16  ;;  %v1984_v14 = vperm.slane %v1976_v1, %v9951_v16 }
 0x1a6   : > { %v803_v29 = vperm.slane %v797_v25, %v9951_v16  ;;  %v844_v30 = vrot.slane %v807_v18, 4  ;;  %v847_v31 = vsel %vm672_vm6, %v807_v18, %v846_v20  ;;  %v1874_v36 = vsel %vm672_vm6, %v1873_v21, %v10065_v54 }
 0x1a7   : > { %v1880_v38 = vperm.slane %v1874_v36, %v9951_v16  ;;  %v1986_v41 = vsel %vm672_vm6, %v1985_v26, %v2199_v28  ;;  %v1987_v18 = vrot.slane %v2199_v28, 4  ;;  %v1884_v20 = vperm.slane %v1876_v27, %v9951_v16 }
 0x1a8   : > { %v835_v47 = vsel %vm672_vm6, %v803_v29, %v834_v24  ;;  %v832_v48 = vrot.slane %v803_v29, 4  ;;  %v845_v52 = vsel %vm672_vm6, %v844_v30, %v795_v59  ;;  %v1992_v53 = vperm.slane %v1986_v41, %v9951_v16  ;;  %v586_v58 = vpop.permute.xlu1 %585 }
 0x1a9   : > { %v1909_v60 = vrot.slane %v1880_v38, 4  ;;  %642 = vst.msk [vmem:[#allocation2 + $0x88] sm:$0x3] %vm626_vm7, %v586_v58  ;;  %v584_v2 = vpop.permute.xlu0 %583  ;;  %v10118_v4 = vld [vmem:[#allocation2 + $0x68] sm:$0xff]  ;;  %v1912_v7 = vsel %vm672_vm6, %v1880_v38, %v1911_v61  ;;  %v1988_v21 = vsel %vm672_vm6, %v10087_v9, %v1987_v18  ;;  %v1923_v25 = vrot.slane %v1872_v11, 4 }
 0x1aa   : > { %v833_v5 = vsel %vm672_vm6, %v832_v48, %v791_v3  ;;  %v2021_v6 = vrot.slane %v1992_v53, 4  ;;  %v2024_v10 = vsel %vm672_vm6, %v1992_v53, %v2023_v44  ;;  %641 = vst.msk [vmem:[#allocation2 + $0x80] sm:$0xff] %vm16096_vm5, %v584_v2  ;;  %v10126_v59 = vpack.i.bf16 %v10118_v4, %v9975_v43  ;;  %v2204_v44 = vld [vmem:[#allocation2 + $0x61] sm:$0xff]  ;;  %v2205_v48 = vld [vmem:[#allocation2 + $0x69] sm:$0xff] }
 0x1ab   : > { %v1910_v3 = vsel %vm672_vm6, %v1909_v60, %v1868_v17  ;;  %v1996_v43 = vperm.slane %v1988_v21, %v9951_v16  ;;  %v2035_v24 = vrot.slane %v1984_v14, 4  ;;  %v1921_v26 = vrot.slane %v1884_v20, 4 }
 0x1ac   : > { %8665 = vrot.lane.b32.xlu2 %v10126_v59, %s9768_s6  ;;  %v2022_v15 = vsel %vm672_vm6, %v2021_v6, %v1980_v22  ;;  %v1924_v1 = vsel %vm672_vm6, %v1884_v20, %v1923_v25  ;;  %v10144_v22 = vperm.slane %v9969_v39, %v9997_v57  ;;  %v10156_v38 = vperm.slane %v10043_v37, %v9997_v57 }
 0x1ad   : > { %v2033_v27 = vrot.slane %v1996_v43, 4  ;;  %v10147_v30 = vsel %vm672_vm6, %v1996_v43, %v2035_v24  ;;  %v10159_v41 = vperm.slane %v847_v31, %v9997_v57  ;;  %v1922_v39 = vsel %vm672_vm6, %v1921_v26, %v1872_v11 }
 0x1ae   : > { %16218 = vst [vmem:[#allocation9_spill] sm:$0xff] %v10144_v22  ;;  %v10166_v53 = vperm.slane %v835_v47, %v9997_v57  ;;  %v770_v37 = vrot.slane %v10144_v22, 4  ;;  %v10173_v31 = vpack.i.bf16 %v2199_v28, %v10065_v54  ;;  %v10175_v58 = vpack.i.bf16 %v2205_v48, %v2204_v44 }
 0x1af   : > { %16219 = vst [vmem:[#allocation10_spill] sm:$0xff] %v10156_v38  ;;  %v2034_v61 = vsel %vm672_vm6, %v2033_v27, %v1984_v14  ;;  %v10182_v2 = vperm.slane %v833_v5, %v9997_v57  ;;  %v810_v11 = vrot.slane %v10118_v4, 4  ;;  %v1887_v54 = vrot.slane %v2204_v44, 4 }
 0x1b0   : > { %v592_v62 = vpop.permute.xlu1 %591  ;;  %v10179_v60 = vsel %vm672_vm6, %v10156_v38, %v770_v37  ;;  %v10194_v5 = vperm.slane %v1910_v3, %v9997_v57  ;;  %v1999_v25 = vrot.slane %v2205_v48, 4  ;;  %v10197_v43 = vperm.slane %v2022_v15, %v9997_v57 }
 0x1b1   : > { %645 = vst.msk [vmem:[#allocation2 + $0xa0] sm:$0x3] %vm626_vm7, %v592_v62  ;;  %v590_v29 = vpop.permute.xlu0 %589  ;;  %v10140_v17 = vld [vmem:[#allocation2 + $0x80] sm:$0xff]  ;;  %v10200_v24 = vperm.slane %v1912_v7, %v9997_v57  ;;  %v10208_v27 = vperm.slane %v2024_v10, %v9997_v57  ;;  %v10213_v15 = vperm.slane %v1922_v39, %v9997_v57  ;;  %v10216_v7 = vperm.slane %v1924_v1, %v9997_v57 }
 0x1b2   : > { %644 = vst.msk [vmem:[#allocation2 + $0x98] sm:$0xff] %vm16096_vm5, %v590_v29  ;;  %v10152_v36 = vpack.i.bf16 %v10140_v17, %v9995_v56  ;;  %v10169_v56 = vperm.slane %v845_v52, %v9997_v57  ;;  %v10224_v10 = vld [vmem:[#allocation2 + $0x81] sm:$0xff]  ;;  %v10237_v14 = vperm.slane %v2034_v61, %v9997_v57 }
 0x1b3   : > { %16220 = vst [vmem:[#allocation11_spill] sm:$0xff] %v10182_v2 }
 0x1b4   : > { %8670 = vrot.lane.b32.xlu0 %v10152_v36, %s9768_s6  ;;  %16223 = vst [vmem:[#allocation14_spill] sm:$0xff] %v10194_v5 }
 0x1b5   : > { %16224 = vst [vmem:[#allocation15_spill] sm:$0xff] %v10197_v43 }
 0x1b8   : > { %v598_v6 = vpop.permute.xlu1 %597 }
 0x1b9   : > { %648 = vst.msk [vmem:[#allocation2 + $0xb8] sm:$0x3] %vm626_vm7, %v598_v6  ;;  %v596_v28 = vpop.permute.xlu0 %595  ;;  %v1028_v18 = vld [vmem:[#allocation2 + $0x98] sm:$0xff] }
 0x1ba   : > { %v10189_v20 = vld [vmem:[#allocation2 + $0x91] sm:$0xff]  ;;  %v10191_v21 = vld [vmem:[#allocation2 + $0x99] sm:$0xff]  ;;  %647 = vst.msk [vmem:[#allocation2 + $0xb0] sm:$0xff] %vm16096_vm5, %v596_v28  ;;  %v10204_v62 = vpack.i.bf16 %v1028_v18, %v9985_v50  ;;  %v808_v26 = vrot.slane %v1028_v18, 4  ;;  %v811_v29 = vsel %vm672_vm6, %v1028_v18, %v810_v11  ;;  %vm16097_vm5 = vcmask 64512  }
 0x1bb   : > { %16221 = vst [vmem:[#allocation12_spill] sm:$0xff] %v10189_v20  ;;  %v1885_v3 = vrot.slane %v10189_v20, 4  ;;  %v1997_v37 = vrot.slane %v10191_v21, 4  ;;  %v10222_v50 = vld [vmem:[#allocation2 + $0x79] sm:$0xff]  ;;  %v1888_v39 = vsel %vm672_vm6, %v10189_v20, %v1887_v54  ;;  %v2000_v1 = vsel %vm672_vm6, %v10191_v21, %v1999_v25 }
 0x1bc   : > { %16222 = vst [vmem:[#allocation13_spill] sm:$0xff] %v10191_v21  ;;  %8695 = vrot.lane.b32.xlu0 %v10036_v33, %s9764_s29  ;;  %8675 = vrot.lane.b32.xlu1 %v10204_v62, %s9768_s6  ;;  %v809_v6 = vsel %vm672_vm6, %v808_v26, %v10118_v4  ;;  %v819_v33 = vperm.slane %v811_v29, %v9951_v16  ;;  %v822_v25 = vrot.slane %v10140_v17, 4  ;;  %v1899_v29 = vrot.slane %v10222_v50, 4 }
 0x1bd   : > { %v1886_v28 = vsel %vm672_vm6, %v1885_v3, %v2204_v44  ;;  %v1998_v52 = vsel %vm672_vm6, %v1997_v37, %v2205_v48  ;;  %v815_v11 = vperm.slane %v809_v6, %v9951_v16  ;;  %v2011_v44 = vrot.slane %v10224_v10, 4 }
 0x1be   : > { %v10248_v3 = vperm.slane %v1886_v28, %v9951_v16  ;;  %v10254_v37 = vperm.slane %v10147_v30, %v9997_v57  ;;  %v870_v4 = vrot.slane %v819_v33, 4  ;;  %v10261_v18 = vperm.slane %v1998_v52, %v9951_v16 }
 0x1bf   : > { %v10264_v28 = vperm.slane %v1888_v39, %v9951_v16  ;;  %v10272_v23 = vperm.slane %v2000_v1, %v9951_v16  ;;  %v858_v19 = vrot.slane %v815_v11, 4 }
 0x1c0   : > { %v1935_v39 = vrot.slane %v10248_v3, 4 }
 0x1c1   : > { %v1030_v54 = vld [vmem:[#allocation2 + $0xb0] sm:$0xff] }
 0x1c2   : > { %v10256_v26 = vld [vmem:[#allocation2 + $0xa9] sm:$0xff]  ;;  %v10258_v6 = vld [vmem:[#allocation2 + $0xb1] sm:$0xff]  ;;  %v10268_v48 = vpack.i.bf16 %v1030_v54, %v10008_v0  ;;  %v820_v47 = vrot.slane %v1030_v54, 4  ;;  %v823_v30 = vsel %vm672_vm6, %v1030_v54, %v822_v25 }
 0x1c3   : > { %v831_v22 = vperm.slane %v823_v30, %v9951_v16  ;;  %v1897_v52 = vrot.slane %v10256_v26, 4  ;;  %v2009_v38 = vrot.slane %v10258_v6, 4  ;;  %v1900_v1 = vsel %vm672_vm6, %v10256_v26, %v1899_v29 }
 0x1c4   : > { %8710 = vrot.lane.b32.xlu0 %v10152_v36, %s9764_s29  ;;  %8685 = vrot.lane.b32.xlu1 %v9983_v49, %s9764_s29  ;;  %v821_v0 = vsel %vm672_vm6, %v820_v47, %v10140_v17  ;;  %v2012_v54 = vsel %vm672_vm6, %v10258_v6, %v2011_v44  ;;  %v1908_v44 = vperm.slane %v1900_v1, %v9951_v16 }
 0x1c5   : > { %8680 = vrot.lane.b32.xlu2 %v10268_v48, %s9768_s6  ;;  %v827_v25 = vperm.slane %v821_v0, %v9951_v16  ;;  %v868_v36 = vrot.slane %v831_v22, 4  ;;  %v871_v30 = vsel %vm672_vm6, %v831_v22, %v870_v4  ;;  %v1898_v49 = vsel %vm672_vm6, %v1897_v52, %v10222_v50 }
 0x1c6   : > { %v879_v17 = vperm.slane %v871_v30, %v9997_v57  ;;  %v1904_v47 = vperm.slane %v1898_v49, %v9951_v16  ;;  %v2010_v29 = vsel %vm672_vm6, %v2009_v38, %v10224_v10  ;;  %v16225_v38 = vrot.slane %v10159_v41, 4 }
 0x1c7   : > { %v859_v61 = vsel %vm672_vm6, %v827_v25, %v858_v19  ;;  %v856_v21 = vrot.slane %v827_v25, 4  ;;  %v869_v0 = vsel %vm672_vm6, %v868_v36, %v819_v33  ;;  %v2016_v20 = vperm.slane %v2010_v29, %v9951_v16 }
 0x1c8   : > { %v867_v22 = vperm.slane %v859_v61, %v9997_v57  ;;  %v875_v4 = vperm.slane %v869_v0, %v9997_v57  ;;  %v892_v52 = vrot.slane %v879_v17, 4  ;;  %v1933_v30 = vrot.slane %v1904_v47, 4 }
 0x1c9   : > { %v857_v49 = vsel %vm672_vm6, %v856_v21, %v815_v11  ;;  %v2045_v9 = vrot.slane %v2016_v20, 4  ;;  %v10308_v1 = vsel %vm672_vm6, %v879_v17, %v16225_v38  ;;  %v1936_v19 = vsel %vm672_vm6, %v1904_v47, %v1935_v39 }
 0x1ca   : > { %16226 = vst [vmem:[#allocation16_spill] sm:$0xff] %v10308_v1  ;;  %v884_v25 = vrot.slane %v867_v22, 4  ;;  %v10312_v33 = vperm.slane %v857_v49, %v9997_v57  ;;  %v16227_v61 = vrot.slane %v10166_v53, 4  ;;  %v16228_v29 = vrot.slane %v10169_v56, 4 }
 0x1cb   : > { %v888_v17 = vrot.slane %v875_v4, 4  ;;  %v10330_v47 = vsel %vm672_vm6, %v892_v52, %v10159_v41  ;;  %v1934_v38 = vsel %vm672_vm6, %v1933_v30, %v10248_v3  ;;  %v1945_v3 = vrot.slane %v1908_v44, 4 }
 0x1cc   : > { %v10317_v36 = vsel %vm672_vm6, %v867_v22, %v16227_v61  ;;  %v10322_v21 = vsel %vm672_vm6, %v875_v4, %v16228_v29  ;;  %16229 = vst [vmem:[#allocation17_spill] sm:$0xff] %v10330_v47  ;;  %8730 = vrot.lane.b32.xlu0 %v10173_v31, %s9768_s6  ;;  %8700 = vrot.lane.b32.xlu1 %v10094_v12, %s9764_s29  ;;  %v16230_v22 = vrot.slane %v10182_v2, 4  ;;  %v2047_v4 = vrot.slane %v10261_v18, 4  ;;  %v10551_v12 = vld [vmem:[#allocation2 + $0x9a] sm:$0xff] }
 0x1cd   : > { %v10338_v0 = vsel %vm672_vm6, %v884_v25, %v10166_v53  ;;  %8690 = vrot.lane.b32.xlu2 %v10006_v63, %s9764_s29  ;;  %v10357_v52 = vsel %vm672_vm6, %v888_v17, %v10169_v56  ;;  %v10364_v61 = vperm.slane %v1934_v38, %v9997_v57  ;;  %v2046_v63 = vsel %vm672_vm6, %v2045_v9, %v10261_v18  ;;  %v10549_v53 = vld [vmem:[#allocation2 + $0xb2] sm:$0xff] }
 0x1ce   : > { %v10344_v49 = vsel %vm672_vm6, %v10312_v33, %v16230_v22  ;;  %v10371_v22 = vperm.slane %v2046_v63, %v9997_v57  ;;  %v1944_v56 = vperm.slane %v1936_v19, %v9997_v57  ;;  %v2048_v17 = vsel %vm672_vm6, %v2016_v20, %v2047_v4 }
 0x1cf   : > { %v16231_v30 = vrot.slane %v10194_v5, 4  ;;  %v2056_v41 = vperm.slane %v2048_v17, %v9997_v57  ;;  %v2020_v9 = vperm.slane %v2012_v54, %v9951_v16  ;;  %v1947_v18 = vrot.slane %v10264_v28, 4  ;;  %v3037_v5 = vld [vmem:[#allocation2 + $0x82] sm:$0xff] }
 0x1d0   : > { %v16233_v63 = vrot.slane %v10197_v43, 4  ;;  %v1961_v20 = vrot.slane %v1944_v56, 4  ;;  %v1946_v4 = vsel %vm672_vm6, %v1945_v3, %v10264_v28  ;;  %v2059_v29 = vrot.slane %v10272_v23, 4 }
 0x1d1   : > { %v10379_v38 = vsel %vm672_vm6, %v10364_v61, %v16231_v30  ;;  %v2073_v17 = vrot.slane %v2056_v41, 4  ;;  %v1952_v54 = vperm.slane %v1946_v4, %v9997_v57  ;;  %v2057_v11 = vrot.slane %v2020_v9, 4 }
 0x1d2   : > { %16232 = vst [vmem:[#allocation18_spill] sm:$0xff] %v10379_v38  ;;  %v10388_v19 = vsel %vm672_vm6, %v10371_v22, %v16233_v63  ;;  %v10398_v25 = vsel %vm672_vm6, %v1961_v20, %v10200_v24  ;;  %v16236_v63 = vrot.slane %v10200_v24, 4  ;;  %v16238_v28 = vrot.slane %v10208_v27, 4 }
 0x1d3   : > { %16234 = vst [vmem:[#allocation19_spill] sm:$0xff] %v10388_v19  ;;  %v1948_v30 = vsel %vm672_vm6, %v1908_v44, %v1947_v18  ;;  %v10417_v20 = vsel %vm672_vm6, %v2073_v17, %v10208_v27  ;;  %v1965_v24 = vrot.slane %v1952_v54, 4  ;;  %v3390_v44 = vld [vmem:[#allocation2 + $0x9a] sm:$0xff] }
 0x1d4   : > { %16235 = vst [vmem:[#allocation20_spill] sm:$0xff] %v10398_v25  ;;  %v10403_v39 = vsel %vm672_vm6, %v1944_v56, %v16236_v63  ;;  %v10408_v3 = vsel %vm672_vm6, %v2056_v41, %v16238_v28  ;;  %8745 = vrot.lane.b32.xlu0 %v10175_v58, %s9768_s6  ;;  %8715 = vrot.lane.b32.xlu1 %v10204_v62, %s9764_s29  ;;  %v16241_v62 = vrot.slane %v10213_v15, 4  ;;  %v16244_v63 = vrot.slane %v10237_v14, 4  ;;  %v3382_v25 = vld [vmem:[#allocation2 + $0x3a] sm:$0xff] }
 0x1d5   : > { %16237 = vst [vmem:[#allocation21_spill] sm:$0xff] %v10403_v39  ;;  %v2058_v56 = vsel %vm672_vm6, %v2057_v11, %v10272_v23  ;;  %8705 = vrot.lane.b32.xlu2 %v10126_v59, %s9764_s29  ;;  %v1956_v4 = vperm.slane %v1948_v30, %v9997_v57  ;;  %v10436_v23 = vsel %vm672_vm6, %v1965_v24, %v10213_v15  ;;  %v2083_v59 = vrot.slane %v10254_v37, 4 }
 0x1d6   : > { %16239 = vst [vmem:[#allocation22_spill] sm:$0xff] %v10408_v3  ;;  %v2064_v18 = vperm.slane %v2058_v56, %v9997_v57  ;;  %v10431_v27 = vsel %vm672_vm6, %v1952_v54, %v16241_v62  ;;  %v2060_v11 = vsel %vm672_vm6, %v2020_v9, %v2059_v29  ;;  %v16246_v56 = vrot.slane %v10216_v7, 4 }
 0x1d7   : > { %16240 = vst [vmem:[#allocation23_spill] sm:$0xff] %v10417_v20  ;;  %v2068_v30 = vperm.slane %v2060_v11, %v9997_v57  ;;  %v1969_v24 = vrot.slane %v1956_v4, 4  ;;  %v8734_v29 = vpack.i.bf16 %v10052_v13, %v10045_v40  ;;  %v10547_v11 = vld [vmem:[#allocation2 + $0x2] sm:$0xff]  ;;  %v10566_v20 = vld [vmem:[#allocation2 + $0xa] sm:$0xff] }
 0x1d8   : > { %16242 = vst [vmem:[#allocation24_spill] sm:$0xff] %v10431_v27  ;;  %v2077_v17 = vrot.slane %v2064_v18, 4  ;;  %v10443_v28 = vsel %vm672_vm6, %v2064_v18, %v16244_v63  ;;  %v10448_v54 = vsel %vm672_vm6, %v1956_v4, %v16246_v56  ;;  %v8759_v63 = vpack.i.bf16 %v10258_v6, %v10256_v26  ;;  %v3384_v56 = vld [vmem:[#allocation2 + $0x52] sm:$0xff] }
 0x1d9   : > { %16243 = vst [vmem:[#allocation25_spill] sm:$0xff] %v10436_v23  ;;  %v10460_v18 = vsel %vm672_vm6, %v2068_v30, %v2083_v59  ;;  %v2081_v62 = vrot.slane %v2068_v30, 4  ;;  %v10470_v40 = vsel %vm672_vm6, %v1969_v24, %v10216_v7  ;;  %v8749_v26 = vpack.i.bf16 %v10224_v10, %v10222_v50  ;;  %v16253_v50 = vld [vmem:[#allocation12_spill] sm:$0xff]  ;;  %v16254_v10 = vld [vmem:[#allocation13_spill] sm:$0xff]  ;;  %v3392_v4 = vld [vmem:[#allocation2 + $0xb2] sm:$0xff] }
 0x1da   : > { %16245 = vst [vmem:[#allocation26_spill] sm:$0xff] %v10443_v28  ;;  %v10457_v9 = vsel %vm672_vm6, %v2077_v17, %v10237_v14  ;;  %v8724_v7 = vpack.i.bf16 %v10040_v35, %v10038_v34  ;;  %v8754_v34 = vpack.i.bf16 %v16254_v10, %v16253_v50  ;;  %v3377_v35 = vld [vmem:[#allocation2 + $0x2] sm:$0xff]  ;;  %v3386_v24 = vld [vmem:[#allocation2 + $0x6a] sm:$0xff]  ;;  %v10520_v50 = vld [vmem:[#allocation2 + $0x32] sm:$0xff]  ;;  %v3044_v2 = vrot.slane %v10547_v11, 4 }
 0x1db   : > { %16247 = vst [vmem:[#allocation27_spill] sm:$0xff] %v10448_v54  ;;  %v10474_v13 = vsel %vm672_vm6, %v2081_v62, %v10254_v37  ;;  %v16252_v37 = vld [vmem:[#allocation8_spill] sm:$0xff]  ;;  %v10512_v62 = vld [vmem:[#allocation2 + $0x52] sm:$0xff]  ;;  %v3391_v14 = vld [vmem:[#allocation2 + $0xaa] sm:$0xff] }
 0x1dc   : > { %16248 = vst [vmem:[#allocation28_spill] sm:$0xff] %v10457_v9  ;;  %8735 = vrot.lane.b32.xlu1 %v8734_v29, %s9768_s6  ;;  %8760 = vrot.lane.b32.xlu0 %v8759_v63, %s9768_s6  ;;  %v8739_v6 = vpack.i.bf16 %v16252_v37, %v10085_v8  ;;  %v3378_v8 = vld [vmem:[#allocation2 + $0xa] sm:$0xff]  ;;  %v3385_v30 = vld [vmem:[#allocation2 + $0x62] sm:$0xff] }
 0x1dd   : > { %16249 = vst [vmem:[#allocation29_spill] sm:$0xff] %v10460_v18  ;;  %8720 = vrot.lane.b32.xlu2 %v10268_v48, %s9764_s29  ;;  %v3380_v48 = vld [vmem:[#allocation2 + $0x22] sm:$0xff]  ;;  %v10503_v17 = vpack.i.bf16 %v3378_v8, %v3377_v35  ;;  %v3166_v35 = vrot.slane %v10512_v62, 4  ;;  %v10534_v8 = vld [vmem:[#allocation2 + $0x3a] sm:$0xff]  ;;  %v3381_v18 = vld [vmem:[#allocation2 + $0x32] sm:$0xff] }
 0x1de   : > { %16250 = vst [vmem:[#allocation30_spill] sm:$0xff] %v10470_v40  ;;  %v3154_v40 = vrot.slane %v10534_v8, 4  ;;  %v10579_v23 = vpack.i.bf16 %v3382_v25, %v3381_v18  ;;  %v16255_v9 = vld [vmem:[#allocation10_spill] sm:$0xff] }
 0x1df   : > { %16251 = vst [vmem:[#allocation31_spill] sm:$0xff] %v10474_v13  ;;  %v10558_v13 = vpack.i.bf16 %v3392_v4, %v3391_v14  ;;  %v3034_v4 = vld [vmem:[#allocation2 + $0x62] sm:$0xff]  ;;  %v3178_v14 = vrot.slane %v10551_v12, 4 }
 0x1e0   : > { %v3155_v3 = vsel %vm672_vm6, %v3154_v40, %v10566_v20  ;;  %v3068_v1 = vrot.slane %v3034_v4, 4 }
 0x1e1   : > { %v3161_v25 = vperm.slane %v3155_v3, %v9951_v16 }
 0x1e4   : > { %8750 = vrot.lane.b32.xlu1 %v8749_v26, %s9768_s6  ;;  %8770 = vrot.lane.b32.xlu0 %v10173_v31, %s9764_s29  ;;  %v3379_v31 = vld [vmem:[#allocation2 + $0x1a] sm:$0xff] }
 0x1e5   : > { %8725 = vrot.lane.b32.xlu2 %v8724_v7, %s9768_s6  ;;  %v10501_v59 = vpack.i.bf16 %v3380_v48, %v3379_v31  ;;  %v10530_v31 = vld [vmem:[#allocation2 + $0x1a] sm:$0xff]  ;;  %v10532_v48 = vld [vmem:[#allocation2 + $0x22] sm:$0xff] }
 0x1e6   : > { %v3167_v41 = vsel %vm672_vm6, %v3166_v35, %v10532_v48 }
 0x1e7   : > { %v10564_v54 = vperm.slane %v3167_v41, %v9951_v16  ;;  %v3035_v41 = vld [vmem:[#allocation2 + $0x6a] sm:$0xff] }
 0x1e8   : > { %v3179_v18 = vsel %vm672_vm6, %v3178_v14, %v3035_v41  ;;  %v3180_v40 = vrot.slane %v3035_v41, 4 }
 0x1e9   : > { %v3202_v47 = vrot.slane %v10564_v54, 4  ;;  %v3185_v14 = vperm.slane %v3179_v18, %v9951_v16 }
 0x1ec   : > { %8775 = vrot.lane.b32.xlu1 %v8734_v29, %s9764_s29  ;;  %8785 = vrot.lane.b32.xlu0 %v10175_v58, %s9764_s29  ;;  %v3383_v58 = vld [vmem:[#allocation2 + $0x4a] sm:$0xff] }
 0x1ed   : > { %8740 = vrot.lane.b32.xlu2 %v8739_v6, %s9768_s6  ;;  %v10510_v29 = vld [vmem:[#allocation2 + $0x4a] sm:$0xff]  ;;  %v10518_v37 = vpack.i.bf16 %v3384_v56, %v3383_v58  ;;  %v3042_v58 = vrot.slane %v10520_v50, 4  ;;  %v3389_v56 = vld [vmem:[#allocation2 + $0x92] sm:$0xff] }
 0x1ee   : > { %v3054_v10 = vrot.slane %v10510_v29, 4  ;;  %v10583_v32 = vpop.permute.xlu2 %8650 }
 0x1ef   : > { %v3043_v27 = vsel %vm672_vm6, %v3042_v58, %v10547_v11  ;;  %v3190_v58 = vrot.slane %v10549_v53, 4  ;;  %v3168_v11 = vrot.slane %v10532_v48, 4 }
 0x1f0   : > { %v3055_v15 = vsel %vm672_vm6, %v3054_v10, %v10530_v31 }
 0x1f1   : > { %v3061_v10 = vperm.slane %v3055_v15, %v9951_v16  ;;  %v3387_v15 = vld [vmem:[#allocation2 + $0x7a] sm:$0xff]  ;;  %v3169_v48 = vsel %vm672_vm6, %v10512_v62, %v3168_v11 }
 0x1f3   : > { %v3090_v39 = vrot.slane %v3061_v10, 4 }
 0x1f4   : > { %8790 = vrot.lane.b32.xlu1 %v8749_v26, %s9764_s29  ;;  %8800 = vrot.lane.b32.xlu0 %v8759_v63, %s9764_s29  ;;  %v10514_v63 = vld [vmem:[#allocation2 + $0xaa] sm:$0xff]  ;;  %v10516_v26 = vpack.i.bf16 %v3386_v24, %v3385_v30  ;;  %v10537_v30 = vld [vmem:[#allocation2 + $0x7a] sm:$0xff]  ;;  %v10539_v24 = vld [vmem:[#allocation2 + $0x92] sm:$0xff] }
 0x1f5   : > { %8755 = vrot.lane.b32.xlu2 %v8754_v34, %s9768_s6  ;;  %v3066_v28 = vrot.slane %v10539_v24, 4  ;;  %v3069_v18 = vsel %vm672_vm6, %v10539_v24, %v3068_v1 }
 0x1f6   : > { %v3077_v24 = vperm.slane %v3069_v18, %v9951_v16 }
 0x1fc   : > { %8810 = vrot.lane.b32.xlu1 %v10501_v59, %s9768_s6  ;;  %8805 = vrot.lane.b32.xlu0 %v10503_v17, %s9768_s6 }
 0x1fd   : > { %8765 = vrot.lane.b32.xlu2 %v8724_v7, %s9764_s29  ;;  %v3078_v7 = vrot.slane %v10514_v63, 4 }
 0x204   : > { %8825 = vrot.lane.b32.xlu1 %v10516_v26, %s9768_s6  ;;  %8820 = vrot.lane.b32.xlu0 %v10518_v37, %s9768_s6 }
 0x205   : > { %8780 = vrot.lane.b32.xlu2 %v8739_v6, %s9764_s29  ;;  %v3079_v6 = vsel %vm672_vm6, %v3078_v7, %v10537_v30  ;;  %v10560_v7 = vpack.i.bf16 %v3390_v44, %v3389_v56  ;;  %v3388_v44 = vld [vmem:[#allocation2 + $0x82] sm:$0xff]  ;;  %v3049_v56 = vperm.slane %v3043_v27, %v9951_v16  ;;  %v3080_v27 = vrot.slane %v10537_v30, 4 }
 0x206   : > { %v3085_v35 = vperm.slane %v3079_v6, %v9951_v16  ;;  %v3067_v6 = vsel %vm672_vm6, %v3066_v28, %v3034_v4  ;;  %v3191_v28 = vsel %vm672_vm6, %v3190_v58, %v3037_v5  ;;  %v3192_v4 = vrot.slane %v3037_v5, 4 }
 0x207   : > { %v3073_v38 = vperm.slane %v3067_v6, %v9951_v16  ;;  %v3091_v43 = vsel %vm672_vm6, %v3090_v39, %v3049_v56  ;;  %v3092_v19 = vrot.slane %v3049_v56, 4  ;;  %v3197_v30 = vperm.slane %v3191_v28, %v9951_v16  ;;  %v16260_v6 = vld [vmem:[#allocation9_spill] sm:$0xff] }
 0x208   : > { %v3114_v46 = vrot.slane %v3085_v35, 4  ;;  %v3203_v58 = vsel %vm672_vm6, %v3202_v47, %v3161_v25  ;;  %v3228_v56 = vrot.slane %v3185_v14, 4 }
 0x209   : > { %v3093_v39 = vsel %vm672_vm6, %v3061_v10, %v3092_v19  ;;  %v3116_v5 = vrot.slane %v3073_v38, 4  ;;  %v10628_v10 = vpop.permute.xlu2 %8665 }
 0x20a   : > { %v3229_v62 = vsel %vm672_vm6, %v3197_v30, %v3228_v56 }
 0x20b   : > { %v3117_v41 = vsel %vm672_vm6, %v3085_v35, %v3116_v5  ;;  %v3177_v35 = vperm.slane %v3169_v48, %v9951_v16 }
 0x20c   : > { %8840 = vrot.lane.b32.xlu1 %v10558_v13, %s9768_s6  ;;  %8835 = vrot.lane.b32.xlu0 %v10560_v7, %s9768_s6 }
 0x20d   : > { %8795 = vrot.lane.b32.xlu2 %v8754_v34, %s9764_s29  ;;  %v10585_v34 = vpack.i.bf16 %v3388_v44, %v3387_v15  ;;  %v3056_v15 = vrot.slane %v10530_v31, 4  ;;  %v3115_v44 = vsel %vm672_vm6, %v3114_v46, %v3073_v38  ;;  %v10607_v46 = vperm.slane %v3091_v43, %v9997_v57 }
 0x20e   : > { %v10615_v19 = vperm.slane %v3115_v44, %v9997_v57  ;;  %v3081_v43 = vsel %vm672_vm6, %v10514_v63, %v3080_v27  ;;  %v3226_v38 = vrot.slane %v3197_v30, 4  ;;  %v3156_v31 = vrot.slane %v10566_v20, 4 }
 0x20f   : > { %16256 = vst [vmem:[#allocation8_spill] sm:$0xff] %v10607_v46  ;;  %v3057_v47 = vsel %vm672_vm6, %v10510_v29, %v3056_v15  ;;  %v3101_v29 = vperm.slane %v3093_v39, %v9997_v57  ;;  %v3089_v27 = vperm.slane %v3081_v43, %v9951_v16  ;;  %v3181_v15 = vsel %vm672_vm6, %v10551_v12, %v3180_v40 }
 0x210   : > { %16257 = vst [vmem:[#allocation12_spill] sm:$0xff] %v10615_v19  ;;  %v3065_v28 = vperm.slane %v3057_v47, %v9951_v16  ;;  %v3157_v20 = vsel %vm672_vm6, %v10534_v8, %v3156_v31  ;;  %v3140_v8 = vrot.slane %v10607_v46, 4  ;;  %v3237_v12 = vperm.slane %v3229_v62, %v9997_v57  ;;  %v10664_v47 = vpop.permute.xlu1 %8645 }
 0x211   : > { %v3144_v30 = vrot.slane %v3101_v29, 4  ;;  %v3165_v1 = vperm.slane %v3157_v20, %v9951_v16  ;;  %v3126_v40 = vrot.slane %v3089_v27, 4  ;;  %v3214_v5 = vrot.slane %v3177_v35, 4 }
 0x212   : > { %v10670_v11 = vsel %vm672_vm6, %v10615_v19, %v3140_v8  ;;  %v3128_v62 = vrot.slane %v3077_v24, 4 }
 0x213   : > { %v3127_v20 = vsel %vm672_vm6, %v3126_v40, %v3077_v24 }
 0x214   : > { %8850 = vrot.lane.b32.xlu1 %v10501_v59, %s9764_s29  ;;  %8845 = vrot.lane.b32.xlu0 %v10503_v17, %s9764_s29  ;;  %v10618_v59 = vperm.slane %v3203_v58, %v9997_v57  ;;  %v3045_v17 = vsel %vm672_vm6, %v10520_v50, %v3044_v2  ;;  %v3193_v2 = vsel %vm672_vm6, %v10549_v53, %v3192_v4  ;;  %v3204_v50 = vrot.slane %v3161_v25, 4 }
 0x215   : > { %8815 = vrot.lane.b32.xlu2 %v10579_v23, %s9768_s6  ;;  %v3053_v63 = vperm.slane %v3045_v17, %v9951_v16  ;;  %v3227_v53 = vsel %vm672_vm6, %v3226_v38, %v3185_v14  ;;  %v3125_v25 = vperm.slane %v3117_v41, %v9997_v57  ;;  %v3201_v4 = vperm.slane %v3193_v2, %v9951_v16 }
 0x216   : > { %16258 = vst [vmem:[#allocation13_spill] sm:$0xff] %v10618_v59  ;;  %v3205_v44 = vsel %vm672_vm6, %v10564_v54, %v3204_v50  ;;  %v3102_v58 = vrot.slane %v3065_v28, 4  ;;  %v3189_v54 = vperm.slane %v3181_v15, %v9951_v16  ;;  %v10661_v14 = vperm.slane %v3227_v53, %v9997_v57 }
 0x217   : > { %v3213_v39 = vperm.slane %v3205_v44, %v9997_v57  ;;  %v3252_v17 = vrot.slane %v10618_v59, 4  ;;  %v10674_v43 = vsel %vm672_vm6, %v3125_v25, %v3144_v30  ;;  %v3238_v38 = vrot.slane %v3201_v4, 4 }
 0x218   : > { %16259 = vst [vmem:[#allocation10_spill] sm:$0xff] %v10661_v14  ;;  %v3142_v48 = vrot.slane %v3125_v25, 4  ;;  %v3103_v41 = vsel %vm672_vm6, %v3102_v58, %v3053_v63  ;;  %v3216_v2 = vrot.slane %v3165_v1, 4  ;;  %v3254_v50 = vrot.slane %v3237_v12, 4 }
 0x219   : > { %v3240_v18 = vrot.slane %v3189_v54, 4  ;;  %v10683_v15 = vsel %vm672_vm6, %v10661_v14, %v3252_v17  ;;  %v3256_v53 = vrot.slane %v3213_v39, 4  ;;  %v3215_v44 = vsel %vm672_vm6, %v3214_v5, %v3165_v1 }
 0x21a   : > { %v3217_v8 = vsel %vm672_vm6, %v3177_v35, %v3216_v2  ;;  %v3109_v25 = vperm.slane %v3103_v41, %v9997_v57  ;;  %v10695_v24 = vsel %vm672_vm6, %v3142_v48, %v3101_v29  ;;  %v3133_v40 = vperm.slane %v3127_v20, %v9997_v57 }
 0x21b   : > { %v3241_v30 = vsel %vm672_vm6, %v3201_v4, %v3240_v18  ;;  %v10692_v58 = vsel %vm672_vm6, %v3237_v12, %v3256_v53  ;;  %v16005_v35 = vunpack.i.h.bf16 %v10583_v32  ;;  %v3221_v4 = vperm.slane %v3215_v44, %v9997_v57 }
 0x21c   : > { %8865 = vrot.lane.b32.xlu1 %v10516_v26, %s9764_s29  ;;  %8860 = vrot.lane.b32.xlu0 %v10518_v37, %s9764_s29  ;;  %v3104_v26 = vrot.slane %v3053_v63, 4  ;;  %v10666_v37 = vpop.permute.xlu0 %8655  ;;  %v3239_v63 = vsel %vm672_vm6, %v3238_v38, %v3189_v54  ;;  %v3225_v29 = vperm.slane %v3217_v8, %v9997_v57  ;;  %v16006_v12 = vunpack.i.l.bf16 %v10583_v32 }
 0x21d   : > { %8830 = vrot.lane.b32.xlu2 %v10585_v34, %s9768_s6  ;;  %v3245_v54 = vperm.slane %v3239_v63, %v9997_v57  ;;  %v3148_v48 = vrot.slane %v3109_v25, 4  ;;  %v8647_v41 = vunpack.i.l.bf16 %v10664_v47  ;;  %v1221_v20 = vrot.slane %v16005_v35, 4 }
 0x21e   : > { %v3105_v56 = vsel %vm672_vm6, %v3065_v28, %v3104_v26  ;;  %v3129_v28 = vsel %vm672_vm6, %v3089_v27, %v3128_v62  ;;  %v10705_v27 = vsel %vm672_vm6, %v3254_v50, %v3213_v39  ;;  %v10715_v26 = vpop.permute.xlu1 %8660  ;;  %v3146_v50 = vrot.slane %v3133_v40, 4 }
 0x21f   : > { %v10676_v31 = vpop.permute.xlu2 %8680  ;;  %v3113_v1 = vperm.slane %v3105_v56, %v9997_v57  ;;  %v3137_v5 = vperm.slane %v3129_v28, %v9997_v57  ;;  %v3260_v62 = vrot.slane %v3221_v4, 4  ;;  %v3264_v53 = vrot.slane %v3225_v29, 4 }
 0x220   : > { %v1109_v44 = vrot.slane %v16006_v12, 4  ;;  %v3258_v8 = vrot.slane %v3245_v54, 4  ;;  %v10737_v17 = vsel %vm672_vm6, %v3133_v40, %v3148_v48  ;;  %v1097_v39 = vrot.slane %v8647_v41, 4 }
 0x221   : > { %v3152_v18 = vrot.slane %v3113_v1, 4  ;;  %v3150_v63 = vrot.slane %v3137_v5, 4  ;;  %v10740_v2 = vsel %vm672_vm6, %v3245_v54, %v3260_v62  ;;  %v10743_v3 = vsel %vm672_vm6, %v3146_v50, %v3109_v25 }
 0x222   : > { %v16261_v35 = vrot.slane %v16255_v9, 4  ;;  %v8663_v59 = vunpack.i.h.bf16 %v10715_v26  ;;  %v16263_v40 = vpack.i.bf16 %v10338_v0, %v10061_v51  ;;  %v16264_v25 = vpack.i.bf16 %v10344_v49, %v10179_v60 }
 0x223   : > { %v10762_v9 = vsel %vm672_vm6, %v3137_v5, %v3152_v18  ;;  %v10771_v51 = vsel %vm672_vm6, %v3150_v63, %v3113_v1  ;;  %v8682_v1 = vunpack.i.l.bf16 %v10676_v31  ;;  %v8683_v63 = vunpack.i.h.bf16 %v10676_v31 }
 0x224   : > { %8880 = vrot.lane.b32.xlu1 %v10558_v13, %s9764_s29  ;;  %8875 = vrot.lane.b32.xlu0 %v10560_v7, %s9764_s29  ;;  %v3249_v13 = vperm.slane %v3241_v30, %v9997_v57  ;;  %v8657_v30 = vunpack.i.l.bf16 %v10666_v37  ;;  %v10749_v12 = vsel %vm672_vm6, %v16261_v35, %v16260_v6  ;;  %v16008_v35 = vunpack.i.h.bf16 %v10628_v10 }
 0x225   : > { %8855 = vrot.lane.b32.xlu2 %v10579_v23, %s9764_s29  ;;  %v8648_v23 = vunpack.i.h.bf16 %v10664_v47  ;;  %v8658_v47 = vunpack.i.h.bf16 %v10666_v37  ;;  %16262 = vst [vmem:[#allocation9_spill] sm:$0xff] %v10749_v12  ;;  %v8662_v37 = vunpack.i.l.bf16 %v10715_v26  ;;  %v10782_v26 = vsel %vm672_vm6, %v3258_v8, %v3221_v4 }
 0x226   : > { %v10717_v7 = vpop.permute.xlu0 %8670  ;;  %v3262_v28 = vrot.slane %v3249_v13, 4  ;;  %v10765_v6 = vsel %vm672_vm6, %v3249_v13, %v3264_v53  ;;  %v1095_v54 = vrot.slane %v8657_v30, 4  ;;  %v1098_v62 = vsel %vm672_vm6, %v8657_v30, %v1097_v39 }
 0x227   : > { %v10726_v56 = vpop.permute.xlu2 %8690  ;;  %v1209_v38 = vrot.slane %v8648_v23, 4  ;;  %v1207_v49 = vrot.slane %v8658_v47, 4  ;;  %v8672_v5 = vunpack.i.l.bf16 %v10717_v7  ;;  %v8673_v48 = vunpack.i.h.bf16 %v10717_v7 }
 0x228   : > { %v10774_v0 = vsel %vm672_vm6, %v3262_v28, %v3225_v29  ;;  %v1219_v18 = vrot.slane %v8663_v59, 4  ;;  %v1107_v53 = vrot.slane %v8662_v37, 4  ;;  %v10797_v4 = vrot.slane %v16008_v35, 4 }
 0x229   : > { %v1208_v39 = vsel %vm672_vm6, %v1207_v49, %v8648_v23  ;;  %v1096_v31 = vsel %vm672_vm6, %v1095_v54, %v8647_v41  ;;  %v1133_v30 = vrot.slane %v8672_v5, 4  ;;  %v1131_v50 = vrot.slane %v8682_v1, 4 }
 0x22a   : > { %v1245_v60 = vrot.slane %v8673_v48, 4  ;;  %v16265_v7 = vunpack.i.l.bf16 %v10583_v32  ;;  %v16266_v8 = vunpack.i.h.bf16 %v10583_v32  ;;  %v1222_v49 = vsel %vm672_vm6, %v8663_v59, %v1221_v20 }
 0x22b   : > { %v16267_v41 = vpack.i.bf16 %v10322_v21, %v10057_v45  ;;  %v10836_v59 = vperm.slane %v1096_v31, %v9951_v16  ;;  %v1132_v20 = vsel %vm672_vm6, %v1131_v50, %v8672_v5  ;;  %v16269_v45 = vpack.i.bf16 %v10317_v36, %v10048_v42 }
 0x22c   : > { %8890 = vrot.lane.b32.xlu1 %v16263_v40, %s9769_s7  ;;  %8885 = vrot.lane.b32.xlu0 %v16264_v25, %s9770_s8  ;;  %v10810_v40 = vperm.slane %v1098_v62, %v9951_v16  ;;  %v1110_v25 = vsel %vm672_vm6, %v8662_v37, %v1109_v44  ;;  %v1108_v35 = vsel %vm672_vm6, %v1107_v53, %v16265_v7  ;;  %v16274_v53 = vld [vmem:[#allocation18_spill] sm:$0xff]  ;;  %v16279_v7 = vld [vmem:[#allocation17_spill] sm:$0xff] }
 0x22d   : > { %8870 = vrot.lane.b32.xlu2 %v10585_v34, %s9764_s29  ;;  %v1210_v34 = vsel %vm672_vm6, %v8658_v47, %v1209_v38  ;;  %v16011_v38 = vunpack.i.l.bf16 %v10628_v10  ;;  %v1220_v23 = vsel %vm672_vm6, %v1219_v18, %v16266_v8  ;;  %v16268_v44 = vpack.i.bf16 %v10357_v52, %v10068_v55  ;;  %v16273_v55 = vld [vmem:[#allocation19_spill] sm:$0xff] }
 0x22e   : > { %v10779_v13 = vpop.permute.xlu1 %8675  ;;  %v10793_v28 = vpop.permute.xlu0 %8695  ;;  %v10806_v47 = vperm.slane %v1210_v34, %v9951_v16  ;;  %v1243_v34 = vrot.slane %v8683_v63, 4  ;;  %v10833_v37 = vperm.slane %v1208_v39, %v9951_v16  ;;  %v10845_v21 = vperm.slane %v1110_v25, %v9951_v16  ;;  %v16280_v8 = vld [vmem:[#allocation7_spill] sm:$0xff] }
 0x22f   : > { %v10787_v29 = vpop.permute.xlu2 %8705  ;;  %v10830_v32 = vrot.slane %v16011_v38, 4  ;;  %v1134_v52 = vsel %vm672_vm6, %v8682_v1, %v1133_v30  ;;  %v10850_v18 = vperm.slane %v1108_v35, %v9951_v16  ;;  %v10853_v5 = vperm.slane %v1220_v23, %v9951_v16 }
 0x230   : > { %v1244_v54 = vsel %vm672_vm6, %v1243_v34, %v8673_v48  ;;  %v10856_v50 = vperm.slane %v1222_v49, %v9951_v16  ;;  %v1246_v42 = vsel %vm672_vm6, %v8683_v63, %v1245_v60  ;;  %v10863_v1 = vperm.slane %v1132_v20, %v9951_v16 }
 0x231   : > { %v16009_v48 = vunpack.i.h.bf16 %v10726_v56  ;;  %v16010_v35 = vunpack.i.l.bf16 %v10726_v56  ;;  %v10870_v39 = vperm.slane %v1134_v52, %v9951_v16  ;;  %v10873_v60 = vperm.slane %v1244_v54, %v9951_v16 }
 0x232   : > { %v10877_v31 = vperm.slane %v1246_v42, %v9951_v16  ;;  %v8678_v30 = vunpack.i.h.bf16 %v10779_v13  ;;  %v8677_v25 = vunpack.i.l.bf16 %v10779_v13  ;;  %v16271_v20 = vrot.slane %v10312_v33, 4  ;;  %v16276_v33 = vld [vmem:[#allocation16_spill] sm:$0xff] }
 0x233   : > { %v10895_v54 = vrot.slane %v16009_v48, 4  ;;  %v10899_v13 = vrot.slane %v16010_v35, 4  ;;  %v8698_v52 = vunpack.i.h.bf16 %v10793_v28  ;;  %v8697_v49 = vunpack.i.l.bf16 %v10793_v28  ;;  %v16282_v28 = vld [vmem:[#allocation14_spill] sm:$0xff] }
 0x234   : > { %8905 = vrot.lane.b32.xlu1 %v16267_v41, %s9771_s9  ;;  %8900 = vrot.lane.b32.xlu0 %v16268_v44, %s9772_s10  ;;  %v16270_v44 = vld [vmem:[#allocation11_spill] sm:$0xff]  ;;  %v16275_v41 = vpack.i.bf16 %v16273_v55, %v16274_v53  ;;  %v16281_v55 = vpack.i.bf16 %v16279_v7, %v16280_v8  ;;  %v1119_v48 = vrot.slane %v8677_v25, 4  ;;  %v16283_v35 = vrot.slane %v10364_v61, 4 }
 0x235   : > { %8895 = vrot.lane.b32.xlu2 %v16269_v45, %s9773_s11  ;;  %v10890_v45 = vsel %vm672_vm6, %v16271_v20, %v16270_v44  ;;  %v16277_v44 = vld [vmem:[#allocation6_spill] sm:$0xff]  ;;  %v16285_v7 = vld [vmem:[#allocation15_spill] sm:$0xff]  ;;  %v16286_v8 = vrot.slane %v10371_v22, 4  ;;  %v1622_v14 = vrot.slane %v8698_v52, 4  ;;  %v1510_v12 = vrot.slane %v8697_v49, 4 }
 0x236   : > { %v8686_v62 = vpop.permute.xlu1 %8685  ;;  %v10881_v23 = vpop.permute.xlu0 %8710  ;;  %16272 = vst [vmem:[#allocation11_spill] sm:$0xff] %v10890_v45  ;;  %v16278_v20 = vpack.i.bf16 %v16276_v33, %v16277_v44  ;;  %v10928_v38 = vsel %vm672_vm6, %v16283_v35, %v16282_v28  ;;  %v1122_v61 = vsel %vm672_vm6, %v8677_v25, %v10830_v32  ;;  %v16288_v28 = vunpack.i.l.bf16 %v10628_v10 }
 0x237   : > { %v10859_v36 = vpop.permute.xlu2 %8720  ;;  %v8688_v42 = vunpack.i.h.bf16 %v8686_v62  ;;  %v8687_v33 = vunpack.i.l.bf16 %v8686_v62  ;;  %16284 = vst [vmem:[#allocation19_spill] sm:$0xff] %v10928_v38  ;;  %v8712_v53 = vunpack.i.l.bf16 %v10881_v23  ;;  %v10953_v25 = vperm.slane %v1122_v61, %v9951_v16 }
 0x238   : > { %v8723_v63 = vunpack.i.h.bf16 %v10859_v36  ;;  %v8722_v19 = vunpack.i.l.bf16 %v10859_v36  ;;  %v1120_v22 = vsel %vm672_vm6, %v1119_v48, %v16288_v28 }
 0x239   : > { %v1624_v46 = vrot.slane %v8688_v42, 4  ;;  %v1512_v62 = vrot.slane %v8687_v33, 4  ;;  %v1623_v38 = vsel %vm672_vm6, %v1622_v14, %v8688_v42  ;;  %v1548_v35 = vrot.slane %v8712_v53, 4  ;;  %v16294_v14 = vld [vmem:[#allocation21_spill] sm:$0xff] }
 0x23a   : > { %v1658_v32 = vrot.slane %v8723_v63, 4  ;;  %v1546_v28 = vrot.slane %v8722_v19, 4 }
 0x23b   : > { %v1625_v48 = vsel %vm672_vm6, %v8698_v52, %v1624_v46  ;;  %v16296_v52 = vunpack.i.h.bf16 %v10787_v29 }
 0x23c   : > { %8920 = vrot.lane.b32.xlu1 %v16275_v41, %s9770_s8  ;;  %8915 = vrot.lane.b32.xlu0 %v16278_v20, %s9774_s12  ;;  %v1231_v41 = vrot.slane %v8678_v30, 4  ;;  %v8713_v20 = vunpack.i.h.bf16 %v10881_v23  ;;  %v1234_v23 = vsel %vm672_vm6, %v8678_v30, %v10797_v4  ;;  %v16293_v30 = vld [vmem:[#allocation22_spill] sm:$0xff] }
 0x23d   : > { %8910 = vrot.lane.b32.xlu2 %v16281_v55, %s9775_s13  ;;  %v10934_v55 = vsel %vm672_vm6, %v16286_v8, %v16285_v7  ;;  %v16289_v7 = vunpack.i.h.bf16 %v10628_v10  ;;  %v16295_v42 = vpack.i.bf16 %v16293_v30, %v16294_v14  ;;  %v10973_v46 = vperm.slane %v1234_v23, %v9951_v16 }
 0x23e   : > { %v10918_v44 = vpop.permute.xlu1 %8700  ;;  %16287 = vst [vmem:[#allocation18_spill] sm:$0xff] %v10934_v55  ;;  %v1660_v36 = vrot.slane %v8713_v20, 4  ;;  %v1511_v55 = vsel %vm672_vm6, %v1510_v12, %v8687_v33  ;;  %v10956_v10 = vpop.permute.xlu0 %8730  ;;  %v10967_v12 = vperm.slane %v1120_v22, %v9951_v16  ;;  %v1648_v61 = vrot.slane %v16296_v52, 4 }
 0x23f   : > { %v10922_v34 = vpop.permute.xlu2 %8725  ;;  %v1232_v8 = vsel %vm672_vm6, %v1231_v41, %v16289_v7  ;;  %v16290_v41 = vld [vmem:[#allocation28_spill] sm:$0xff]  ;;  %v16291_v7 = vld [vmem:[#allocation25_spill] sm:$0xff]  ;;  %v16300_v30 = vunpack.i.l.bf16 %v10787_v29  ;;  %v10986_v22 = vperm.slane %v1623_v38, %v9951_v16  ;;  %v10990_v23 = vperm.slane %v1511_v55, %v9951_v16  ;;  %v16313_v55 = vld [vmem:[#allocation30_spill] sm:$0xff] }
 0x240   : > { %v16292_v4 = vpack.i.bf16 %v16290_v41, %v16291_v7  ;;  %v10970_v33 = vperm.slane %v1232_v8, %v9951_v16  ;;  %v16297_v41 = vld [vmem:[#allocation23_spill] sm:$0xff]  ;;  %v16298_v7 = vld [vmem:[#allocation20_spill] sm:$0xff]  ;;  %v1513_v8 = vsel %vm672_vm6, %v8697_v49, %v1512_v62  ;;  %v10993_v52 = vperm.slane %v1625_v48, %v9951_v16 }
 0x241   : > { %v10983_v14 = vrot.slane %v16300_v30, 4  ;;  %16301 = vst [vmem:[#allocation16_spill] sm:$0xff] %v10986_v22  ;;  %v1659_v45 = vsel %vm672_vm6, %v1658_v32, %v8713_v20  ;;  %v1547_v38 = vsel %vm672_vm6, %v1546_v28, %v8712_v53  ;;  %v1549_v30 = vsel %vm672_vm6, %v8722_v19, %v1548_v35  ;;  %v16310_v62 = vld [vmem:[#allocation27_spill] sm:$0xff] }
 0x242   : > { %16302 = vst [vmem:[#allocation6_spill] sm:$0xff] %v10990_v23  ;;  %v8702_v49 = vunpack.i.l.bf16 %v10918_v44  ;;  %v11006_v20 = vperm.slane %v1513_v8, %v9951_v16  ;;  %v11013_v53 = vperm.slane %v1659_v45, %v9951_v16  ;;  %v11020_v35 = vperm.slane %v1547_v38, %v9951_v16  ;;  %v16309_v45 = vld [vmem:[#allocation29_spill] sm:$0xff] }
 0x243   : > { %16303 = vst [vmem:[#allocation17_spill] sm:$0xff] %v10993_v52  ;;  %v11023_v28 = vperm.slane %v1549_v30, %v9951_v16  ;;  %v8733_v52 = vunpack.i.h.bf16 %v10956_v10  ;;  %v8732_v22 = vunpack.i.l.bf16 %v10956_v10  ;;  %v16320_v30 = vunpack.i.h.bf16 %v10922_v34 }
 0x244   : > { %8935 = vrot.lane.b32.xlu1 %v16292_v4, %s9772_s10  ;;  %8930 = vrot.lane.b32.xlu0 %v16295_v42, %s9773_s11  ;;  %v16299_v4 = vpack.i.bf16 %v16297_v41, %v16298_v7  ;;  %v1661_v41 = vsel %vm672_vm6, %v8723_v63, %v1660_v36  ;;  %v8703_v7 = vunpack.i.h.bf16 %v10918_v44  ;;  %16304 = vst [vmem:[#allocation7_spill] sm:$0xff] %v11006_v20  ;;  %v1522_v48 = vrot.slane %v8702_v49, 4  ;;  %v16312_v44 = vld [vmem:[#allocation31_spill] sm:$0xff] }
 0x245   : > { %16305 = vst [vmem:[#allocation14_spill] sm:$0xff] %v11013_v53  ;;  %v11016_v19 = vperm.slane %v1661_v41, %v9951_v16  ;;  %v1525_v36 = vsel %vm672_vm6, %v8702_v49, %v10899_v13  ;;  %v16311_v41 = vpack.i.bf16 %v16309_v45, %v16310_v62  ;;  %v16314_v38 = vpack.i.bf16 %v16312_v44, %v16313_v55  ;;  %v16316_v49 = vld [vmem:[#allocation24_spill] sm:$0xff] }
 0x246   : > { %8925 = vrot.lane.b32.xlu2 %v16299_v4, %s9769_s7  ;;  %v8716_v42 = vpop.permute.xlu1 %8715  ;;  %16307 = vst [vmem:[#allocation28_spill] sm:$0xff] %v11020_v35  ;;  %v1634_v8 = vrot.slane %v8703_v7, 4  ;;  %v1637_v45 = vsel %vm672_vm6, %v8703_v7, %v10895_v54  ;;  %v11047_v44 = vpop.permute.xlu0 %8745  ;;  %v16319_v54 = vunpack.i.h.bf16 %v10726_v56  ;;  %v2402_v20 = vrot.slane %v8733_v52, 4 }
 0x247   : > { %v11008_v63 = vpop.permute.xlu2 %8740  ;;  %16306 = vst [vmem:[#allocation15_spill] sm:$0xff] %v11016_v19  ;;  %v8718_v32 = vunpack.i.h.bf16 %v8716_v42  ;;  %v8717_v4 = vunpack.i.l.bf16 %v8716_v42  ;;  %v16315_v42 = vld [vmem:[#allocation26_spill] sm:$0xff]  ;;  %v2290_v10 = vrot.slane %v8732_v22, 4  ;;  %v16321_v19 = vunpack.i.l.bf16 %v10922_v34 }
 0x248   : > { %16308 = vst [vmem:[#allocation25_spill] sm:$0xff] %v11023_v28  ;;  %v16317_v23 = vpack.i.bf16 %v16315_v42, %v16316_v49  ;;  %v11054_v42 = vperm.slane %v1525_v36, %v9951_v16  ;;  %v1635_v7 = vsel %vm672_vm6, %v1634_v8, %v16319_v54  ;;  %v2390_v36 = vrot.slane %v16320_v30, 4 }
 0x249   : > { %v1646_v62 = vrot.slane %v8718_v32, 4  ;;  %v1534_v55 = vrot.slane %v8717_v4, 4  ;;  %v2278_v28 = vrot.slane %v16321_v19, 4  ;;  %v11076_v53 = vperm.slane %v1635_v7, %v9951_v16 }
 0x24a   : > { %v8748_v35 = vunpack.i.h.bf16 %v11047_v44  ;;  %v16322_v19 = vunpack.i.l.bf16 %v10787_v29  ;;  %v16324_v7 = vpack.i.bf16 %v10692_v58, %v10674_v43  ;;  %v8747_v54 = vunpack.i.l.bf16 %v11047_v44 }
 0x24c   : > { %8950 = vrot.lane.b32.xlu1 %v16311_v41, %s9774_s12  ;;  %8945 = vrot.lane.b32.xlu0 %v16314_v38, %s9775_s13  ;;  %v8743_v41 = vunpack.i.h.bf16 %v11008_v63  ;;  %v11063_v38 = vperm.slane %v1637_v45, %v9951_v16  ;;  %v1537_v45 = vsel %vm672_vm6, %v8717_v4, %v10983_v14  ;;  %v16325_v14 = vpack.i.bf16 %v10705_v27, %v10695_v24 }
 0x24d   : > { %v11105_v43 = vperm.slane %v1537_v45, %v9951_v16 }
 0x24e   : > { %8940 = vrot.lane.b32.xlu2 %v16317_v23, %s9771_s9  ;;  %v16318_v23 = vunpack.i.l.bf16 %v10726_v56  ;;  %v8736_v13 = vpop.permute.xlu1 %8735  ;;  %v8742_v56 = vunpack.i.l.bf16 %v11008_v63  ;;  %v16323_v63 = vunpack.i.h.bf16 %v10787_v29  ;;  %v11117_v45 = vpop.permute.xlu0 %8760 }
 0x24f   : > { %v8756_v30 = vpop.permute.xlu2 %8755  ;;  %v8738_v29 = vunpack.i.h.bf16 %v8736_v13 }
 0x250   : > { %v1523_v49 = vsel %vm672_vm6, %v1522_v48, %v16318_v23  ;;  %v1649_v48 = vsel %vm672_vm6, %v8718_v32, %v1648_v61  ;;  %v2400_v23 = vrot.slane %v8743_v41, 4  ;;  %v1535_v61 = vsel %vm672_vm6, %v1534_v55, %v16322_v19 }
 0x251   : > { %v11072_v8 = vperm.slane %v1523_v49, %v9951_v16  ;;  %v1647_v32 = vsel %vm672_vm6, %v1646_v62, %v16323_v63  ;;  %v8737_v49 = vunpack.i.l.bf16 %v8736_v13  ;;  %v11098_v55 = vperm.slane %v1649_v48, %v9951_v16 }
 0x252   : > { %v16327_v62 = vpack.i.bf16 %v10683_v15, %v10670_v11  ;;  %v2401_v58 = vsel %vm672_vm6, %v2400_v23, %v8733_v52  ;;  %v2288_v24 = vrot.slane %v8742_v56, 4  ;;  %v8758_v27 = vunpack.i.h.bf16 %v8756_v30 }
 0x253   : > { %16326 = vst [vmem:[#allocation22_spill] sm:$0xff] %v11098_v55  ;;  %v11110_v44 = vperm.slane %v1535_v61, %v9951_v16  ;;  %v11113_v48 = vperm.slane %v1647_v32, %v9951_v16  ;;  %v2403_v13 = vsel %vm672_vm6, %v8743_v41, %v2402_v20  ;;  %v2414_v15 = vrot.slane %v8748_v35, 4 }
 0x254   : > { %8965 = vrot.lane.b32.xlu1 %v16324_v7, %s9773_s11  ;;  %8960 = vrot.lane.b32.xlu0 %v16325_v14, %s9769_s7  ;;  %v2276_v63 = vrot.slane %v8737_v49, 4  ;;  %v8757_v7 = vunpack.i.l.bf16 %v8756_v30  ;;  %v2302_v52 = vrot.slane %v8747_v54, 4  ;;  %v11121_v14 = vperm.slane %v2401_v58, %v9951_v16 }
 0x255   : > { %v2388_v61 = vrot.slane %v8738_v29, 4  ;;  %v11125_v32 = vperm.slane %v2403_v13, %v9951_v16  ;;  %v2289_v20 = vsel %vm672_vm6, %v2288_v24, %v8732_v22  ;;  %v2412_v41 = vrot.slane %v8758_v27, 4 }
 0x256   : > { %8955 = vrot.lane.b32.xlu2 %v16327_v62, %s9770_s8  ;;  %v8751_v19 = vpop.permute.xlu1 %8750  ;;  %v2291_v4 = vsel %vm672_vm6, %v8742_v56, %v2290_v10  ;;  %v16329_v23 = vrot.slane %v10836_v59, 4  ;;  %v16330_v62 = vunpack.i.l.bf16 %v10922_v34  ;;  %v2279_v22 = vsel %vm672_vm6, %v8737_v49, %v2278_v28 }
 0x257   : > { %16328 = vst [vmem:[#allocation21_spill] sm:$0xff] %v11125_v32  ;;  %v2391_v24 = vsel %vm672_vm6, %v8738_v29, %v2390_v36  ;;  %v2300_v55 = vrot.slane %v8757_v7, 4  ;;  %v16331_v30 = vpack.i.bf16 %v10774_v0, %v10771_v51  ;;  %v16332_v10 = vpack.i.bf16 %v10740_v2, %v10737_v17  ;;  %v11158_v29 = vpop.permute.xlu2 %8765 }
 0x258   : > { %v11135_v58 = vsel %vm672_vm6, %v10850_v18, %v16329_v23  ;;  %v2277_v13 = vsel %vm672_vm6, %v2276_v63, %v16330_v62  ;;  %v11152_v23 = vperm.slane %v2289_v20, %v9951_v16  ;;  %v16333_v28 = vunpack.i.h.bf16 %v10922_v34 }
 0x259   : > { %v2415_v49 = vsel %vm672_vm6, %v8758_v27, %v2414_v15  ;;  %v16334_v51 = vpack.i.bf16 %v10782_v26, %v10743_v3  ;;  %v11165_v17 = vperm.slane %v2291_v4, %v9951_v16  ;;  %v8763_v2 = vunpack.i.h.bf16 %v11117_v45 }
 0x25a   : > { %v2389_v36 = vsel %vm672_vm6, %v2388_v61, %v16333_v28  ;;  %v8762_v0 = vunpack.i.l.bf16 %v11117_v45  ;;  %v2413_v34 = vsel %vm672_vm6, %v2412_v41, %v8748_v35  ;;  %v11171_v63 = vperm.slane %v2277_v13, %v9951_v16 }
 0x25b   : > { %16335 = vst [vmem:[#allocation23_spill] sm:$0xff] %v11165_v17  ;;  %v11174_v27 = vperm.slane %v2279_v22, %v9951_v16  ;;  %v11177_v15 = vperm.slane %v2391_v24, %v9951_v16  ;;  %v2303_v3 = vsel %vm672_vm6, %v8757_v7, %v2302_v52  ;;  %v11181_v26 = vperm.slane %v2389_v36, %v9951_v16  ;;  %v11196_v22 = vpop.permute.xlu0 %8770 }
 0x25c   : > { %8980 = vrot.lane.b32.xlu1 %v16331_v30, %s9775_s13  ;;  %8975 = vrot.lane.b32.xlu0 %v16332_v10, %s9771_s9  ;;  %v11184_v4 = vperm.slane %v2415_v49, %v9951_v16  ;;  %v2301_v45 = vsel %vm672_vm6, %v2300_v55, %v8747_v54  ;;  %v8753_v35 = vunpack.i.h.bf16 %v8751_v19  ;;  %v11190_v20 = vperm.slane %v2413_v34, %v9951_v16 }
 0x25d   : > { %16336 = vst [vmem:[#allocation20_spill] sm:$0xff] %v11177_v15  ;;  %v8752_v41 = vunpack.i.l.bf16 %v8751_v19  ;;  %v2424_v7 = vrot.slane %v8763_v2, 4  ;;  %v2312_v52 = vrot.slane %v8762_v0, 4  ;;  %v11194_v13 = vperm.slane %v2303_v3, %v9951_v16 }
 0x25e   : > { %8970 = vrot.lane.b32.xlu2 %v16334_v51, %s9772_s10  ;;  %16337 = vst [vmem:[#allocation29_spill] sm:$0xff] %v11184_v4  ;;  %v11202_v10 = vperm.slane %v2301_v45, %v9951_v16  ;;  %v2426_v36 = vrot.slane %v8753_v35, 4  ;;  %v8776_v51 = vpop.permute.xlu1 %8775  ;;  %v8773_v55 = vunpack.i.h.bf16 %v11196_v22  ;;  %v16339_v45 = vpack.i.bf16 %v10765_v6, %v10762_v9 }
 0x25f   : > { %16338 = vst [vmem:[#allocation27_spill] sm:$0xff] %v11194_v13  ;;  %v2425_v49 = vsel %vm672_vm6, %v2424_v7, %v8753_v35  ;;  %v2313_v3 = vsel %vm672_vm6, %v2312_v52, %v8752_v41  ;;  %v2314_v61 = vrot.slane %v8752_v41, 4  ;;  %v8768_v30 = vunpack.i.h.bf16 %v11158_v29  ;;  %v11226_v6 = vpop.permute.xlu2 %8780 }
 0x260   : > { %v16340_v35 = vrot.slane %v10967_v12, 4  ;;  %v11223_v52 = vperm.slane %v2425_v49, %v9951_v16  ;;  %v8767_v34 = vunpack.i.l.bf16 %v11158_v29  ;;  %v8777_v9 = vunpack.i.l.bf16 %v8776_v51 }
 0x261   : > { %v2427_v24 = vsel %vm672_vm6, %v8763_v2, %v2426_v36  ;;  %v8778_v19 = vunpack.i.h.bf16 %v8776_v51  ;;  %v2817_v41 = vrot.slane %v8773_v55, 4  ;;  %v16341_v49 = vrot.slane %v10833_v37, 4 }
 0x262   : > { %v1170_v7 = vsel %vm672_vm6, %v10863_v1, %v16340_v35  ;;  %v2315_v35 = vsel %vm672_vm6, %v8762_v0, %v2314_v61  ;;  %v16342_v56 = vrot.slane %v10970_v33, 4  ;;  %v2805_v62 = vrot.slane %v8768_v30, 4 }
 0x263   : > { %v11233_v54 = vperm.slane %v1170_v7, %v9997_v57  ;;  %v1258_v29 = vsel %vm672_vm6, %v10853_v5, %v16341_v49  ;;  %v8783_v2 = vunpack.i.h.bf16 %v11226_v6  ;;  %v11247_v36 = vperm.slane %v11135_v58, %v9997_v57  ;;  %v11266_v32 = vpop.permute.xlu0 %8785 }
 0x264   : > { %v2693_v61 = vrot.slane %v8767_v34, 4  ;;  %v2691_v51 = vrot.slane %v8777_v9, 4  ;;  %v16343_v49 = vrot.slane %v10850_v18, 4  ;;  %v11261_v58 = vperm.slane %v1258_v29, %v9997_v57 }
 0x265   : > { %v1195_v0 = vrot.slane %v11233_v54, 4  ;;  %v16345_v18 = vrot.slane %v10863_v1, 4  ;;  %v16347_v29 = vrot.slane %v10873_v60, 4  ;;  %v2815_v15 = vrot.slane %v8783_v2, 4 }
 0x266   : > { %8985 = vrot.lane.b32.xlu2 %v16339_v45, %s9774_s12  ;;  %v11229_v45 = vperm.slane %v2313_v3, %v9951_v16  ;;  %v1282_v3 = vsel %vm672_vm6, %v10873_v60, %v16342_v56  ;;  %v1144_v11 = vsel %vm672_vm6, %v16343_v49, %v10836_v59  ;;  %v2806_v56 = vsel %vm672_vm6, %v8778_v19, %v2805_v62 }
 0x267   : > { %v11251_v7 = vperm.slane %v1282_v3, %v9997_v57  ;;  %v1196_v28 = vsel %vm672_vm6, %v1195_v0, %v11247_v36  ;;  %v11264_v4 = vperm.slane %v1144_v11, %v9997_v57  ;;  %v1168_v59 = vsel %vm672_vm6, %v16345_v18, %v10967_v12 }
 0x268   : > { %v16346_v62 = vrot.slane %v10853_v5, 4  ;;  %v1280_v11 = vsel %vm672_vm6, %v16347_v29, %v10970_v33  ;;  %v2803_v49 = vrot.slane %v8778_v19, 4  ;;  %v11282_v13 = vperm.slane %v1168_v59, %v9997_v57 }
 0x269   : > { %16344 = vst [vmem:[#allocation31_spill] sm:$0xff] %v11264_v4  ;;  %v1307_v3 = vrot.slane %v11251_v7, 4  ;;  %v11288_v1 = vperm.slane %v2427_v24, %v9951_v16  ;;  %v11294_v60 = vperm.slane %v1280_v11, %v9997_v57  ;;  %v2694_v12 = vsel %vm672_vm6, %v8777_v9, %v2693_v61 }
 0x26a   : > { %v1256_v0 = vsel %vm672_vm6, %v16346_v62, %v10833_v37  ;;  %16348 = vst [vmem:[#allocation30_spill] sm:$0xff] %v11282_v13  ;;  %v1193_v37 = vrot.slane %v11264_v4, 4  ;;  %v2814_v33 = vperm.slane %v2806_v56, %v9951_v16  ;;  %v2818_v19 = vsel %vm672_vm6, %v8783_v2, %v2817_v41 }
 0x26b   : > { %v11285_v17 = vperm.slane %v1256_v0, %v9997_v57  ;;  %v1308_v5 = vsel %vm672_vm6, %v1307_v3, %v11261_v58  ;;  %16350 = vst [vmem:[#allocation24_spill] sm:$0xff] %v11294_v60  ;;  %v2692_v59 = vsel %vm672_vm6, %v2691_v51, %v8767_v34  ;;  %v8782_v24 = vunpack.i.l.bf16 %v11226_v6 }
 0x26c   : > { %v8994_v18 = vpack.i.bf16 %v1308_v5, %v1196_v28  ;;  %v1194_v62 = vsel %vm672_vm6, %v11282_v13, %v1193_v37  ;;  %v11305_v0 = vperm.slane %v2315_v35, %v9951_v16  ;;  %v2804_v29 = vsel %vm672_vm6, %v2803_v49, %v8768_v30 }
 0x26d   : > { %16349 = vst [vmem:[#allocation26_spill] sm:$0xff] %v11285_v17  ;;  %v1305_v3 = vrot.slane %v11285_v17, 4  ;;  %v16044_v9 = vunpack.i.h.bf16 %v11266_v32  ;;  %v2816_v61 = vsel %vm672_vm6, %v2815_v15, %v8773_v55  ;;  %v11312_v28 = vperm.slane %v2694_v12, %v9951_v16 }
 0x26e   : > { %8995 = vrot.lane.b32.xlu1 %v8994_v18, %s9769_s7  ;;  %v16043_v34 = vunpack.i.l.bf16 %v11266_v32  ;;  %v2826_v41 = vperm.slane %v2818_v19, %v9951_v16  ;;  %v16351_v35 = vunpack.i.l.bf16 %v11196_v22  ;;  %v11321_v30 = vperm.slane %v2692_v59, %v9951_v16 }
 0x26f   : > { %v1306_v6 = vsel %vm672_vm6, %v11294_v60, %v1305_v3  ;;  %v2865_v51 = vrot.slane %v2814_v33, 4  ;;  %v11325_v56 = vperm.slane %v2804_v29, %v9951_v16  ;;  %v11328_v11 = vperm.slane %v2816_v61, %v9951_v16  ;;  %v11344_v29 = vpop.permute.xlu1 %8790  ;;  %v11346_v61 = vpop.permute.xlu0 %8800 }
 0x270   : > { %v2705_v2 = vrot.slane %v16351_v35, 4  ;;  %16352 = vst [vmem:[#allocation32_spill] sm:$0xff] %v11321_v30  ;;  %v8989_v15 = vpack.i.bf16 %v1306_v6, %v1194_v62  ;;  %v2703_v49 = vrot.slane %v8782_v24, 4  ;;  %v2753_v18 = vrot.slane %v11312_v28, 4 }
 0x271   : > { %16353 = vst [vmem:[#allocation33_spill] sm:$0xff] %v11325_v56  ;;  %v11338_v59 = vrot.slane %v16044_v9, 4  ;;  %v11342_v62 = vrot.slane %v16043_v34, 4  ;;  %v2863_v3 = vrot.slane %v2826_v41, 4  ;;  %v1197_v35 = vrot.slane %v11247_v36, 4 }
 0x272   : > { %16354 = vst [vmem:[#allocation34_spill] sm:$0xff] %v11328_v11  ;;  %v2706_v19 = vsel %vm672_vm6, %v8782_v24, %v2705_v2  ;;  %8990 = vrot.lane.b32.xlu0 %v8989_v15, %s9770_s8  ;;  %v2866_v24 = vsel %vm672_vm6, %v2826_v41, %v2865_v51  ;;  %v1309_v2 = vrot.slane %v11261_v58, 4  ;;  %v16355_v37 = vunpack.i.l.bf16 %v11196_v22 }
 0x273   : > { %v11358_v5 = vperm.slane %v2706_v19, %v9951_v16  ;;  %v8793_v34 = vunpack.i.h.bf16 %v11344_v29  ;;  %v8803_v6 = vunpack.i.h.bf16 %v11346_v61  ;;  %v1198_v36 = vsel %vm672_vm6, %v11233_v54, %v1197_v35 }
 0x274   : > { %v2704_v55 = vsel %vm672_vm6, %v2703_v49, %v16355_v37  ;;  %v1310_v58 = vsel %vm672_vm6, %v11251_v7, %v1309_v2  ;;  %v11367_v41 = vsel %vm672_vm6, %v2863_v3, %v2814_v33  ;;  %v11370_v22 = vperm.slane %v2866_v24, %v9997_v57 }
 0x275   : > { %16356 = vst [vmem:[#allocation35_spill] sm:$0xff] %v11367_v41  ;;  %v8999_v51 = vpack.i.bf16 %v1310_v58, %v1198_v36  ;;  %v16358_v49 = vrot.slane %v10845_v21, 4  ;;  %v16359_v54 = vrot.slane %v10870_v39, 4  ;;  %v16360_v7 = vrot.slane %v10856_v50, 4  ;;  %v11392_v36 = vpop.permute.xlu2 %8795 }
 0x276   : > { %16357 = vst [vmem:[#allocation36_spill] sm:$0xff] %v11370_v22  ;;  %v16361_v3 = vrot.slane %v10877_v31, 4  ;;  %v11390_v2 = vperm.slane %v2704_v55, %v9951_v16  ;;  %v2839_v12 = vrot.slane %v8803_v6, 4  ;;  %v2751_v17 = vrot.slane %v11358_v5, 4 }
 0x277   : > { %v1156_v37 = vsel %vm672_vm6, %v16358_v49, %v10810_v40  ;;  %v1180_v35 = vsel %vm672_vm6, %v16359_v54, %v10953_v25  ;;  %v1268_v33 = vsel %vm672_vm6, %v16360_v7, %v10806_v47  ;;  %9000 = vrot.lane.b32.xlu2 %v8999_v51, %s9773_s11  ;;  %v2841_v54 = vrot.slane %v8793_v34, 4 }
 0x278   : > { %v1162_v19 = vperm.slane %v1156_v37, %v9997_v57  ;;  %v1292_v24 = vsel %vm672_vm6, %v16361_v3, %v10973_v46  ;;  %v1186_v58 = vperm.slane %v1180_v35, %v9997_v57  ;;  %v1274_v49 = vperm.slane %v1268_v33, %v9997_v57 }
 0x279   : > { %v1298_v37 = vperm.slane %v1292_v24, %v9997_v57  ;;  %v8792_v7 = vunpack.i.l.bf16 %v11344_v29  ;;  %v8802_v3 = vunpack.i.l.bf16 %v11346_v61  ;;  %v8798_v51 = vunpack.i.h.bf16 %v11392_v36 }
 0x27a   : > { %v1201_v15 = vrot.slane %v1162_v19, 4  ;;  %v1313_v9 = vrot.slane %v1274_v49, 4  ;;  %v1199_v55 = vrot.slane %v1186_v58, 4  ;;  %v2754_v24 = vsel %vm672_vm6, %v11358_v5, %v2753_v18 }
 0x27b   : > { %v1311_v4 = vrot.slane %v1298_v37, 4  ;;  %v2729_v13 = vrot.slane %v8792_v7, 4  ;;  %v2840_v22 = vsel %vm672_vm6, %v2839_v12, %v8793_v34  ;;  %v2842_v56 = vsel %vm672_vm6, %v8803_v6, %v2841_v54 }
 0x27c   : > { %v1202_v33 = vsel %vm672_vm6, %v1186_v58, %v1201_v15  ;;  %v1314_v29 = vsel %vm672_vm6, %v1298_v37, %v1313_v9  ;;  %v1200_v60 = vsel %vm672_vm6, %v1199_v55, %v1162_v19  ;;  %v2727_v30 = vrot.slane %v8802_v3, 4  ;;  %v16371_v55 = vld [vmem:[#allocation6_spill] sm:$0xff] }
 0x27d   : > { %v1312_v61 = vsel %vm672_vm6, %v1311_v4, %v1274_v49  ;;  %v9009_v41 = vpack.i.bf16 %v1314_v29, %v1202_v33  ;;  %v16362_v35 = vrot.slane %v10810_v40, 4  ;;  %v16363_v5 = vrot.slane %v10953_v25, 4  ;;  %v11426_v40 = vpop.permute.xlu0 %8805 }
 0x27e   : > { %v9004_v11 = vpack.i.bf16 %v1312_v61, %v1200_v60  ;;  %v11420_v4 = vperm.slane %v2754_v24, %v9997_v57  ;;  %v2827_v18 = vrot.slane %v8798_v51, 4  ;;  %v16365_v34 = vunpack.i.l.bf16 %v11392_v36  ;;  %v16375_v61 = vld [vmem:[#allocation16_spill] sm:$0xff] }
 0x27f   : > { %v1158_v15 = vsel %vm672_vm6, %v10845_v21, %v16362_v35  ;;  %v1182_v9 = vsel %vm672_vm6, %v10870_v39, %v16363_v5  ;;  %9010 = vrot.lane.b32.xlu1 %v9009_v41, %s9771_s9  ;;  %v11431_v12 = vperm.slane %v2840_v22, %v9951_v16  ;;  %v16366_v39 = vrot.slane %v10806_v47, 4 }
 0x280   : > { %16364 = vst [vmem:[#allocation37_spill] sm:$0xff] %v11420_v4  ;;  %v2715_v60 = vrot.slane %v16365_v34, 4  ;;  %9005 = vrot.lane.b32.xlu0 %v9004_v11, %s9772_s10  ;;  %v1190_v21 = vperm.slane %v1182_v9, %v9997_v57  ;;  %v16367_v19 = vrot.slane %v10973_v46, 4  ;;  %v11442_v11 = vperm.slane %v2842_v56, %v9951_v16 }
 0x281   : > { %v1270_v6 = vsel %vm672_vm6, %v10856_v50, %v16366_v39  ;;  %v2730_v58 = vsel %vm672_vm6, %v8802_v3, %v2729_v13  ;;  %v1166_v49 = vperm.slane %v1158_v15, %v9997_v57  ;;  %v2728_v22 = vsel %vm672_vm6, %v2727_v30, %v8792_v7  ;;  %v11457_v3 = vpop.permute.xlu1 %8810  ;;  %v16374_v7 = vld [vmem:[#allocation28_spill] sm:$0xff] }
 0x282   : > { %v1294_v41 = vsel %vm672_vm6, %v10877_v31, %v16367_v19  ;;  %16368 = vst [vmem:[#allocation38_spill] sm:$0xff] %v11442_v11  ;;  %v1203_v37 = vrot.slane %v1190_v21, 4  ;;  %v2830_v47 = vsel %vm672_vm6, %v8798_v51, %v11338_v59  ;;  %v1278_v50 = vperm.slane %v1270_v6, %v9997_v57  ;;  %v8816_v6 = vpop.permute.xlu2 %8815 }
 0x283   : > { %v1302_v46 = vperm.slane %v1294_v41, %v9997_v57  ;;  %v16369_v54 = vunpack.i.h.bf16 %v11266_v32  ;;  %v16370_v56 = vunpack.i.l.bf16 %v11266_v32  ;;  %v16372_v35 = vrot.slane %v16371_v55, 4 }
 0x284   : > { %v16373_v59 = vrot.slane %v11110_v44, 4  ;;  %v8808_v33 = vunpack.i.h.bf16 %v11426_v40  ;;  %v1204_v24 = vsel %vm672_vm6, %v1203_v37, %v1166_v49  ;;  %v16376_v15 = vrot.slane %v16375_v61, 4 }
 0x285   : > { %v2828_v31 = vsel %vm672_vm6, %v2827_v18, %v16369_v54  ;;  %v2716_v13 = vsel %vm672_vm6, %v2715_v60, %v16370_v56  ;;  %v1561_v30 = vsel %vm672_vm6, %v11072_v8, %v16372_v35  ;;  %v1315_v29 = vrot.slane %v1302_v46, 4  ;;  %v16378_v18 = vld [vmem:[#allocation14_spill] sm:$0xff] }
 0x286   : > { %v1585_v51 = vsel %vm672_vm6, %v16374_v7, %v16373_v59  ;;  %v1673_v5 = vsel %vm672_vm6, %v11076_v53, %v16376_v15  ;;  %v16377_v9 = vrot.slane %v11113_v48, 4  ;;  %v1205_v60 = vrot.slane %v1166_v49, 4 }
 0x287   : > { %v1593_v32 = vperm.slane %v1585_v51, %v9997_v57  ;;  %v1317_v39 = vrot.slane %v1278_v50, 4  ;;  %v1316_v19 = vsel %vm672_vm6, %v1315_v29, %v1278_v50  ;;  %v1569_v41 = vperm.slane %v1561_v30, %v9997_v57 }
 0x288   : > { %v1697_v34 = vsel %vm672_vm6, %v16378_v18, %v16377_v9  ;;  %v16058_v56 = vunpack.i.l.bf16 %v11426_v40  ;;  %v9014_v35 = vpack.i.bf16 %v1316_v19, %v1204_v24  ;;  %v1206_v59 = vsel %vm672_vm6, %v1190_v21, %v1205_v60  ;;  %v11497_v21 = vpop.permute.xlu0 %8820 }
 0x289   : > { %v1610_v37 = vrot.slane %v1593_v32, 4  ;;  %v1705_v54 = vperm.slane %v1697_v34, %v9997_v57  ;;  %v1318_v51 = vsel %vm672_vm6, %v1302_v46, %v1317_v39  ;;  %v1681_v49 = vperm.slane %v1673_v5, %v9997_v57 }
 0x28a   : > { %v9019_v25 = vpack.i.bf16 %v1318_v51, %v1206_v59  ;;  %v11488_v50 = vsel %vm672_vm6, %v2751_v17, %v11312_v28  ;;  %v11491_v30 = vperm.slane %v2728_v22, %v9951_v16  ;;  %v11494_v29 = vperm.slane %v2730_v58, %v9951_v16  ;;  %9015 = vrot.lane.b32.xlu2 %v9014_v35, %s9775_s13 }
 0x28b   : > { %v1611_v15 = vsel %vm672_vm6, %v1610_v37, %v1569_v41  ;;  %v1722_v9 = vrot.slane %v1705_v54, 4  ;;  %v8818_v24 = vunpack.i.h.bf16 %v8816_v6  ;;  %v2887_v46 = vrot.slane %v11442_v11, 4 }
 0x28c   : > { %16379 = vst [vmem:[#allocation6_spill] sm:$0xff] %v11494_v29  ;;  %v11501_v5 = vperm.slane %v2828_v31, %v9951_v16  ;;  %v11504_v34 = vperm.slane %v2830_v47, %v9951_v16  ;;  %9020 = vrot.lane.b32.xlu0 %v9019_v25, %s9774_s12  ;;  %v16381_v58 = vunpack.i.l.bf16 %v11392_v36  ;;  %v11514_v60 = vperm.slane %v2716_v13, %v9951_v16  ;;  %v11522_v36 = vpop.permute.xlu1 %8825  ;;  %v16383_v13 = vld [vmem:[#allocation7_spill] sm:$0xff] }
 0x28d   : > { %v1723_v17 = vsel %vm672_vm6, %v1722_v9, %v1681_v49  ;;  %v16057_v31 = vunpack.i.h.bf16 %v11457_v3  ;;  %v3571_v19 = vrot.slane %v8808_v33, 4  ;;  %v3459_v47 = vrot.slane %v16058_v56, 4 }
 0x28e   : > { %16380 = vst [vmem:[#allocation28_spill] sm:$0xff] %v11504_v34  ;;  %v2718_v22 = vsel %vm672_vm6, %v16381_v58, %v11342_v62  ;;  %v9029_v39 = vpack.i.bf16 %v1723_v17, %v1611_v15  ;;  %v8817_v37 = vunpack.i.l.bf16 %v8816_v6  ;;  %v3569_v59 = vrot.slane %v8818_v24, 4 }
 0x28f   : > { %v1612_v62 = vrot.slane %v1569_v41, 4  ;;  %v11527_v51 = vsel %vm672_vm6, %v2887_v46, %v11504_v34  ;;  %v11531_v6 = vperm.slane %v2718_v22, %v9951_v16  ;;  %v3583_v41 = vrot.slane %v16057_v31, 4  ;;  %v8831_v34 = vpop.permute.xlu2 %8830 }
 0x290   : > { %9030 = vrot.lane.b32.xlu1 %v9029_v39, %s9769_s7  ;;  %v1724_v39 = vrot.slane %v1681_v49, 4  ;;  %v3572_v28 = vsel %vm672_vm6, %v8818_v24, %v3571_v19  ;;  %v3457_v25 = vrot.slane %v8817_v37, 4  ;;  %v3460_v46 = vsel %vm672_vm6, %v8817_v37, %v3459_v47  ;;  %v11575_v56 = vpop.permute.xlu0 %8835 }
 0x291   : > { %16382 = vst [vmem:[#allocation16_spill] sm:$0xff] %v11531_v6  ;;  %v1613_v58 = vsel %vm672_vm6, %v1593_v32, %v1612_v62  ;;  %v3570_v15 = vsel %vm672_vm6, %v3569_v59, %v8808_v33  ;;  %v16384_v9 = vrot.slane %v11054_v42, 4  ;;  %v16385_v32 = vld [vmem:[#allocation25_spill] sm:$0xff]  ;;  %v16389_v59 = vld [vmem:[#allocation22_spill] sm:$0xff]  ;;  %v16399_v11 = vunpack.i.l.bf16 %v11457_v3 }
 0x292   : > { %v1725_v22 = vsel %vm672_vm6, %v1705_v54, %v1724_v39  ;;  %v16386_v49 = vrot.slane %v16385_v32, 4  ;;  %v16387_v33 = vld [vmem:[#allocation17_spill] sm:$0xff]  ;;  %v16388_v54 = vrot.slane %v11063_v38, 4 }
 0x293   : > { %v1571_v35 = vsel %vm672_vm6, %v16384_v9, %v16383_v13  ;;  %v9034_v31 = vpack.i.bf16 %v1725_v22, %v1613_v58  ;;  %v16390_v9 = vld [vmem:[#allocation15_spill] sm:$0xff]  ;;  %v16393_v22 = vrot.slane %v16374_v7, 4 }
 0x294   : > { %v1595_v62 = vsel %vm672_vm6, %v16386_v49, %v11105_v43  ;;  %v11551_v24 = vperm.slane %v1571_v35, %v9997_v57  ;;  %v1683_v47 = vsel %vm672_vm6, %v16388_v54, %v16387_v33  ;;  %v16391_v39 = vrot.slane %v16390_v9, 4 }
 0x295   : > { %v11554_v19 = vperm.slane %v1595_v62, %v9997_v57  ;;  %v11561_v37 = vperm.slane %v1683_v47, %v9997_v57  ;;  %v16392_v35 = vrot.slane %v11072_v8, 4  ;;  %v1583_v62 = vsel %vm672_vm6, %v16393_v22, %v11110_v44  ;;  %9035 = vrot.lane.b32.xlu2 %v9034_v31, %s9773_s11 }
 0x296   : > { %v1707_v49 = vsel %vm672_vm6, %v16391_v39, %v16389_v59  ;;  %v1616_v54 = vrot.slane %v11551_v24, 4  ;;  %v11586_v8 = vperm.slane %v1583_v62, %v9997_v57  ;;  %v16396_v44 = vrot.slane %v11076_v53, 4 }
 0x297   : > { %v1559_v58 = vsel %vm672_vm6, %v16392_v35, %v16371_v55  ;;  %v11580_v47 = vperm.slane %v1707_v49, %v9997_v57  ;;  %v8823_v55 = vunpack.i.h.bf16 %v11497_v21  ;;  %v1728_v7 = vrot.slane %v11561_v37, 4 }
 0x298   : > { %v11583_v39 = vperm.slane %v1559_v58, %v9997_v57  ;;  %16395 = vst [vmem:[#allocation7_spill] sm:$0xff] %v11586_v8  ;;  %v1671_v31 = vsel %vm672_vm6, %v16396_v44, %v16375_v61  ;;  %v16397_v35 = vrot.slane %v16378_v18, 4  ;;  %v8822_v58 = vunpack.i.l.bf16 %v11497_v21  ;;  %v8841_v21 = vpop.permute.xlu1 %8840 }
 0x299   : > { %v1617_v22 = vsel %vm672_vm6, %v11554_v19, %v1616_v54  ;;  %v11603_v17 = vperm.slane %v1671_v31, %v9997_v57  ;;  %v3471_v53 = vrot.slane %v16399_v11, 4  ;;  %v11608_v61 = vperm.slane %v3572_v28, %v9951_v16 }
 0x29a   : > { %16394 = vst [vmem:[#allocation14_spill] sm:$0xff] %v11583_v39  ;;  %v1695_v49 = vsel %vm672_vm6, %v16397_v35, %v11113_v48  ;;  %v1608_v62 = vrot.slane %v11583_v39, 4  ;;  %v1729_v18 = vsel %vm672_vm6, %v11580_v47, %v1728_v7  ;;  %v16402_v54 = vunpack.i.l.bf16 %v11426_v40 }
 0x29b   : > { %16398 = vst [vmem:[#allocation25_spill] sm:$0xff] %v11603_v17  ;;  %v11613_v48 = vperm.slane %v1695_v49, %v9997_v57  ;;  %v9044_v35 = vpack.i.bf16 %v1729_v18, %v1617_v22  ;;  %v1720_v11 = vrot.slane %v11603_v17, 4  ;;  %v11622_v28 = vperm.slane %v3570_v15, %v9951_v16 }
 0x29c   : > { %16400 = vst [vmem:[#allocation17_spill] sm:$0xff] %v11608_v61  ;;  %v3458_v44 = vsel %vm672_vm6, %v3457_v25, %v16402_v54  ;;  %v1609_v31 = vsel %vm672_vm6, %v11586_v8, %v1608_v62  ;;  %v11625_v39 = vperm.slane %v3460_v46, %v9951_v16  ;;  %v3581_v7 = vrot.slane %v8823_v55, 4 }
 0x29d   : > { %16401 = vst [vmem:[#allocation22_spill] sm:$0xff] %v11613_v48  ;;  %v3584_v49 = vsel %vm672_vm6, %v8823_v55, %v3583_v41  ;;  %v3469_v4 = vrot.slane %v8822_v58, 4  ;;  %9045 = vrot.lane.b32.xlu1 %v9044_v35, %s9771_s9  ;;  %v1721_v40 = vsel %vm672_vm6, %v11613_v48, %v1720_v11  ;;  %v8843_v25 = vunpack.i.h.bf16 %v8841_v21 }
 0x29e   : > { %16403 = vst [vmem:[#allocation15_spill] sm:$0xff] %v11625_v39  ;;  %v8842_v22 = vunpack.i.l.bf16 %v8841_v21  ;;  %v11632_v62 = vperm.slane %v3458_v44, %v9951_v16  ;;  %v9024_v18 = vpack.i.bf16 %v1721_v40, %v1609_v31  ;;  %v16404_v41 = vrot.slane %v11494_v29, 4  ;;  %v11650_v31 = vpop.permute.xlu0 %8845 }
 0x29f   : > { %v8833_v35 = vunpack.i.h.bf16 %v8831_v34  ;;  %v8832_v11 = vunpack.i.l.bf16 %v8831_v34  ;;  %v3631_v21 = vrot.slane %v11608_v61, 4  ;;  %v3519_v44 = vrot.slane %v11625_v39, 4 }
 0x2a0   : > { %v11640_v55 = vsel %vm672_vm6, %v16404_v41, %v11531_v6  ;;  %v11646_v17 = vperm.slane %v3584_v49, %v9951_v16  ;;  %v3472_v46 = vsel %vm672_vm6, %v8822_v58, %v3471_v53  ;;  %9025 = vrot.lane.b32.xlu0 %v9024_v18, %s9770_s8  ;;  %v16406_v40 = vunpack.i.h.bf16 %v11457_v3 }
 0x2a1   : > { %v16407_v54 = vunpack.i.l.bf16 %v11457_v3  ;;  %v3605_v15 = vrot.slane %v8843_v25, 4  ;;  %v3493_v48 = vrot.slane %v8842_v22, 4  ;;  %v16408_v58 = vunpack.i.h.bf16 %v11522_v36 }
 0x2a2   : > { %16405 = vst [vmem:[#allocation39_spill] sm:$0xff] %v11646_v17  ;;  %v3582_v41 = vsel %vm672_vm6, %v3581_v7, %v16406_v40  ;;  %v16409_v18 = vunpack.i.l.bf16 %v11522_v36  ;;  %v11665_v39 = vperm.slane %v3472_v46, %v9951_v16  ;;  %v3607_v7 = vrot.slane %v8833_v35, 4 }
 0x2a3   : > { %v3470_v34 = vsel %vm672_vm6, %v3469_v4, %v16407_v54  ;;  %v3595_v53 = vrot.slane %v16408_v58, 4  ;;  %v3495_v40 = vrot.slane %v8832_v11, 4  ;;  %v16411_v3 = vrot.slane %v16383_v13, 4 }
 0x2a4   : > { %v3483_v61 = vrot.slane %v16409_v18, 4  ;;  %16410 = vst [vmem:[#allocation40_spill] sm:$0xff] %v11665_v39  ;;  %v11672_v54 = vperm.slane %v3582_v41, %v9951_v16  ;;  %v11676_v58 = vperm.slane %v3470_v34, %v9951_v16  ;;  %v3632_v18 = vsel %vm672_vm6, %v11646_v17, %v3631_v21 }
 0x2a5   : > { %v1573_v4 = vsel %vm672_vm6, %v11054_v42, %v16411_v3  ;;  %v3494_v46 = vsel %vm672_vm6, %v3493_v48, %v8832_v11  ;;  %v3496_v49 = vsel %vm672_vm6, %v8842_v22, %v3495_v40  ;;  %v3606_v13 = vsel %vm672_vm6, %v3605_v15, %v8833_v35  ;;  %v11684_v42 = vpop.permute.xlu1 %8850 }
 0x2a6   : > { %v3608_v29 = vsel %vm672_vm6, %v8843_v25, %v3607_v7  ;;  %v11687_v41 = vperm.slane %v1573_v4, %v9997_v57  ;;  %v16412_v3 = vrot.slane %v11105_v43, 4  ;;  %v16413_v21 = vrot.slane %v16387_v33, 4 }
 0x2a7   : > { %v16414_v22 = vrot.slane %v16389_v59, 4  ;;  %v16418_v7 = vrot.slane %v11121_v14, 4  ;;  %v16419_v4 = vrot.slane %v11223_v52, 4  ;;  %v3520_v17 = vsel %vm672_vm6, %v11665_v39, %v3519_v44 }
 0x2a8   : > { %v1597_v34 = vsel %vm672_vm6, %v16385_v32, %v16412_v3  ;;  %v1685_v48 = vsel %vm672_vm6, %v11063_v38, %v16413_v21  ;;  %v16415_v32 = vrot.slane %v11152_v23, 4  ;;  %v11714_v38 = vpop.permute.xlu2 %8855  ;;  %v11761_v6 = vperm.slane %v3496_v49, %v9951_v16 }
 0x2a9   : > { %v1709_v25 = vsel %vm672_vm6, %v16390_v9, %v16414_v22  ;;  %v11702_v15 = vperm.slane %v1597_v34, %v9997_v57  ;;  %v11705_v35 = vperm.slane %v1685_v48, %v9997_v57  ;;  %v16417_v9 = vrot.slane %v11229_v45, 4 }
 0x2aa   : > { %v11708_v43 = vperm.slane %v1709_v25, %v9997_v57  ;;  %v2325_v33 = vsel %vm672_vm6, %v16415_v32, %v11171_v63  ;;  %v2437_v40 = vsel %vm672_vm6, %v16418_v7, %v11181_v26  ;;  %v2461_v3 = vsel %vm672_vm6, %v16419_v4, %v11190_v20  ;;  %v11745_v7 = vpop.permute.xlu0 %8860  ;;  %16423 = vst [vmem:[#allocation45_spill] sm:$0xff] %v11761_v6 }
 0x2ab   : > { %v11717_v59 = vperm.slane %v2325_v33, %v9997_v57  ;;  %v2349_v11 = vsel %vm672_vm6, %v16417_v9, %v11202_v10  ;;  %v1618_v34 = vrot.slane %v11702_v15, 4  ;;  %v11737_v22 = vperm.slane %v2437_v40, %v9997_v57 }
 0x2ac   : > { %v1730_v21 = vrot.slane %v11708_v43, 4  ;;  %v11734_v48 = vperm.slane %v2349_v11, %v9997_v57  ;;  %v11741_v32 = vperm.slane %v2461_v3, %v9997_v57  ;;  %v1614_v33 = vrot.slane %v11554_v19, 4 }
 0x2ad   : > { %16416 = vst [vmem:[#allocation41_spill] sm:$0xff] %v11717_v59  ;;  %v2374_v25 = vrot.slane %v11717_v59, 4  ;;  %v1726_v9 = vrot.slane %v11580_v47, 4  ;;  %v8838_v4 = vunpack.i.h.bf16 %v11575_v56  ;;  %v1619_v11 = vsel %vm672_vm6, %v1618_v34, %v11687_v41 }
 0x2ae   : > { %16420 = vst [vmem:[#allocation42_spill] sm:$0xff] %v11734_v48  ;;  %v1731_v40 = vsel %vm672_vm6, %v1730_v21, %v11705_v35  ;;  %v2486_v8 = vrot.slane %v11737_v22, 4  ;;  %v8837_v59 = vunpack.i.l.bf16 %v11575_v56  ;;  %v1615_v47 = vsel %vm672_vm6, %v1614_v33, %v11551_v24 }
 0x2af   : > { %16421 = vst [vmem:[#allocation43_spill] sm:$0xff] %v11737_v22  ;;  %v9049_v3 = vpack.i.bf16 %v1731_v40, %v1619_v11  ;;  %v2375_v19 = vsel %vm672_vm6, %v11734_v48, %v2374_v25  ;;  %v1727_v21 = vsel %vm672_vm6, %v1726_v9, %v11561_v37  ;;  %v11768_v56 = vperm.slane %v3606_v13, %v9951_v16  ;;  %v11782_v37 = vpop.permute.xlu1 %8865 }
 0x2b0   : > { %16422 = vst [vmem:[#allocation44_spill] sm:$0xff] %v11741_v32  ;;  %v2487_v34 = vsel %vm672_vm6, %v11741_v32, %v2486_v8  ;;  %v11771_v25 = vperm.slane %v3608_v29, %v9951_v16  ;;  %v9039_v33 = vpack.i.bf16 %v1727_v21, %v1615_v47  ;;  %v11777_v11 = vperm.slane %v3632_v18, %v9997_v57  ;;  %v11807_v21 = vpop.permute.xlu2 %8870  ;;  %v16446_v32 = vld [vmem:[#allocation29_spill] sm:$0xff] }
 0x2b1   : > { %9050 = vrot.lane.b32.xlu2 %v9049_v3, %s9775_s13  ;;  %v9059_v24 = vpack.i.bf16 %v2487_v34, %v2375_v19  ;;  %v11780_v8 = vperm.slane %v3494_v46, %v9951_v16  ;;  %v3593_v29 = vrot.slane %v8838_v4, 4  ;;  %v3596_v9 = vsel %vm672_vm6, %v8838_v4, %v3595_v53 }
 0x2b2   : > { %16424 = vst [vmem:[#allocation46_spill] sm:$0xff] %v11771_v25  ;;  %v3484_v40 = vsel %vm672_vm6, %v8837_v59, %v3483_v61  ;;  %9040 = vrot.lane.b32.xlu0 %v9039_v33, %s9772_s10  ;;  %v16426_v3 = vrot.slane %v11632_v62, 4  ;;  %v11796_v46 = vperm.slane %v3520_v17, %v9997_v57  ;;  %v16429_v19 = vrot.slane %v11622_v28, 4 }
 0x2b3   : > { %16425 = vst [vmem:[#allocation47_spill] sm:$0xff] %v11777_v11  ;;  %9060 = vrot.lane.b32.xlu1 %v9059_v24, %s9770_s8  ;;  %v3481_v61 = vrot.slane %v8837_v59, 4  ;;  %v3541_v4 = vrot.slane %v11761_v6, 4  ;;  %v3653_v34 = vrot.slane %v11771_v25, 4  ;;  %v16431_v24 = vrot.slane %v11202_v10, 4 }
 0x2b4   : > { %v11793_v18 = vsel %vm672_vm6, %v11676_v58, %v16426_v3  ;;  %16428 = vst [vmem:[#allocation49_spill] sm:$0xff] %v11796_v46  ;;  %v11802_v53 = vsel %vm672_vm6, %v11672_v54, %v16429_v19  ;;  %v11815_v3 = vperm.slane %v3596_v9, %v9951_v16  ;;  %v11818_v59 = vperm.slane %v3484_v40, %v9951_v16 }
 0x2b5   : > { %16427 = vst [vmem:[#allocation48_spill] sm:$0xff] %v11793_v18  ;;  %v2351_v17 = vsel %vm672_vm6, %v11229_v45, %v16431_v24  ;;  %v16434_v19 = vrot.slane %v11171_v63, 4  ;;  %v16435_v47 = vunpack.i.h.bf16 %v11522_v36  ;;  %v16436_v45 = vrot.slane %v11181_v26, 4  ;;  %v11838_v24 = vpop.permute.xlu0 %8875 }
 0x2b6   : > { %16430 = vst [vmem:[#allocation50_spill] sm:$0xff] %v11802_v53  ;;  %v11828_v44 = vperm.slane %v2351_v17, %v9997_v57  ;;  %v16437_v40 = vrot.slane %v11190_v20, 4 }
 0x2b7   : > { %16432 = vst [vmem:[#allocation51_spill] sm:$0xff] %v11815_v3  ;;  %v2327_v49 = vsel %vm672_vm6, %v11152_v23, %v16434_v19  ;;  %v3594_v10 = vsel %vm672_vm6, %v3593_v29, %v16435_v47  ;;  %v2439_v9 = vsel %vm672_vm6, %v11121_v14, %v16436_v45  ;;  %v16438_v23 = vunpack.i.l.bf16 %v11522_v36  ;;  %v16441_v36 = vld [vmem:[#allocation27_spill] sm:$0xff]  ;;  %v16443_v47 = vld [vmem:[#allocation20_spill] sm:$0xff]  ;;  %v11883_v46 = vpop.permute.xlu1 %8880 }
 0x2b8   : > { %16433 = vst [vmem:[#allocation52_spill] sm:$0xff] %v11818_v59  ;;  %v2463_v63 = vsel %vm672_vm6, %v11223_v52, %v16437_v40  ;;  %v11849_v14 = vperm.slane %v2327_v49, %v9997_v57  ;;  %v2376_v20 = vrot.slane %v11828_v44, 4  ;;  %v16439_v52 = vld [vmem:[#allocation23_spill] sm:$0xff] }
 0x2b9   : > { %v3482_v19 = vsel %vm672_vm6, %v3481_v61, %v16438_v23  ;;  %v11846_v26 = vperm.slane %v2463_v63, %v9997_v57  ;;  %v16440_v17 = vrot.slane %v16439_v52, 4  ;;  %v16442_v61 = vrot.slane %v11305_v0, 4 }
 0x2ba   : > { %v11861_v23 = vperm.slane %v3594_v10, %v9951_v16  ;;  %v11864_v63 = vperm.slane %v2439_v9, %v9997_v57  ;;  %v2377_v13 = vsel %vm672_vm6, %v2376_v20, %v11849_v14  ;;  %v1620_v9 = vrot.slane %v11687_v41, 4 }
 0x2bb   : > { %v2337_v45 = vsel %vm672_vm6, %v16440_v17, %v11174_v27  ;;  %v2361_v40 = vsel %vm672_vm6, %v16442_v61, %v16441_v36  ;;  %v2488_v49 = vrot.slane %v11846_v26, 4  ;;  %v16444_v17 = vld [vmem:[#allocation21_spill] sm:$0xff]  ;;  %v16447_v61 = vrot.slane %v11288_v1, 4 }
 0x2bc   : > { %v2367_v33 = vperm.slane %v2361_v40, %v9997_v57  ;;  %v16445_v29 = vrot.slane %v16444_v17, 4  ;;  %v2343_v40 = vperm.slane %v2337_v45, %v9997_v57  ;;  %v1621_v6 = vsel %vm672_vm6, %v11702_v15, %v1620_v9 }
 0x2bd   : > { %v2473_v10 = vsel %vm672_vm6, %v16447_v61, %v16446_v32  ;;  %v2489_v48 = vsel %vm672_vm6, %v2488_v49, %v11864_v63  ;;  %v1732_v61 = vrot.slane %v11705_v35, 4  ;;  %v3542_v41 = vsel %vm672_vm6, %v3541_v4, %v11818_v59  ;;  %v11901_v35 = vpop.permute.xlu2 %8895 }
 0x2be   : > { %v2449_v22 = vsel %vm672_vm6, %v16445_v29, %v16443_v47  ;;  %v2380_v11 = vrot.slane %v2367_v33, 4  ;;  %v2479_v20 = vperm.slane %v2473_v10, %v9997_v57  ;;  %v9064_v29 = vpack.i.bf16 %v2489_v48, %v2377_v13  ;;  %v11912_v48 = vpop.permute.xlu0 %8885 }
 0x2bf   : > { %v2455_v45 = vperm.slane %v2449_v22, %v9997_v57  ;;  %v11894_v10 = vperm.slane %v3482_v19, %v9951_v16  ;;  %v1733_v15 = vsel %vm672_vm6, %v11708_v43, %v1732_v61  ;;  %v8848_v13 = vunpack.i.h.bf16 %v11650_v31 }
 0x2c0   : > { %v2381_v49 = vsel %vm672_vm6, %v2380_v11, %v2343_v40  ;;  %v2492_v53 = vrot.slane %v2479_v20, 4  ;;  %9065 = vrot.lane.b32.xlu2 %v9064_v29, %s9769_s7  ;;  %v8847_v11 = vunpack.i.l.bf16 %v11650_v31  ;;  %v9054_v4 = vpack.i.bf16 %v1733_v15, %v1621_v6 }
 0x2c1   : > { %v11908_v9 = vperm.slane %v3542_v41, %v9997_v57  ;;  %v3654_v29 = vsel %vm672_vm6, %v3653_v34, %v11815_v3  ;;  %v16449_v61 = vunpack.i.h.bf16 %v11714_v38  ;;  %v16450_v31 = vunpack.i.l.bf16 %v11714_v38 }
 0x2c2   : > { %v2493_v22 = vsel %vm672_vm6, %v2492_v53, %v2455_v45  ;;  %9055 = vrot.lane.b32.xlu0 %v9054_v4, %s9774_s12  ;;  %v8863_v6 = vunpack.i.h.bf16 %v11745_v7  ;;  %v16451_v15 = vunpack.i.h.bf16 %v11684_v42  ;;  %v2382_v19 = vrot.slane %v2343_v40, 4 }
 0x2c3   : > { %16448 = vst [vmem:[#allocation23_spill] sm:$0xff] %v11908_v9  ;;  %v9074_v25 = vpack.i.bf16 %v2493_v22, %v2381_v49  ;;  %v3984_v18 = vrot.slane %v16449_v61, 4  ;;  %v3872_v53 = vrot.slane %v16450_v31, 4  ;;  %v16452_v49 = vunpack.i.l.bf16 %v11684_v42 }
 0x2c4   : > { %v3998_v34 = vrot.slane %v16451_v15, 4  ;;  %v3986_v43 = vrot.slane %v8848_v13, 4  ;;  %v3874_v3 = vrot.slane %v8847_v11, 4  ;;  %v2494_v31 = vrot.slane %v2455_v45, 4 }
 0x2c5   : > { %v3886_v22 = vrot.slane %v16452_v49, 4  ;;  %9075 = vrot.lane.b32.xlu1 %v9074_v25, %s9772_s10  ;;  %v3873_v61 = vsel %vm672_vm6, %v3872_v53, %v8847_v11  ;;  %v3985_v4 = vsel %vm672_vm6, %v3984_v18, %v8848_v13  ;;  %v2378_v59 = vrot.slane %v11849_v14, 4  ;;  %v11938_v11 = vpop.permute.xlu1 %8890 }
 0x2c6   : > { %v8862_v41 = vunpack.i.l.bf16 %v11745_v7  ;;  %v2383_v9 = vsel %vm672_vm6, %v2367_v33, %v2382_v19  ;;  %v2490_v15 = vrot.slane %v11864_v63, 4  ;;  %v3996_v39 = vrot.slane %v8863_v6, 4 }
 0x2c7   : > { %v2495_v49 = vsel %vm672_vm6, %v2479_v20, %v2494_v31  ;;  %v16453_v25 = vrot.slane %v11174_v27, 4  ;;  %v16454_v7 = vrot.slane %v16441_v36, 4  ;;  %v16455_v14 = vrot.slane %v16443_v47, 4 }
 0x2c8   : > { %v9079_v45 = vpack.i.bf16 %v2495_v49, %v2383_v9  ;;  %v16456_v20 = vrot.slane %v16446_v32, 4  ;;  %v2379_v36 = vsel %vm672_vm6, %v11828_v44, %v2378_v59  ;;  %v2491_v19 = vsel %vm672_vm6, %v11846_v26, %v2490_v15  ;;  %v11970_v9 = vpop.permute.xlu2 %8910  ;;  %v11975_v59 = vpop.permute.xlu0 %8900 }
 0x2c9   : > { %v2339_v40 = vsel %vm672_vm6, %v16439_v52, %v16453_v25  ;;  %v2363_v33 = vsel %vm672_vm6, %v11305_v0, %v16454_v7  ;;  %v2451_v63 = vsel %vm672_vm6, %v16444_v17, %v16455_v14  ;;  %v3884_v0 = vrot.slane %v8862_v41, 4 }
 0x2ca   : > { %v11941_v18 = vperm.slane %v2339_v40, %v9997_v57  ;;  %v11952_v27 = vperm.slane %v2363_v33, %v9997_v57  ;;  %v11955_v52 = vperm.slane %v2451_v63, %v9997_v57  ;;  %v2475_v13 = vsel %vm672_vm6, %v11288_v1, %v16456_v20  ;;  %9080 = vrot.lane.b32.xlu2 %v9079_v45, %s9771_s9 }
 0x2cb   : > { %v11966_v17 = vperm.slane %v2475_v13, %v9997_v57  ;;  %v8873_v32 = vunpack.i.h.bf16 %v11807_v21  ;;  %v16085_v1 = vunpack.i.l.bf16 %v11807_v21  ;;  %v9069_v44 = vpack.i.bf16 %v2491_v19, %v2379_v36 }
 0x2cc   : > { %v2386_v47 = vrot.slane %v11941_v18, 4  ;;  %v2498_v53 = vrot.slane %v11955_v52, 4  ;;  %v11978_v31 = vperm.slane %v3873_v61, %v9951_v16  ;;  %v3999_v49 = vsel %vm672_vm6, %v8863_v6, %v3998_v34 }
 0x2cd   : > { %v3887_v25 = vsel %vm672_vm6, %v8862_v41, %v3886_v22  ;;  %v16457_v15 = vunpack.i.l.bf16 %v11714_v38  ;;  %v11988_v45 = vperm.slane %v3985_v4, %v9951_v16  ;;  %v16458_v7 = vunpack.i.h.bf16 %v11684_v42  ;;  %9070 = vrot.lane.b32.xlu0 %v9069_v44, %s9773_s11  ;;  %v12030_v19 = vpop.permute.xlu1 %8905 }
 0x2ce   : > { %v2387_v26 = vsel %vm672_vm6, %v11952_v27, %v2386_v47  ;;  %v2499_v61 = vsel %vm672_vm6, %v11966_v17, %v2498_v53  ;;  %v16459_v6 = vunpack.i.h.bf16 %v11714_v38  ;;  %v16084_v34 = vunpack.i.h.bf16 %v11782_v37 }
 0x2cf   : > { %v3875_v40 = vsel %vm672_vm6, %v16457_v15, %v3874_v3  ;;  %v3997_v33 = vsel %vm672_vm6, %v3996_v39, %v16458_v7  ;;  %v16460_v3 = vunpack.i.l.bf16 %v11684_v42  ;;  %v9089_v4 = vpack.i.bf16 %v2499_v61, %v2387_v26  ;;  %v16470_v7 = vld [vmem:[#allocation34_spill] sm:$0xff] }
 0x2d0   : > { %v3987_v41 = vsel %vm672_vm6, %v16459_v6, %v3986_v43  ;;  %v12004_v14 = vperm.slane %v3654_v29, %v9997_v57  ;;  %v16083_v39 = vunpack.i.l.bf16 %v11782_v37  ;;  %v12008_v63 = vperm.slane %v3999_v49, %v9951_v16 }
 0x2d1   : > { %v3885_v22 = vsel %vm672_vm6, %v3884_v0, %v16460_v3  ;;  %v12011_v20 = vperm.slane %v3887_v25, %v9951_v16  ;;  %v4022_v38 = vrot.slane %v8873_v32, 4  ;;  %v3910_v43 = vrot.slane %v16085_v1, 4  ;;  %9090 = vrot.lane.b32.xlu1 %v9089_v4, %s9774_s12 }
 0x2d2   : > { %16461 = vst [vmem:[#allocation27_spill] sm:$0xff] %v12008_v63  ;;  %v12016_v42 = vperm.slane %v3997_v33, %v9951_v16  ;;  %v8883_v29 = vunpack.i.h.bf16 %v11883_v46  ;;  %v12021_v13 = vperm.slane %v3875_v40, %v9951_v16  ;;  %v3922_v36 = vrot.slane %v11978_v31, 4  ;;  %v12061_v40 = vpop.permute.xlu0 %8915 }
 0x2d3   : > { %16462 = vst [vmem:[#allocation20_spill] sm:$0xff] %v12011_v20  ;;  %v12025_v0 = vperm.slane %v3987_v41, %v9951_v16  ;;  %v12028_v47 = vperm.slane %v3885_v22, %v9951_v16  ;;  %v4034_v53 = vrot.slane %v11988_v45, 4  ;;  %v12035_v44 = vrot.slane %v16084_v34, 4 }
 0x2d4   : > { %v8882_v25 = vunpack.i.l.bf16 %v11883_v46  ;;  %v12041_v26 = vrot.slane %v16083_v39, 4  ;;  %v4020_v6 = vrot.slane %v8883_v29, 4  ;;  %v4023_v41 = vsel %vm672_vm6, %v8883_v29, %v4022_v38  ;;  %v12052_v46 = vpop.permute.xlu2 %8925  ;;  %v16465_v39 = vld [vmem:[#allocation32_spill] sm:$0xff] }
 0x2d5   : > { %16463 = vst [vmem:[#allocation21_spill] sm:$0xff] %v12025_v0  ;;  %v12049_v61 = vsel %vm672_vm6, %v12016_v42, %v4034_v53  ;;  %v12057_v22 = vsel %vm672_vm6, %v12028_v47, %v3922_v36  ;;  %v2384_v4 = vrot.slane %v11952_v27, 4  ;;  %v2496_v15 = vrot.slane %v11966_v17, 4  ;;  %v16468_v17 = vld [vmem:[#allocation33_spill] sm:$0xff] }
 0x2d6   : > { %16464 = vst [vmem:[#allocation29_spill] sm:$0xff] %v12052_v46  ;;  %v3908_v33 = vrot.slane %v8882_v25, 4  ;;  %v3911_v53 = vsel %vm672_vm6, %v8882_v25, %v3910_v43  ;;  %v16466_v34 = vrot.slane %v16465_v39, 4  ;;  %v16467_v29 = vrot.slane %v11514_v60, 4 }
 0x2d7   : > { %v12073_v3 = vperm.slane %v4023_v41, %v9951_v16  ;;  %v16469_v49 = vrot.slane %v16468_v17, 4  ;;  %v16471_v25 = vrot.slane %v11501_v5, 4  ;;  %v4021_v1 = vsel %vm672_vm6, %v4020_v6, %v8873_v32 }
 0x2d8   : > { %v2742_v38 = vsel %vm672_vm6, %v11390_v2, %v16466_v34  ;;  %v2766_v36 = vsel %vm672_vm6, %v11491_v30, %v16467_v29  ;;  %v16472_v41 = vrot.slane %v11390_v2, 4  ;;  %v16476_v2 = vrot.slane %v16470_v7, 4 }
 0x2d9   : > { %v2774_v27 = vperm.slane %v2766_v36, %v9997_v57  ;;  %v2854_v43 = vsel %vm672_vm6, %v16470_v7, %v16469_v49  ;;  %v2878_v34 = vsel %vm672_vm6, %v11431_v12, %v16471_v25  ;;  %v16473_v36 = vrot.slane %v11491_v30, 4 }
 0x2da   : > { %v2886_v46 = vperm.slane %v2878_v34, %v9997_v57  ;;  %v2740_v29 = vsel %vm672_vm6, %v16472_v41, %v16465_v39  ;;  %v2750_v49 = vperm.slane %v2742_v38, %v9997_v57  ;;  %v2862_v6 = vperm.slane %v2854_v43, %v9997_v57  ;;  %v12118_v41 = vpop.permute.xlu1 %8920 }
 0x2db   : > { %v2764_v63 = vsel %vm672_vm6, %v16473_v36, %v11514_v60  ;;  %v2791_v20 = vrot.slane %v2774_v27, 4  ;;  %v12096_v0 = vperm.slane %v2740_v29, %v9997_v57  ;;  %v2852_v39 = vsel %vm672_vm6, %v16476_v2, %v16468_v17 }
 0x2dc   : > { %v12099_v32 = vperm.slane %v2764_v63, %v9997_v57  ;;  %v2903_v25 = vrot.slane %v2886_v46, 4  ;;  %v16477_v30 = vrot.slane %v11431_v12, 4  ;;  %v12113_v63 = vperm.slane %v2852_v39, %v9997_v57 }
 0x2dd   : > { %16474 = vst [vmem:[#allocation32_spill] sm:$0xff] %v12096_v0  ;;  %v2792_v38 = vsel %vm672_vm6, %v2791_v20, %v2750_v49  ;;  %v2789_v34 = vrot.slane %v12096_v0, 4  ;;  %v16480_v7 = vunpack.i.l.bf16 %v11807_v21  ;;  %v2497_v20 = vsel %vm672_vm6, %v2496_v15, %v11955_v52 }
 0x2de   : > { %16475 = vst [vmem:[#allocation33_spill] sm:$0xff] %v12099_v32  ;;  %v2876_v60 = vsel %vm672_vm6, %v16477_v30, %v11501_v5  ;;  %v2904_v12 = vsel %vm672_vm6, %v2903_v25, %v2862_v6  ;;  %v2385_v5 = vsel %vm672_vm6, %v2384_v4, %v11941_v18  ;;  %v2901_v2 = vrot.slane %v12113_v63, 4  ;;  %v12139_v4 = vpop.permute.xlu2 %8940 }
 0x2df   : > { %16478 = vst [vmem:[#allocation34_spill] sm:$0xff] %v12113_v63  ;;  %v12116_v43 = vperm.slane %v2876_v60, %v9997_v57  ;;  %v3909_v17 = vsel %vm672_vm6, %v3908_v33, %v16480_v7  ;;  %v9099_v29 = vpack.i.bf16 %v2904_v12, %v2792_v38  ;;  %v2790_v36 = vsel %vm672_vm6, %v12099_v32, %v2789_v34  ;;  %v16503_v32 = vld [vmem:[#allocation17_spill] sm:$0xff] }
 0x2e0   : > { %v9084_v39 = vpack.i.bf16 %v2497_v20, %v2385_v5  ;;  %v12132_v30 = vperm.slane %v3911_v53, %v9951_v16  ;;  %v12135_v21 = vperm.slane %v4021_v1, %v9951_v16  ;;  %v8878_v33 = vunpack.i.h.bf16 %v11838_v24  ;;  %v12149_v53 = vpop.permute.xlu0 %8930 }
 0x2e1   : > { %16479 = vst [vmem:[#allocation53_spill] sm:$0xff] %v12116_v43  ;;  %v12142_v52 = vperm.slane %v3909_v17, %v9951_v16  ;;  %v2793_v15 = vrot.slane %v2750_v49, 4  ;;  %9100 = vrot.lane.b32.xlu2 %v9099_v29, %s9769_s7  ;;  %v2902_v25 = vsel %vm672_vm6, %v12116_v43, %v2901_v2  ;;  %v8888_v1 = vunpack.i.h.bf16 %v11912_v48  ;;  %v16481_v17 = vld [vmem:[#allocation35_spill] sm:$0xff] }
 0x2e2   : > { %9085 = vrot.lane.b32.xlu0 %v9084_v39, %s9775_s13  ;;  %v9094_v60 = vpack.i.bf16 %v2902_v25, %v2790_v36  ;;  %v8887_v38 = vunpack.i.l.bf16 %v11912_v48  ;;  %v2758_v34 = vperm.slane %v11488_v50, %v9997_v57  ;;  %v2782_v49 = vperm.slane %v11640_v55, %v9997_v57  ;;  %v16482_v39 = vld [vmem:[#allocation11_spill] sm:$0xff] }
 0x2e3   : > { %v2905_v7 = vrot.slane %v2862_v6, 4  ;;  %v2870_v12 = vperm.slane %v16481_v17, %v9997_v57  ;;  %v2894_v5 = vperm.slane %v11527_v51, %v9997_v57  ;;  %v8893_v20 = vunpack.i.h.bf16 %v11938_v11  ;;  %v16483_v17 = vld [vmem:[#allocation9_spill] sm:$0xff] }
 0x2e4   : > { %9095 = vrot.lane.b32.xlu1 %v9094_v60, %s9770_s8  ;;  %v2797_v29 = vrot.slane %v2758_v34, 4  ;;  %v2795_v48 = vrot.slane %v2782_v49, 4  ;;  %v2794_v36 = vsel %vm672_vm6, %v2774_v27, %v2793_v15  ;;  %v8892_v50 = vunpack.i.l.bf16 %v11938_v11  ;;  %v12173_v15 = vpop.permute.xlu1 %8935 }
 0x2e5   : > { %v2909_v2 = vrot.slane %v2870_v12, 4  ;;  %v2907_v55 = vrot.slane %v2894_v5, 4  ;;  %v2906_v6 = vsel %vm672_vm6, %v2886_v46, %v2905_v7  ;;  %v966_v25 = vsel %vm952_vm8, %v16482_v39, %v8888_v1 }
 0x2e6   : > { %v953_v51 = vsel %vm952_vm8, %v16483_v17, %v8887_v38  ;;  %v2798_v60 = vsel %vm672_vm6, %v2782_v49, %v2797_v29  ;;  %v2796_v63 = vsel %vm672_vm6, %v2795_v48, %v2758_v34  ;;  %v9104_v11 = vpack.i.bf16 %v2906_v6, %v2794_v36  ;;  %v16489_v17 = vld [vmem:[#allocation16_spill] sm:$0xff] }
 0x2e7   : > { %v2910_v18 = vsel %vm672_vm6, %v2894_v5, %v2909_v2  ;;  %v2908_v27 = vsel %vm672_vm6, %v2907_v55, %v2870_v12  ;;  %v12175_v0 = vrot.slane %v8878_v33, 4  ;;  %v12179_v46 = vsel %vm672_vm6, %v8878_v33, %v12035_v44 }
 0x2e8   : > { %v16484_v1 = vunpack.i.l.bf16 %v11838_v24  ;;  %v9114_v49 = vpack.i.bf16 %v2910_v18, %v2798_v60  ;;  %v967_v12 = vsel %vm954_vm9, %v966_v25, %v8893_v20  ;;  %v955_v5 = vsel %vm954_vm9, %v953_v51, %v8892_v50  ;;  %v12190_v29 = vpop.permute.xlu0 %8945  ;;  %v12202_v50 = vpop.permute.xlu2 %8955  ;;  %v16491_v60 = vld [vmem:[#allocation6_spill] sm:$0xff] }
 0x2e9   : > { %v9109_v44 = vpack.i.bf16 %v2908_v27, %v2796_v63  ;;  %v16485_v18 = vrot.slane %v11676_v58, 4  ;;  %v16486_v36 = vrot.slane %v11780_v8, 4  ;;  %v16487_v63 = vrot.slane %v11672_v54, 4 }
 0x2ea   : > { %v12183_v38 = vrot.slane %v16484_v1, 4  ;;  %9105 = vrot.lane.b32.xlu0 %v9104_v11, %s9773_s11  ;;  %9115 = vrot.lane.b32.xlu2 %v9114_v49, %s9771_s9  ;;  %v16490_v51 = vrot.slane %v16489_v17, 4  ;;  %v16492_v11 = vld [vmem:[#allocation37_spill] sm:$0xff]  ;;  %v16493_v49 = vld [vmem:[#allocation28_spill] sm:$0xff] }
 0x2eb   : > { %v3506_v48 = vsel %vm672_vm6, %v16485_v18, %v11632_v62  ;;  %v3530_v20 = vsel %vm672_vm6, %v16486_v36, %v11894_v10  ;;  %v3618_v58 = vsel %vm672_vm6, %v16487_v63, %v11622_v28  ;;  %v16488_v62 = vrot.slane %v11768_v56, 4  ;;  %v16495_v18 = vld [vmem:[#allocation38_spill] sm:$0xff] }
 0x2ec   : > { %v12205_v2 = vperm.slane %v3506_v48, %v9997_v57  ;;  %v12208_v55 = vperm.slane %v3530_v20, %v9997_v57  ;;  %9110 = vrot.lane.b32.xlu1 %v9109_v44, %s9772_s10  ;;  %v12220_v39 = vperm.slane %v3618_v58, %v9997_v57  ;;  %v2778_v54 = vsel %vm672_vm6, %v16491_v60, %v16490_v51  ;;  %v16496_v58 = vld [vmem:[#allocation36_spill] sm:$0xff] }
 0x2ed   : > { %v3642_v6 = vsel %vm672_vm6, %v16488_v62, %v11861_v23  ;;  %v2786_v27 = vperm.slane %v2778_v54, %v9997_v57  ;;  %v2801_v1 = vrot.slane %v16492_v11, 4  ;;  %v16494_v44 = vrot.slane %v16493_v49, 4 }
 0x2ee   : > { %v12223_v25 = vperm.slane %v3642_v6, %v9997_v57  ;;  %v3555_v28 = vrot.slane %v12205_v2, 4  ;;  %v8902_v36 = vunpack.i.l.bf16 %v11975_v59  ;;  %v3667_v20 = vrot.slane %v12220_v39, 4 }
 0x2ef   : > { %v2890_v48 = vsel %vm672_vm6, %v16495_v18, %v16494_v44  ;;  %v2913_v62 = vrot.slane %v16496_v58, 4  ;;  %v2802_v17 = vsel %vm672_vm6, %v2786_v27, %v2801_v1  ;;  %v2799_v51 = vrot.slane %v2786_v27, 4  ;;  %v12253_v1 = vpop.permute.xlu1 %8950 }
 0x2f0   : > { %v2898_v63 = vperm.slane %v2890_v48, %v9997_v57  ;;  %v3556_v6 = vsel %vm672_vm6, %v12208_v55, %v3555_v28  ;;  %v8903_v60 = vunpack.i.h.bf16 %v11975_v59  ;;  %v3668_v54 = vsel %vm672_vm6, %v12223_v25, %v3667_v20  ;;  %v12255_v27 = vpop.permute.xlu0 %8960 }
 0x2f1   : > { %v8907_v18 = vunpack.i.l.bf16 %v12030_v19  ;;  %v16497_v48 = vunpack.i.l.bf16 %v11901_v35  ;;  %v9129_v33 = vpack.i.bf16 %v3668_v54, %v3556_v6  ;;  %v2800_v28 = vsel %vm672_vm6, %v2799_v51, %v16492_v11  ;;  %v16499_v6 = vld [vmem:[#allocation15_spill] sm:$0xff]  ;;  %v16500_v54 = vld [vmem:[#allocation40_spill] sm:$0xff] }
 0x2f2   : > { %v2914_v49 = vsel %vm672_vm6, %v2898_v63, %v2913_v62  ;;  %v2911_v44 = vrot.slane %v2898_v63, 4  ;;  %v16498_v20 = vunpack.i.h.bf16 %v11901_v35  ;;  %v16501_v11 = vrot.slane %v16500_v54, 4 }
 0x2f3   : > { %v957_v7 = vsel %vm956_vm10, %v955_v5, %v16497_v48  ;;  %v9124_v62 = vpack.i.bf16 %v2914_v49, %v2802_v17  ;;  %9130 = vrot.lane.b32.xlu2 %v9129_v33, %s9770_s8  ;;  %v16502_v48 = vld [vmem:[#allocation23_spill] sm:$0xff]  ;;  %v12282_v17 = vpop.permute.xlu2 %8970  ;;  %v3673_v49 = vrot.slane %v12004_v14, 4 }
 0x2f4   : > { %v959_v59 = vsel %vm958_vm11, %v957_v7, %v8902_v36  ;;  %v968_v63 = vsel %vm956_vm10, %v967_v12, %v16498_v20  ;;  %v2912_v34 = vsel %vm672_vm6, %v2911_v44, %v16496_v58  ;;  %v3518_v51 = vsel %vm672_vm6, %v16501_v11, %v16499_v6  ;;  %v16504_v7 = vld [vmem:[#allocation39_spill] sm:$0xff]  ;;  %v16508_v20 = vld [vmem:[#allocation50_spill] sm:$0xff] }
 0x2f5   : > { %v9119_v5 = vpack.i.bf16 %v2912_v34, %v2800_v28  ;;  %v3561_v43 = vrot.slane %v16502_v48, 4  ;;  %v16505_v36 = vrot.slane %v16504_v7, 4  ;;  %v969_v12 = vsel %vm958_vm11, %v968_v63, %v8903_v60  ;;  %9125 = vrot.lane.b32.xlu1 %v9124_v62, %s9774_s12 }
 0x2f6   : > { %v8917_v58 = vunpack.i.l.bf16 %v12061_v40  ;;  %v12277_v34 = vperm.slane %v3518_v51, %v9997_v57  ;;  %v16507_v60 = vrot.slane %v11894_v10, 4  ;;  %v3628_v63 = vperm.slane %v16508_v20, %v9997_v57 }
 0x2f7   : > { %v3630_v35 = vsel %vm672_vm6, %v16505_v36, %v16503_v32  ;;  %9120 = vrot.lane.b32.xlu0 %v9119_v5, %s9775_s13  ;;  %v16506_v32 = vld [vmem:[#allocation48_spill] sm:$0xff]  ;;  %v16509_v5 = vrot.slane %v11861_v23, 4  ;;  %v8918_v7 = vunpack.i.h.bf16 %v12061_v40 }
 0x2f8   : > { %v12280_v33 = vperm.slane %v3630_v35, %v9997_v57  ;;  %v3516_v44 = vperm.slane %v16506_v32, %v9997_v57  ;;  %v3532_v28 = vsel %vm672_vm6, %v11780_v8, %v16507_v60  ;;  %v3562_v62 = vsel %vm672_vm6, %v3561_v43, %v12277_v34 }
 0x2f9   : > { %v3540_v6 = vperm.slane %v3532_v28, %v9997_v57  ;;  %v3644_v54 = vsel %vm672_vm6, %v11768_v56, %v16509_v5  ;;  %v3671_v51 = vrot.slane %v3628_v63, 4  ;;  %v961_v43 = vsel %vm960_vm12, %v959_v59, %v8907_v18  ;;  %v12312_v5 = vpop.permute.xlu0 %8975 }
 0x2fa   : > { %v3674_v10 = vsel %vm672_vm6, %v3673_v49, %v12280_v33  ;;  %v3559_v11 = vrot.slane %v3516_v44, 4  ;;  %v3652_v8 = vperm.slane %v3644_v54, %v9997_v57  ;;  %v16510_v49 = vunpack.i.l.bf16 %v11970_v9 }
 0x2fb   : > { %v3557_v36 = vrot.slane %v3540_v6, 4  ;;  %v9144_v35 = vpack.i.bf16 %v3674_v10, %v3562_v62  ;;  %v16511_v59 = vunpack.i.h.bf16 %v12030_v19  ;;  %v4068_v19 = vrot.slane %v12073_v3, 4 }
 0x2fc   : > { %v3560_v23 = vsel %vm672_vm6, %v3540_v6, %v3559_v11  ;;  %v3672_v32 = vsel %vm672_vm6, %v3652_v8, %v3671_v51  ;;  %v3669_v56 = vrot.slane %v3652_v8, 4  ;;  %v963_v20 = vsel %vm962_vm13, %v961_v43, %v16510_v49  ;;  %v12320_v6 = vpop.permute.xlu1 %8965 }
 0x2fd   : > { %v9139_v60 = vpack.i.bf16 %v3672_v32, %v3560_v23  ;;  %v3558_v28 = vsel %vm672_vm6, %v3557_v36, %v3516_v44  ;;  %9145 = vrot.lane.b32.xlu2 %v9144_v35, %s9772_s10  ;;  %v965_v18 = vsel %vm964_vm14, %v963_v20, %v8917_v58  ;;  %v970_v62 = vsel %vm960_vm12, %v969_v12, %v16511_v59  ;;  %v12344_v23 = vpop.permute.xlu2 %8985  ;;  %v16518_v20 = vld [vmem:[#allocation45_spill] sm:$0xff] }
 0x2fe   : > { %v3670_v40 = vsel %vm672_vm6, %v3669_v56, %v3628_v63  ;;  %v16512_v44 = vunpack.i.h.bf16 %v11782_v37  ;;  %v974_v11 = vpack.c.bf16 %v965_v18, %v965_v18  ;;  %v16513_v63 = vunpack.i.h.bf16 %v11970_v9  ;;  %v16519_v18 = vld [vmem:[#allocation51_spill] sm:$0xff] }
 0x2ff   : > { %9140 = vrot.lane.b32.xlu1 %v9139_v60, %s9773_s11  ;;  %v9134_v10 = vpack.i.bf16 %v3670_v40, %v3558_v28  ;;  %v3956_v8 = vrot.slane %v12132_v30, 4  ;;  %v16514_v12 = vunpack.i.l.bf16 %v11782_v37  ;;  %v12340_v43 = vperm.slane %v12179_v46, %v9951_v16  ;;  %v973_v46 = vld [vmem:[%s15971_s1] sm:$0xf] }
 0x300   : > { %v4009_v54 = vsel %vm672_vm6, %v12175_v0, %v16512_v44  ;;  %v971_v58 = vsel %vm962_vm13, %v970_v62, %v16513_v63  ;;  %v4056_v0 = vrot.slane %v12135_v21, 4  ;;  %v982_v9 = vsel %vm16098_vm15, %v974_v11, 0  ;;  %v16516_v28 = vld [vmem:[#allocation52_spill] sm:$0xff]  ;;  %v16522_v44 = vld [vmem:[#allocation49_spill] sm:$0xff]  ;;  %v16523_v11 = vld [vmem:[#allocation47_spill] sm:$0xff] }
 0x301   : > { %v3897_v51 = vsel %vm672_vm6, %v12183_v38, %v16514_v12  ;;  %v972_v36 = vsel %vm964_vm14, %v971_v58, %v8918_v7  ;;  %9135 = vrot.lane.b32.xlu0 %v9134_v10, %s9769_s7  ;;  %v3944_v37 = vrot.slane %v12142_v52, 4  ;;  %v4015_v32 = vperm.slane %v4009_v54, %v9951_v16  ;;  %994 = vmatpush.bf16.msra.mxu0 %v982_v9 }
 0x302   : > { %v975_v35 = vpack.c.bf16 %v972_v36, %v972_v36  ;;  %v16515_v38 = vunpack.i.l.bf16 %v11838_v24  ;;  %v3903_v56 = vperm.slane %v3897_v51, %v9951_v16  ;;  %v16517_v49 = vrot.slane %v16516_v28, 4  ;;  %v16521_v24 = vld [vmem:[#allocation46_spill] sm:$0xff] }
 0x303   : > { %v16520_v59 = vrot.slane %v16519_v18, 4  ;;  %v3567_v54 = vrot.slane %v16522_v44, 4  ;;  %v3679_v63 = vrot.slane %v16523_v11, 4  ;;  %v4070_v58 = vrot.slane %v12340_v43, 4 }
 0x304   : > { %v3899_v7 = vsel %vm672_vm6, %v16515_v38, %v12041_v26  ;;  %v985_v60 = vsel %vm16098_vm15, %v975_v35, 0  ;;  %v3544_v40 = vsel %vm672_vm6, %v16518_v20, %v16517_v49  ;;  %8485 = vmatmul.msk.bf16.vlgmr.msra.gmra.mxu0 %vm16097_vm5, %v973_v46  ;;  %v3563_v51 = vrot.slane %v12277_v34, 4 }
 0x305   : > { %v3656_v26 = vsel %vm672_vm6, %v16521_v24, %v16520_v59  ;;  %1007 = vmatpush.bf16.msra.mxu1 %v985_v60  ;;  %v3552_v62 = vperm.slane %v3544_v40, %v9997_v57  ;;  %v12371_v12 = vperm.slane %v3899_v7, %v9951_v16  ;;  %v3675_v36 = vrot.slane %v12280_v33, 4  ;;  %v12383_v40 = vpop.permute.xlu0 %8990  ;;  %v12389_v24 = vpop.permute.xlu1 %8980 }
 0x306   : > { %v3664_v10 = vperm.slane %v3656_v26, %v9997_v57  ;;  %v3946_v28 = vrot.slane %v3903_v56, 4  ;;  %v3564_v7 = vsel %vm672_vm6, %v16502_v48, %v3563_v51  ;;  %v4058_v34 = vrot.slane %v4015_v32, 4 }
 0x307   : > { %v3568_v9 = vsel %vm672_vm6, %v3552_v62, %v3567_v54  ;;  %v3565_v38 = vrot.slane %v3552_v62, 4  ;;  %v3676_v20 = vsel %vm672_vm6, %v12004_v14, %v3675_v36  ;;  %v16524_v14 = vrot.slane %v12028_v47, 4 }
 0x308   : > { %v3680_v35 = vsel %vm672_vm6, %v3664_v10, %v3679_v63  ;;  %v3677_v60 = vrot.slane %v3664_v10, 4  ;;  %8486 = vmatmul.msk.bf16.vlgmr.msra.gmra.mxu1 %vm16097_vm5, %v973_v46  ;;  %v9149_v59 = vpack.i.bf16 %v3676_v20, %v3564_v7  ;;  %v3957_v46 = vsel %vm672_vm6, %v3956_v8, %v12371_v12  ;;  %v12422_v63 = vpop.permute.xlu2 %9000 }
 0x309   : > { %v9159_v49 = vpack.i.bf16 %v3680_v35, %v3568_v9  ;;  %v3566_v33 = vsel %vm672_vm6, %v3565_v38, %v16522_v44  ;;  %v3921_v26 = vsel %vm672_vm6, %v16524_v14, %v11978_v31  ;;  %v3945_v62 = vsel %vm672_vm6, %v3944_v37, %v3903_v56  ;;  %v16527_v14 = vld [vmem:[#allocation21_spill] sm:$0xff] }
 0x30a   : > { %v3678_v18 = vsel %vm672_vm6, %v3677_v60, %v16523_v11  ;;  %9150 = vrot.lane.b32.xlu0 %v9149_v59, %s9771_s9  ;;  %v12401_v44 = vperm.slane %v3921_v26, %v9997_v57  ;;  %v12404_v54 = vperm.slane %v3945_v62, %v9997_v57  ;;  %v16525_v8 = vrot.slane %v12016_v42, 4 }
 0x30b   : > { %9160 = vrot.lane.b32.xlu2 %v9159_v49, %s9774_s12  ;;  %v9154_v48 = vpack.i.bf16 %v3678_v18, %v3566_v33  ;;  %v4057_v11 = vsel %vm672_vm6, %v4056_v0, %v4015_v32  ;;  %v3931_v37 = vperm.slane %v12057_v22, %v9997_v57  ;;  %v3947_v56 = vsel %vm672_vm6, %v12142_v52, %v3946_v28 }
 0x30c   : > { %v4033_v10 = vsel %vm672_vm6, %v16525_v8, %v11988_v45  ;;  %v12416_v47 = vperm.slane %v4057_v11, %v9997_v57  ;;  %v3970_v45 = vrot.slane %v12401_v44, 4  ;;  %v3955_v42 = vperm.slane %v3947_v56, %v9997_v57 }
 0x30d   : > { %9155 = vrot.lane.b32.xlu1 %v9154_v48, %s9775_s13  ;;  %v12413_v31 = vperm.slane %v4033_v10, %v9997_v57  ;;  %v4043_v0 = vperm.slane %v12049_v61, %v9997_v57  ;;  %v4059_v32 = vsel %vm672_vm6, %v12135_v21, %v4058_v34  ;;  %v4069_v22 = vsel %vm672_vm6, %v4068_v19, %v12340_v43  ;;  %v16526_v34 = vld [vmem:[#allocation30_spill] sm:$0xff]  ;;  %v12449_v48 = vpop.permute.xlu0 %9005  ;;  %v12459_v11 = vpop.permute.xlu1 %8995  ;;  %v16530_v43 = vld [vmem:[#allocation27_spill] sm:$0xff] }
 0x30e   : > { %v3974_v52 = vrot.slane %v3931_v37, 4  ;;  %v4067_v36 = vperm.slane %v4059_v32, %v9997_v57  ;;  %v3958_v9 = vrot.slane %v12371_v12, 4  ;;  %v3971_v35 = vsel %vm672_vm6, %v12404_v54, %v3970_v45 }
 0x30f   : > { %v4082_v51 = vrot.slane %v12413_v31, 4  ;;  %v4086_v38 = vrot.slane %v4043_v0, 4  ;;  %v3972_v61 = vrot.slane %v3955_v42, 4  ;;  %v3963_v60 = vperm.slane %v3957_v46, %v9997_v57 }
 0x310   : > { %v3975_v28 = vsel %vm672_vm6, %v3955_v42, %v3974_v52  ;;  %v4084_v19 = vrot.slane %v4067_v36, 4  ;;  %v4075_v49 = vperm.slane %v4069_v22, %v9997_v57  ;;  %v1191_v33 = vrot.slane %v16526_v34, 4 }
 0x311   : > { %v4083_v21 = vsel %vm672_vm6, %v12416_v47, %v4082_v51  ;;  %v4087_v20 = vsel %vm672_vm6, %v4067_v36, %v4086_v38  ;;  %v3973_v12 = vsel %vm672_vm6, %v3972_v61, %v3931_v37  ;;  %v3934_v18 = vrot.slane %v12021_v13, 4  ;;  %v16528_v37 = vld [vmem:[#allocation20_spill] sm:$0xff] }
 0x312   : > { %v9164_v7 = vpack.i.bf16 %v4083_v21, %v3971_v35  ;;  %v9174_v59 = vpack.i.bf16 %v4087_v20, %v3975_v28  ;;  %v4085_v46 = vsel %vm672_vm6, %v4084_v19, %v4043_v0  ;;  %v4046_v26 = vrot.slane %v16527_v14, 4  ;;  %v12481_v35 = vpop.permute.xlu2 %9015 }
 0x313   : > { %v3959_v62 = vsel %vm672_vm6, %v12132_v30, %v3958_v9  ;;  %v4071_v8 = vsel %vm672_vm6, %v12073_v3, %v4070_v58  ;;  %v9169_v10 = vpack.i.bf16 %v4085_v46, %v3973_v12  ;;  %v3935_v56 = vsel %vm672_vm6, %v16528_v37, %v3934_v18  ;;  %v16532_v18 = vld [vmem:[#allocation24_spill] sm:$0xff] }
 0x314   : > { %9165 = vrot.lane.b32.xlu2 %v9164_v7, %s9770_s8  ;;  %v16529_v45 = vrot.slane %v16528_v37, 4  ;;  %v3976_v42 = vrot.slane %v3963_v60, 4  ;;  %v16531_v0 = vrot.slane %v16530_v43, 4  ;;  %v4047_v58 = vsel %vm672_vm6, %v16530_v43, %v4046_v26  ;;  %v16533_v26 = vld [vmem:[#allocation29_spill] sm:$0xff] }
 0x315   : > { %9175 = vrot.lane.b32.xlu1 %v9174_v59, %s9773_s11  ;;  %9170 = vrot.lane.b32.xlu0 %v9169_v10, %s9769_s7  ;;  %v4088_v51 = vrot.slane %v4075_v49, 4  ;;  %v8923_v52 = vunpack.i.h.bf16 %v12118_v41  ;;  %v3967_v36 = vperm.slane %v3959_v62, %v9997_v57  ;;  %v4079_v9 = vperm.slane %v4071_v8, %v9997_v57 }
 0x316   : > { %v3933_v30 = vsel %vm672_vm6, %v16529_v45, %v12021_v13  ;;  %v4045_v3 = vsel %vm672_vm6, %v16531_v0, %v16527_v14  ;;  %v8922_v13 = vunpack.i.l.bf16 %v12118_v41  ;;  %v3943_v19 = vperm.slane %v3935_v56, %v9997_v57  ;;  %v16534_v56 = vld [vmem:[#allocation18_spill] sm:$0xff] }
 0x317   : > { %v3939_v32 = vperm.slane %v3933_v30, %v9997_v57  ;;  %v4051_v22 = vperm.slane %v4045_v3, %v9997_v57  ;;  %v3980_v7 = vrot.slane %v3967_v36, 4  ;;  %v4055_v20 = vperm.slane %v4047_v58, %v9997_v57  ;;  %v16535_v30 = vld [vmem:[#allocation19_spill] sm:$0xff] }
 0x318   : > { %v4092_v12 = vrot.slane %v4079_v9, 4  ;;  %v1303_v41 = vrot.slane %v16532_v18, 4  ;;  %v8928_v62 = vunpack.i.h.bf16 %v16533_v26  ;;  %v8927_v8 = vunpack.i.l.bf16 %v16533_v26 }
 0x319   : > { %v3977_v38 = vsel %vm672_vm6, %v3976_v42, %v3939_v32  ;;  %v4089_v61 = vsel %vm672_vm6, %v4088_v51, %v4051_v22  ;;  %v3978_v21 = vrot.slane %v3939_v32, 4  ;;  %v4090_v28 = vrot.slane %v4051_v22, 4  ;;  %v9021_v32 = vpop.permute.xlu0 %9020 }
 0x31a   : > { %v9179_v59 = vpack.i.bf16 %v4089_v61, %v3977_v38  ;;  %v3981_v10 = vsel %vm672_vm6, %v3980_v7, %v3943_v19  ;;  %v4093_v37 = vsel %vm672_vm6, %v4092_v12, %v4055_v20  ;;  %v2148_v45 = vsel %vm952_vm8, %v16534_v56, %v8923_v52  ;;  %v9011_v38 = vpop.permute.xlu1 %9010  ;;  %v16536_v7 = vld [vmem:[#allocation26_spill] sm:$0xff]  ;;  %v12515_v18 = vpop.permute.xlu2 %9035 }
 0x31b   : > { %v3979_v46 = vsel %vm672_vm6, %v3963_v60, %v3978_v21  ;;  %v4091_v14 = vsel %vm672_vm6, %v4075_v49, %v4090_v28  ;;  %v2141_v42 = vsel %vm952_vm8, %v16535_v30, %v8922_v13  ;;  %v9189_v43 = vpack.i.bf16 %v4093_v37, %v3981_v10 }
 0x31c   : > { %9180 = vrot.lane.b32.xlu2 %v9179_v59, %s9772_s10  ;;  %v9184_v60 = vpack.i.bf16 %v4091_v14, %v3979_v46  ;;  %v8938_v49 = vunpack.i.h.bf16 %v12173_v15  ;;  %v8937_v0 = vunpack.i.l.bf16 %v12173_v15  ;;  %v3982_v3 = vrot.slane %v3943_v19, 4  ;;  %v16537_v46 = vld [vmem:[#allocation31_spill] sm:$0xff] }
 0x31d   : > { %v4094_v58 = vrot.slane %v4055_v20, 4  ;;  %v8933_v22 = vunpack.i.h.bf16 %v12149_v53  ;;  %v8932_v51 = vunpack.i.l.bf16 %v12149_v53  ;;  %v9003_v52 = vunpack.i.h.bf16 %v12422_v63  ;;  %9190 = vrot.lane.b32.xlu1 %v9189_v43, %s9775_s13 }
 0x31e   : > { %9185 = vrot.lane.b32.xlu0 %v9184_v60, %s9771_s9  ;;  %v8998_v13 = vunpack.i.h.bf16 %v12459_v11  ;;  %v3983_v61 = vsel %vm672_vm6, %v3967_v36, %v3982_v3  ;;  %v8997_v21 = vunpack.i.l.bf16 %v12459_v11  ;;  %v8993_v28 = vunpack.i.h.bf16 %v12383_v40 }
 0x31f   : > { %v4095_v15 = vsel %vm672_vm6, %v4079_v9, %v4094_v58  ;;  %v9002_v19 = vunpack.i.l.bf16 %v12422_v63  ;;  %v1304_v20 = vsel %vm672_vm6, %v1303_v41, %v16536_v7  ;;  %v8992_v12 = vunpack.i.l.bf16 %v12383_v40 }
 0x320   : > { %v9194_v53 = vpack.i.bf16 %v4095_v15, %v3983_v61  ;;  %v1382_v59 = vsel %vm952_vm8, %v1304_v20, %v8993_v28  ;;  %v1192_v36 = vsel %vm672_vm6, %v1191_v33, %v16537_v46  ;;  %v9013_v11 = vunpack.i.h.bf16 %v9011_v38 }
 0x321   : > { %v9012_v9 = vunpack.i.l.bf16 %v9011_v38  ;;  %v1383_v14 = vsel %vm954_vm9, %v1382_v59, %v8998_v13  ;;  %v1375_v63 = vsel %vm952_vm8, %v1192_v36, %v8992_v12  ;;  %v9008_v26 = vunpack.i.h.bf16 %v12449_v48  ;;  %v9026_v38 = vpop.permute.xlu0 %9025 }
 0x322   : > { %v9007_v41 = vunpack.i.l.bf16 %v12449_v48  ;;  %v2142_v40 = vsel %vm954_vm9, %v2141_v42, %v8927_v8  ;;  %v2149_v10 = vsel %vm954_vm9, %v2148_v45, %v8928_v62  ;;  %v1376_v37 = vsel %vm954_vm9, %v1375_v63, %v8997_v21  ;;  %v9031_v21 = vpop.permute.xlu1 %9030  ;;  %v9051_v46 = vpop.permute.xlu2 %9050 }
 0x323   : > { %v1384_v34 = vsel %vm956_vm10, %v1383_v14, %v9003_v52  ;;  %v9018_v33 = vunpack.i.h.bf16 %v12481_v35  ;;  %v9017_v56 = vunpack.i.l.bf16 %v12481_v35  ;;  %v1377_v30 = vsel %vm956_vm10, %v1376_v37, %v9002_v19 }
 0x324   : > { %9195 = vrot.lane.b32.xlu2 %v9194_v53, %s9774_s12  ;;  %v1385_v43 = vsel %vm958_vm11, %v1384_v34, %v9008_v26  ;;  %v1378_v48 = vsel %vm958_vm11, %v1377_v30, %v9007_v41  ;;  %v9023_v60 = vunpack.i.h.bf16 %v9021_v32  ;;  %v9022_v8 = vunpack.i.l.bf16 %v9021_v32  ;;  %v16541_v30 = vld [vmem:[#allocation25_spill] sm:$0xff] }
 0x325   : > { %v1386_v62 = vsel %vm960_vm12, %v1385_v43, %v9013_v11  ;;  %v2143_v45 = vsel %vm956_vm10, %v2142_v40, %v8932_v51  ;;  %v2150_v42 = vsel %vm956_vm10, %v2149_v10, %v8933_v22  ;;  %v1379_v3 = vsel %vm960_vm12, %v1378_v48, %v9012_v9  ;;  %v16538_v11 = vld [vmem:[#allocation7_spill] sm:$0xff]  ;;  %v16539_v9 = vld [vmem:[#allocation22_spill] sm:$0xff] }
 0x326   : > { %v1387_v35 = vsel %vm962_vm13, %v1386_v62, %v9018_v33  ;;  %v8947_v58 = vunpack.i.l.bf16 %v12190_v29  ;;  %v1380_v52 = vsel %vm962_vm13, %v1379_v3, %v9017_v56  ;;  %v8942_v61 = vunpack.i.l.bf16 %v12139_v4  ;;  %v16540_v33 = vld [vmem:[#allocation14_spill] sm:$0xff] }
 0x327   : > { %v1388_v13 = vsel %vm964_vm14, %v1387_v35, %v9023_v60  ;;  %v8952_v32 = vunpack.i.l.bf16 %v12253_v1  ;;  %v1381_v15 = vsel %vm964_vm14, %v1380_v52, %v9022_v8  ;;  %v8948_v22 = vunpack.i.h.bf16 %v12190_v29 }
 0x328   : > { %v1392_v51 = vpack.c.bf16 %v1388_v13, %v1388_v13  ;;  %v1391_v28 = vpack.c.bf16 %v1381_v15, %v1381_v15  ;;  %v2144_v19 = vsel %vm958_vm11, %v2143_v45, %v8937_v0  ;;  %v2151_v53 = vsel %vm958_vm11, %v2150_v42, %v8938_v49  ;;  %v8487_v0 = vld [vmem:[%s15971_s1 + $0x4] sm:$0xf] }
 0x329   : > { %v8943_v7 = vunpack.i.h.bf16 %v12139_v4  ;;  %v8953_v20 = vunpack.i.h.bf16 %v12253_v1  ;;  %v2145_v59 = vsel %vm960_vm12, %v2144_v19, %v8942_v61  ;;  %v1606_v49 = vrot.slane %v16538_v11, 4  ;;  %v9041_v45 = vpop.permute.xlu0 %9040 }
 0x32a   : > { %v1400_v12 = vsel %vm16098_vm15, %v1392_v51, 0  ;;  %v1397_v36 = vsel %vm16098_vm15, %v1391_v28, 0  ;;  %v2146_v29 = vsel %vm962_vm13, %v2145_v59, %v8947_v58  ;;  %v1718_v4 = vrot.slane %v16539_v9, 4  ;;  %v9046_v52 = vpop.permute.xlu1 %9045  ;;  %v12589_v51 = vpop.permute.xlu2 %9065 }
 0x32b   : > { %1422 = vmatpush.bf16.msra.mxu3 %v1400_v12  ;;  %1409 = vmatpush.bf16.msra.mxu2 %v1397_v36  ;;  %v2147_v1 = vsel %vm964_vm14, %v2146_v29, %v8952_v32  ;;  %v2152_v14 = vsel %vm960_vm12, %v2151_v53, %v8943_v7  ;;  %v9028_v63 = vunpack.i.h.bf16 %v9026_v38  ;;  %v9027_v26 = vunpack.i.l.bf16 %v9026_v38  ;;  %v8493_v53 = vld [vmem:[%s15971_s1 + $0xc] sm:$0xf] }
 0x32c   : > { %v2157_v41 = vpack.c.bf16 %v2147_v1, %v2147_v1  ;;  %v2153_v40 = vsel %vm962_vm13, %v2152_v14, %v8948_v22  ;;  %v1607_v56 = vsel %vm672_vm6, %v1606_v49, %v16540_v33  ;;  %v1719_v43 = vsel %vm672_vm6, %v1718_v4, %v16541_v30 }
 0x32d   : > { %v2154_v10 = vsel %vm964_vm14, %v2153_v40, %v8953_v20  ;;  %v3553_v48 = vrot.slane %v12208_v55, 4  ;;  %v1797_v60 = vsel %vm952_vm8, %v1719_v43, %v9028_v63  ;;  %v1790_v8 = vsel %vm952_vm8, %v1607_v56, %v9027_v26  ;;  %v16542_v40 = vld [vmem:[#allocation10_spill] sm:$0xff] }
 0x32e   : > { %8489 = vmatmul.msk.bf16.vlgmr.msra.gmra.mxu3 %vm16097_vm5, %v8487_v0  ;;  %v2163_v37 = vsel %vm16098_vm15, %v2157_v41, 0  ;;  %v2158_v34 = vpack.c.bf16 %v2154_v10, %v2154_v10  ;;  %8488 = vmatmul.msk.bf16.vlgmr.msra.gmra.mxu2 %vm16097_vm5, %v8487_v0  ;;  %v3665_v42 = vrot.slane %v12223_v25, 4  ;;  %v9033_v3 = vunpack.i.h.bf16 %v9031_v21  ;;  %v8490_v41 = vld [vmem:[%s15971_s1 + $0x8] sm:$0xf] }
 0x32f   : > { %2175 = vmatpush.bf16.msrb.mxu2 %v2163_v37  ;;  %v9032_v35 = vunpack.i.l.bf16 %v9031_v21  ;;  %v12579_v58 = vsel %vm672_vm6, %v3553_v48, %v12205_v2  ;;  %v9043_v61 = vunpack.i.h.bf16 %v9041_v45  ;;  %v9042_v32 = vunpack.i.l.bf16 %v9041_v45  ;;  %v16543_v37 = vld [vmem:[#allocation12_spill] sm:$0xff] }
 0x330   : > { %v2166_v62 = vsel %vm16098_vm15, %v2158_v34, 0  ;;  %v12583_v55 = vsel %vm672_vm6, %v3665_v42, %v12220_v39  ;;  %v1798_v13 = vsel %vm954_vm9, %v1797_v60, %v9033_v3  ;;  %v9038_v25 = vunpack.i.h.bf16 %v12515_v18  ;;  %v16544_v45 = vld [vmem:[#allocation8_spill] sm:$0xff]  ;;  %v16545_v3 = vld [vmem:[#allocation13_spill] sm:$0xff] }
 0x331   : > { %2188 = vmatpush.bf16.msrb.mxu3 %v2166_v62  ;;  %v1791_v38 = vsel %vm954_vm9, %v1790_v8, %v9032_v35  ;;  %v9037_v15 = vunpack.i.l.bf16 %v12515_v18  ;;  %v9048_v28 = vunpack.i.h.bf16 %v9046_v52  ;;  %v9047_v19 = vunpack.i.l.bf16 %v9046_v52 }
 0x332   : > { %v1799_v22 = vsel %vm956_vm10, %v1798_v13, %v9038_v25  ;;  %v9053_v20 = vunpack.i.h.bf16 %v9051_v46  ;;  %v9052_v12 = vunpack.i.l.bf16 %v9051_v46  ;;  %v9061_v36 = vpop.permute.xlu1 %9060  ;;  %v12603_v9 = vpop.permute.xlu2 %9080  ;;  %v3250_v10 = vrot.slane %v16542_v40, 4  ;;  %v16546_v13 = vld [vmem:[#allocation42_spill] sm:$0xff] }
 0x333   : > { %v1792_v2 = vsel %vm956_vm10, %v1791_v38, %v9037_v15  ;;  %v1800_v39 = vsel %vm958_vm11, %v1799_v22, %v9043_v61  ;;  %v3138_v34 = vrot.slane %v16543_v37, 4  ;;  %v8958_v33 = vunpack.i.h.bf16 %v12202_v50 }
 0x334   : > { %v1793_v21 = vsel %vm958_vm11, %v1792_v2, %v9042_v32  ;;  %v1801_v18 = vsel %vm960_vm12, %v1800_v39, %v9048_v28  ;;  %v9056_v59 = vpop.permute.xlu0 %9055  ;;  %v8957_v56 = vunpack.i.l.bf16 %v12202_v50  ;;  %v3968_v30 = vrot.slane %v12404_v54, 4 }
 0x335   : > { %v1794_v7 = vsel %vm960_vm12, %v1793_v21, %v9047_v19  ;;  %v9058_v29 = vunpack.i.h.bf16 %v9056_v59  ;;  %v9057_v0 = vunpack.i.l.bf16 %v9056_v59  ;;  %v1802_v49 = vsel %vm962_vm13, %v1801_v18, %v9053_v20  ;;  %v16549_v20 = vld [vmem:[#allocation43_spill] sm:$0xff] }
 0x336   : > { %v1795_v11 = vsel %vm962_vm13, %v1794_v7, %v9052_v12  ;;  %v4080_v43 = vrot.slane %v12416_v47, 4  ;;  %v8963_v48 = vunpack.i.h.bf16 %v12255_v27  ;;  %v8962_v60 = vunpack.i.l.bf16 %v12255_v27  ;;  %v16548_v7 = vld [vmem:[#allocation41_spill] sm:$0xff] }
 0x337   : > { %v1796_v4 = vsel %vm964_vm14, %v1795_v11, %v9057_v0  ;;  %v1803_v1 = vsel %vm964_vm14, %v1802_v49, %v9058_v29  ;;  %v12625_v62 = vsel %vm672_vm6, %v3968_v30, %v12401_v44  ;;  %v3139_v42 = vsel %vm672_vm6, %v3138_v34, %v16544_v45 }
 0x338   : > { %v1806_v14 = vpack.c.bf16 %v1796_v4, %v1796_v4  ;;  %v1807_v46 = vpack.c.bf16 %v1803_v1, %v1803_v1  ;;  %v12629_v50 = vsel %vm672_vm6, %v4080_v43, %v12413_v31  ;;  %v3251_v54 = vsel %vm672_vm6, %v3250_v10, %v16545_v3  ;;  %v16547_v31 = vld [vmem:[#allocation44_spill] sm:$0xff] }
 0x339   : > { %v3329_v35 = vsel %vm952_vm8, %v3251_v54, %v8958_v33  ;;  %v3322_v27 = vsel %vm952_vm8, %v3139_v42, %v8957_v56  ;;  %v8968_v52 = vunpack.i.h.bf16 %v12320_v6  ;;  %v8967_v44 = vunpack.i.l.bf16 %v12320_v6 }
 0x33a   : > { %v1812_v63 = vsel %vm16098_vm15, %v1806_v14, 0  ;;  %v1815_v26 = vsel %vm16098_vm15, %v1807_v46, 0  ;;  %v9076_v8 = vpop.permute.xlu1 %9075  ;;  %v2372_v38 = vrot.slane %v16546_v13, 4  ;;  %v2484_v61 = vrot.slane %v16547_v31, 4 }
 0x33b   : > { %1824 = vmatpush.bf16.msrb.mxu0 %v1812_v63  ;;  %1837 = vmatpush.bf16.msrb.mxu1 %v1815_v26  ;;  %v12635_v47 = vpop.permute.xlu2 %9100  ;;  %v3323_v32 = vsel %vm954_vm9, %v3322_v27, %v8962_v60  ;;  %v3330_v25 = vsel %vm954_vm9, %v3329_v35, %v8963_v48  ;;  %v9063_v15 = vunpack.i.h.bf16 %v9061_v36  ;;  %v9062_v2 = vunpack.i.l.bf16 %v9061_v36 }
 0x33c   : > { %v8973_v21 = vunpack.i.h.bf16 %v12282_v17  ;;  %v8972_v39 = vunpack.i.l.bf16 %v12282_v17  ;;  %v3324_v28 = vsel %vm956_vm10, %v3323_v32, %v8967_v44  ;;  %v3331_v19 = vsel %vm956_vm10, %v3330_v25, %v8968_v52 }
 0x33d   : > { %v8978_v6 = vunpack.i.h.bf16 %v12312_v5  ;;  %v2373_v18 = vsel %vm672_vm6, %v2372_v38, %v16548_v7  ;;  %v2485_v12 = vsel %vm672_vm6, %v2484_v61, %v16549_v20  ;;  %v9068_v0 = vunpack.i.h.bf16 %v12589_v51 }
 0x33e   : > { %8495 = vmatmul.msk.bf16.vlgmr.msrb.gmra.mxu3 %vm16097_vm5, %v8493_v53  ;;  %8494 = vmatmul.msk.bf16.vlgmr.msrb.gmra.mxu2 %vm16097_vm5, %v8493_v53  ;;  %v8977_v53 = vunpack.i.l.bf16 %v12312_v5  ;;  %v2563_v59 = vsel %vm952_vm8, %v2485_v12, %v9063_v15  ;;  %v2556_v36 = vsel %vm952_vm8, %v2373_v18, %v9062_v2  ;;  %v9067_v11 = vunpack.i.l.bf16 %v12589_v51 }
 0x33f   : > { %8491 = vmatmul.msk.bf16.vlgmr.msrb.gmra.mxu0 %vm16097_vm5, %v8490_v41  ;;  %8492 = vmatmul.msk.bf16.vlgmr.msrb.gmra.mxu1 %vm16097_vm5, %v8490_v41  ;;  %v9071_v22 = vpop.permute.xlu0 %9070  ;;  %v8983_v4 = vunpack.i.h.bf16 %v12389_v24  ;;  %v8982_v5 = vunpack.i.l.bf16 %v12389_v24  ;;  %v3325_v1 = vsel %vm958_vm11, %v3324_v28, %v8972_v39  ;;  %v3332_v14 = vsel %vm958_vm11, %v3331_v19, %v8973_v21  ;;  %v16550_v21 = vld [vmem:[#allocation33_spill] sm:$0xff] }
 0x340   : > { %v9073_v29 = vunpack.i.h.bf16 %v9071_v22  ;;  %v9072_v17 = vunpack.i.l.bf16 %v9071_v22  ;;  %v3326_v46 = vsel %vm960_vm12, %v3325_v1, %v8977_v53  ;;  %v3333_v63 = vsel %vm960_vm12, %v3332_v14, %v8978_v6  ;;  %v16551_v28 = vld [vmem:[#allocation53_spill] sm:$0xff] }
 0x341   : > { %v2557_v41 = vsel %vm954_vm9, %v2556_v36, %v9067_v11  ;;  %v2564_v40 = vsel %vm954_vm9, %v2563_v59, %v9068_v0  ;;  %v9078_v37 = vunpack.i.h.bf16 %v9076_v8  ;;  %v9077_v24 = vunpack.i.l.bf16 %v9076_v8  ;;  %v8496_v59 = vld [vmem:[%s15971_s1 + $0x10] sm:$0xf] }
 0x342   : > { %v2565_v51 = vsel %vm956_vm10, %v2564_v40, %v9073_v29  ;;  %v2558_v10 = vsel %vm956_vm10, %v2557_v41, %v9072_v17  ;;  %v3327_v34 = vsel %vm962_vm13, %v3326_v46, %v8982_v5  ;;  %v3334_v33 = vsel %vm962_vm13, %v3333_v63, %v8983_v4  ;;  %v16552_v29 = vld [vmem:[#allocation32_spill] sm:$0xff]  ;;  %v16553_v0 = vld [vmem:[#allocation34_spill] sm:$0xff] }
 0x343   : > { %v9091_v49 = vpop.permute.xlu1 %9090  ;;  %v8988_v56 = vunpack.i.h.bf16 %v12344_v23  ;;  %v8987_v30 = vunpack.i.l.bf16 %v12344_v23  ;;  %v2566_v43 = vsel %vm958_vm11, %v2565_v51, %v9078_v37  ;;  %v2559_v48 = vsel %vm958_vm11, %v2558_v10, %v9077_v24 }
 0x344   : > { %v12665_v26 = vpop.permute.xlu2 %9115  ;;  %v9083_v60 = vunpack.i.h.bf16 %v12603_v9  ;;  %v9082_v45 = vunpack.i.l.bf16 %v12603_v9  ;;  %v9093_v27 = vunpack.i.h.bf16 %v9091_v49  ;;  %v9092_v52 = vunpack.i.l.bf16 %v9091_v49 }
 0x345   : > { %v3328_v8 = vsel %vm964_vm14, %v3327_v34, %v8987_v30  ;;  %v3335_v35 = vsel %vm964_vm14, %v3334_v33, %v8988_v56  ;;  %v2787_v39 = vrot.slane %v16550_v21, 4  ;;  %v2899_v19 = vrot.slane %v16551_v28, 4 }
 0x346   : > { %v2560_v44 = vsel %vm960_vm12, %v2559_v48, %v9082_v45  ;;  %v2567_v23 = vsel %vm960_vm12, %v2566_v43, %v9083_v60  ;;  %v3338_v32 = vpack.c.bf16 %v3328_v8, %v3328_v8  ;;  %v3339_v25 = vpack.c.bf16 %v3335_v35, %v3335_v35 }
 0x347   : > { %v2788_v17 = vsel %vm672_vm6, %v2787_v39, %v16552_v29  ;;  %v2900_v11 = vsel %vm672_vm6, %v2899_v19, %v16553_v0  ;;  %v9103_v46 = vunpack.i.h.bf16 %v12635_v47  ;;  %v9102_v63 = vunpack.i.l.bf16 %v12635_v47 }
 0x348   : > { %v3344_v20 = vsel %vm16098_vm15, %v3338_v32, 0  ;;  %v3347_v12 = vsel %vm16098_vm15, %v3339_v25, 0  ;;  %v9118_v43 = vunpack.i.h.bf16 %v12665_v26  ;;  %v9117_v47 = vunpack.i.l.bf16 %v12665_v26  ;;  %v8502_v26 = vld [vmem:[%s15971_s1 + $0x18] sm:$0xf] }
 0x34d   : > { %v12687_v15 = vpop.permute.xlu2 %9130 }
 0x34e   : > { %v9133_v32 = vunpack.i.h.bf16 %v12687_v15  ;;  %v9132_v25 = vunpack.i.l.bf16 %v12687_v15 }
 0x350   : > { %v3744_v28 = vsel %vm952_vm8, %v12583_v55, %v9133_v32  ;;  %v3737_v19 = vsel %vm952_vm8, %v12579_v58, %v9132_v25 }
 0x354   : > { %v9086_v42 = vpop.permute.xlu0 %9085 }
 0x355   : > { %v9088_v3 = vunpack.i.h.bf16 %v9086_v42  ;;  %v9087_v54 = vunpack.i.l.bf16 %v9086_v42 }
 0x356   : > { %v9096_v13 = vpop.permute.xlu1 %9095 }
 0x357   : > { %v2561_v38 = vsel %vm962_vm13, %v2560_v44, %v9087_v54  ;;  %v2568_v31 = vsel %vm962_vm13, %v2567_v23, %v9088_v3  ;;  %v9098_v7 = vunpack.i.h.bf16 %v9096_v13  ;;  %v9097_v18 = vunpack.i.l.bf16 %v9096_v13  ;;  %v9146_v41 = vpop.permute.xlu2 %9145 }
 0x358   : > { %v2562_v9 = vsel %vm964_vm14, %v2561_v38, %v9092_v52  ;;  %v2569_v61 = vsel %vm964_vm14, %v2568_v31, %v9093_v27 }
 0x359   : > { %v2572_v2 = vpack.c.bf16 %v2562_v9, %v2562_v9  ;;  %v2573_v22 = vpack.c.bf16 %v2569_v61, %v2569_v61  ;;  %v2978_v4 = vsel %vm952_vm8, %v2900_v11, %v9098_v7  ;;  %v2971_v5 = vsel %vm952_vm8, %v2788_v17, %v9097_v18  ;;  %v8499_v61 = vld [vmem:[%s15971_s1 + $0x14] sm:$0xf] }
 0x35a   : > { %v2972_v10 = vsel %vm954_vm9, %v2971_v5, %v9102_v63  ;;  %v2979_v37 = vsel %vm954_vm9, %v2978_v4, %v9103_v46 }
 0x35b   : > { %v2578_v6 = vsel %vm16098_vm15, %v2572_v2, 0  ;;  %v2581_v53 = vsel %vm16098_vm15, %v2573_v22, 0 }
 0x35c   : > { %2590 = vmatpush.bf16.msra.mxu0 %v2578_v6  ;;  %2603 = vmatpush.bf16.msra.mxu1 %v2581_v53  ;;  %v9106_v36 = vpop.permute.xlu0 %9105 }
 0x35d   : > { %v9108_v1 = vunpack.i.h.bf16 %v9106_v36  ;;  %v9107_v14 = vunpack.i.l.bf16 %v9106_v36  ;;  %v9147_v36 = vunpack.i.l.bf16 %v9146_v41 }
 0x35e   : > { %v9111_v49 = vpop.permute.xlu1 %9110 }
 0x35f   : > { %8497 = vmatmul.msk.bf16.vlgmr.msra.gmra.mxu0 %vm16097_vm5, %v8496_v59  ;;  %8498 = vmatmul.msk.bf16.vlgmr.msra.gmra.mxu1 %vm16097_vm5, %v8496_v59  ;;  %v9113_v40 = vunpack.i.h.bf16 %v9111_v49  ;;  %v9112_v51 = vunpack.i.l.bf16 %v9111_v49  ;;  %v2980_v24 = vsel %vm956_vm10, %v2979_v37, %v9108_v1  ;;  %v2973_v34 = vsel %vm956_vm10, %v2972_v10, %v9107_v14 }
 0x360   : > { %3356 = vmatpush.bf16.msrb.mxu0 %v3344_v20  ;;  %3369 = vmatpush.bf16.msrb.mxu1 %v3347_v12  ;;  %v9148_v59 = vunpack.i.h.bf16 %v9146_v41 }
 0x361   : > { %v2981_v33 = vsel %vm958_vm11, %v2980_v24, %v9113_v40  ;;  %v2974_v56 = vsel %vm958_vm11, %v2973_v34, %v9112_v51 }
 0x362   : > { %v2975_v54 = vsel %vm960_vm12, %v2974_v56, %v9117_v47  ;;  %v2982_v8 = vsel %vm960_vm12, %v2981_v33, %v9118_v43 }
 0x365   : > { %v9161_v23 = vpop.permute.xlu2 %9160 }
 0x366   : > { %v9163_v5 = vunpack.i.h.bf16 %v9161_v23  ;;  %v9162_v1 = vunpack.i.l.bf16 %v9161_v23 }
 0x367   : > { %v9126_v30 = vpop.permute.xlu1 %9125 }
 0x368   : > { %v9128_v48 = vunpack.i.h.bf16 %v9126_v30  ;;  %v9127_v60 = vunpack.i.l.bf16 %v9126_v30 }
 0x369   : > { %v9121_v45 = vpop.permute.xlu0 %9120 }
 0x36a   : > { %v9123_v42 = vunpack.i.h.bf16 %v9121_v45  ;;  %v9122_v3 = vunpack.i.l.bf16 %v9121_v45 }
 0x36c   : > { %v2976_v35 = vsel %vm962_vm13, %v2975_v54, %v9122_v3  ;;  %v2983_v27 = vsel %vm962_vm13, %v2982_v8, %v9123_v42 }
 0x36d   : > { %v2977_v52 = vsel %vm964_vm14, %v2976_v35, %v9127_v60  ;;  %v2984_v44 = vsel %vm964_vm14, %v2983_v27, %v9128_v48  ;;  %v8505_v60 = vld [vmem:[%s15971_s1 + $0x1c] sm:$0xf] }
 0x36e   : > { %v2987_v13 = vpack.c.bf16 %v2977_v52, %v2977_v52  ;;  %v2988_v38 = vpack.c.bf16 %v2984_v44, %v2984_v44  ;;  %v9166_v18 = vpop.permute.xlu2 %9165 }
 0x36f   : > { %8503 = vmatmul.msk.bf16.vlgmr.msrb.gmra.mxu0 %vm16097_vm5, %v8502_v26  ;;  %8504 = vmatmul.msk.bf16.vlgmr.msrb.gmra.mxu1 %vm16097_vm5, %v8502_v26  ;;  %v9168_v43 = vunpack.i.h.bf16 %v9166_v18  ;;  %v9167_v47 = vunpack.i.l.bf16 %v9166_v18 }
 0x370   : > { %v2993_v31 = vsel %vm16098_vm15, %v2987_v13, 0  ;;  %v2996_v9 = vsel %vm16098_vm15, %v2988_v38, 0 }
 0x371   : > { %3005 = vmatpush.bf16.msra.mxu2 %v2993_v31  ;;  %3018 = vmatpush.bf16.msra.mxu3 %v2996_v9  ;;  %v9141_v2 = vpop.permute.xlu1 %9140  ;;  %v4159_v54 = vsel %vm952_vm8, %v12629_v50, %v9168_v43  ;;  %v4152_v8 = vsel %vm952_vm8, %v12625_v62, %v9167_v47 }
 0x372   : > { %v9143_v6 = vunpack.i.h.bf16 %v9141_v2  ;;  %v9142_v53 = vunpack.i.l.bf16 %v9141_v2 }
 0x373   : > { %v9136_v22 = vpop.permute.xlu0 %9135 }
 0x374   : > { %v9138_v21 = vunpack.i.h.bf16 %v9136_v22  ;;  %v9137_v39 = vunpack.i.l.bf16 %v9136_v22  ;;  %8500 = vmatmul.msk.bf16.vlgmr.msra.gmra.mxu2 %vm16097_vm5, %v8499_v61  ;;  %8501 = vmatmul.msk.bf16.vlgmr.msra.gmra.mxu3 %vm16097_vm5, %v8499_v61 }
 0x376   : > { %v3745_v7 = vsel %vm954_vm9, %v3744_v28, %v9138_v21  ;;  %v3738_v15 = vsel %vm954_vm9, %v3737_v19, %v9137_v39  ;;  %v9181_v34 = vpop.permute.xlu2 %9180 }
 0x377   : > { %v3746_v20 = vsel %vm956_vm10, %v3745_v7, %v9143_v6  ;;  %v3739_v12 = vsel %vm956_vm10, %v3738_v15, %v9142_v53  ;;  %v9183_v9 = vunpack.i.h.bf16 %v9181_v34  ;;  %v9182_v61 = vunpack.i.l.bf16 %v9181_v34 }
 0x378   : > { %v3740_v58 = vsel %vm958_vm11, %v3739_v12, %v9147_v36  ;;  %v3747_v4 = vsel %vm958_vm11, %v3746_v20, %v9148_v59 }
 0x37c   : > { %v9151_v29 = vpop.permute.xlu0 %9150 }
 0x37d   : > { %v9153_v0 = vunpack.i.h.bf16 %v9151_v29  ;;  %v9152_v55 = vunpack.i.l.bf16 %v9151_v29 }
 0x37e   : > { %v9196_v13 = vpop.permute.xlu2 %9195 }
 0x37f   : > { %v9156_v17 = vpop.permute.xlu1 %9155  ;;  %v3741_v14 = vsel %vm960_vm12, %v3740_v58, %v9152_v55  ;;  %v3748_v46 = vsel %vm960_vm12, %v3747_v4, %v9153_v0  ;;  %v9198_v28 = vunpack.i.h.bf16 %v9196_v13  ;;  %v9197_v19 = vunpack.i.l.bf16 %v9196_v13  ;;  %v16554_v0 = vld [vmem:[#allocation4_spill] sm:$0xff] }
 0x380   : > { %v9158_v11 = vunpack.i.h.bf16 %v9156_v17  ;;  %v9157_v49 = vunpack.i.l.bf16 %v9156_v17  ;;  %v8508_v17 = vld [vmem:[%s15971_s1 + $0x20] sm:$0xf] }
 0x381   : > { %v996_v10 = vpop.f32.mrf.mxu0 }
 0x382   : > { %v3742_v63 = vsel %vm962_vm13, %v3741_v14, %v9157_v49  ;;  %v3749_v41 = vsel %vm962_vm13, %v3748_v46, %v9158_v11  ;;  %v1013_v11 = vadd.f32 %v996_v10, %v16554_v0 }
 0x383   : > { %v3743_v40 = vsel %vm964_vm14, %v3742_v63, %v9162_v1  ;;  %v3750_v51 = vsel %vm964_vm14, %v3749_v41, %v9163_v5 }
 0x384   : > { %v3753_v37 = vpack.c.bf16 %v3743_v40, %v3743_v40  ;;  %v3754_v24 = vpack.c.bf16 %v3750_v51, %v3750_v51 }
 0x385   : > { %v1009_v33 = vpop.f32.mrf.mxu1 }
 0x386   : > { %v3759_v56 = vsel %vm16098_vm15, %v3753_v37, 0  ;;  %v3762_v30 = vsel %vm16098_vm15, %v3754_v24, 0  ;;  %v1014_v55 = vadd.f32 %v1009_v33, %v16554_v0 }
 0x387   : > { %v9176_v48 = vpop.permute.xlu1 %9175  ;;  %3771 = vmatpush.bf16.msrb.mxu2 %v3759_v56  ;;  %3784 = vmatpush.bf16.msrb.mxu3 %v3762_v30  ;;  %v9171_v45 = vpop.permute.xlu0 %9170 }
 0x388   : > { %v9173_v42 = vunpack.i.h.bf16 %v9171_v45  ;;  %v9172_v3 = vunpack.i.l.bf16 %v9171_v45  ;;  %v9178_v35 = vunpack.i.h.bf16 %v9176_v48  ;;  %v9177_v27 = vunpack.i.l.bf16 %v9176_v48 }
 0x389   : > { %v998_v26 = vpop.f32.mrf.mxu0 }
 0x38a   : > { %8506 = vmatmul.msk.bf16.vlgmr.msrb.gmra.mxu2 %vm16097_vm5, %v8505_v60  ;;  %8507 = vmatmul.msk.bf16.vlgmr.msrb.gmra.mxu3 %vm16097_vm5, %v8505_v60  ;;  %v4160_v52 = vsel %vm954_vm9, %v4159_v54, %v9173_v42  ;;  %v4153_v44 = vsel %vm954_vm9, %v4152_v8, %v9172_v3 }
 0x38b   : > { %v4161_v38 = vsel %vm956_vm10, %v4160_v52, %v9178_v35  ;;  %v4154_v31 = vsel %vm956_vm10, %v4153_v44, %v9177_v27 }
 0x38c   : > { %v4155_v21 = vsel %vm958_vm11, %v4154_v31, %v9182_v61  ;;  %v4162_v39 = vsel %vm958_vm11, %v4161_v38, %v9183_v9 }
 0x38d   : > { %v1011_v23 = vpop.f32.mrf.mxu1 }
 0x38f   : > { %v9191_v32 = vpop.permute.xlu1 %9190 }
 0x390   : > { %v9186_v50 = vpop.permute.xlu0 %9185  ;;  %v9193_v25 = vunpack.i.h.bf16 %v9191_v32  ;;  %v9192_v2 = vunpack.i.l.bf16 %v9191_v32 }
 0x391   : > { %v9188_v62 = vunpack.i.h.bf16 %v9186_v50  ;;  %v9187_v22 = vunpack.i.l.bf16 %v9186_v50 }
 0x393   : > { %v4156_v6 = vsel %vm960_vm12, %v4155_v21, %v9187_v22  ;;  %v4163_v53 = vsel %vm960_vm12, %v4162_v39, %v9188_v62 }
 0x394   : > { %v4157_v7 = vsel %vm962_vm13, %v4156_v6, %v9192_v2  ;;  %v4164_v15 = vsel %vm962_vm13, %v4163_v53, %v9193_v25 }
 0x395   : > { %v4158_v18 = vsel %vm964_vm14, %v4157_v7, %v9197_v19  ;;  %v4165_v20 = vsel %vm964_vm14, %v4164_v15, %v9198_v28 }
 0x396   : > { %v4168_v12 = vpack.c.bf16 %v4158_v18, %v4158_v18  ;;  %v4169_v59 = vpack.c.bf16 %v4165_v20, %v4165_v20 }
 0x398   : > { %v4174_v36 = vsel %vm16098_vm15, %v4168_v12, 0  ;;  %v4177_v29 = vsel %vm16098_vm15, %v4169_v59, 0 }
 0x399   : > { %4186 = vmatpush.bf16.msra.mxu0 %v4174_v36  ;;  %4199 = vmatpush.bf16.msra.mxu1 %v4177_v29 }
 0x39c   : > { %8509 = vmatmul.msk.bf16.vlgmr.msra.gmra.mxu0 %vm16097_vm5, %v8508_v17  ;;  %8510 = vmatmul.msk.bf16.vlgmr.msra.gmra.mxu1 %vm16097_vm5, %v8508_v17 }
 0x3b1   : > { %v1424_v49 = vpop.f32.mrf.mxu3  ;;  %v1411_v58 = vpop.f32.mrf.mxu2 }
 0x3b2   : > { %v1429_v4 = vadd.f32 %v1424_v49, %v1014_v55  ;;  %v1428_v5 = vadd.f32 %v1411_v58, %v1013_v11 }
 0x3b9   : > { %v1426_v1 = vpop.f32.mrf.mxu3  ;;  %v1413_v14 = vpop.f32.mrf.mxu2 }
 0x3bc   : > { %v1826_v41 = vpop.f32.mrf.mxu0  ;;  %v1839_v40 = vpop.f32.mrf.mxu1 }
 0x3bd   : > { %v1843_v51 = vadd.f32 %v1826_v41, %v1428_v5  ;;  %v1844_v37 = vadd.f32 %v1839_v40, %v1429_v4 }
 0x3c1   : > { %v2190_v46 = vpop.f32.mrf.mxu3  ;;  %v2177_v63 = vpop.f32.mrf.mxu2 }
 0x3c2   : > { %v2194_v24 = vadd.f32 %v2177_v63, %v1843_v51  ;;  %v2195_v34 = vadd.f32 %v2190_v46, %v1844_v37 }
 0x3c4   : > { %v1828_v43 = vpop.f32.mrf.mxu0  ;;  %v1841_v33 = vpop.f32.mrf.mxu1 }
 0x3c9   : > { %v2192_v56 = vpop.f32.mrf.mxu3  ;;  %v2179_v30 = vpop.f32.mrf.mxu2 }
 0x3dc   : > { %v2592_v47 = vpop.f32.mrf.mxu0  ;;  %v2605_v10 = vpop.f32.mrf.mxu1 }
 0x3dd   : > { %v2610_v48 = vadd.f32 %v2605_v10, %v2195_v34  ;;  %v2609_v13 = vadd.f32 %v2592_v47, %v2194_v24 }
 0x3e4   : > { %v2594_v60 = vpop.f32.mrf.mxu0  ;;  %v2607_v45 = vpop.f32.mrf.mxu1 }
 0x3ec   : > { %v3358_v42 = vpop.f32.mrf.mxu0  ;;  %v3371_v3 = vpop.f32.mrf.mxu1 }
 0x3f4   : > { %v3360_v54 = vpop.f32.mrf.mxu0  ;;  %v3373_v8 = vpop.f32.mrf.mxu1 }
 0x3f7   : > { %v3007_v35 = vpop.f32.mrf.mxu2  ;;  %v3020_v27 = vpop.f32.mrf.mxu3 }
 0x3f8   : > { %v3024_v38 = vadd.f32 %v3007_v35, %v2609_v13  ;;  %v3025_v22 = vadd.f32 %v3020_v27, %v2610_v48 }
 0x3fa   : > { %v3375_v61 = vadd.f32 %v3358_v42, %v3024_v38  ;;  %v3376_v19 = vadd.f32 %v3371_v3, %v3025_v22 }
 0x3ff   : > { %v3009_v52 = vpop.f32.mrf.mxu2  ;;  %v3022_v44 = vpop.f32.mrf.mxu3 }
 0x40d   : > { %v3773_v26 = vpop.f32.mrf.mxu2  ;;  %v3786_v23 = vpop.f32.mrf.mxu3 }
 0x40e   : > { %v3790_v32 = vadd.f32 %v3773_v26, %v3375_v61  ;;  %v3791_v6 = vadd.f32 %v3786_v23, %v3376_v19 }
 0x415   : > { %v3775_v31 = vpop.f32.mrf.mxu2  ;;  %v3788_v9 = vpop.f32.mrf.mxu3 }
 0x419   : > { %v4188_v50 = vpop.f32.mrf.mxu0  ;;  %v4201_v25 = vpop.f32.mrf.mxu1 }
 0x41a   : > { %v4205_v2 = vadd.f32 %v4188_v50, %v3790_v32  ;;  %v4206_v53 = vadd.f32 %v4201_v25, %v3791_v6 }
 0x41c   : > { %vm4207_vm5 = vcmp.gt.f32.partialorder %v4205_v2, 0.0  ;;  %v4209_v62 = vmul.f32 0.01, %v4205_v2  ;;  %v4210_v7 = vmul.f32 0.01, %v4206_v53  ;;  %vm4208_vm15 = vcmp.gt.f32.partialorder %v4206_v53, 0.0 }
 0x41e   : > { %v4211_v21 = vsel %vm4207_vm5, %v4205_v2, %v4209_v62  ;;  %v12790_v15 = vsel %vm4208_vm15, %v4206_v53, %v4210_v7 }
 0x41f   : > { %4220 = vrot.lane.b32.xlu2 %v4211_v21, %s9771_s9  ;;  %4217 = vrot.lane.b32.xlu1 %v4211_v21, %s9775_s13  ;;  %v4259_v59 = vrot.slane %v4211_v21, 4  ;;  %v4371_v27 = vrot.slane %v12790_v15, 4 }
 0x420   : > { %4214 = vrot.lane.b32.xlu0 %v4211_v21, %s9774_s12 }
 0x421   : > { %v4190_v39 = vpop.f32.mrf.mxu0  ;;  %v4203_v28 = vpop.f32.mrf.mxu1 }
 0x427   : > { %4229 = vrot.lane.b32.xlu2 %v4211_v21, %s9769_s7  ;;  %4226 = vrot.lane.b32.xlu1 %v4211_v21, %s9773_s11 }
 0x428   : > { %4223 = vrot.lane.b32.xlu0 %v4211_v21, %s9772_s10 }
 0x42f   : > { %4239 = vrot.lane.b32.xlu2 %v12790_v15, %s9775_s13  ;;  %4236 = vrot.lane.b32.xlu1 %v12790_v15, %s9774_s12 }
 0x430   : > { %4232 = vrot.lane.b32.xlu0 %v4211_v21, %s9770_s8 }
 0x437   : > { %4248 = vrot.lane.b32.xlu2 %v12790_v15, %s9773_s11  ;;  %4245 = vrot.lane.b32.xlu1 %v12790_v15, %s9772_s10 }
 0x438   : > { %4242 = vrot.lane.b32.xlu0 %v12790_v15, %s9771_s9 }
 0x43f   : > { %4254 = vrot.lane.b32.xlu1 %v12790_v15, %s9770_s8 }
 0x440   : > { %4251 = vrot.lane.b32.xlu0 %v12790_v15, %s9769_s7 }
 0x479   : > { %v4221_v18 = vpop.permute.xlu2 %4220 }
 0x47a   : > { %v4269_v58 = vrot.slane %v4221_v18, 4 }
 0x481   : > { %v4230_v11 = vpop.permute.xlu2 %4229 }
 0x482   : > { %v4281_v30 = vrot.slane %v4230_v11, 4 }
 0x489   : > { %v4240_v10 = vpop.permute.xlu2 %4239 }
 0x48a   : > { %v4372_v38 = vsel %vm672_vm6, %v4240_v10, %v4371_v27  ;;  %v4369_v22 = vrot.slane %v4240_v10, 4 }
 0x48c   : > { %v4370_v7 = vsel %vm672_vm6, %v4369_v22, %v12790_v15 }
 0x491   : > { %v4218_v20 = vpop.permute.xlu1 %4217  ;;  %v4249_v28 = vpop.permute.xlu2 %4248 }
 0x492   : > { %v4215_v12 = vpop.permute.xlu0 %4214  ;;  %v4260_v36 = vsel %vm672_vm6, %v4218_v20, %v4259_v59  ;;  %v4257_v14 = vrot.slane %v4218_v20, 4  ;;  %v4407_v20 = vrot.slane %v4249_v28, 4 }
 0x493   : > { %v4271_v29 = vrot.slane %v4215_v12, 4  ;;  %v12809_v17 = vperm.slane %v4260_v36, %v9951_v16  ;;  %v4270_v46 = vsel %vm672_vm6, %v4269_v58, %v4215_v12 }
 0x494   : > { %v12819_v41 = vperm.slane %v4270_v46, %v9951_v16  ;;  %v4258_v37 = vsel %vm672_vm6, %v4257_v14, %v4211_v21  ;;  %v12865_v21 = vperm.slane %v4372_v38, %v9951_v16 }
 0x495   : > { %v4272_v0 = vsel %vm672_vm6, %v4221_v18, %v4271_v29  ;;  %v4319_v5 = vrot.slane %v12809_v17, 4  ;;  %v12832_v48 = vperm.slane %v4258_v37, %v9951_v16 }
 0x496   : > { %v12814_v1 = vperm.slane %v4272_v0, %v9951_v16  ;;  %v4305_v60 = vrot.slane %v12819_v41, 4  ;;  %v4431_v18 = vrot.slane %v12865_v21, 4 }
 0x498   : > { %v4320_v51 = vsel %vm672_vm6, %v12814_v1, %v4319_v5  ;;  %v4306_v13 = vsel %vm672_vm6, %v4305_v60, %v12832_v48 }
 0x499   : > { %v4227_v55 = vpop.permute.xlu1 %4226  ;;  %v12829_v47 = vperm.slane %v4320_v51, %v9997_v57  ;;  %v12862_v62 = vperm.slane %v4306_v13, %v9997_v57 }
 0x49a   : > { %v4224_v49 = vpop.permute.xlu0 %4223  ;;  %v4295_v24 = vrot.slane %v4227_v55, 4 }
 0x49b   : > { %v4283_v4 = vrot.slane %v4224_v49, 4  ;;  %v4282_v3 = vsel %vm672_vm6, %v4281_v30, %v4224_v49  ;;  %v4367_v44 = vrot.slane %v12829_v47, 4  ;;  %v4355_v53 = vrot.slane %v12862_v62, 4 }
 0x49c   : > { %v4288_v26 = vperm.slane %v4282_v3, %v9951_v16  ;;  %v4376_v49 = vperm.slane %v4370_v7, %v9951_v16 }
 0x49d   : > { %v4284_v63 = vsel %vm672_vm6, %v4230_v11, %v4283_v4 }
 0x49e   : > { %v12822_v40 = vperm.slane %v4284_v63, %v9951_v16  ;;  %v4419_v30 = vrot.slane %v4376_v49, 4 }
 0x4a0   : > { %v4343_v45 = vrot.slane %v12822_v40, 4 }
 0x4a1   : > { %v4237_v34 = vpop.permute.xlu1 %4236 }
 0x4a2   : > { %v4233_v56 = vpop.permute.xlu0 %4232  ;;  %v4383_v31 = vrot.slane %v4237_v34, 4 }
 0x4a3   : > { %v4293_v43 = vrot.slane %v4233_v56, 4  ;;  %v4296_v33 = vsel %vm672_vm6, %v4233_v56, %v4295_v24 }
 0x4a4   : > { %v12837_v42 = vperm.slane %v4296_v33, %v9951_v16  ;;  %v4331_v33 = vrot.slane %v4288_v26, 4 }
 0x4a5   : > { %v4294_v54 = vsel %vm672_vm6, %v4293_v43, %v4227_v55 }
 0x4a6   : > { %v12842_v8 = vperm.slane %v4294_v54, %v9951_v16  ;;  %v4344_v35 = vsel %vm672_vm6, %v12837_v42, %v4343_v45  ;;  %v4341_v10 = vrot.slane %v12837_v42, 4 }
 0x4a7   : > { %v12848_v52 = vperm.slane %v4344_v35, %v9997_v57 }
 0x4a8   : > { %v4329_v23 = vrot.slane %v12842_v8, 4  ;;  %v4332_v38 = vsel %vm672_vm6, %v12842_v8, %v4331_v33 }
 0x4a9   : > { %v4246_v9 = vpop.permute.xlu1 %4245  ;;  %v4368_v61 = vsel %vm672_vm6, %v12848_v52, %v4367_v44 }
 0x4aa   : > { %v4243_v32 = vpop.permute.xlu0 %4242  ;;  %4525 = vrot.lane.b32.xlu1 %v4368_v61, %s9762_s24  ;;  %v4330_v50 = vsel %vm672_vm6, %v4329_v23, %v4288_v26  ;;  %v4395_v12 = vrot.slane %v4246_v9, 4  ;;  %v4342_v61 = vsel %vm672_vm6, %v4341_v10, %v12822_v40 }
 0x4ab   : > { %v4381_v25 = vrot.slane %v4243_v32, 4  ;;  %v4384_v2 = vsel %vm672_vm6, %v4243_v32, %v4383_v31  ;;  %v12868_v39 = vperm.slane %v4330_v50, %v9997_v57  ;;  %v4307_v32 = vrot.slane %v12832_v48, 4 }
 0x4ac   : > { %v12872_v6 = vperm.slane %v4384_v2, %v9951_v16  ;;  %v4317_v2 = vrot.slane %v12814_v1, 4 }
 0x4ad   : > { %v4382_v19 = vsel %vm672_vm6, %v4381_v25, %v4237_v34  ;;  %v4356_v29 = vsel %vm672_vm6, %v12868_v39, %v4355_v53  ;;  %v4348_v53 = vperm.slane %v4342_v61, %v9997_v57  ;;  %v4308_v40 = vsel %vm672_vm6, %v12819_v41, %v4307_v32 }
 0x4ae   : > { %v4388_v59 = vperm.slane %v4382_v19, %v9951_v16  ;;  %v4432_v0 = vsel %vm672_vm6, %v12872_v6, %v4431_v18  ;;  %v4353_v19 = vrot.slane %v12868_v39, 4  ;;  %v4429_v48 = vrot.slane %v12872_v6, 4 }
 0x4af   : > { %v12892_v37 = vperm.slane %v4432_v0, %v9997_v57  ;;  %v4318_v7 = vsel %vm672_vm6, %v4317_v2, %v12809_v17  ;;  %v4316_v39 = vperm.slane %v4308_v40, %v9997_v57 }
 0x4b0   : > { %v4417_v46 = vrot.slane %v4388_v59, 4  ;;  %v4420_v23 = vsel %vm672_vm6, %v4388_v59, %v4419_v30  ;;  %v4354_v18 = vsel %vm672_vm6, %v4353_v19, %v12862_v62  ;;  %v4324_v59 = vperm.slane %v4318_v7, %v9997_v57 }
 0x4b1   : > { %v4255_v36 = vpop.permute.xlu1 %4254  ;;  %v4479_v54 = vrot.slane %v12892_v37, 4  ;;  %v4428_v50 = vperm.slane %v4420_v23, %v9997_v57  ;;  %v4430_v41 = vsel %vm672_vm6, %v4429_v48, %v12865_v21 }
 0x4b2   : > { %v4405_v55 = vrot.slane %v4255_v36, 4  ;;  %v4252_v11 = vpop.permute.xlu0 %4251  ;;  %4501 = vrot.lane.b32.xlu1 %v4356_v29, %s9762_s24  ;;  %v4408_v15 = vsel %vm672_vm6, %v4255_v36, %v4407_v20  ;;  %v4418_v35 = vsel %vm672_vm6, %v4417_v46, %v4376_v49  ;;  %v4361_v20 = vrot.slane %v4348_v53, 4 }
 0x4b3   : > { %v4393_v58 = vrot.slane %v4252_v11, 4  ;;  %v4396_v4 = vsel %vm672_vm6, %v4252_v11, %v4395_v12  ;;  %v4416_v24 = vperm.slane %v4408_v15, %v9951_v16  ;;  %v4424_v31 = vperm.slane %v4418_v35, %v9997_v57 }
 0x4b4   : > { %v4406_v5 = vsel %vm672_vm6, %v4405_v55, %v4249_v28  ;;  %v4404_v14 = vperm.slane %v4396_v4, %v9951_v16  ;;  %v4340_v28 = vperm.slane %v4332_v38, %v9997_v57  ;;  %v4362_v17 = vsel %vm672_vm6, %v4361_v20, %v4324_v59 }
 0x4b5   : > { %v4412_v63 = vperm.slane %v4406_v5, %v9951_v16  ;;  %v4394_v51 = vsel %vm672_vm6, %v4393_v58, %v4246_v9  ;;  %v4453_v12 = vrot.slane %v4416_v24, 4  ;;  %v4467_v6 = vrot.slane %v4424_v31, 4 }
 0x4b6   : > { %v4400_v34 = vperm.slane %v4394_v51, %v9951_v16  ;;  %v4455_v56 = vrot.slane %v4404_v14, 4  ;;  %v4357_v1 = vrot.slane %v4340_v28, 4  ;;  %v4436_v29 = vperm.slane %v4430_v41, %v9997_v57 }
 0x4b7   : > { %v4441_v43 = vrot.slane %v4412_v63, 4  ;;  %v4454_v62 = vsel %vm672_vm6, %v4453_v12, %v4404_v14  ;;  %v4471_v11 = vrot.slane %v4428_v50, 4  ;;  %v4359_v58 = vrot.slane %v4316_v39, 4 }
 0x4b8   : > { %v4443_v60 = vrot.slane %v4400_v34, 4  ;;  %v4456_v45 = vsel %vm672_vm6, %v4416_v24, %v4455_v56  ;;  %v4358_v36 = vsel %vm672_vm6, %v4357_v1, %v4316_v39  ;;  %v4460_v55 = vperm.slane %v4454_v62, %v9997_v57 }
 0x4b9   : > { %v12899_v3 = vperm.slane %v4456_v45, %v9997_v57  ;;  %v4442_v27 = vsel %vm672_vm6, %v4441_v43, %v4400_v34  ;;  %v4475_v49 = vrot.slane %v4436_v29, 4  ;;  %v4360_v4 = vsel %vm672_vm6, %v4340_v28, %v4359_v58 }
 0x4ba   : > { %v4448_v44 = vperm.slane %v4442_v27, %v9997_v57  ;;  %v4444_v26 = vsel %vm672_vm6, %v4412_v63, %v4443_v60  ;;  %v4363_v5 = vrot.slane %v4324_v59, 4  ;;  %v4473_v46 = vrot.slane %v4460_v55, 4 }
 0x4bb   : > { %v4480_v42 = vsel %vm672_vm6, %v12899_v3, %v4479_v54  ;;  %v4452_v13 = vperm.slane %v4444_v26, %v9997_v57  ;;  %v4476_v15 = vsel %vm672_vm6, %v4460_v55, %v4475_v49  ;;  %v4477_v63 = vrot.slane %v12899_v3, 4 }
 0x4bc   : > { %4527 = vrot.lane.b32.xlu2 %v4480_v42, %s9762_s24  ;;  %v4465_v9 = vrot.slane %v4448_v44, 4  ;;  %v4468_v0 = vsel %vm672_vm6, %v4448_v44, %v4467_v6  ;;  %v4364_v14 = vsel %vm672_vm6, %v4348_v53, %v4363_v5  ;;  %v4474_v51 = vsel %vm672_vm6, %v4473_v46, %v4436_v29 }
 0x4bd   : > { %v4469_v25 = vrot.slane %v4452_v13, 4  ;;  %v4472_v21 = vsel %vm672_vm6, %v4452_v13, %v4471_v11  ;;  %v4478_v24 = vsel %vm672_vm6, %v4477_v63, %v12892_v37  ;;  %v4365_v34 = vrot.slane %v12848_v52, 4 }
 0x4be   : > { %v4466_v22 = vsel %vm672_vm6, %v4465_v9, %v4424_v31 }
 0x4bf   : > { %4499 = vrot.lane.b32.xlu0 %v4466_v22, %s9762_s24  ;;  %v4470_v8 = vsel %vm672_vm6, %v4469_v25, %v4428_v50  ;;  %v4366_v56 = vsel %vm672_vm6, %v4365_v34, %v12829_v47 }
 0x4c0   : > { %4507 = vrot.lane.b32.xlu1 %v4470_v8, %s9762_s24 }
 0x4c4   : > { %4497 = vrot.lane.b32.xlu2 %v4354_v18, %s9762_s24 }
 0x4c7   : > { %4505 = vrot.lane.b32.xlu0 %v4358_v36, %s9762_s24 }
 0x4c8   : > { %4513 = vrot.lane.b32.xlu1 %v4362_v17, %s9762_s24 }
 0x4cc   : > { %4503 = vrot.lane.b32.xlu2 %v4468_v0, %s9762_s24 }
 0x4cf   : > { %4511 = vrot.lane.b32.xlu0 %v4472_v21, %s9762_s24 }
 0x4d0   : > { %4519 = vrot.lane.b32.xlu1 %v4476_v15, %s9762_s24 }
 0x4d4   : > { %4509 = vrot.lane.b32.xlu2 %v4360_v4, %s9762_s24 }
 0x4d7   : > { %4517 = vrot.lane.b32.xlu0 %v4364_v14, %s9762_s24 }
 0x4dc   : > { %4515 = vrot.lane.b32.xlu2 %v4474_v51, %s9762_s24 }
 0x4df   : > { %4523 = vrot.lane.b32.xlu0 %v4478_v24, %s9762_s24 }
 0x4e4   : > { %4521 = vrot.lane.b32.xlu2 %v4366_v56, %s9762_s24 }
 0x516   : > { %v4528_v30 = vpop.permute.xlu2 %4527 }
 0x517   : > { %4560 = vst.msk [vmem:[#allocation3 + $0xb1] sm:$0xff] %vm322_vm0, %v4528_v30 }
 0x518   : > { %4576 = vst.msk [vmem:[#allocation3 + $0xb3] sm:$0x40] %vm348_vm1, %v4528_v30 }
 0x51c   : > { %v4526_v43 = vpop.permute.xlu1 %4525 }
 0x51d   : > { %4559 = vst.msk [vmem:[#allocation3 + $0xa9] sm:$0xff] %vm322_vm0, %v4526_v43 }
 0x51e   : > { %4568 = vst.msk [vmem:[#allocation3 + $0xa7] sm:$0x2] %vm339_vm2, %v4526_v43  ;;  %v4498_v37 = vpop.permute.xlu2 %4497 }
 0x51f   : > { %4545 = vst.msk [vmem:[#allocation3 + $0x1] sm:$0xff] %vm322_vm0, %v4498_v37  ;;  %v4600_v33 = vld [vmem:[#allocation3 + $0xb8] sm:$0x3] }
 0x520   : > { %4561 = vst.msk [vmem:[#allocation3 - $0x1] sm:$0x2] %vm339_vm2, %v4498_v37  ;;  %4671 = vrot.lane.b32.xlu2 %v4600_v33, %s9764_s29 }
 0x524   : > { %v4502_v47 = vpop.permute.xlu1 %4501  ;;  %v4599_v52 = vld [vmem:[#allocation3 + $0xb0] sm:$0xff] }
 0x525   : > { %4547 = vst.msk [vmem:[#allocation3 + $0x19] sm:$0xff] %vm322_vm0, %v4502_v47  ;;  %v4598_v10 = vld [vmem:[#allocation3 + $0xa8] sm:$0xff]  ;;  %4669 = vrot.lane.b32.xlu1 %v4599_v52, %s9764_s29 }
 0x526   : > { %4562 = vst.msk [vmem:[#allocation3 + $0x17] sm:$0x2] %vm339_vm2, %v4502_v47  ;;  %4667 = vrot.lane.b32.xlu0 %v4598_v10, %s9764_s29  ;;  %v4504_v60 = vpop.permute.xlu2 %4503 }
 0x527   : > { %4548 = vst.msk [vmem:[#allocation3 + $0x21] sm:$0xff] %vm322_vm0, %v4504_v60  ;;  %v4577_v45 = vld [vmem:[#allocation3] sm:$0xff] }
 0x528   : > { %4570 = vst.msk [vmem:[#allocation3 + $0x23] sm:$0x40] %vm348_vm1, %v4504_v60 }
 0x52d   : > { %v4580_v27 = vld [vmem:[#allocation3 + $0x18] sm:$0xff] }
 0x52e   : > { %4625 = vrot.lane.b32.xlu0 %v4577_v45, %s9764_s29  ;;  %v4510_v3 = vpop.permute.xlu2 %4509  ;;  %v4581_v9 = vld [vmem:[#allocation3 + $0x20] sm:$0xff] }
 0x52f   : > { %4551 = vst.msk [vmem:[#allocation3 + $0x49] sm:$0xff] %vm322_vm0, %v4510_v3  ;;  %v4582_v32 = vld [vmem:[#allocation3 + $0x28] sm:$0x3] }
 0x530   : > { %4564 = vst.msk [vmem:[#allocation3 + $0x47] sm:$0x2] %vm339_vm2, %v4510_v3 }
 0x531   : > { %v4500_v54 = vpop.permute.xlu0 %4499 }
 0x532   : > { %4546 = vst.msk [vmem:[#allocation3 + $0x9] sm:$0xff] %vm322_vm0, %v4500_v54  ;;  %v4508_v35 = vpop.permute.xlu1 %4507 }
 0x533   : > { %4569 = vst.msk [vmem:[#allocation3 + $0xb] sm:$0x40] %vm348_vm1, %v4500_v54 }
 0x534   : > { %4550 = vst.msk [vmem:[#allocation3 + $0x39] sm:$0xff] %vm322_vm0, %v4508_v35 }
 0x535   : > { %4571 = vst.msk [vmem:[#allocation3 + $0x3b] sm:$0x40] %vm348_vm1, %v4508_v35 }
 0x536   : > { %4631 = vrot.lane.b32.xlu0 %v4580_v27, %s9764_s29  ;;  %v4516_v44 = vpop.permute.xlu2 %4515 }
 0x537   : > { %4554 = vst.msk [vmem:[#allocation3 + $0x69] sm:$0xff] %vm322_vm0, %v4516_v44  ;;  %v4586_v28 = vld [vmem:[#allocation3 + $0x48] sm:$0xff] }
 0x538   : > { %4573 = vst.msk [vmem:[#allocation3 + $0x6b] sm:$0x40] %vm348_vm1, %v4516_v44 }
 0x539   : > { %v4506_v23 = vpop.permute.xlu0 %4505  ;;  %v4578_v26 = vld [vmem:[#allocation3 + $0x8] sm:$0xff] }
 0x53a   : > { %4549 = vst.msk [vmem:[#allocation3 + $0x31] sm:$0xff] %vm322_vm0, %v4506_v23  ;;  %v4514_v42 = vpop.permute.xlu1 %4513  ;;  %v4579_v13 = vld [vmem:[#allocation3 + $0x10] sm:$0x3]  ;;  %4627 = vrot.lane.b32.xlu1 %v4578_v26, %s9764_s29 }
 0x53b   : > { %4563 = vst.msk [vmem:[#allocation3 + $0x2f] sm:$0x2] %vm339_vm2, %v4506_v23  ;;  %4629 = vrot.lane.b32.xlu2 %v4579_v13, %s9764_s29 }
 0x53c   : > { %4553 = vst.msk [vmem:[#allocation3 + $0x61] sm:$0xff] %vm322_vm0, %v4514_v42  ;;  %v4585_v22 = vld [vmem:[#allocation3 + $0x40] sm:$0x3] }
 0x53d   : > { %4565 = vst.msk [vmem:[#allocation3 + $0x5f] sm:$0x2] %vm339_vm2, %v4514_v42 }
 0x53e   : > { %v4522_v38 = vpop.permute.xlu2 %4521 }
 0x53f   : > { %4557 = vst.msk [vmem:[#allocation3 + $0x91] sm:$0xff] %vm322_vm0, %v4522_v38  ;;  %v4591_v1 = vld [vmem:[#allocation3 + $0x70] sm:$0x3] }
 0x540   : > { %4567 = vst.msk [vmem:[#allocation3 + $0x8f] sm:$0x2] %vm339_vm2, %v4522_v38 }
 0x541   : > { %v4512_v31 = vpop.permute.xlu0 %4511  ;;  %v4584_v2 = vld [vmem:[#allocation3 + $0x38] sm:$0xff] }
 0x542   : > { %4552 = vst.msk [vmem:[#allocation3 + $0x51] sm:$0xff] %vm322_vm0, %v4512_v31  ;;  %v4520_v61 = vpop.permute.xlu1 %4519  ;;  %v4583_v50 = vld [vmem:[#allocation3 + $0x30] sm:$0xff]  ;;  %4633 = vrot.lane.b32.xlu1 %v4581_v9, %s9764_s29 }
 0x543   : > { %4572 = vst.msk [vmem:[#allocation3 + $0x53] sm:$0x40] %vm348_vm1, %v4512_v31  ;;  %4635 = vrot.lane.b32.xlu2 %v4582_v32, %s9764_s29  ;;  %4637 = vrot.lane.b32.xlu0 %v4583_v50, %s9764_s29  ;;  %v4590_v48 = vld [vmem:[#allocation3 + $0x68] sm:$0xff] }
 0x544   : > { %4556 = vst.msk [vmem:[#allocation3 + $0x81] sm:$0xff] %vm322_vm0, %v4520_v61  ;;  %v4589_v40 = vld [vmem:[#allocation3 + $0x60] sm:$0xff] }
 0x545   : > { %4574 = vst.msk [vmem:[#allocation3 + $0x83] sm:$0x40] %vm348_vm1, %v4520_v61 }
 0x547   : > { %v4595_v20 = vld [vmem:[#allocation3 + $0x90] sm:$0xff] }
 0x549   : > { %v4518_v25 = vpop.permute.xlu0 %4517  ;;  %v4587_v19 = vld [vmem:[#allocation3 + $0x50] sm:$0xff] }
 0x54a   : > { %4555 = vst.msk [vmem:[#allocation3 + $0x79] sm:$0xff] %vm322_vm0, %v4518_v25  ;;  %4639 = vrot.lane.b32.xlu1 %v4584_v2, %s9764_s29  ;;  %v4588_v53 = vld [vmem:[#allocation3 + $0x58] sm:$0x3] }
 0x54b   : > { %4566 = vst.msk [vmem:[#allocation3 + $0x77] sm:$0x2] %vm339_vm2, %v4518_v25  ;;  %4641 = vrot.lane.b32.xlu2 %v4585_v22, %s9764_s29  ;;  %4643 = vrot.lane.b32.xlu0 %v4586_v28, %s9764_s29 }
 0x54c   : > { %v4594_v12 = vld [vmem:[#allocation3 + $0x88] sm:$0x3] }
 0x551   : > { %v4524_v8 = vpop.permute.xlu0 %4523  ;;  %v4593_v18 = vld [vmem:[#allocation3 + $0x80] sm:$0xff] }
 0x552   : > { %4558 = vst.msk [vmem:[#allocation3 + $0x99] sm:$0xff] %vm322_vm0, %v4524_v8  ;;  %4645 = vrot.lane.b32.xlu1 %v4587_v19, %s9764_s29  ;;  %v4592_v7 = vld [vmem:[#allocation3 + $0x78] sm:$0xff]  ;;  %vm16555_vm0 = vcmask 146568  }
 0x553   : > { %4575 = vst.msk [vmem:[#allocation3 + $0x9b] sm:$0x40] %vm348_vm1, %v4524_v8  ;;  %4647 = vrot.lane.b32.xlu2 %v4588_v53, %s9764_s29  ;;  %4649 = vrot.lane.b32.xlu0 %v4589_v40, %s9764_s29  ;;  %vm16556_vm1 = vmmov %vm16555_vm0 }
 0x554   : > { %vm16558_vm2 = vmmov %vm16555_vm0 }
 0x555   : > { %vm16561_vm5 = vmmov %vm16555_vm0 }
 0x556   : > { %vm16562_vm15 = vmmov %vm16555_vm0 }
 0x559   : > { %v4596_v39 = vld [vmem:[#allocation3 + $0x98] sm:$0xff] }
 0x55a   : > { %4651 = vrot.lane.b32.xlu1 %v4590_v48, %s9764_s29  ;;  %v4597_v59 = vld [vmem:[#allocation3 + $0xa0] sm:$0x3] }
 0x55b   : > { %4653 = vrot.lane.b32.xlu2 %v4591_v1, %s9764_s29  ;;  %4655 = vrot.lane.b32.xlu0 %v4592_v7, %s9764_s29 }
 0x562   : > { %4657 = vrot.lane.b32.xlu1 %v4593_v18, %s9764_s29 }
 0x563   : > { %4661 = vrot.lane.b32.xlu0 %v4595_v20, %s9764_s29  ;;  %4659 = vrot.lane.b32.xlu2 %v4594_v12, %s9764_s29 }
 0x56a   : > { %4663 = vrot.lane.b32.xlu1 %v4596_v39, %s9764_s29 }
 0x56b   : > { %4665 = vrot.lane.b32.xlu2 %v4597_v59, %s9764_s29 }
 0x57a   : > { %v4672_v36 = vpop.permute.xlu2 %4671 }
 0x57b   : > { %4720 = vst.msk [vmem:[#allocation3 + $0xb8] sm:$0x3] %vm480_vm4, %v4672_v36 }
 0x582   : > { %v4744_v41 = vld [vmem:[#allocation3 + $0xb8] sm:$0x3] }
 0x583   : > { %4815 = vrot.lane.b32.xlu2 %v4744_v41, %s9765_s30 }
 0x595   : > { %v4630_v17 = vpop.permute.xlu2 %4629 }
 0x596   : > { %4699 = vst.msk [vmem:[#allocation3 + $0x10] sm:$0x3] %vm480_vm4, %v4630_v17 }
 0x597   : > { %v4670_v62 = vpop.permute.xlu1 %4669 }
 0x598   : > { %v4668_v6 = vpop.permute.xlu0 %4667  ;;  %4719 = vst.msk [vmem:[#allocation3 + $0xb0] sm:$0xff] %vm477_vm3, %v4670_v62 }
 0x599   : > { %4718 = vst.msk [vmem:[#allocation3 + $0xa8] sm:$0xff] %vm477_vm3, %v4668_v6 }
 0x59d   : > { %v4636_v29 = vpop.permute.xlu2 %4635  ;;  %v4723_v0 = vld [vmem:[#allocation3 + $0x10] sm:$0x3] }
 0x59e   : > { %4702 = vst.msk [vmem:[#allocation3 + $0x28] sm:$0x3] %vm480_vm4, %v4636_v29  ;;  %4773 = vrot.lane.b32.xlu2 %v4723_v0, %s9765_s30 }
 0x59f   : > { %v4743_v55 = vld [vmem:[#allocation3 + $0xb0] sm:$0xff] }
 0x5a0   : > { %v4626_v11 = vpop.permute.xlu0 %4625  ;;  %v4742_v49 = vld [vmem:[#allocation3 + $0xa8] sm:$0xff]  ;;  %4813 = vrot.lane.b32.xlu1 %v4743_v55, %s9765_s30 }
 0x5a1   : > { %4697 = vst.msk [vmem:[#allocation3] sm:$0xff] %vm477_vm3, %v4626_v11  ;;  %4811 = vrot.lane.b32.xlu0 %v4742_v49, %s9765_s30 }
 0x5a5   : > { %v4642_v21 = vpop.permute.xlu2 %4641  ;;  %v4726_v15 = vld [vmem:[#allocation3 + $0x28] sm:$0x3] }
 0x5a6   : > { %4705 = vst.msk [vmem:[#allocation3 + $0x40] sm:$0x3] %vm480_vm4, %v4642_v21  ;;  %4779 = vrot.lane.b32.xlu2 %v4726_v15, %s9765_s30 }
 0x5a8   : > { %v4632_v58 = vpop.permute.xlu0 %4631  ;;  %v4721_v4 = vld [vmem:[#allocation3] sm:$0xff] }
 0x5a9   : > { %4700 = vst.msk [vmem:[#allocation3 + $0x18] sm:$0xff] %vm477_vm3, %v4632_v58  ;;  %4769 = vrot.lane.b32.xlu0 %v4721_v4, %s9765_s30 }
 0x5ac   : > { %v4628_v5 = vpop.permute.xlu1 %4627 }
 0x5ad   : > { %v4648_v14 = vpop.permute.xlu2 %4647  ;;  %4698 = vst.msk [vmem:[#allocation3 + $0x8] sm:$0xff] %vm477_vm3, %v4628_v5  ;;  %v4729_v46 = vld [vmem:[#allocation3 + $0x40] sm:$0x3] }
 0x5ae   : > { %4708 = vst.msk [vmem:[#allocation3 + $0x58] sm:$0x3] %vm480_vm4, %v4648_v14  ;;  %4785 = vrot.lane.b32.xlu2 %v4729_v46, %s9765_s30 }
 0x5b0   : > { %v4724_v63 = vld [vmem:[#allocation3 + $0x18] sm:$0xff] }
 0x5b1   : > { %4775 = vrot.lane.b32.xlu0 %v4724_v63, %s9765_s30 }
 0x5b4   : > { %v4634_v51 = vpop.permute.xlu1 %4633  ;;  %v4722_v24 = vld [vmem:[#allocation3 + $0x8] sm:$0xff] }
 0x5b5   : > { %v4654_v34 = vpop.permute.xlu2 %4653  ;;  %v4638_v56 = vpop.permute.xlu0 %4637  ;;  %4701 = vst.msk [vmem:[#allocation3 + $0x20] sm:$0xff] %vm477_vm3, %v4634_v51  ;;  %v4732_v30 = vld [vmem:[#allocation3 + $0x58] sm:$0x3]  ;;  %4771 = vrot.lane.b32.xlu1 %v4722_v24, %s9765_s30 }
 0x5b6   : > { %4711 = vst.msk [vmem:[#allocation3 + $0x70] sm:$0x3] %vm480_vm4, %v4654_v34  ;;  %4791 = vrot.lane.b32.xlu2 %v4732_v30, %s9765_s30 }
 0x5b7   : > { %4703 = vst.msk [vmem:[#allocation3 + $0x30] sm:$0xff] %vm477_vm3, %v4638_v56 }
 0x5bc   : > { %v4640_v43 = vpop.permute.xlu1 %4639  ;;  %v4725_v37 = vld [vmem:[#allocation3 + $0x20] sm:$0xff] }
 0x5bd   : > { %v4644_v33 = vpop.permute.xlu0 %4643  ;;  %v4660_v47 = vpop.permute.xlu2 %4659  ;;  %4704 = vst.msk [vmem:[#allocation3 + $0x38] sm:$0xff] %vm477_vm3, %v4640_v43  ;;  %v4735_v52 = vld [vmem:[#allocation3 + $0x70] sm:$0x3]  ;;  %4777 = vrot.lane.b32.xlu1 %v4725_v37, %s9765_s30 }
 0x5be   : > { %4706 = vst.msk [vmem:[#allocation3 + $0x48] sm:$0xff] %vm477_vm3, %v4644_v33  ;;  %v4727_v10 = vld [vmem:[#allocation3 + $0x30] sm:$0xff]  ;;  %4797 = vrot.lane.b32.xlu2 %v4735_v52, %s9765_s30 }
 0x5bf   : > { %4714 = vst.msk [vmem:[#allocation3 + $0x88] sm:$0x3] %vm480_vm4, %v4660_v47  ;;  %4781 = vrot.lane.b32.xlu0 %v4727_v10, %s9765_s30 }
 0x5c4   : > { %v4646_v60 = vpop.permute.xlu1 %4645  ;;  %v4728_v45 = vld [vmem:[#allocation3 + $0x38] sm:$0xff] }
 0x5c5   : > { %v4650_v3 = vpop.permute.xlu0 %4649  ;;  %v4666_v54 = vpop.permute.xlu2 %4665  ;;  %4707 = vst.msk [vmem:[#allocation3 + $0x50] sm:$0xff] %vm477_vm3, %v4646_v60  ;;  %v4730_v35 = vld [vmem:[#allocation3 + $0x48] sm:$0xff]  ;;  %4783 = vrot.lane.b32.xlu1 %v4728_v45, %s9765_s30 }
 0x5c6   : > { %4709 = vst.msk [vmem:[#allocation3 + $0x60] sm:$0xff] %vm477_vm3, %v4650_v3  ;;  %v4738_v27 = vld [vmem:[#allocation3 + $0x88] sm:$0x3] }
 0x5c7   : > { %4717 = vst.msk [vmem:[#allocation3 + $0xa0] sm:$0x3] %vm480_vm4, %v4666_v54  ;;  %4787 = vrot.lane.b32.xlu0 %v4730_v35, %s9765_s30  ;;  %4803 = vrot.lane.b32.xlu2 %v4738_v27, %s9765_s30  ;;  %vm16560_vm4 = vmmov %vm16555_vm0 }
 0x5cc   : > { %v4652_v44 = vpop.permute.xlu1 %4651  ;;  %v4731_v23 = vld [vmem:[#allocation3 + $0x50] sm:$0xff] }
 0x5cd   : > { %v4656_v26 = vpop.permute.xlu0 %4655  ;;  %4710 = vst.msk [vmem:[#allocation3 + $0x68] sm:$0xff] %vm477_vm3, %v4652_v44  ;;  %v4733_v42 = vld [vmem:[#allocation3 + $0x60] sm:$0xff]  ;;  %4789 = vrot.lane.b32.xlu1 %v4731_v23, %s9765_s30 }
 0x5ce   : > { %4712 = vst.msk [vmem:[#allocation3 + $0x78] sm:$0xff] %vm477_vm3, %v4656_v26  ;;  %v4741_v13 = vld [vmem:[#allocation3 + $0xa0] sm:$0x3] }
 0x5cf   : > { %4793 = vrot.lane.b32.xlu0 %v4733_v42, %s9765_s30  ;;  %4809 = vrot.lane.b32.xlu2 %v4741_v13, %s9765_s30 }
 0x5d4   : > { %v4658_v38 = vpop.permute.xlu1 %4657  ;;  %v4734_v31 = vld [vmem:[#allocation3 + $0x68] sm:$0xff] }
 0x5d5   : > { %v4662_v9 = vpop.permute.xlu0 %4661  ;;  %4713 = vst.msk [vmem:[#allocation3 + $0x80] sm:$0xff] %vm477_vm3, %v4658_v38  ;;  %v4736_v61 = vld [vmem:[#allocation3 + $0x78] sm:$0xff]  ;;  %4795 = vrot.lane.b32.xlu1 %v4734_v31, %s9765_s30 }
 0x5d6   : > { %4715 = vst.msk [vmem:[#allocation3 + $0x90] sm:$0xff] %vm477_vm3, %v4662_v9 }
 0x5d7   : > { %4799 = vrot.lane.b32.xlu0 %v4736_v61, %s9765_s30 }
 0x5dc   : > { %v4664_v32 = vpop.permute.xlu1 %4663  ;;  %v4737_v50 = vld [vmem:[#allocation3 + $0x80] sm:$0xff] }
 0x5dd   : > { %v4816_v25 = vpop.permute.xlu2 %4815  ;;  %4716 = vst.msk [vmem:[#allocation3 + $0x98] sm:$0xff] %vm477_vm3, %v4664_v32  ;;  %v4739_v2 = vld [vmem:[#allocation3 + $0x90] sm:$0xff]  ;;  %4801 = vrot.lane.b32.xlu1 %v4737_v50, %s9765_s30  ;;  %vm16559_vm3 = vmmov %vm16555_vm0 }
 0x5de   : > { %4864 = vst.msk [vmem:[#allocation3 + $0xb8] sm:$0x3] %vm626_vm7, %v4816_v25 }
 0x5df   : > { %4805 = vrot.lane.b32.xlu0 %v4739_v2, %s9765_s30 }
 0x5e4   : > { %v4740_v22 = vld [vmem:[#allocation3 + $0x98] sm:$0xff] }
 0x5e5   : > { %4807 = vrot.lane.b32.xlu1 %v4740_v22, %s9765_s30 }
 0x5f8   : > { %v4774_v28 = vpop.permute.xlu2 %4773 }
 0x5f9   : > { %4843 = vst.msk [vmem:[#allocation3 + $0x10] sm:$0x3] %vm626_vm7, %v4774_v28 }
 0x600   : > { %v4780_v8 = vpop.permute.xlu2 %4779 }
 0x601   : > { %4846 = vst.msk [vmem:[#allocation3 + $0x28] sm:$0x3] %vm626_vm7, %v4780_v8 }
 0x608   : > { %v4786_v19 = vpop.permute.xlu2 %4785 }
 0x609   : > { %4849 = vst.msk [vmem:[#allocation3 + $0x40] sm:$0x3] %vm626_vm7, %v4786_v19 }
 0x610   : > { %v4792_v53 = vpop.permute.xlu2 %4791 }
 0x611   : > { %4852 = vst.msk [vmem:[#allocation3 + $0x58] sm:$0x3] %vm626_vm7, %v4792_v53 }
 0x612   : > { %v4814_v40 = vpop.permute.xlu1 %4813 }
 0x613   : > { %v4812_v48 = vpop.permute.xlu0 %4811  ;;  %4863 = vst.msk [vmem:[#allocation3 + $0xb0] sm:$0xff] %vm16555_vm0, %v4814_v40 }
 0x614   : > { %4862 = vst.msk [vmem:[#allocation3 + $0xa8] sm:$0xff] %vm16556_vm1, %v4812_v48  ;;  %vm16564_vm1 = vmmov %vm16555_vm0 }
 0x618   : > { %v4798_v1 = vpop.permute.xlu2 %4797 }
 0x619   : > { %4855 = vst.msk [vmem:[#allocation3 + $0x70] sm:$0x3] %vm626_vm7, %v4798_v1 }
 0x61a   : > { %v13077_v7 = vld [vmem:[#allocation3 + $0xb1] sm:$0xff] }
 0x61b   : > { %16557 = vst [vmem:[#allocation35_spill] sm:$0xff] %v13077_v7  ;;  %v13079_v18 = vld [vmem:[#allocation3 + $0xb0] sm:$0xff]  ;;  %v4770_v20 = vpop.permute.xlu0 %4769  ;;  %v13083_v39 = vld [vmem:[#allocation3 + $0xa8] sm:$0xff] }
 0x61c   : > { %v13081_v12 = vld [vmem:[#allocation3 + $0xa9] sm:$0xff]  ;;  %4841 = vst.msk [vmem:[#allocation3] sm:$0xff] %vm16558_vm2, %v4770_v20  ;;  %v9199_v36 = vpack.i.bf16 %v13079_v18, %v13083_v39  ;;  %v8013_v0 = vld [vmem:[#allocation3 + $0xb2] sm:$0xff]  ;;  %vm16565_vm2 = vmmov %vm16555_vm0 }
 0x61d   : > { %v9209_v59 = vpack.i.bf16 %v13077_v7, %v13081_v12  ;;  %v8012_v29 = vld [vmem:[#allocation3 + $0xaa] sm:$0xff] }
 0x61e   : > { %9200 = vrot.lane.b32.xlu1 %v9199_v36, %s9768_s6  ;;  %v9219_v55 = vpack.i.bf16 %v8013_v0, %v8012_v29 }
 0x61f   : > { %9210 = vrot.lane.b32.xlu2 %v9209_v59, %s9768_s6 }
 0x621   : > { %v4804_v41 = vpop.permute.xlu2 %4803 }
 0x622   : > { %4858 = vst.msk [vmem:[#allocation3 + $0x88] sm:$0x3] %vm626_vm7, %v4804_v41 }
 0x623   : > { %v4776_v17 = vpop.permute.xlu0 %4775  ;;  %v13100_v49 = vld [vmem:[#allocation3] sm:$0xff] }
 0x624   : > { %4844 = vst.msk [vmem:[#allocation3 + $0x18] sm:$0xff] %vm16559_vm3, %v4776_v17  ;;  %vm16566_vm3 = vmmov %vm16555_vm0 }
 0x626   : > { %9205 = vrot.lane.b32.xlu1 %v9199_v36, %s9764_s29 }
 0x627   : > { %9215 = vrot.lane.b32.xlu2 %v9209_v59, %s9764_s29  ;;  %v4772_v62 = vpop.permute.xlu1 %4771 }
 0x628   : > { %4842 = vst.msk [vmem:[#allocation3 + $0x8] sm:$0xff] %vm16560_vm4, %v4772_v62  ;;  %vm16567_vm4 = vmmov %vm16555_vm0 }
 0x629   : > { %v4810_v6 = vpop.permute.xlu2 %4809 }
 0x62a   : > { %4861 = vst.msk [vmem:[#allocation3 + $0xa0] sm:$0x3] %vm626_vm7, %v4810_v6  ;;  %vm16563_vm7 = vmmov %vm16555_vm0 }
 0x62b   : > { %v13109_v5 = vld [vmem:[#allocation3 + $0x18] sm:$0xff] }
 0x62e   : > { %9225 = vrot.lane.b32.xlu1 %v9219_v55, %s9768_s6 }
 0x62f   : > { %9220 = vrot.lane.b32.xlu2 %v9219_v55, %s9764_s29  ;;  %v4778_v11 = vpop.permute.xlu1 %4777  ;;  %v13102_v21 = vld [vmem:[#allocation3 + $0x8] sm:$0xff] }
 0x630   : > { %4845 = vst.msk [vmem:[#allocation3 + $0x20] sm:$0xff] %vm16561_vm5, %v4778_v11  ;;  %v9229_v15 = vpack.i.bf16 %v13102_v21, %v13100_v49  ;;  %vm16568_vm5 = vmmov %vm16555_vm0  ;;  %v13163_v38 = vld [vmem:[#allocation3 + $0x1] sm:$0xff]  ;;  %v13165_v31 = vld [vmem:[#allocation3 + $0x9] sm:$0xff] }
 0x631   : > { %v4782_v58 = vpop.permute.xlu0 %4781  ;;  %16571 = vst [vmem:[#allocation11_spill] sm:$0xff] %v13165_v31  ;;  %v9299_v9 = vpack.i.bf16 %v13165_v31, %v13163_v38 }
 0x632   : > { %4847 = vst.msk [vmem:[#allocation3 + $0x30] sm:$0xff] %vm16562_vm15, %v4782_v58  ;;  %9230 = vrot.lane.b32.xlu0 %v9229_v15, %s9768_s6  ;;  %vm16569_vm15 = vmmov %vm16555_vm0  ;;  %v7998_v58 = vld [vmem:[#allocation3 + $0x2] sm:$0xff] }
 0x637   : > { %v4784_v4 = vpop.permute.xlu1 %4783  ;;  %v13111_v14 = vld [vmem:[#allocation3 + $0x20] sm:$0xff] }
 0x638   : > { %4848 = vst.msk [vmem:[#allocation3 + $0x38] sm:$0xff] %vm16563_vm7, %v4784_v4  ;;  %v9234_v46 = vpack.i.bf16 %v13111_v14, %v13109_v5  ;;  %vm16570_vm7 = vmmov %vm16555_vm0  ;;  %v13176_v50 = vld [vmem:[#allocation3 + $0x19] sm:$0xff]  ;;  %v13178_v25 = vld [vmem:[#allocation3 + $0x21] sm:$0xff] }
 0x639   : > { %v4788_v63 = vpop.permute.xlu0 %4787  ;;  %v13118_v24 = vld [vmem:[#allocation3 + $0x30] sm:$0xff]  ;;  %16573 = vst [vmem:[#allocation16_spill] sm:$0xff] %v13178_v25  ;;  %v9304_v22 = vpack.i.bf16 %v13178_v25, %v13176_v50 }
 0x63a   : > { %4850 = vst.msk [vmem:[#allocation3 + $0x48] sm:$0xff] %vm16555_vm0, %v4788_v63  ;;  %9235 = vrot.lane.b32.xlu1 %v9234_v46, %s9768_s6  ;;  %v7999_v63 = vld [vmem:[#allocation3 + $0xa] sm:$0xff]  ;;  %vm16815_vm0 = vcmask 1043456  }
 0x63f   : > { %v4790_v51 = vpop.permute.xlu1 %4789  ;;  %v13120_v34 = vld [vmem:[#allocation3 + $0x38] sm:$0xff] }
 0x640   : > { %4851 = vst.msk [vmem:[#allocation3 + $0x50] sm:$0xff] %vm16564_vm1, %v4790_v51  ;;  %v9239_v56 = vpack.i.bf16 %v13120_v34, %v13118_v24  ;;  %v13204_v20 = vld [vmem:[#allocation3 + $0x31] sm:$0xff]  ;;  %v13206_v59 = vld [vmem:[#allocation3 + $0x39] sm:$0xff]  ;;  %vm16816_vm1 = vmmov %vm16815_vm0 }
 0x641   : > { %v4794_v30 = vpop.permute.xlu0 %4793  ;;  %v13127_v37 = vld [vmem:[#allocation3 + $0x48] sm:$0xff]  ;;  %v9309_v41 = vpack.i.bf16 %v13206_v59, %v13204_v20 }
 0x642   : > { %4853 = vst.msk [vmem:[#allocation3 + $0x60] sm:$0xff] %vm16565_vm2, %v4794_v30  ;;  %9240 = vrot.lane.b32.xlu2 %v9239_v56, %s9768_s6  ;;  %vm16824_vm2 = vcmask 64512  }
 0x647   : > { %v4796_v43 = vpop.permute.xlu1 %4795  ;;  %v13129_v33 = vld [vmem:[#allocation3 + $0x50] sm:$0xff] }
 0x648   : > { %4854 = vst.msk [vmem:[#allocation3 + $0x68] sm:$0xff] %vm16566_vm3, %v4796_v43  ;;  %v9244_v47 = vpack.i.bf16 %v13129_v33, %v13127_v37  ;;  %v13172_v61 = vld [vmem:[#allocation3 + $0x49] sm:$0xff]  ;;  %v13174_v32 = vld [vmem:[#allocation3 + $0x51] sm:$0xff]  ;;  %vm16825_vm3 = vmmov %vm16824_vm2 }
 0x649   : > { %v4800_v52 = vpop.permute.xlu0 %4799  ;;  %v13136_v60 = vld [vmem:[#allocation3 + $0x60] sm:$0xff]  ;;  %16572 = vst [vmem:[#allocation9_spill] sm:$0xff] %v13174_v32  ;;  %v9314_v2 = vpack.i.bf16 %v13174_v32, %v13172_v61  ;;  %v8004_v51 = vld [vmem:[#allocation3 + $0x4a] sm:$0xff] }
 0x64a   : > { %4856 = vst.msk [vmem:[#allocation3 + $0x78] sm:$0xff] %vm16567_vm4, %v4800_v52  ;;  %9245 = vrot.lane.b32.xlu0 %v9244_v47, %s9768_s6  ;;  %v7586_v52 = vld [vmem:[#allocation3 + $0x22] sm:$0xff]  ;;  %vm16836_vm4 = vmmov %vm16815_vm0 }
 0x64f   : > { %v4802_v10 = vpop.permute.xlu1 %4801  ;;  %v13138_v45 = vld [vmem:[#allocation3 + $0x68] sm:$0xff] }
 0x650   : > { %4857 = vst.msk [vmem:[#allocation3 + $0x80] sm:$0xff] %vm16568_vm5, %v4802_v10  ;;  %v9249_v3 = vpack.i.bf16 %v13138_v45, %v13136_v60  ;;  %v13187_v28 = vld [vmem:[#allocation3 + $0x61] sm:$0xff]  ;;  %v13189_v8 = vld [vmem:[#allocation3 + $0x69] sm:$0xff]  ;;  %v8002_v10 = vld [vmem:[#allocation3 + $0x32] sm:$0xff] }
 0x651   : > { %v4806_v54 = vpop.permute.xlu0 %4805  ;;  %v13145_v27 = vld [vmem:[#allocation3 + $0x78] sm:$0xff]  ;;  %16574 = vst [vmem:[#allocation6_spill] sm:$0xff] %v13189_v8  ;;  %v9319_v48 = vpack.i.bf16 %v13189_v8, %v13187_v28  ;;  %vm16838_vm5 = vmmov %vm16815_vm0 }
 0x652   : > { %4859 = vst.msk [vmem:[#allocation3 + $0x90] sm:$0xff] %vm16569_vm15, %v4806_v54  ;;  %9250 = vrot.lane.b32.xlu1 %v9249_v3, %s9768_s6  ;;  %v7591_v54 = vld [vmem:[#allocation3 + $0x62] sm:$0xff]  ;;  %vm16841_vm15 = vmmov %vm16815_vm0 }
 0x657   : > { %v4808_v35 = vpop.permute.xlu1 %4807  ;;  %v13147_v44 = vld [vmem:[#allocation3 + $0x80] sm:$0xff] }
 0x658   : > { %4860 = vst.msk [vmem:[#allocation3 + $0x98] sm:$0xff] %vm16570_vm7, %v4808_v35  ;;  %v9254_v23 = vpack.i.bf16 %v13147_v44, %v13145_v27  ;;  %v13215_v17 = vld [vmem:[#allocation3 + $0x79] sm:$0xff]  ;;  %v13217_v62 = vld [vmem:[#allocation3 + $0x81] sm:$0xff]  ;;  %v7592_v35 = vld [vmem:[#allocation3 + $0x6a] sm:$0xff] }
 0x659   : > { %v13154_v26 = vld [vmem:[#allocation3 + $0x90] sm:$0xff]  ;;  %16578 = vst [vmem:[#allocation36_spill] sm:$0xff] %v13217_v62  ;;  %v13221_v6 = vpack.i.bf16 %v13217_v62, %v13215_v17  ;;  %vm16842_vm7 = vmmov %vm16824_vm2 }
 0x65a   : > { %9270 = vrot.lane.b32.xlu1 %v9234_v46, %s9764_s29  ;;  %9255 = vrot.lane.b32.xlu2 %v9254_v23, %s9768_s6 }
 0x65f   : > { %v13156_v42 = vld [vmem:[#allocation3 + $0x98] sm:$0xff] }
 0x660   : > { %v9259_v13 = vpack.i.bf16 %v13156_v42, %v13154_v26  ;;  %v13191_v19 = vld [vmem:[#allocation3 + $0x91] sm:$0xff]  ;;  %v13193_v53 = vld [vmem:[#allocation3 + $0x99] sm:$0xff] }
 0x661   : > { %16575 = vst [vmem:[#allocation37_spill] sm:$0xff] %v13193_v53  ;;  %v9329_v1 = vpack.i.bf16 %v13193_v53, %v13191_v19  ;;  %v8010_v11 = vld [vmem:[#allocation3 + $0x92] sm:$0xff] }
 0x662   : > { %9285 = vrot.lane.b32.xlu1 %v9249_v3, %s9764_s29  ;;  %9275 = vrot.lane.b32.xlu2 %v9239_v56, %s9764_s29  ;;  %v8005_v56 = vld [vmem:[#allocation3 + $0x52] sm:$0xff]  ;;  %v8003_v3 = vld [vmem:[#allocation3 + $0x3a] sm:$0xff] }
 0x663   : > { %9260 = vrot.lane.b32.xlu0 %v9259_v13, %s9768_s6 }
 0x66a   : > { %9300 = vrot.lane.b32.xlu1 %v9299_v9, %s9768_s6  ;;  %9290 = vrot.lane.b32.xlu2 %v9254_v23, %s9764_s29 }
 0x66b   : > { %9265 = vrot.lane.b32.xlu0 %v9229_v15, %s9764_s29  ;;  %v8011_v15 = vld [vmem:[#allocation3 + $0x9a] sm:$0xff] }
 0x672   : > { %9315 = vrot.lane.b32.xlu1 %v9314_v2, %s9768_s6  ;;  %9305 = vrot.lane.b32.xlu2 %v9304_v22, %s9768_s6 }
 0x673   : > { %9280 = vrot.lane.b32.xlu0 %v9244_v47, %s9764_s29  ;;  %v7585_v47 = vld [vmem:[#allocation3 + $0x1a] sm:$0xff] }
 0x674   : > { %v13259_v30 = vpack.i.bf16 %v7586_v52, %v7585_v47  ;;  %v4899_v47 = vrot.slane %v13127_v37, 4  ;;  %v4923_v52 = vrot.slane %v13083_v39, 4 }
 0x679   : > { %v13195_v40 = vpop.permute.xlu2 %9210 }
 0x67a   : > { %16576 = vst [vmem:[#allocation28_spill] sm:$0xff] %v13195_v40  ;;  %9320 = vrot.lane.b32.xlu2 %v9319_v48, %s9768_s6  ;;  %9330 = vrot.lane.b32.xlu1 %v9329_v1, %s9768_s6  ;;  %v16099_v0 = vunpack.i.h.bf16 %v13195_v40  ;;  %v16100_v55 = vunpack.i.l.bf16 %v13195_v40 }
 0x67b   : > { %9295 = vrot.lane.b32.xlu0 %v9259_v13, %s9764_s29 }
 0x67c   : > { %v13237_v23 = vrot.slane %v16099_v0, 4  ;;  %v13241_v13 = vrot.slane %v16100_v55, 4  ;;  %v13257_v0 = vpack.i.bf16 %v8005_v56, %v8004_v51  ;;  %v8008_v51 = vld [vmem:[#allocation3 + $0x7a] sm:$0xff]  ;;  %v8009_v56 = vld [vmem:[#allocation3 + $0x82] sm:$0xff] }
 0x67e   : > { %16580 = vst [vmem:[#allocation40_spill] sm:$0xff] %v13237_v23 }
 0x67f   : > { %16581 = vst [vmem:[#allocation23_spill] sm:$0xff] %v13241_v13 }
 0x681   : > { %v13208_v36 = vpop.permute.xlu2 %9215 }
 0x682   : > { %16577 = vst [vmem:[#allocation38_spill] sm:$0xff] %v13208_v36  ;;  %9340 = vrot.lane.b32.xlu2 %v9304_v22, %s9764_s29  ;;  %9335 = vrot.lane.b32.xlu1 %v9299_v9, %s9764_s29  ;;  %v16104_v4 = vunpack.i.h.bf16 %v13208_v36  ;;  %v16103_v46 = vunpack.i.l.bf16 %v13208_v36  ;;  %v13247_v22 = vpack.i.bf16 %v7999_v63, %v7998_v58  ;;  %v13272_v58 = vpack.i.bf16 %v8003_v3, %v8002_v10 }
 0x683   : > { %9310 = vrot.lane.b32.xlu0 %v9309_v41, %s9768_s6  ;;  %v13274_v63 = vpack.i.bf16 %v7592_v35, %v7591_v54  ;;  %v4911_v10 = vrot.slane %v13154_v26, 4  ;;  %v13285_v54 = vpack.i.bf16 %v8009_v56, %v8008_v51  ;;  %v4900_v35 = vsel %vm672_vm6, %v4899_v47, %v13109_v5 }
 0x684   : > { %v13255_v43 = vrot.slane %v16103_v46, 4  ;;  %v4924_v46 = vsel %vm672_vm6, %v4923_v52, %v13145_v27  ;;  %v5011_v51 = vrot.slane %v13129_v33, 4  ;;  %v5023_v47 = vrot.slane %v13156_v42, 4 }
 0x685   : > { %v4901_v36 = vrot.slane %v13109_v5, 4  ;;  %v13324_v3 = vperm.slane %v4924_v46, %v9951_v16  ;;  %v5013_v5 = vrot.slane %v13111_v14, 4 }
 0x686   : > { %16583 = vst [vmem:[#allocation39_spill] sm:$0xff] %v13255_v43  ;;  %v5024_v46 = vsel %vm672_vm6, %v5023_v47, %v13138_v45 }
 0x689   : > { %v13225_v29 = vpop.permute.xlu2 %9220 }
 0x68a   : > { %9355 = vrot.lane.b32.xlu2 %v9319_v48, %s9764_s29  ;;  %9350 = vrot.lane.b32.xlu1 %v9314_v2, %s9764_s29  ;;  %16579 = vst [vmem:[#allocation15_spill] sm:$0xff] %v13225_v29  ;;  %v13245_v2 = vpack.i.bf16 %v8011_v15, %v8010_v11  ;;  %v13251_v48 = vrot.slane %v16104_v4, 4  ;;  %v16584_v55 = vunpack.i.h.bf16 %v13225_v29  ;;  %v16586_v11 = vunpack.i.l.bf16 %v13225_v29 }
 0x68b   : > { %9325 = vrot.lane.b32.xlu0 %v13221_v6, %s9768_s6  ;;  %v4999_v4 = vrot.slane %v13120_v34, 4 }
 0x68c   : > { %16582 = vst [vmem:[#allocation17_spill] sm:$0xff] %v13251_v48  ;;  %v13263_v40 = vrot.slane %v16584_v55, 4  ;;  %v13267_v15 = vrot.slane %v16586_v11, 4  ;;  %v4887_v55 = vrot.slane %v13118_v24, 4  ;;  %v5035_v11 = vrot.slane %v13079_v18, 4 }
 0x68e   : > { %16585 = vst [vmem:[#allocation48_spill] sm:$0xff] %v13263_v40 }
 0x68f   : > { %16587 = vst [vmem:[#allocation50_spill] sm:$0xff] %v13267_v15 }
 0x690   : > { %v13243_v9 = vpop.permute.xlu1 %9200 }
 0x692   : > { %9375 = vrot.lane.b32.xlu2 %v13245_v2, %s9764_s29  ;;  %9365 = vrot.lane.b32.xlu1 %v9329_v1, %s9764_s29  ;;  %v4912_v1 = vsel %vm672_vm6, %v4911_v10, %v13136_v60  ;;  %v16589_v10 = vunpack.i.l.bf16 %v13243_v9 }
 0x693   : > { %9345 = vrot.lane.b32.xlu0 %v9309_v41, %s9764_s29  ;;  %v4888_v41 = vsel %vm672_vm6, %v4887_v55, %v13100_v49  ;;  %v13301_v56 = vperm.slane %v4912_v1, %v9951_v16  ;;  %v5000_v55 = vsel %vm672_vm6, %v4999_v4, %v13102_v21  ;;  %v13318_v1 = vperm.slane %v4900_v35, %v9951_v16 }
 0x694   : > { %v13293_v29 = vperm.slane %v4888_v41, %v9951_v16  ;;  %v16588_v41 = vunpack.i.h.bf16 %v13243_v9  ;;  %v13313_v40 = vrot.slane %v16589_v10, 4  ;;  %v5012_v4 = vsel %vm672_vm6, %v5011_v51, %v13111_v14 }
 0x695   : > { %v13328_v43 = vperm.slane %v5000_v55, %v9951_v16  ;;  %v4925_v35 = vrot.slane %v13145_v27, 4  ;;  %v13345_v48 = vperm.slane %v5012_v4, %v9951_v16  ;;  %v5036_v27 = vsel %vm672_vm6, %v5035_v11, %v13147_v44 }
 0x696   : > { %v13309_v15 = vrot.slane %v16588_v41, 4  ;;  %v4961_v41 = vrot.slane %v13301_v56, 4  ;;  %v4937_v51 = vrot.slane %v13293_v29, 4  ;;  %v5037_v4 = vrot.slane %v13147_v44, 4 }
 0x697   : > { %v5049_v23 = vrot.slane %v13328_v43, 4  ;;  %v4902_v11 = vsel %vm672_vm6, %v13127_v37, %v4901_v36  ;;  %v13367_v7 = vperm.slane %v5036_v27, %v9951_v16  ;;  %v4913_v37 = vrot.slane %v13136_v60, 4 }
 0x698   : > { %v13315_v52 = vpop.permute.xlu1 %9205  ;;  %v4962_v55 = vsel %vm672_vm6, %v13324_v3, %v4961_v41  ;;  %v4938_v47 = vsel %vm672_vm6, %v13318_v1, %v4937_v51 }
 0x699   : > { %v13355_v10 = vperm.slane %v4962_v55, %v9997_v57  ;;  %v4889_v55 = vrot.slane %v13100_v49, 4  ;;  %v5050_v8 = vsel %vm672_vm6, %v13345_v48, %v5049_v23  ;;  %v16592_v36 = vunpack.i.l.bf16 %v13315_v52 }
 0x69a   : > { %9400 = vrot.lane.b32.xlu2 %v13247_v22, %s9764_s29  ;;  %9370 = vrot.lane.b32.xlu1 %v13257_v0, %s9764_s29  ;;  %v13393_v23 = vperm.slane %v4938_v47, %v9997_v57  ;;  %v4926_v47 = vsel %vm672_vm6, %v13083_v39, %v4925_v35 }
 0x69b   : > { %9360 = vrot.lane.b32.xlu0 %v13221_v6, %s9764_s29  ;;  %16590 = vst [vmem:[#allocation52_spill] sm:$0xff] %v13355_v10  ;;  %v13358_v6 = vperm.slane %v5024_v46, %v9951_v16  ;;  %v16591_v46 = vunpack.i.h.bf16 %v13315_v52  ;;  %v4987_v44 = vrot.slane %v13355_v10, 4  ;;  %v4890_v49 = vsel %vm672_vm6, %v13118_v24, %v4889_v55 }
 0x69c   : > { %v13350_v14 = vpop.permute.xlu2 %9240  ;;  %16594 = vst [vmem:[#allocation51_spill] sm:$0xff] %v13393_v23  ;;  %v13405_v24 = vperm.slane %v5050_v8, %v9997_v57  ;;  %v4934_v55 = vperm.slane %v4926_v47, %v9951_v16  ;;  %v5014_v8 = vsel %vm672_vm6, %v13129_v33, %v5013_v5  ;;  %v5025_v5 = vrot.slane %v13138_v45, 4 }
 0x69d   : > { %v9243_v41 = vunpack.i.h.bf16 %v13350_v14  ;;  %v9242_v13 = vunpack.i.l.bf16 %v13350_v14  ;;  %v5073_v51 = vrot.slane %v13358_v6, 4  ;;  %v13373_v62 = vrot.slane %v16591_v46, 4 }
 0x69e   : > { %v13381_v14 = vrot.slane %v16592_v36, 4  ;;  %v13388_v46 = vperm.slane %v4902_v11, %v9951_v16  ;;  %v4914_v36 = vsel %vm672_vm6, %v13154_v26, %v4913_v37  ;;  %v13414_v26 = vsel %vm672_vm6, %v4987_v44, %v13393_v23 }
 0x69f   : > { %v5074_v27 = vsel %vm672_vm6, %v13367_v7, %v5073_v51  ;;  %v5413_v25 = vrot.slane %v9243_v41, 4  ;;  %v5301_v31 = vrot.slane %v9242_v13, 4  ;;  %v4898_v51 = vperm.slane %v4890_v49, %v9951_v16 }
 0x6a0   : > { %v13390_v10 = vpop.permute.xlu1 %9225  ;;  %v13396_v60 = vperm.slane %v5074_v27, %v9997_v57  ;;  %v4947_v11 = vrot.slane %v13388_v46, 4  ;;  %v4922_v35 = vperm.slane %v4914_v36, %v9951_v16  ;;  %v4971_v32 = vrot.slane %v4934_v55, 4 }
 0x6a1   : > { %16593 = vst [vmem:[#allocation45_spill] sm:$0xff] %v13390_v10  ;;  %v5022_v33 = vperm.slane %v5014_v8, %v9951_v16 }
 0x6a2   : > { %16595 = vst [vmem:[#allocation46_spill] sm:$0xff] %v13396_v60  ;;  %9415 = vrot.lane.b32.xlu2 %v13259_v30, %s9768_s6  ;;  %9385 = vrot.lane.b32.xlu1 %v13272_v58, %s9764_s29  ;;  %v5099_v39 = vrot.slane %v13396_v60, 4  ;;  %v4948_v49 = vsel %vm672_vm6, %v4947_v11, %v4898_v51 }
 0x6a3   : > { %9380 = vrot.lane.b32.xlu0 %v13259_v30, %s9764_s29  ;;  %v5001_v30 = vrot.slane %v13102_v21, 4 }
 0x6a4   : > { %v9231_v27 = vpop.permute.xlu0 %9230  ;;  %v5100_v11 = vsel %vm672_vm6, %v5099_v39, %v13405_v24 }
 0x6a5   : > { %v9233_v44 = vunpack.i.h.bf16 %v9231_v27  ;;  %v9232_v23 = vunpack.i.l.bf16 %v9231_v27  ;;  %v5002_v47 = vsel %vm672_vm6, %v13120_v34, %v5001_v30  ;;  %v4972_v27 = vsel %vm672_vm6, %v4971_v32, %v4922_v35 }
 0x6a6   : > { %v5026_v34 = vsel %vm672_vm6, %v13156_v42, %v5025_v5  ;;  %v16598_v32 = vunpack.i.l.bf16 %v13390_v10 }
 0x6a7   : > { %v5415_v37 = vrot.slane %v9233_v44, 4  ;;  %v5302_v60 = vsel %vm672_vm6, %v5301_v31, %v9232_v23  ;;  %v5303_v36 = vrot.slane %v9232_v23, 4  ;;  %v5414_v21 = vsel %vm672_vm6, %v5413_v25, %v9233_v44 }
 0x6a8   : > { %v13433_v53 = vperm.slane %v5302_v60, %v9951_v16  ;;  %v13442_v45 = vperm.slane %v5414_v21, %v9951_v16  ;;  %v13445_v31 = vperm.slane %v4972_v27, %v9997_v57  ;;  %v5038_v25 = vsel %vm672_vm6, %v13079_v18, %v5037_v4 }
 0x6a9   : > { %v5304_v8 = vsel %vm672_vm6, %v9242_v13, %v5303_v36  ;;  %v16596_v23 = vunpack.i.h.bf16 %v13390_v10  ;;  %v13455_v39 = vrot.slane %v16598_v32, 4  ;;  %v5416_v42 = vsel %vm672_vm6, %v9243_v41, %v5415_v37  ;;  %v16624_v10 = vld [vmem:[#allocation35_spill] sm:$0xff] }
 0x6aa   : > { %9425 = vrot.lane.b32.xlu2 %v13274_v63, %s9768_s6  ;;  %9395 = vrot.lane.b32.xlu1 %v13285_v54, %s9764_s29  ;;  %v5010_v13 = vperm.slane %v5002_v47, %v9951_v16  ;;  %v13464_v18 = vperm.slane %v5304_v8, %v9951_v16  ;;  %v13469_v4 = vperm.slane %v4948_v49, %v9997_v57  ;;  %v5059_v41 = vrot.slane %v5022_v33, 4 }
 0x6ab   : > { %v13451_v60 = vrot.slane %v16596_v23, 4  ;;  %16599 = vst [vmem:[#allocation47_spill] sm:$0xff] %v13455_v39  ;;  %9390 = vrot.lane.b32.xlu0 %v13274_v63, %s9764_s29  ;;  %v5046_v30 = vperm.slane %v5038_v25, %v9951_v16  ;;  %v9444_v44 = vpack.i.bf16 %v5100_v11, %v13414_v26  ;;  %v5034_v5 = vperm.slane %v5026_v34, %v9951_v16  ;;  %v16626_v39 = vld [vmem:[#allocation51_spill] sm:$0xff] }
 0x6ac   : > { %v13472_v37 = vpop.permute.xlu1 %9235  ;;  %v4949_v36 = vrot.slane %v4898_v51, 4  ;;  %v4973_v47 = vrot.slane %v4922_v35, 4  ;;  %v13478_v27 = vperm.slane %v5416_v42, %v9951_v16  ;;  %v4991_v49 = vrot.slane %v13445_v31, 4 }
 0x6ad   : > { %16597 = vst [vmem:[#allocation49_spill] sm:$0xff] %v13451_v60  ;;  %v5083_v8 = vrot.slane %v5046_v30, 4  ;;  %v5061_v26 = vrot.slane %v5010_v13, 4  ;;  %v5363_v11 = vrot.slane %v13464_v18, 4  ;;  %v9238_v51 = vunpack.i.h.bf16 %v13472_v37 }
 0x6ae   : > { %v4950_v25 = vsel %vm672_vm6, %v13388_v46, %v4949_v36  ;;  %v4974_v23 = vsel %vm672_vm6, %v4934_v55, %v4973_v47  ;;  %v9237_v35 = vunpack.i.l.bf16 %v13472_v37  ;;  %v5060_v34 = vsel %vm672_vm6, %v5059_v41, %v5010_v13 }
 0x6af   : > { %v5084_v32 = vsel %vm672_vm6, %v5083_v8, %v5034_v5  ;;  %v5062_v42 = vsel %vm672_vm6, %v5022_v33, %v5061_v26  ;;  %v5085_v63 = vrot.slane %v5034_v5, 4  ;;  %v4935_v21 = vrot.slane %v13318_v1, 4 }
 0x6b0   : > { %v4992_v46 = vsel %vm672_vm6, %v4991_v49, %v13469_v4  ;;  %v13495_v55 = vperm.slane %v5084_v32, %v9997_v57  ;;  %v13498_v36 = vperm.slane %v4950_v25, %v9997_v57  ;;  %v13501_v47 = vperm.slane %v5062_v42, %v9997_v57 }
 0x6b1   : > { %v5086_v33 = vsel %vm672_vm6, %v5046_v30, %v5085_v63  ;;  %v4936_v1 = vsel %vm672_vm6, %v4935_v21, %v13293_v29  ;;  %v4959_v13 = vrot.slane %v13324_v3, 4  ;;  %v5047_v41 = vrot.slane %v13345_v48, 4 }
 0x6b2   : > { %9410 = vrot.lane.b32.xlu1 %v13245_v2, %s9768_s6  ;;  %9445 = vrot.lane.b32.xlu2 %v9444_v44, %s9769_s7  ;;  %v13514_v5 = vperm.slane %v5060_v34, %v9997_v57  ;;  %v5103_v49 = vrot.slane %v13495_v55, 4  ;;  %v13518_v2 = vperm.slane %v4974_v23, %v9997_v57  ;;  %v13521_v30 = vperm.slane %v5086_v33, %v9997_v57 }
 0x6b3   : > { %9405 = vrot.lane.b32.xlu0 %v13257_v0, %s9768_s6  ;;  %v5109_v29 = vrot.slane %v13501_v47, 4  ;;  %v13525_v3 = vperm.slane %v4936_v1, %v9997_v57  ;;  %v4960_v0 = vsel %vm672_vm6, %v4959_v13, %v13301_v56  ;;  %v5071_v48 = vrot.slane %v13367_v7, 4 }
 0x6b4   : > { %v9256_v44 = vpop.permute.xlu2 %9255  ;;  %v5104_v8 = vsel %vm672_vm6, %v5103_v49, %v13514_v5  ;;  %v5048_v25 = vsel %vm672_vm6, %v5047_v41, %v13328_v43  ;;  %v4997_v23 = vrot.slane %v13498_v36, 4  ;;  %v13538_v34 = vperm.slane %v4960_v0, %v9997_v57 }
 0x6b5   : > { %16600 = vst [vmem:[#allocation30_spill] sm:$0xff] %v13525_v3  ;;  %v9258_v21 = vunpack.i.h.bf16 %v9256_v44  ;;  %v9257_v63 = vunpack.i.l.bf16 %v9256_v44  ;;  %v5110_v26 = vsel %vm672_vm6, %v13521_v30, %v5109_v29  ;;  %v5072_v56 = vsel %vm672_vm6, %v5071_v48, %v13358_v6 }
 0x6b6   : > { %16601 = vst [vmem:[#allocation21_spill] sm:$0xff] %v13538_v34  ;;  %v9454_v13 = vpack.i.bf16 %v5104_v8, %v4992_v46  ;;  %v13553_v41 = vperm.slane %v5048_v25, %v9997_v57  ;;  %v5475_v6 = vrot.slane %v13478_v27, 4  ;;  %v16603_v49 = vunpack.i.l.bf16 %v13243_v9 }
 0x6b7   : > { %v5451_v7 = vrot.slane %v9258_v21, 4  ;;  %v5338_v32 = vsel %vm672_vm6, %v13313_v40, %v9257_v63  ;;  %v5339_v42 = vrot.slane %v9257_v63, 4  ;;  %v5450_v33 = vsel %vm672_vm6, %v13309_v15, %v9258_v21 }
 0x6b8   : > { %v13547_v43 = vperm.slane %v5338_v32, %v9951_v16  ;;  %v13550_v1 = vperm.slane %v5450_v33, %v9951_v16  ;;  %16602 = vst [vmem:[#allocation20_spill] sm:$0xff] %v13553_v41  ;;  %v16604_v44 = vunpack.i.h.bf16 %v13243_v9  ;;  %v4985_v29 = vrot.slane %v13525_v3, 4 }
 0x6b9   : > { %v5340_v40 = vsel %vm672_vm6, %v16603_v49, %v5339_v42  ;;  %v5427_v0 = vrot.slane %v9238_v51, 4  ;;  %v4998_v48 = vsel %vm672_vm6, %v13518_v2, %v4997_v23  ;;  %v13574_v9 = vperm.slane %v5072_v56, %v9997_v57 }
 0x6ba   : > { %v5452_v15 = vsel %vm672_vm6, %v16604_v44, %v5451_v7  ;;  %v13566_v46 = vperm.slane %v5340_v40, %v9951_v16  ;;  %9435 = vrot.lane.b32.xlu1 %v13247_v22, %s9768_s6  ;;  %9455 = vrot.lane.b32.xlu2 %v9454_v13, %s9772_s10  ;;  %v5315_v21 = vrot.slane %v9237_v35, 4  ;;  %v9469_v63 = vpack.i.bf16 %v5110_v26, %v4998_v48 }
 0x6bb   : > { %16605 = vst [vmem:[#allocation27_spill] sm:$0xff] %v13574_v9  ;;  %9420 = vrot.lane.b32.xlu0 %v13272_v58, %s9768_s6  ;;  %v4986_v8 = vsel %vm672_vm6, %v13538_v34, %v4985_v29  ;;  %v4993_v22 = vrot.slane %v13469_v4, 4  ;;  %v13585_v7 = vperm.slane %v5452_v15, %v9951_v16  ;;  %v5097_v42 = vrot.slane %v13553_v41, 4  ;;  %v16621_v41 = vld [vmem:[#allocation16_spill] sm:$0xff] }
 0x6bc   : > { %v9246_v56 = vpop.permute.xlu0 %9245  ;;  %v13588_v32 = vpop.permute.xlu2 %9275  ;;  %v5105_v13 = vrot.slane %v13514_v5, 4  ;;  %v6067_v40 = vrot.slane %v13204_v20, 4  ;;  %v6079_v44 = vrot.slane %v13172_v61, 4  ;;  %v16623_v34 = vld [vmem:[#allocation36_spill] sm:$0xff] }
 0x6bd   : > { %v9248_v33 = vunpack.i.h.bf16 %v9246_v56  ;;  %v9247_v58 = vunpack.i.l.bf16 %v9246_v56  ;;  %v4994_v26 = vsel %vm672_vm6, %v13445_v31, %v4993_v22  ;;  %v5098_v49 = vsel %vm672_vm6, %v13574_v9, %v5097_v42 }
 0x6be   : > { %v16126_v5 = vunpack.i.h.bf16 %v13588_v32  ;;  %v16127_v22 = vunpack.i.l.bf16 %v13588_v32  ;;  %v9439_v4 = vpack.i.bf16 %v5098_v49, %v4986_v8  ;;  %v16606_v8 = vrot.slane %v13433_v53, 4 }
 0x6bf   : > { %v5425_v15 = vrot.slane %v9248_v33, 4  ;;  %v5313_v29 = vrot.slane %v9247_v58, 4  ;;  %v5316_v48 = vsel %vm672_vm6, %v9247_v58, %v5315_v21  ;;  %v5428_v56 = vsel %vm672_vm6, %v9248_v33, %v5427_v0 }
 0x6c0   : > { %v5324_v25 = vperm.slane %v5316_v48, %v9951_v16  ;;  %v5436_v31 = vperm.slane %v5428_v56, %v9951_v16  ;;  %v5106_v0 = vsel %vm672_vm6, %v13495_v55, %v5105_v13  ;;  %v6091_v55 = vrot.slane %v13191_v19, 4 }
 0x6c1   : > { %v5314_v42 = vsel %vm672_vm6, %v5313_v29, %v9237_v35  ;;  %v5426_v23 = vsel %vm672_vm6, %v5425_v15, %v9238_v51  ;;  %v6068_v51 = vsel %vm672_vm6, %v6067_v40, %v13163_v38  ;;  %v9459_v15 = vpack.i.bf16 %v5106_v0, %v4994_v26  ;;  %v16620_v35 = vld [vmem:[#allocation11_spill] sm:$0xff] }
 0x6c2   : > { %v5320_v21 = vperm.slane %v5314_v42, %v9951_v16  ;;  %v5361_v33 = vrot.slane %v5324_v25, 4  ;;  %v5364_v58 = vsel %vm672_vm6, %v5324_v25, %v5363_v11  ;;  %v5432_v48 = vperm.slane %v5426_v23, %v9951_v16  ;;  %9470 = vrot.lane.b32.xlu2 %v9469_v63, %s9774_s12  ;;  %9440 = vrot.lane.b32.xlu1 %v9439_v4, %s9770_s8 }
 0x6c3   : > { %v5473_v37 = vrot.slane %v5436_v31, 4  ;;  %9430 = vrot.lane.b32.xlu0 %v13285_v54, %s9768_s6  ;;  %v13631_v63 = vrot.slane %v16126_v5, 4  ;;  %v13635_v25 = vrot.slane %v16127_v22, 4  ;;  %v6080_v23 = vsel %vm672_vm6, %v6079_v44, %v13176_v50 }
 0x6c4   : > { %v5352_v11 = vsel %vm672_vm6, %v5320_v21, %v16606_v8  ;;  %v9291_v54 = vpop.permute.xlu2 %9290  ;;  %v5349_v13 = vrot.slane %v5320_v21, 4  ;;  %v13640_v4 = vperm.slane %v5364_v58, %v9997_v57  ;;  %v5476_v49 = vsel %vm672_vm6, %v5436_v31, %v5475_v6  ;;  %v13643_v40 = vpop.permute.xlu1 %9250 }
 0x6c5   : > { %v13647_v29 = vsel %vm672_vm6, %v5361_v33, %v13464_v18  ;;  %v5461_v56 = vrot.slane %v5432_v48, 4  ;;  %v9293_v42 = vunpack.i.h.bf16 %v9291_v54  ;;  %v13650_v8 = vperm.slane %v6068_v51, %v9951_v16 }
 0x6c6   : > { %16607 = vst [vmem:[#allocation24_spill] sm:$0xff] %v13640_v4  ;;  %v13653_v44 = vperm.slane %v5352_v11, %v9997_v57  ;;  %v16608_v21 = vrot.slane %v13442_v45, 4  ;;  %v13660_v6 = vsel %vm672_vm6, %v5473_v37, %v13478_v27  ;;  %v9292_v26 = vunpack.i.l.bf16 %v9291_v54 }
 0x6c7   : > { %16609 = vst [vmem:[#allocation29_spill] sm:$0xff] %v13660_v6  ;;  %v13663_v18 = vperm.slane %v5476_v49, %v9997_v57  ;;  %v5866_v31 = vrot.slane %v9293_v42, 4  ;;  %v16128_v0 = vunpack.i.h.bf16 %v13643_v40  ;;  %v6092_v33 = vsel %vm672_vm6, %v6091_v55, %v13187_v28 }
 0x6c8   : > { %v5464_v58 = vsel %vm672_vm6, %v5432_v48, %v16608_v21  ;;  %v13670_v51 = vsel %vm672_vm6, %v5349_v13, %v13433_v53  ;;  %v5753_v48 = vsel %vm672_vm6, %v13381_v14, %v9292_v26  ;;  %v5754_v11 = vrot.slane %v9292_v26, 4 }
 0x6c9   : > { %16610 = vst [vmem:[#allocation18_spill] sm:$0xff] %v13663_v18  ;;  %v5865_v27 = vsel %vm672_vm6, %v13373_v62, %v9293_v42  ;;  %v13678_v37 = vsel %vm672_vm6, %v5461_v56, %v13442_v45  ;;  %v13681_v54 = vperm.slane %v5464_v58, %v9997_v57  ;;  %v16129_v55 = vunpack.i.l.bf16 %v13643_v40 }
 0x6ca   : > { %v13685_v49 = vperm.slane %v6092_v33, %v9951_v16  ;;  %v16611_v53 = vunpack.i.h.bf16 %v13315_v52  ;;  %v6086_v62 = vperm.slane %v6080_v23, %v9951_v16  ;;  %v16612_v45 = vrot.slane %v13081_v12, 4 }
 0x6cb   : > { %9460 = vrot.lane.b32.xlu0 %v9459_v15, %s9771_s9  ;;  %v16613_v42 = vunpack.i.l.bf16 %v13315_v52  ;;  %v13701_v58 = vperm.slane %v5753_v48, %v9951_v16  ;;  %v13704_v26 = vperm.slane %v5865_v27, %v9951_v16  ;;  %v13708_v23 = vrot.slane %v16128_v0, 4  ;;  %v16617_v27 = vld [vmem:[#allocation9_spill] sm:$0xff] }
 0x6cc   : > { %v5867_v14 = vsel %vm672_vm6, %v16611_v53, %v5866_v31  ;;  %v6104_v56 = vsel %vm672_vm6, %v16612_v45, %v13215_v17  ;;  %v6117_v31 = vrot.slane %v13650_v8, 4  ;;  %v6141_v33 = vrot.slane %v13685_v49, 4  ;;  %v16618_v45 = vld [vmem:[#allocation37_spill] sm:$0xff] }
 0x6cd   : > { %v5755_v21 = vsel %vm672_vm6, %v16613_v42, %v5754_v11  ;;  %16614 = vst [vmem:[#allocation19_spill] sm:$0xff] %v13701_v58  ;;  %v6110_v15 = vperm.slane %v6104_v56, %v9951_v16  ;;  %v6179_v52 = vrot.slane %v13206_v59, 4  ;;  %v13715_v11 = vperm.slane %v5867_v14, %v9951_v16  ;;  %v16627_v58 = vld [vmem:[#allocation52_spill] sm:$0xff] }
 0x6ce   : > { %16615 = vst [vmem:[#allocation26_spill] sm:$0xff] %v13704_v26  ;;  %v13719_v48 = vrot.slane %v16129_v55, 4  ;;  %v6191_v53 = vrot.slane %v16617_v27, 4  ;;  %v6203_v42 = vrot.slane %v16618_v45, 4  ;;  %v13724_v5 = vperm.slane %v5755_v21, %v9951_v16 }
 0x6cf   : > { %16616 = vst [vmem:[#allocation31_spill] sm:$0xff] %v13715_v11  ;;  %v6118_v56 = vsel %vm672_vm6, %v6086_v62, %v6117_v31  ;;  %v6142_v22 = vsel %vm672_vm6, %v6110_v15, %v6141_v33  ;;  %v6180_v0 = vsel %vm672_vm6, %v6179_v52, %v16620_v35  ;;  %v16622_v31 = vld [vmem:[#allocation6_spill] sm:$0xff]  ;;  %v16625_v52 = vrot.slane %v16624_v10, 4  ;;  %v13765_v11 = vpop.permute.xlu2 %9305 }
 0x6d0   : > { %16619 = vst [vmem:[#allocation7_spill] sm:$0xff] %v13724_v5  ;;  %v13732_v13 = vperm.slane %v6118_v56, %v9997_v57  ;;  %v6186_v55 = vperm.slane %v6180_v0, %v9951_v16  ;;  %v6192_v3 = vsel %vm672_vm6, %v6191_v53, %v16621_v41  ;;  %v6204_v33 = vsel %vm672_vm6, %v6203_v42, %v16622_v31 }
 0x6d1   : > { %v6198_v9 = vperm.slane %v6192_v3, %v9951_v16  ;;  %v6216_v14 = vsel %vm672_vm6, %v16625_v52, %v16623_v34  ;;  %v6105_v56 = vrot.slane %v13215_v17, 4  ;;  %v13747_v60 = vperm.slane %v6142_v22, %v9997_v57  ;;  %v16628_v3 = vld [vmem:[#allocation46_spill] sm:$0xff] }
 0x6d2   : > { %v6210_v0 = vperm.slane %v6204_v33, %v9951_v16  ;;  %v6229_v53 = vrot.slane %v6186_v55, 4  ;;  %v4989_v18 = vrot.slane %v16626_v39, 4  ;;  %v5101_v42 = vrot.slane %v13405_v24, 4 }
 0x6d3   : > { %v6169_v4 = vrot.slane %v13732_v13, 4  ;;  %v6222_v52 = vperm.slane %v6216_v14, %v9951_v16  ;;  %v6205_v22 = vrot.slane %v16622_v31, 4  ;;  %v6217_v14 = vrot.slane %v16623_v34, 4 }
 0x6d4   : > { %v6230_v17 = vsel %vm672_vm6, %v6198_v9, %v6229_v53  ;;  %v6253_v26 = vrot.slane %v6210_v0, 4  ;;  %v4990_v21 = vsel %vm672_vm6, %v16627_v58, %v4989_v18  ;;  %v5102_v39 = vsel %vm672_vm6, %v16628_v3, %v5101_v42 }
 0x6d5   : > { %v13759_v33 = vperm.slane %v6230_v17, %v9997_v57  ;;  %v6170_v24 = vsel %vm672_vm6, %v13747_v60, %v6169_v4  ;;  %v9449_v5 = vpack.i.bf16 %v5102_v39, %v4990_v21  ;;  %v6115_v6 = vrot.slane %v6086_v62, 4 }
 0x6d6   : > { %v6254_v53 = vsel %vm672_vm6, %v6222_v52, %v6253_v26  ;;  %v6139_v18 = vrot.slane %v6110_v15, 4  ;;  %v16150_v58 = vunpack.i.h.bf16 %v13765_v11  ;;  %v6227_v3 = vrot.slane %v6198_v9, 4 }
 0x6d7   : > { %v13772_v31 = vperm.slane %v6254_v53, %v9997_v57  ;;  %v6281_v17 = vrot.slane %v13759_v33, 4  ;;  %9450 = vrot.lane.b32.xlu1 %v9449_v5, %s9773_s11  ;;  %v6251_v42 = vrot.slane %v6222_v52, 4  ;;  %v6069_v4 = vrot.slane %v13163_v38, 4  ;;  %v13792_v52 = vpop.permute.xlu1 %9270 }
 0x6d8   : > { %v6116_v26 = vsel %vm672_vm6, %v6115_v6, %v13650_v8  ;;  %v6140_v21 = vsel %vm672_vm6, %v6139_v18, %v13685_v49  ;;  %v6081_v62 = vrot.slane %v13176_v50, 4  ;;  %v6228_v38 = vsel %vm672_vm6, %v6227_v3, %v6186_v55 }
 0x6d9   : > { %v6282_v34 = vsel %vm672_vm6, %v13772_v31, %v6281_v17  ;;  %v13786_v5 = vperm.slane %v6116_v26, %v9997_v57  ;;  %v13789_v9 = vperm.slane %v6140_v21, %v9997_v57  ;;  %v13795_v39 = vperm.slane %v6228_v38, %v9997_v57 }
 0x6da   : > { %v9484_v15 = vpack.i.bf16 %v6282_v34, %v6170_v24  ;;  %v6252_v8 = vsel %vm672_vm6, %v6251_v42, %v6210_v0  ;;  %v6070_v6 = vsel %vm672_vm6, %v13204_v20, %v6069_v4  ;;  %v6082_v50 = vsel %vm672_vm6, %v13172_v61, %v6081_v62 }
 0x6db   : > { %16629 = vst [vmem:[#allocation22_spill] sm:$0xff] %v13786_v5  ;;  %v6165_v49 = vrot.slane %v13786_v5, 4  ;;  %v13805_v24 = vperm.slane %v6252_v8, %v9997_v57  ;;  %v13808_v55 = vperm.slane %v6070_v6, %v9951_v16  ;;  %v13811_v53 = vperm.slane %v6082_v50, %v9951_v16  ;;  %v13861_v50 = vpop.permute.xlu2 %9320 }
 0x6dc   : > { %16630 = vst [vmem:[#allocation14_spill] sm:$0xff] %v13789_v9  ;;  %9485 = vrot.lane.b32.xlu2 %v9484_v15, %s9773_s11  ;;  %v6277_v0 = vrot.slane %v13795_v39, 4  ;;  %v16633_v20 = vrot.slane %v13187_v28, 4  ;;  %v6106_v17 = vsel %vm672_vm6, %v13081_v12, %v6105_v56  ;;  %v6181_v18 = vrot.slane %v16620_v35, 4 }
 0x6dd   : > { %16631 = vst [vmem:[#allocation25_spill] sm:$0xff] %v13795_v39  ;;  %v16149_v3 = vunpack.i.l.bf16 %v13765_v11  ;;  %v6166_v42 = vsel %vm672_vm6, %v13789_v9, %v6165_v49  ;;  %v6129_v34 = vrot.slane %v13808_v55, 4  ;;  %v6193_v12 = vrot.slane %v16621_v41, 4 }
 0x6de   : > { %16632 = vst [vmem:[#allocation10_spill] sm:$0xff] %v13805_v24  ;;  %v6094_v61 = vsel %vm672_vm6, %v13191_v19, %v16633_v20  ;;  %v6278_v28 = vsel %vm672_vm6, %v13805_v24, %v6277_v0  ;;  %v6182_v19 = vsel %vm672_vm6, %v13206_v59, %v6181_v18  ;;  %v6206_v35 = vsel %vm672_vm6, %v16618_v45, %v6205_v22  ;;  %v9261_v22 = vpop.permute.xlu0 %9260 }
 0x6df   : > { %v13825_v4 = vperm.slane %v6094_v61, %v9951_v16  ;;  %v9474_v56 = vpack.i.bf16 %v6278_v28, %v6166_v42  ;;  %v13836_v26 = vperm.slane %v6106_v17, %v9951_v16  ;;  %v13840_v62 = vperm.slane %v6182_v19, %v9951_v16  ;;  %v13880_v19 = vpop.permute.xlu1 %9285 }
 0x6e0   : > { %v6130_v15 = vsel %vm672_vm6, %v13811_v53, %v6129_v34  ;;  %v6194_v59 = vsel %vm672_vm6, %v16617_v27, %v6193_v12  ;;  %v13847_v41 = vperm.slane %v6206_v35, %v9951_v16  ;;  %v6218_v45 = vsel %vm672_vm6, %v16624_v10, %v6217_v14 }
 0x6e1   : > { %v6153_v21 = vrot.slane %v13825_v4, 4  ;;  %9475 = vrot.lane.b32.xlu0 %v9474_v56, %s9770_s8  ;;  %v13855_v8 = vperm.slane %v6194_v59, %v9951_v16  ;;  %v13858_v6 = vperm.slane %v6218_v45, %v9951_v16  ;;  %v6241_v27 = vrot.slane %v13840_v62, 4 }
 0x6e2   : > { %v6265_v10 = vrot.slane %v13847_v41, 4  ;;  %v4995_v14 = vrot.slane %v13518_v2, 4  ;;  %v5107_v0 = vrot.slane %v13521_v30, 4  ;;  %v16151_v20 = vunpack.i.h.bf16 %v13792_v52 }
 0x6e3   : > { %v6154_v38 = vsel %vm672_vm6, %v13836_v26, %v6153_v21  ;;  %v16152_v61 = vunpack.i.l.bf16 %v13792_v52  ;;  %v6242_v17 = vsel %vm672_vm6, %v13855_v8, %v6241_v27  ;;  %v9263_v18 = vunpack.i.h.bf16 %v9261_v22 }
 0x6e4   : > { %v13864_v49 = vperm.slane %v6154_v38, %v9997_v57  ;;  %v13874_v42 = vperm.slane %v6130_v15, %v9997_v57  ;;  %v6266_v28 = vsel %vm672_vm6, %v13858_v6, %v6265_v10  ;;  %v16147_v2 = vunpack.i.h.bf16 %v13861_v50 }
 0x6e5   : > { %v13883_v30 = vperm.slane %v6266_v28, %v9997_v57  ;;  %v4996_v12 = vsel %vm672_vm6, %v4995_v14, %v13498_v36  ;;  %v5108_v35 = vsel %vm672_vm6, %v5107_v0, %v13501_v47  ;;  %v16146_v56 = vunpack.i.l.bf16 %v13861_v50 }
 0x6e6   : > { %v6175_v34 = vrot.slane %v13864_v49, 4  ;;  %v13891_v21 = vperm.slane %v6242_v17, %v9997_v57  ;;  %v9464_v15 = vpack.i.bf16 %v5108_v35, %v4996_v12  ;;  %v5437_v59 = vrot.slane %v9263_v18, 4 }
 0x6e7   : > { %v9262_v45 = vunpack.i.l.bf16 %v9261_v22  ;;  %v6287_v27 = vrot.slane %v13883_v30, 4  ;;  %v5440_v10 = vsel %vm672_vm6, %v9263_v18, %v13708_v23  ;;  %v16148_v36 = vunpack.i.h.bf16 %v13880_v19 }
 0x6e8   : > { %v6176_v38 = vsel %vm672_vm6, %v6175_v34, %v13874_v42  ;;  %9465 = vrot.lane.b32.xlu1 %v9464_v15, %s9775_s13  ;;  %v16634_v0 = vunpack.i.h.bf16 %v13643_v40  ;;  %v5448_v17 = vperm.slane %v5440_v10, %v9951_v16  ;;  %v13908_v34 = vrot.slane %v16150_v58, 4 }
 0x6e9   : > { %v5325_v47 = vrot.slane %v9262_v45, 4  ;;  %v5328_v14 = vsel %vm672_vm6, %v9262_v45, %v13719_v48  ;;  %v6288_v23 = vsel %vm672_vm6, %v6287_v27, %v13891_v21  ;;  %v13918_v48 = vrot.slane %v16149_v3, 4 }
 0x6ea   : > { %v5438_v22 = vsel %vm672_vm6, %v5437_v59, %v16634_v0  ;;  %v5336_v18 = vperm.slane %v5328_v14, %v9951_v16  ;;  %v9499_v12 = vpack.i.bf16 %v6288_v23, %v6176_v38  ;;  %v16635_v35 = vunpack.i.l.bf16 %v13643_v40 }
 0x6eb   : > { %v13914_v28 = vperm.slane %v5438_v22, %v9951_v16  ;;  %v5499_v59 = vrot.slane %v5448_v17, 4  ;;  %v13925_v45 = vrot.slane %v16151_v20, 4  ;;  %v13929_v27 = vrot.slane %v16152_v61, 4  ;;  %v13972_v61 = vpop.permute.xlu2 %9340 }
 0x6ec   : > { %v5326_v15 = vsel %vm672_vm6, %v5325_v47, %v16635_v35  ;;  %v13933_v10 = vrot.slane %v16147_v2, 4  ;;  %v16636_v14 = vrot.slane %v13566_v46, 4  ;;  %9500 = vrot.lane.b32.xlu2 %v9499_v12, %s9775_s13  ;;  %v13941_v40 = vrot.slane %v16146_v56, 4 }
 0x6ed   : > { %v13944_v47 = vperm.slane %v5326_v15, %v9951_v16  ;;  %v13948_v0 = vrot.slane %v16148_v36, 4  ;;  %v16155_v22 = vunpack.i.l.bf16 %v13880_v19  ;;  %v5387_v23 = vrot.slane %v5336_v18, 4 }
 0x6ee   : > { %v5386_v38 = vsel %vm672_vm6, %v16636_v14, %v5336_v18  ;;  %v16637_v12 = vrot.slane %v13550_v1, 4  ;;  %v16638_v56 = vrot.slane %v13585_v7, 4  ;;  %v5500_v36 = vsel %vm672_vm6, %v13585_v7, %v5499_v59  ;;  %v9266_v59 = vpop.permute.xlu0 %9265 }
 0x6ef   : > { %v13952_v35 = vperm.slane %v5386_v38, %v9997_v57  ;;  %v6127_v18 = vrot.slane %v13811_v53, 4  ;;  %v6151_v38 = vrot.slane %v13836_v26, 4  ;;  %v6239_v3 = vrot.slane %v13855_v8, 4 }
 0x6f0   : > { %v13958_v14 = vsel %vm672_vm6, %v16637_v12, %v13914_v28  ;;  %v5498_v15 = vsel %vm672_vm6, %v16638_v56, %v5448_v17  ;;  %v6263_v58 = vrot.slane %v13858_v6, 4  ;;  %v6167_v12 = vrot.slane %v13747_v60, 4 }
 0x6f1   : > { %v6279_v20 = vrot.slane %v13772_v31, 4  ;;  %v16639_v56 = vrot.slane %v13547_v43, 4  ;;  %v13979_v7 = vperm.slane %v5498_v15, %v9997_v57  ;;  %v6128_v53 = vsel %vm672_vm6, %v6127_v18, %v13808_v55 }
 0x6f2   : > { %v6152_v26 = vsel %vm672_vm6, %v6151_v38, %v13825_v4  ;;  %v5388_v60 = vsel %vm672_vm6, %v13566_v46, %v5387_v23  ;;  %v6240_v8 = vsel %vm672_vm6, %v6239_v3, %v13840_v62  ;;  %v6264_v6 = vsel %vm672_vm6, %v6263_v58, %v13847_v41  ;;  %v13998_v46 = vpop.permute.xlu1 %9300 }
 0x6f3   : > { %v5374_v17 = vsel %vm672_vm6, %v16639_v56, %v13944_v47  ;;  %v6158_v31 = vperm.slane %v6152_v26, %v9997_v57  ;;  %v6270_v15 = vperm.slane %v6264_v6, %v9997_v57  ;;  %v6168_v55 = vsel %vm672_vm6, %v6167_v12, %v13732_v13 }
 0x6f4   : > { %v6280_v4 = vsel %vm672_vm6, %v6279_v20, %v13759_v33  ;;  %v16154_v18 = vunpack.i.h.bf16 %v13972_v61  ;;  %v6134_v23 = vperm.slane %v6128_v53, %v9997_v57  ;;  %v16153_v62 = vunpack.i.l.bf16 %v13972_v61 }
 0x6f5   : > { %v6171_v38 = vrot.slane %v6158_v31, 4  ;;  %v9479_v3 = vpack.i.bf16 %v6280_v4, %v6168_v55  ;;  %v6246_v58 = vperm.slane %v6240_v8, %v9997_v57  ;;  %v6283_v41 = vrot.slane %v6270_v15, 4 }
 0x6f6   : > { %v9268_v56 = vunpack.i.h.bf16 %v9266_v59  ;;  %v9267_v26 = vunpack.i.l.bf16 %v9266_v59  ;;  %v14005_v12 = vperm.slane %v5388_v60, %v9997_v57  ;;  %v14008_v33 = vperm.slane %v5500_v36, %v9997_v57 }
 0x6f7   : > { %v6172_v20 = vsel %vm672_vm6, %v6171_v38, %v6134_v23  ;;  %9480 = vrot.lane.b32.xlu1 %v9479_v3, %s9769_s7  ;;  %v6284_v53 = vsel %vm672_vm6, %v6283_v41, %v6246_v58  ;;  %v14019_v60 = vrot.slane %v16155_v22, 4  ;;  %v14023_v36 = vrot.slane %v16154_v18, 4 }
 0x6f8   : > { %v5829_v8 = vsel %vm672_vm6, %v13631_v63, %v9268_v56  ;;  %v5830_v6 = vrot.slane %v9268_v56, 4  ;;  %v5717_v59 = vsel %vm672_vm6, %v13635_v25, %v9267_v26  ;;  %v9489_v55 = vpack.i.bf16 %v6284_v53, %v6172_v20 }
 0x6f9   : > { %v5718_v4 = vrot.slane %v9267_v26, 4  ;;  %v14027_v38 = vrot.slane %v16153_v62, 4  ;;  %v16156_v63 = vunpack.i.h.bf16 %v13998_v46  ;;  %v16157_v3 = vunpack.i.l.bf16 %v13998_v46 }
 0x6fa   : > { %v6177_v25 = vrot.slane %v13874_v42, 4  ;;  %9490 = vrot.lane.b32.xlu0 %v9489_v55, %s9772_s10  ;;  %v14034_v41 = vperm.slane %v5829_v8, %v9951_v16  ;;  %v16640_v56 = vunpack.i.l.bf16 %v13588_v32  ;;  %v14040_v26 = vperm.slane %v5717_v59, %v9951_v16 }
 0x6fb   : > { %v6289_v53 = vrot.slane %v13891_v21, 4  ;;  %v16641_v62 = vunpack.i.h.bf16 %v13588_v32  ;;  %v6173_v55 = vrot.slane %v6134_v23, 4  ;;  %v6285_v22 = vrot.slane %v6246_v58, 4  ;;  %v9281_v32 = vpop.permute.xlu0 %9280 }
 0x6fc   : > { %v5719_v20 = vsel %vm672_vm6, %v16640_v56, %v5718_v4  ;;  %v6178_v42 = vsel %vm672_vm6, %v13864_v49, %v6177_v25  ;;  %v14053_v59 = vperm.slane %v13670_v51, %v9997_v57  ;;  %v14056_v21 = vperm.slane %v5374_v17, %v9997_v57  ;;  %v14070_v51 = vpop.permute.xlu1 %9315 }
 0x6fd   : > { %v5831_v18 = vsel %vm672_vm6, %v16641_v62, %v5830_v6  ;;  %v5727_v8 = vperm.slane %v5719_v20, %v9951_v16  ;;  %v6290_v2 = vsel %vm672_vm6, %v13883_v30, %v6289_v53  ;;  %v14060_v62 = vrot.slane %v16156_v63, 4  ;;  %v14068_v30 = vpop.permute.xlu2 %9355 }
 0x6fe   : > { %16642 = vst [vmem:[#allocation12_spill] sm:$0xff] %v14053_v59  ;;  %v6174_v49 = vsel %vm672_vm6, %v6158_v31, %v6173_v55  ;;  %v6286_v23 = vsel %vm672_vm6, %v6270_v15, %v6285_v22  ;;  %v14066_v58 = vperm.slane %v13678_v37, %v9997_v57  ;;  %v5839_v17 = vperm.slane %v5831_v18, %v9951_v16 }
 0x6ff   : > { %16643 = vst [vmem:[#allocation8_spill] sm:$0xff] %v14056_v21  ;;  %v9494_v6 = vpack.i.bf16 %v6286_v23, %v6174_v49  ;;  %v5399_v4 = vrot.slane %v14053_v59, 4  ;;  %v14076_v25 = vperm.slane %v13958_v14, %v9997_v57  ;;  %v9504_v31 = vpack.i.bf16 %v6290_v2, %v6178_v42  ;;  %v16669_v59 = vld [vmem:[#allocation18_spill] sm:$0xff] }
 0x700   : > { %16644 = vst [vmem:[#allocation13_spill] sm:$0xff] %v14066_v58  ;;  %v5511_v22 = vrot.slane %v14066_v58, 4  ;;  %v9283_v15 = vunpack.i.h.bf16 %v9281_v32  ;;  %v9282_v56 = vunpack.i.l.bf16 %v9281_v32  ;;  %v5778_v37 = vrot.slane %v5727_v8, 4 }
 0x701   : > { %16645 = vst [vmem:[#allocation42_spill] sm:$0xff] %v14076_v25  ;;  %9495 = vrot.lane.b32.xlu1 %v9494_v6, %s9771_s9  ;;  %v5400_v20 = vsel %vm672_vm6, %v14056_v21, %v5399_v4  ;;  %v16158_v18 = vunpack.i.h.bf16 %v14068_v30  ;;  %v9318_v53 = vunpack.i.h.bf16 %v14070_v51  ;;  %v16646_v4 = vunpack.i.l.bf16 %v13792_v52 }
 0x702   : > { %v5512_v55 = vsel %vm672_vm6, %v14076_v25, %v5511_v22  ;;  %v5840_v2 = vrot.slane %v9283_v15, 4  ;;  %v5728_v42 = vrot.slane %v9282_v56, 4  ;;  %9505 = vrot.lane.b32.xlu0 %v9504_v31, %s9774_s12  ;;  %v5731_v49 = vsel %vm672_vm6, %v9282_v56, %v13929_v27 }
 0x703   : > { %v9509_v32 = vpack.i.bf16 %v5512_v55, %v5400_v20  ;;  %v5843_v23 = vsel %vm672_vm6, %v9283_v15, %v13925_v45  ;;  %v6606_v6 = vrot.slane %v9318_v53, 4  ;;  %v5739_v22 = vperm.slane %v5731_v49, %v9951_v16 }
 0x704   : > { %v5729_v63 = vsel %vm672_vm6, %v5728_v42, %v16646_v4  ;;  %v16647_v13 = vunpack.i.h.bf16 %v13792_v52  ;;  %v5851_v31 = vperm.slane %v5843_v23, %v9951_v16  ;;  %v5878_v20 = vrot.slane %v14034_v41, 4 }
 0x705   : > { %v5766_v27 = vrot.slane %v14040_v26, 4  ;;  %9510 = vrot.lane.b32.xlu2 %v9509_v32, %s9770_s8  ;;  %v5735_v45 = vperm.slane %v5729_v63, %v9951_v16  ;;  %v5890_v56 = vrot.slane %v5839_v17, 4  ;;  %v5776_v55 = vrot.slane %v5739_v22, 4 }
 0x706   : > { %v5841_v14 = vsel %vm672_vm6, %v5840_v2, %v16647_v13  ;;  %v5779_v42 = vsel %vm672_vm6, %v5739_v22, %v5778_v37  ;;  %v5888_v49 = vrot.slane %v5851_v31, 4  ;;  %v9317_v23 = vunpack.i.l.bf16 %v14070_v51 }
 0x707   : > { %v5847_v15 = vperm.slane %v5841_v14, %v9951_v16  ;;  %v5764_v52 = vrot.slane %v5735_v45, 4  ;;  %v5767_v13 = vsel %vm672_vm6, %v5735_v45, %v5766_v27  ;;  %v14110_v4 = vrot.slane %v16157_v3, 4 }
 0x708   : > { %v14114_v63 = vrot.slane %v16158_v18, 4  ;;  %v16648_v14 = vunpack.i.l.bf16 %v14068_v30  ;;  %v16649_v37 = vunpack.i.h.bf16 %v13765_v11  ;;  %v14124_v27 = vperm.slane %v5779_v42, %v9997_v57 }
 0x709   : > { %v5876_v2 = vrot.slane %v5847_v15, 4  ;;  %v5879_v51 = vsel %vm672_vm6, %v5847_v15, %v5878_v20  ;;  %v5891_v45 = vsel %vm672_vm6, %v5851_v31, %v5890_v56  ;;  %v6609_v3 = vsel %vm672_vm6, %v9318_v53, %v13908_v34 }
 0x70a   : > { %v14118_v32 = vrot.slane %v16648_v14, 4  ;;  %v6607_v22 = vsel %vm672_vm6, %v6606_v6, %v16649_v37  ;;  %v14132_v18 = vsel %vm672_vm6, %v5764_v52, %v14040_v26  ;;  %v14135_v14 = vperm.slane %v5767_v13, %v9997_v57  ;;  %v9296_v13 = vpop.permute.xlu0 %9295 }
 0x70b   : > { %v14138_v39 = vsel %vm672_vm6, %v5776_v55, %v5727_v8  ;;  %v14141_v6 = vsel %vm672_vm6, %v5888_v49, %v5839_v17  ;;  %v14145_v20 = vsel %vm672_vm6, %v5876_v2, %v14034_v41  ;;  %v6494_v31 = vrot.slane %v9317_v23, 4 }
 0x70c   : > { %v16650_v34 = vrot.slane %v13944_v47, 4  ;;  %v16651_v53 = vrot.slane %v13914_v28, 4  ;;  %v14156_v8 = vperm.slane %v5879_v51, %v9997_v57  ;;  %v14159_v17 = vperm.slane %v5891_v45, %v9997_v57  ;;  %v14184_v45 = vpop.permute.xlu1 %9330 }
 0x70d   : > { %v5403_v56 = vrot.slane %v13653_v44, 4  ;;  %v14164_v47 = vperm.slane %v6607_v22, %v9951_v16  ;;  %v14173_v49 = vperm.slane %v13647_v29, %v9997_v57  ;;  %v5405_v52 = vrot.slane %v13952_v35, 4  ;;  %v16653_v22 = vld [vmem:[#allocation29_spill] sm:$0xff] }
 0x70e   : > { %v5376_v26 = vsel %vm672_vm6, %v13547_v43, %v16650_v34  ;;  %v5488_v15 = vsel %vm672_vm6, %v13550_v1, %v16651_v53  ;;  %v6497_v43 = vsel %vm672_vm6, %v9317_v23, %v13918_v48  ;;  %v5515_v1 = vrot.slane %v13681_v54, 4  ;;  %v14191_v53 = vpop.permute.xlu2 %9375 }
 0x70f   : > { %v5384_v41 = vperm.slane %v5376_v26, %v9997_v57  ;;  %v5496_v28 = vperm.slane %v5488_v15, %v9997_v57  ;;  %v16652_v2 = vunpack.i.l.bf16 %v13765_v11  ;;  %v14182_v51 = vperm.slane %v16653_v22, %v9997_v57  ;;  %16654 = vst [vmem:[#allocation44_spill] sm:$0xff] %v14191_v53 }
 0x710   : > { %v5406_v26 = vsel %vm672_vm6, %v5405_v52, %v14173_v49  ;;  %v5517_v11 = vrot.slane %v13979_v7, 4  ;;  %v14197_v15 = vperm.slane %v6497_v43, %v9951_v16  ;;  %v16160_v43 = vunpack.i.h.bf16 %v14191_v53 }
 0x711   : > { %v5404_v55 = vsel %vm672_vm6, %v5384_v41, %v5403_v56  ;;  %v5401_v42 = vrot.slane %v5384_v41, 4  ;;  %v6495_v37 = vsel %vm672_vm6, %v6494_v31, %v16652_v2  ;;  %v5516_v48 = vsel %vm672_vm6, %v5496_v28, %v5515_v1 }
 0x712   : > { %v5513_v23 = vrot.slane %v5496_v28, 4  ;;  %v9519_v34 = vpack.i.bf16 %v5516_v48, %v5404_v55  ;;  %v14194_v31 = vperm.slane %v6609_v3, %v9951_v16  ;;  %v9298_v56 = vunpack.i.h.bf16 %v9296_v13 }
 0x713   : > { %v5402_v29 = vsel %vm672_vm6, %v5401_v42, %v13653_v44  ;;  %v5518_v28 = vsel %vm672_vm6, %v5517_v11, %v14182_v51  ;;  %v9297_v1 = vunpack.i.l.bf16 %v9296_v13  ;;  %v9333_v55 = vunpack.i.h.bf16 %v14184_v45 }
 0x714   : > { %v5514_v41 = vsel %vm672_vm6, %v5513_v23, %v13681_v54  ;;  %9520 = vrot.lane.b32.xlu1 %v9519_v34, %s9773_s11  ;;  %v14206_v42 = vperm.slane %v6495_v37, %v9951_v16  ;;  %v9524_v3 = vpack.i.bf16 %v5518_v28, %v5406_v26  ;;  %v5852_v52 = vrot.slane %v9298_v56, 4 }
 0x715   : > { %v9514_v44 = vpack.i.bf16 %v5514_v41, %v5402_v29  ;;  %v16161_v54 = vunpack.i.l.bf16 %v14191_v53  ;;  %v5740_v2 = vrot.slane %v9297_v1, 4  ;;  %v5743_v48 = vsel %vm672_vm6, %v9297_v1, %v14019_v60  ;;  %v16657_v1 = vld [vmem:[#allocation7_spill] sm:$0xff] }
 0x716   : > { %v5855_v13 = vsel %vm672_vm6, %v9298_v56, %v13948_v0  ;;  %9525 = vrot.lane.b32.xlu2 %v9524_v3, %s9772_s10  ;;  %v5751_v37 = vperm.slane %v5743_v48, %v9951_v16  ;;  %v16655_v23 = vunpack.i.h.bf16 %v13880_v19  ;;  %v6618_v29 = vrot.slane %v9333_v55, 4  ;;  %v16666_v56 = vld [vmem:[#allocation26_spill] sm:$0xff]  ;;  %v14299_v21 = vpop.permute.xlu2 %9400 }
 0x717   : > { %9515 = vrot.lane.b32.xlu0 %v9514_v44, %s9769_s7  ;;  %v5863_v34 = vperm.slane %v5855_v13, %v9951_v16  ;;  %v16656_v11 = vunpack.i.l.bf16 %v13880_v19  ;;  %v6621_v0 = vsel %vm672_vm6, %v9333_v55, %v13933_v10  ;;  %v16658_v3 = vrot.slane %v16657_v1, 4  ;;  %v16661_v55 = vld [vmem:[#allocation31_spill] sm:$0xff]  ;;  %16671 = vst [vmem:[#allocation33_spill] sm:$0xff] %v14299_v21 }
 0x718   : > { %v5853_v22 = vsel %vm672_vm6, %v5852_v52, %v16655_v23  ;;  %v5802_v48 = vrot.slane %v5751_v37, 4  ;;  %v14245_v10 = vrot.slane %v16161_v54, 4  ;;  %v16662_v23 = vrot.slane %v16661_v55, 4 }
 0x719   : > { %v5741_v60 = vsel %vm672_vm6, %v5740_v2, %v16656_v11  ;;  %v14226_v41 = vperm.slane %v5853_v22, %v9951_v16  ;;  %v5801_v52 = vsel %vm672_vm6, %v16658_v3, %v5751_v37  ;;  %v14241_v2 = vrot.slane %v16160_v43, 4  ;;  %v16664_v43 = vld [vmem:[#allocation19_spill] sm:$0xff] }
 0x71a   : > { %v14233_v28 = vperm.slane %v5741_v60, %v9951_v16  ;;  %v5914_v13 = vrot.slane %v5863_v34, 4  ;;  %16660 = vst [vmem:[#allocation43_spill] sm:$0xff] %v14245_v10  ;;  %v5913_v22 = vsel %vm672_vm6, %v16662_v23, %v5863_v34  ;;  %v16663_v11 = vunpack.i.h.bf16 %v13861_v50 }
 0x71b   : > { %16659 = vst [vmem:[#allocation41_spill] sm:$0xff] %v14241_v2  ;;  %v14254_v3 = vperm.slane %v6621_v0, %v9951_v16  ;;  %v16665_v26 = vrot.slane %v16664_v43, 4  ;;  %v14263_v54 = vperm.slane %v5801_v52, %v9997_v57  ;;  %v16667_v19 = vrot.slane %v16666_v56, 4 }
 0x71c   : > { %v6619_v60 = vsel %vm672_vm6, %v6618_v29, %v16663_v11  ;;  %v9332_v23 = vunpack.i.l.bf16 %v14184_v45  ;;  %v5409_v11 = vrot.slane %v14005_v12, 4  ;;  %v5803_v52 = vsel %vm672_vm6, %v16657_v1, %v5802_v48  ;;  %v16668_v29 = vld [vmem:[#allocation24_spill] sm:$0xff] }
 0x71d   : > { %v14260_v37 = vsel %vm672_vm6, %v16665_v26, %v14233_v28  ;;  %v14269_v34 = vsel %vm672_vm6, %v16667_v19, %v14226_v41  ;;  %v5521_v26 = vrot.slane %v14008_v33, 4  ;;  %v5915_v44 = vsel %vm672_vm6, %v16661_v55, %v5914_v13 }
 0x71e   : > { %v5407_v5 = vrot.slane %v14173_v49, 4  ;;  %v5519_v19 = vrot.slane %v14182_v51, 4  ;;  %v6506_v24 = vrot.slane %v9332_v23, 4  ;;  %v5410_v0 = vsel %vm672_vm6, %v5409_v11, %v16668_v29  ;;  %v9311_v51 = vpop.permute.xlu0 %9310 }
 0x71f   : > { %v5522_v45 = vsel %vm672_vm6, %v5521_v26, %v16669_v59  ;;  %v5411_v9 = vrot.slane %v16668_v29, 4  ;;  %v6509_v58 = vsel %vm672_vm6, %v9332_v23, %v13941_v40  ;;  %v16670_v13 = vunpack.i.l.bf16 %v13861_v50  ;;  %v14301_v40 = vpop.permute.xlu1 %9335 }
 0x720   : > { %v9534_v1 = vpack.i.bf16 %v5522_v45, %v5410_v0  ;;  %v5408_v48 = vsel %vm672_vm6, %v13952_v35, %v5407_v5  ;;  %v5520_v49 = vsel %vm672_vm6, %v13979_v7, %v5519_v19  ;;  %v5523_v29 = vrot.slane %v16669_v59, 4 }
 0x721   : > { %v6507_v55 = vsel %vm672_vm6, %v6506_v24, %v16670_v13  ;;  %v9529_v11 = vpack.i.bf16 %v5520_v49, %v5408_v48  ;;  %v5412_v26 = vsel %vm672_vm6, %v14005_v12, %v5411_v9  ;;  %v14304_v5 = vperm.slane %v5803_v52, %v9997_v57 }
 0x722   : > { %v14307_v35 = vperm.slane %v5913_v22, %v9997_v57  ;;  %v14310_v50 = vperm.slane %v6619_v60, %v9951_v16  ;;  %9535 = vrot.lane.b32.xlu1 %v9534_v1, %s9775_s13  ;;  %v14315_v9 = vperm.slane %v5915_v44, %v9997_v57  ;;  %v5524_v7 = vsel %vm672_vm6, %v14008_v33, %v5523_v29 }
 0x723   : > { %9530 = vrot.lane.b32.xlu0 %v9529_v11, %s9771_s9  ;;  %v9313_v12 = vunpack.i.h.bf16 %v9311_v51  ;;  %v9312_v59 = vunpack.i.l.bf16 %v9311_v51  ;;  %v14321_v22 = vperm.slane %v6507_v55, %v9951_v16  ;;  %v14324_v60 = vperm.slane %v6509_v58, %v9951_v16  ;;  %v14399_v11 = vpop.permute.xlu2 %9415 }
 0x724   : > { %v9539_v0 = vpack.i.bf16 %v5524_v7, %v5412_v26  ;;  %v16169_v23 = vunpack.i.h.bf16 %v14299_v21  ;;  %v6668_v33 = vrot.slane %v14310_v50, 4  ;;  %v16168_v1 = vunpack.i.l.bf16 %v14299_v21 }
 0x725   : > { %v6594_v52 = vrot.slane %v9313_v12, 4  ;;  %v6482_v19 = vrot.slane %v9312_v59, 4  ;;  %v6485_v44 = vsel %vm672_vm6, %v9312_v59, %v14110_v4  ;;  %v6597_v45 = vsel %vm672_vm6, %v9313_v12, %v14060_v62 }
 0x726   : > { %9540 = vrot.lane.b32.xlu2 %v9539_v0, %s9774_s12  ;;  %v6493_v58 = vperm.slane %v6485_v44, %v9951_v16  ;;  %v16170_v48 = vunpack.i.h.bf16 %v14301_v40  ;;  %v16672_v49 = vunpack.i.l.bf16 %v13998_v46  ;;  %v16673_v13 = vunpack.i.h.bf16 %v13998_v46 }
 0x727   : > { %v6605_v62 = vperm.slane %v6597_v45, %v9951_v16  ;;  %v16171_v55 = vunpack.i.l.bf16 %v14301_v40  ;;  %v16674_v29 = vrot.slane %v14197_v15, 4  ;;  %v14353_v12 = vperm.slane %v14132_v18, %v9997_v57 }
 0x728   : > { %v6483_v51 = vsel %vm672_vm6, %v6482_v19, %v16672_v49  ;;  %v6595_v4 = vsel %vm672_vm6, %v6594_v52, %v16673_v13  ;;  %v6556_v46 = vrot.slane %v14321_v22, 4  ;;  %v14358_v59 = vrot.slane %v16169_v23, 4  ;;  %v9326_v49 = vpop.permute.xlu0 %9325 }
 0x729   : > { %v14346_v26 = vperm.slane %v6483_v51, %v9951_v16  ;;  %v6543_v7 = vsel %vm672_vm6, %v16674_v29, %v6493_v58  ;;  %16675 = vst [vmem:[#allocation53_spill] sm:$0xff] %v14353_v12  ;;  %v6544_v0 = vrot.slane %v6493_v58, 4  ;;  %v14361_v52 = vperm.slane %v6595_v4, %v9951_v16 }
 0x72a   : > { %v14365_v19 = vrot.slane %v16168_v1, 4  ;;  %v14368_v44 = vperm.slane %v6543_v7, %v9997_v57  ;;  %v14372_v18 = vrot.slane %v16170_v48, 4  ;;  %v14376_v45 = vperm.slane %v14260_v37, %v9997_v57  ;;  %v9351_v1 = vpop.permute.xlu1 %9350 }
 0x72b   : > { %v16678_v58 = vrot.slane %v14206_v42, 4  ;;  %v16679_v13 = vrot.slane %v14194_v31, 4  ;;  %v6656_v29 = vrot.slane %v6605_v62, 4  ;;  %v14387_v7 = vrot.slane %v16171_v55, 4 }
 0x72c   : > { %16676 = vst [vmem:[#allocation32_spill] sm:$0xff] %v14368_v44  ;;  %v5814_v37 = vrot.slane %v14353_v12, 4  ;;  %v14393_v48 = vperm.slane %v14145_v20, %v9997_v57  ;;  %v9328_v55 = vunpack.i.h.bf16 %v9326_v49  ;;  %v9327_v24 = vunpack.i.l.bf16 %v9326_v49 }
 0x72d   : > { %16677 = vst [vmem:[#allocation34_spill] sm:$0xff] %v14376_v45  ;;  %v6531_v51 = vsel %vm672_vm6, %v16678_v58, %v14346_v26  ;;  %v6655_v4 = vsel %vm672_vm6, %v16679_v13, %v6605_v62  ;;  %v14397_v58 = vperm.slane %v14269_v34, %v9997_v57  ;;  %v14403_v62 = vsel %vm672_vm6, %v14197_v15, %v6544_v0  ;;  %v16685_v0 = vld [vmem:[#allocation40_spill] sm:$0xff] }
 0x72e   : > { %16680 = vst [vmem:[#allocation4_spill] sm:$0xff] %v14393_v48  ;;  %v16683_v13 = vrot.slane %v14164_v47, 4  ;;  %v14410_v20 = vperm.slane %v6531_v51, %v9997_v57  ;;  %v5815_v34 = vsel %vm672_vm6, %v14376_v45, %v5814_v37  ;;  %v5926_v12 = vrot.slane %v14393_v48, 4  ;;  %v16687_v48 = vld [vmem:[#allocation28_spill] sm:$0xff] }
 0x72f   : > { %16681 = vst [vmem:[#allocation9_spill] sm:$0xff] %v14397_v58  ;;  %v9353_v25 = vunpack.i.h.bf16 %v9351_v1  ;;  %v6631_v53 = vsel %vm672_vm6, %v16685_v0, %v9328_v55  ;;  %v6632_v2 = vrot.slane %v9328_v55, 4  ;;  %v6520_v37 = vrot.slane %v9327_v24, 4 }
 0x730   : > { %16682 = vst [vmem:[#allocation37_spill] sm:$0xff] %v14403_v62  ;;  %v6643_v23 = vsel %vm672_vm6, %v16683_v13, %v14361_v52  ;;  %v5927_v49 = vsel %vm672_vm6, %v14397_v58, %v5926_v12  ;;  %v6637_v51 = vperm.slane %v6631_v53, %v9951_v16  ;;  %v16686_v13 = vld [vmem:[#allocation23_spill] sm:$0xff]  ;;  %v16688_v44 = vunpack.i.h.bf16 %v16687_v48 }
 0x731   : > { %16684 = vst [vmem:[#allocation11_spill] sm:$0xff] %v14410_v20  ;;  %v6519_v62 = vsel %vm672_vm6, %v16686_v13, %v9327_v24  ;;  %v9544_v45 = vpack.i.bf16 %v5927_v49, %v5815_v34  ;;  %v9352_v21 = vunpack.i.l.bf16 %v9351_v1  ;;  %v16689_v55 = vunpack.i.l.bf16 %v16687_v48 }
 0x732   : > { %v6633_v10 = vsel %vm672_vm6, %v16688_v44, %v6632_v2  ;;  %v6525_v15 = vperm.slane %v6519_v62, %v9951_v16  ;;  %v6669_v53 = vsel %vm672_vm6, %v6637_v51, %v6668_v33  ;;  %v7021_v58 = vrot.slane %v9353_v25, 4 }
 0x733   : > { %v14429_v0 = vperm.slane %v6633_v10, %v9951_v16  ;;  %v6521_v12 = vsel %vm672_vm6, %v16689_v55, %v6520_v37  ;;  %9545 = vrot.lane.b32.xlu2 %v9544_v45, %s9770_s8  ;;  %v6666_v34 = vrot.slane %v6637_v51, 4  ;;  %v14439_v1 = vperm.slane %v6643_v23, %v9997_v57 }
 0x734   : > { %v6554_v49 = vrot.slane %v6525_v15, 4  ;;  %v6557_v2 = vsel %vm672_vm6, %v6525_v15, %v6556_v46  ;;  %v14443_v10 = vsel %vm672_vm6, %v14194_v31, %v6656_v29  ;;  %v14446_v48 = vperm.slane %v6655_v4, %v9997_v57 }
 0x735   : > { %16690 = vst [vmem:[#allocation16_spill] sm:$0xff] %v14439_v1  ;;  %v14449_v33 = vperm.slane %v6521_v12, %v9951_v16  ;;  %v16691_v44 = vunpack.i.h.bf16 %v14399_v11  ;;  %v16692_v62 = vunpack.i.l.bf16 %v14399_v11  ;;  %v14461_v15 = vperm.slane %v6669_v53, %v9997_v57 }
 0x736   : > { %v14464_v31 = vperm.slane %v6557_v2, %v9997_v57  ;;  %v16693_v4 = vunpack.i.h.bf16 %v13972_v61  ;;  %v7024_v51 = vsel %vm672_vm6, %v9353_v25, %v14023_v36  ;;  %v6909_v13 = vrot.slane %v9352_v21, 4 }
 0x737   : > { %v14453_v45 = vrot.slane %v16691_v44, 4  ;;  %v14457_v46 = vrot.slane %v16692_v62, 4  ;;  %v14473_v37 = vsel %vm672_vm6, %v6554_v49, %v14321_v22  ;;  %v14477_v55 = vsel %vm672_vm6, %v6666_v34, %v14310_v50 }
 0x738   : > { %v7022_v29 = vsel %vm672_vm6, %v7021_v58, %v16693_v4  ;;  %v16694_v12 = vrot.slane %v14254_v3, 4  ;;  %v16695_v2 = vrot.slane %v14233_v28, 4  ;;  %v6912_v25 = vsel %vm672_vm6, %v9352_v21, %v14027_v38 }
 0x739   : > { %v5818_v50 = vrot.slane %v14135_v14, 4  ;;  %v16696_v34 = vrot.slane %v14324_v60, 4  ;;  %v14497_v44 = vperm.slane %v7022_v29, %v9951_v16  ;;  %v14500_v28 = vperm.slane %v7024_v51, %v9951_v16 }
 0x73a   : > { %v6681_v53 = vsel %vm672_vm6, %v14429_v0, %v16694_v12  ;;  %v5791_v58 = vsel %vm672_vm6, %v16664_v43, %v16695_v2  ;;  %v16697_v43 = vrot.slane %v14226_v41, 4  ;;  %v16698_v21 = vunpack.i.l.bf16 %v13972_v61 }
 0x73b   : > { %v5799_v22 = vperm.slane %v5791_v58, %v9997_v57  ;;  %v6569_v49 = vsel %vm672_vm6, %v14449_v33, %v16696_v34  ;;  %v5930_v2 = vrot.slane %v14156_v8, 4  ;;  %v6920_v29 = vperm.slane %v6912_v25, %v9951_v16 }
 0x73c   : > { %v5903_v38 = vsel %vm672_vm6, %v16666_v56, %v16697_v43  ;;  %v6910_v62 = vsel %vm672_vm6, %v6909_v13, %v16698_v21  ;;  %v14515_v51 = vperm.slane %v14138_v39, %v9997_v57  ;;  %v5820_v41 = vrot.slane %v14263_v54, 4  ;;  %v9346_v56 = vpop.permute.xlu0 %9345 }
 0x73d   : > { %v5819_v4 = vsel %vm672_vm6, %v5799_v22, %v5818_v50  ;;  %v5911_v12 = vperm.slane %v5903_v38, %v9997_v57  ;;  %v5816_v58 = vrot.slane %v5799_v22, 4  ;;  %v14521_v13 = vperm.slane %v14141_v6, %v9997_v57  ;;  %v14529_v38 = vpop.permute.xlu2 %9425 }
 0x73e   : > { %v5932_v50 = vrot.slane %v14307_v35, 4  ;;  %v7057_v43 = vrot.slane %v14497_v44, 4  ;;  %v5821_v39 = vsel %vm672_vm6, %v5820_v41, %v14515_v51  ;;  %v14532_v21 = vperm.slane %v6910_v62, %v9951_v16  ;;  %v9366_v41 = vpop.permute.xlu1 %9365 }
 0x73f   : > { %v5931_v61 = vsel %vm672_vm6, %v5911_v12, %v5930_v2  ;;  %v5928_v34 = vrot.slane %v5911_v12, 4  ;;  %v5817_v22 = vsel %vm672_vm6, %v5816_v58, %v14135_v14  ;;  %v9348_v2 = vunpack.i.h.bf16 %v9346_v56 }
 0x740   : > { %v9554_v25 = vpack.i.bf16 %v5931_v61, %v5819_v4  ;;  %v5933_v12 = vsel %vm672_vm6, %v5932_v50, %v14521_v13  ;;  %v7069_v4 = vrot.slane %v14500_v28, 4  ;;  %v9347_v61 = vunpack.i.l.bf16 %v9346_v56 }
 0x741   : > { %v5929_v6 = vsel %vm672_vm6, %v5928_v34, %v14156_v8  ;;  %v9559_v58 = vpack.i.bf16 %v5933_v12, %v5821_v39  ;;  %v6957_v23 = vrot.slane %v6920_v29, 4  ;;  %v7009_v62 = vrot.slane %v9348_v2, 4 }
 0x742   : > { %9555 = vrot.lane.b32.xlu1 %v9554_v25, %s9773_s11  ;;  %v9549_v14 = vpack.i.bf16 %v5929_v6, %v5817_v22  ;;  %v7012_v24 = vsel %vm672_vm6, %v9348_v2, %v14372_v18  ;;  %v6897_v34 = vrot.slane %v9347_v61, 4  ;;  %v6900_v50 = vsel %vm672_vm6, %v9347_v61, %v14387_v7 }
 0x743   : > { %9560 = vrot.lane.b32.xlu2 %v9559_v58, %s9772_s10  ;;  %v7020_v56 = vperm.slane %v7012_v24, %v9951_v16  ;;  %v6945_v25 = vrot.slane %v14532_v21, 4  ;;  %v6908_v22 = vperm.slane %v6900_v50, %v9951_v16  ;;  %v16699_v39 = vunpack.i.h.bf16 %v14301_v40 }
 0x744   : > { %9550 = vrot.lane.b32.xlu0 %v9549_v14, %s9769_s7  ;;  %v9368_v6 = vunpack.i.h.bf16 %v9366_v41  ;;  %v16700_v12 = vunpack.i.l.bf16 %v14301_v40  ;;  %v9367_v8 = vunpack.i.l.bf16 %v9366_v41  ;;  %v14564_v36 = vperm.slane %v6569_v49, %v9997_v57 }
 0x745   : > { %v7010_v18 = vsel %vm672_vm6, %v7009_v62, %v16699_v39  ;;  %v7071_v58 = vrot.slane %v7020_v56, 4  ;;  %v6958_v24 = vsel %vm672_vm6, %v6957_v23, %v6908_v22  ;;  %v6959_v61 = vrot.slane %v6908_v22, 4 }
 0x746   : > { %v6898_v2 = vsel %vm672_vm6, %v6897_v34, %v16700_v12  ;;  %v7016_v14 = vperm.slane %v7010_v18, %v9951_v16  ;;  %v7070_v50 = vsel %vm672_vm6, %v7069_v4, %v7020_v56  ;;  %v14567_v62 = vperm.slane %v6681_v53, %v9997_v57 }
 0x747   : > { %v14559_v7 = vperm.slane %v6898_v2, %v9951_v16  ;;  %v16701_v40 = vunpack.i.h.bf16 %v14529_v38  ;;  %v16702_v41 = vunpack.i.l.bf16 %v14529_v38  ;;  %v7033_v4 = vrot.slane %v9368_v6, 4 }
 0x748   : > { %v7058_v22 = vsel %vm672_vm6, %v7057_v43, %v7016_v14  ;;  %v7036_v49 = vsel %vm672_vm6, %v9368_v6, %v14114_v63  ;;  %v14583_v53 = vperm.slane %v6958_v24, %v9997_v57  ;;  %v7059_v56 = vrot.slane %v7016_v14, 4 }
 0x749   : > { %v14571_v34 = vrot.slane %v16701_v40, 4  ;;  %v14575_v39 = vrot.slane %v16702_v41, 4  ;;  %v6946_v23 = vsel %vm672_vm6, %v6945_v25, %v14559_v7  ;;  %v14587_v18 = vsel %vm672_vm6, %v14500_v28, %v7071_v58 }
 0x74a   : > { %v14590_v12 = vperm.slane %v7070_v50, %v9997_v57  ;;  %v14594_v25 = vsel %vm672_vm6, %v6920_v29, %v6959_v61  ;;  %v6921_v43 = vrot.slane %v9367_v8, 4  ;;  %v5824_v40 = vrot.slane %v14304_v5, 4 }
 0x74b   : > { %v14598_v63 = vperm.slane %v6946_v23, %v9997_v57  ;;  %v14601_v6 = vperm.slane %v7058_v22, %v9997_v57  ;;  %v5936_v28 = vrot.slane %v14315_v9, 4  ;;  %v5822_v14 = vrot.slane %v14515_v51, 4  ;;  %v9361_v23 = vpop.permute.xlu0 %9360 }
 0x74c   : > { %16703 = vst [vmem:[#allocation6_spill] sm:$0xff] %v14590_v12  ;;  %v16706_v58 = vunpack.i.h.bf16 %v14068_v30  ;;  %v16707_v29 = vunpack.i.l.bf16 %v14068_v30  ;;  %v5825_v50 = vsel %vm672_vm6, %v5824_v40, %v14124_v27  ;;  %v5934_v41 = vrot.slane %v14521_v13, 4 }
 0x74d   : > { %16704 = vst [vmem:[#allocation36_spill] sm:$0xff] %v14598_v63  ;;  %v14615_v22 = vperm.slane %v7036_v49, %v9951_v16  ;;  %v6924_v51 = vsel %vm672_vm6, %v9367_v8, %v14118_v32  ;;  %v5937_v2 = vsel %vm672_vm6, %v5936_v28, %v14159_v17  ;;  %v5823_v30 = vsel %vm672_vm6, %v14263_v54, %v5822_v14 }
 0x74e   : > { %16705 = vst [vmem:[#allocation35_spill] sm:$0xff] %v14601_v6  ;;  %v7034_v24 = vsel %vm672_vm6, %v7033_v4, %v16706_v58  ;;  %v6922_v61 = vsel %vm672_vm6, %v6921_v43, %v16707_v29  ;;  %v9569_v4 = vpack.i.bf16 %v5937_v2, %v5825_v50  ;;  %v5935_v43 = vsel %vm672_vm6, %v14307_v35, %v5934_v41  ;;  %v16708_v2 = vld [vmem:[#allocation17_spill] sm:$0xff] }
 0x74f   : > { %v5826_v40 = vrot.slane %v14124_v27, 4  ;;  %v5938_v13 = vrot.slane %v14159_v17, 4  ;;  %v6928_v49 = vperm.slane %v6922_v61, %v9951_v16  ;;  %v9564_v58 = vpack.i.bf16 %v5935_v43, %v5823_v30  ;;  %v14639_v17 = vpop.permute.xlu1 %9370 }
 0x750   : > { %v9363_v29 = vunpack.i.h.bf16 %v9361_v23  ;;  %v9362_v12 = vunpack.i.l.bf16 %v9361_v23  ;;  %v14629_v32 = vperm.slane %v7034_v24, %v9951_v16  ;;  %v14632_v8 = vperm.slane %v6924_v51, %v9951_v16  ;;  %9570 = vrot.lane.b32.xlu1 %v9569_v4, %s9775_s13  ;;  %v16709_v24 = vld [vmem:[#allocation39_spill] sm:$0xff]  ;;  %v16710_v51 = vld [vmem:[#allocation38_spill] sm:$0xff] }
 0x751   : > { %v5827_v54 = vsel %vm672_vm6, %v14304_v5, %v5826_v40  ;;  %v5939_v27 = vsel %vm672_vm6, %v14315_v9, %v5938_v13  ;;  %9565 = vrot.lane.b32.xlu0 %v9564_v58, %s9771_s9  ;;  %v14648_v50 = vsel %vm672_vm6, %v14497_v44, %v7059_v56  ;;  %v6971_v23 = vrot.slane %v6928_v49, 4  ;;  %v14657_v40 = vpop.permute.xlu2 %9445 }
 0x752   : > { %v9574_v35 = vpack.i.bf16 %v5939_v27, %v5827_v54  ;;  %v7046_v28 = vsel %vm672_vm6, %v16708_v2, %v9363_v29  ;;  %v7047_v14 = vrot.slane %v9363_v29, 4  ;;  %v6934_v61 = vsel %vm672_vm6, %v16709_v24, %v9362_v12  ;;  %16712 = vst [vmem:[#allocation51_spill] sm:$0xff] %v14657_v40 }
 0x753   : > { %v6935_v41 = vrot.slane %v9362_v12, 4  ;;  %v6940_v9 = vperm.slane %v6934_v61, %v9951_v16  ;;  %v16711_v30 = vunpack.i.h.bf16 %v16710_v51  ;;  %v7052_v43 = vperm.slane %v7046_v28, %v9951_v16 }
 0x754   : > { %9575 = vrot.lane.b32.xlu2 %v9574_v35, %s9774_s12  ;;  %v9373_v13 = vunpack.i.h.bf16 %v14639_v17  ;;  %v16713_v56 = vunpack.i.l.bf16 %v16710_v51  ;;  %v9372_v29 = vunpack.i.l.bf16 %v14639_v17  ;;  %v7083_v54 = vrot.slane %v14629_v32, 4 }
 0x755   : > { %v7048_v4 = vsel %vm672_vm6, %v16711_v30, %v7047_v14  ;;  %v6969_v58 = vrot.slane %v6940_v9, 4  ;;  %v6983_v27 = vrot.slane %v14632_v8, 4  ;;  %v6972_v2 = vsel %vm672_vm6, %v6940_v9, %v6971_v23 }
 0x756   : > { %v14661_v44 = vperm.slane %v7048_v4, %v9951_v16  ;;  %v6936_v12 = vsel %vm672_vm6, %v16713_v56, %v6935_v41  ;;  %v16714_v24 = vrot.slane %v14346_v26, 4  ;;  %v6582_v17 = vrot.slane %v14464_v31, 4 }
 0x757   : > { %v14670_v35 = vperm.slane %v6936_v12, %v9951_v16  ;;  %v7081_v41 = vrot.slane %v7052_v43, 4  ;;  %v7084_v30 = vsel %vm672_vm6, %v7052_v43, %v7083_v54  ;;  %v8202_v4 = vrot.slane %v9373_v13, 4  ;;  %v9381_v12 = vpop.permute.xlu0 %9380 }
 0x758   : > { %v6533_v61 = vsel %vm672_vm6, %v14206_v42, %v16714_v24  ;;  %v7093_v51 = vrot.slane %v14661_v44, 4  ;;  %v14683_v56 = vsel %vm672_vm6, %v6969_v58, %v6928_v49  ;;  %v14686_v9 = vperm.slane %v6972_v2, %v9997_v57 }
 0x759   : > { %v6984_v26 = vsel %vm672_vm6, %v14670_v35, %v6983_v27  ;;  %v8090_v23 = vrot.slane %v9372_v29, 4  ;;  %v6541_v42 = vperm.slane %v6533_v61, %v9997_v57  ;;  %v16715_v24 = vrot.slane %v14361_v52, 4 }
 0x75a   : > { %v6694_v43 = vrot.slane %v14461_v15, 4  ;;  %v14698_v49 = vperm.slane %v14473_v37, %v9997_v57  ;;  %v6580_v54 = vrot.slane %v14410_v20, 4  ;;  %v14704_v27 = vperm.slane %v14477_v55, %v9997_v57 }
 0x75b   : > { %v6645_v28 = vsel %vm672_vm6, %v14164_v47, %v16715_v24  ;;  %v6692_v2 = vrot.slane %v14439_v1, 4  ;;  %v6583_v52 = vsel %vm672_vm6, %v6582_v17, %v6541_v42  ;;  %v6584_v61 = vrot.slane %v6541_v42, 4 }
 0x75c   : > { %16716 = vst [vmem:[#allocation52_spill] sm:$0xff] %v14698_v49  ;;  %v6653_v58 = vperm.slane %v6645_v28, %v9997_v57  ;;  %v9383_v47 = vunpack.i.h.bf16 %v9381_v12  ;;  %v9382_v24 = vunpack.i.l.bf16 %v9381_v12  ;;  %v6581_v37 = vsel %vm672_vm6, %v14698_v49, %v6580_v54  ;;  %v9386_v54 = vpop.permute.xlu1 %9385 }
 0x75d   : > { %16717 = vst [vmem:[#allocation46_spill] sm:$0xff] %v14704_v27  ;;  %v6693_v28 = vsel %vm672_vm6, %v14704_v27, %v6692_v2  ;;  %v6585_v55 = vsel %vm672_vm6, %v14464_v31, %v6584_v61  ;;  %v14717_v17 = vsel %vm672_vm6, %v7081_v41, %v14629_v32  ;;  %v14720_v12 = vperm.slane %v7084_v30, %v9997_v57 }
 0x75e   : > { %v6695_v14 = vsel %vm672_vm6, %v6694_v43, %v6653_v58  ;;  %v6696_v5 = vrot.slane %v6653_v58, 4  ;;  %v9579_v40 = vpack.i.bf16 %v6693_v28, %v6581_v37  ;;  %v8204_v1 = vrot.slane %v9383_v47, 4  ;;  %v14769_v28 = vpop.permute.xlu2 %9455 }
 0x75f   : > { %v9584_v20 = vpack.i.bf16 %v6695_v14, %v6583_v52  ;;  %v8092_v43 = vrot.slane %v9382_v24, 4  ;;  %v8091_v14 = vsel %vm672_vm6, %v8090_v23, %v9382_v24  ;;  %v14730_v41 = vperm.slane %v6984_v26, %v9997_v57 }
 0x760   : > { %v6697_v42 = vsel %vm672_vm6, %v14461_v15, %v6696_v5  ;;  %9580 = vrot.lane.b32.xlu0 %v9579_v40, %s9770_s8  ;;  %v8205_v32 = vsel %vm672_vm6, %v9373_v13, %v8204_v1  ;;  %v16718_v30 = vrot.slane %v14615_v22, 4  ;;  %v8203_v40 = vsel %vm672_vm6, %v8202_v4, %v9383_v47 }
 0x761   : > { %9585 = vrot.lane.b32.xlu1 %v9584_v20, %s9769_s7  ;;  %v9589_v31 = vpack.i.bf16 %v6697_v42, %v6585_v55  ;;  %v8093_v5 = vsel %vm672_vm6, %v9372_v29, %v8092_v43  ;;  %v14738_v2 = vperm.slane %v8205_v32, %v9951_v16  ;;  %v9388_v1 = vunpack.i.h.bf16 %v9386_v54  ;;  %v16721_v55 = vld [vmem:[#allocation33_spill] sm:$0xff] }
 0x762   : > { %v7096_v15 = vsel %vm672_vm6, %v14661_v44, %v16718_v30  ;;  %v8101_v20 = vperm.slane %v8093_v5, %v9951_v16  ;;  %v9387_v13 = vunpack.i.l.bf16 %v9386_v54  ;;  %v14745_v26 = vsel %vm672_vm6, %v7093_v51, %v14615_v22 }
 0x763   : > { %9590 = vrot.lane.b32.xlu2 %v9589_v31, %s9773_s11  ;;  %v14748_v23 = vperm.slane %v8091_v14, %v9951_v16  ;;  %v8250_v44 = vrot.slane %v14738_v2, 4  ;;  %v16719_v29 = vrot.slane %v14449_v33, 4  ;;  %v8190_v24 = vrot.slane %v9388_v1, 4 }
 0x764   : > { %v8138_v61 = vrot.slane %v8101_v20, 4  ;;  %v8193_v4 = vsel %vm672_vm6, %v9388_v1, %v14358_v59  ;;  %v8078_v47 = vrot.slane %v9387_v13, 4  ;;  %v14758_v37 = vperm.slane %v8203_v40, %v9951_v16  ;;  %v16724_v40 = vld [vmem:[#allocation32_spill] sm:$0xff] }
 0x765   : > { %v6567_v52 = vsel %vm672_vm6, %v16719_v29, %v14324_v60  ;;  %v14761_v22 = vperm.slane %v8193_v4, %v9951_v16  ;;  %v8081_v51 = vsel %vm672_vm6, %v9387_v13, %v14365_v19  ;;  %v16720_v33 = vrot.slane %v14429_v0, 4 }
 0x766   : > { %v16722_v42 = vunpack.i.h.bf16 %v16721_v55  ;;  %v16723_v43 = vunpack.i.l.bf16 %v16721_v55  ;;  %v8089_v31 = vperm.slane %v8081_v51, %v9951_v16  ;;  %v6573_v14 = vperm.slane %v6567_v52, %v9997_v57  ;;  %v9391_v51 = vpop.permute.xlu0 %9390 }
 0x767   : > { %v6679_v60 = vsel %vm672_vm6, %v16720_v33, %v14254_v3  ;;  %v8126_v19 = vrot.slane %v14748_v23, 4  ;;  %v8251_v32 = vsel %vm672_vm6, %v8250_v44, %v14761_v22  ;;  %v14789_v30 = vperm.slane %v7096_v15, %v9997_v57 }
 0x768   : > { %v8191_v59 = vsel %vm672_vm6, %v8190_v24, %v16722_v42  ;;  %v8079_v54 = vsel %vm672_vm6, %v8078_v47, %v16723_v43  ;;  %v8139_v5 = vsel %vm672_vm6, %v8138_v61, %v8089_v31  ;;  %v6588_v1 = vrot.slane %v16724_v40, 4  ;;  %v16727_v43 = vld [vmem:[#allocation37_spill] sm:$0xff]  ;;  %v9396_v47 = vpop.permute.xlu1 %9395 }
 0x769   : > { %v14781_v0 = vperm.slane %v8191_v59, %v9951_v16  ;;  %v14784_v3 = vperm.slane %v8079_v54, %v9951_v16  ;;  %v6685_v13 = vperm.slane %v6679_v60, %v9997_v57  ;;  %v8238_v29 = vrot.slane %v14758_v37, 4 }
 0x76a   : > { %v8252_v4 = vrot.slane %v14761_v22, 4  ;;  %v8140_v44 = vrot.slane %v8089_v31, 4  ;;  %v14800_v15 = vperm.slane %v8251_v32, %v9997_v57  ;;  %v6589_v61 = vsel %vm672_vm6, %v6573_v14, %v6588_v1 }
 0x76b   : > { %v8127_v33 = vsel %vm672_vm6, %v8126_v19, %v14784_v3  ;;  %v14807_v55 = vperm.slane %v8139_v5, %v9997_v57  ;;  %v6700_v42 = vrot.slane %v14446_v48, 4  ;;  %v6586_v22 = vrot.slane %v6573_v14, 4 }
 0x76c   : > { %16725 = vst [vmem:[#allocation29_spill] sm:$0xff] %v14800_v15  ;;  %v6698_v59 = vrot.slane %v6685_v13, 4  ;;  %v14812_v54 = vperm.slane %v16727_v43, %v9997_v57  ;;  %v6590_v31 = vrot.slane %v14564_v36, 4  ;;  %v14818_v19 = vperm.slane %v14443_v10, %v9997_v57  ;;  %v16728_v10 = vld [vmem:[#allocation41_spill] sm:$0xff] }
 0x76d   : > { %16726 = vst [vmem:[#allocation7_spill] sm:$0xff] %v14807_v55  ;;  %v6701_v32 = vsel %vm672_vm6, %v6685_v13, %v6700_v42  ;;  %v6702_v1 = vrot.slane %v14567_v62, 4  ;;  %v9393_v5 = vunpack.i.h.bf16 %v9391_v51  ;;  %v6587_v14 = vsel %vm672_vm6, %v6586_v22, %v16724_v40 }
 0x76e   : > { %v9599_v24 = vpack.i.bf16 %v6701_v32, %v6589_v61  ;;  %v6699_v52 = vsel %vm672_vm6, %v6698_v59, %v14446_v48  ;;  %v6591_v43 = vsel %vm672_vm6, %v6590_v31, %v14812_v54  ;;  %v8141_v61 = vsel %vm672_vm6, %v8101_v20, %v8140_v44  ;;  %v16732_v44 = vld [vmem:[#allocation43_spill] sm:$0xff] }
 0x76f   : > { %v9594_v60 = vpack.i.bf16 %v6699_v52, %v6587_v14  ;;  %v6703_v13 = vsel %vm672_vm6, %v6702_v1, %v14818_v19  ;;  %v8215_v42 = vsel %vm672_vm6, %v16728_v10, %v9393_v5  ;;  %v8216_v58 = vrot.slane %v9393_v5, 4  ;;  %v16729_v52 = vld [vmem:[#allocation44_spill] sm:$0xff]  ;;  %v16734_v10 = vld [vmem:[#allocation50_spill] sm:$0xff] }
 0x770   : > { %9600 = vrot.lane.b32.xlu1 %v9599_v24, %s9771_s9  ;;  %v9604_v40 = vpack.i.bf16 %v6703_v13, %v6591_v43  ;;  %v8221_v22 = vperm.slane %v8215_v42, %v9951_v16  ;;  %v9392_v48 = vunpack.i.l.bf16 %v9391_v51  ;;  %v8239_v59 = vsel %vm672_vm6, %v8238_v29, %v14781_v0  ;;  %v16733_v43 = vld [vmem:[#allocation48_spill] sm:$0xff]  ;;  %v9411_v55 = vpop.permute.xlu1 %9410 }
 0x771   : > { %9595 = vrot.lane.b32.xlu0 %v9594_v60, %s9772_s10  ;;  %v16730_v31 = vunpack.i.h.bf16 %v16729_v52  ;;  %v9398_v1 = vunpack.i.h.bf16 %v9396_v47  ;;  %v9397_v14 = vunpack.i.l.bf16 %v9396_v47  ;;  %v8253_v47 = vsel %vm672_vm6, %v14738_v2, %v8252_v4 }
 0x772   : > { %9605 = vrot.lane.b32.xlu2 %v9604_v40, %s9775_s13  ;;  %v8264_v24 = vrot.slane %v8221_v22, 4  ;;  %v8103_v51 = vsel %vm672_vm6, %v16732_v44, %v9392_v48  ;;  %v8104_v5 = vrot.slane %v9392_v48, 4  ;;  %v16735_v42 = vunpack.i.l.bf16 %v16729_v52 }
 0x773   : > { %v8217_v32 = vsel %vm672_vm6, %v16730_v31, %v8216_v58  ;;  %v8109_v29 = vperm.slane %v8103_v51, %v9951_v16  ;;  %v8227_v60 = vsel %vm672_vm6, %v16733_v43, %v9398_v1  ;;  %v8228_v13 = vrot.slane %v9398_v1, 4  ;;  %v14860_v51 = vpop.permute.xlu2 %9470  ;;  %v16737_v1 = vld [vmem:[#allocation15_spill] sm:$0xff] }
 0x774   : > { %v14842_v20 = vperm.slane %v8217_v32, %v9951_v16  ;;  %v8115_v58 = vsel %vm672_vm6, %v16734_v10, %v9397_v14  ;;  %v8105_v40 = vsel %vm672_vm6, %v16735_v42, %v8104_v5  ;;  %v8233_v31 = vperm.slane %v8227_v60, %v9951_v16  ;;  %16736 = vst [vmem:[#allocation19_spill] sm:$0xff] %v14860_v51 }
 0x775   : > { %v8116_v32 = vrot.slane %v9397_v14, 4  ;;  %v14858_v48 = vperm.slane %v8105_v40, %v9951_v16  ;;  %v8152_v44 = vrot.slane %v8109_v29, 4  ;;  %v16738_v43 = vunpack.i.h.bf16 %v16737_v1 }
 0x776   : > { %16731 = vst [vmem:[#allocation31_spill] sm:$0xff] %v14842_v20  ;;  %v8121_v27 = vperm.slane %v8115_v58, %v9951_v16  ;;  %v8262_v4 = vrot.slane %v8233_v31, 4  ;;  %v8265_v52 = vsel %vm672_vm6, %v8233_v31, %v8264_v24  ;;  %v16740_v14 = vunpack.i.l.bf16 %v16737_v1  ;;  %v14880_v58 = vld [vmem:[#allocation3 + $0x32] sm:$0xff] }
 0x777   : > { %v8229_v10 = vsel %vm672_vm6, %v16738_v43, %v8228_v13  ;;  %v14874_v60 = vperm.slane %v8127_v33, %v9997_v57  ;;  %v14877_v42 = vperm.slane %v8141_v61, %v9997_v57  ;;  %v8276_v13 = vrot.slane %v14842_v20, 4  ;;  %v14890_v33 = vld [vmem:[#allocation3 + $0x4a] sm:$0xff]  ;;  %v14892_v1 = vld [vmem:[#allocation3 + $0x92] sm:$0xff] }
 0x778   : > { %v14867_v2 = vperm.slane %v8229_v10, %v9951_v16  ;;  %v8117_v5 = vsel %vm672_vm6, %v16740_v14, %v8116_v32  ;;  %v8150_v40 = vrot.slane %v8121_v27, 4  ;;  %v14883_v43 = vperm.slane %v8239_v59, %v9997_v57 }
 0x779   : > { %16741 = vst [vmem:[#allocation24_spill] sm:$0xff] %v14874_v60  ;;  %v14886_v24 = vperm.slane %v8253_v47, %v9997_v57  ;;  %v8164_v61 = vrot.slane %v14858_v48, 4  ;;  %v14896_v10 = vperm.slane %v8265_v52, %v9997_v57  ;;  %v14899_v14 = vperm.slane %v8117_v5, %v9951_v16  ;;  %v14902_v47 = vld [vmem:[#allocation3 + $0xaa] sm:$0xff] }
 0x77a   : > { %16739 = vst [vmem:[#allocation26_spill] sm:$0xff] %v14867_v2  ;;  %v8153_v59 = vsel %vm672_vm6, %v8121_v27, %v8152_v44  ;;  %v14905_v31 = vsel %vm672_vm6, %v8262_v4, %v8221_v22  ;;  %v16747_v49 = vrot.slane %v14559_v7, 4  ;;  %v7248_v52 = vrot.slane %v14880_v58, 4  ;;  %v14920_v44 = vld [vmem:[#allocation3 + $0x2] sm:$0xff]  ;;  %v14922_v22 = vld [vmem:[#allocation3 + $0x7a] sm:$0xff] }
 0x77b   : > { %16742 = vst [vmem:[#allocation18_spill] sm:$0xff] %v14877_v42  ;;  %v14915_v5 = vsel %vm672_vm6, %v14867_v2, %v8276_v13  ;;  %v14918_v27 = vsel %vm672_vm6, %v8150_v40, %v8109_v29  ;;  %v7260_v4 = vrot.slane %v14890_v33, 4  ;;  %v7272_v7 = vrot.slane %v14892_v1, 4  ;;  %v14932_v13 = vld [vmem:[#allocation3 + $0x62] sm:$0xff] }
 0x77c   : > { %16743 = vst [vmem:[#allocation40_spill] sm:$0xff] %v14883_v43  ;;  %v6948_v43 = vsel %vm672_vm6, %v14532_v21, %v16747_v49  ;;  %v14927_v32 = vperm.slane %v8153_v59, %v9997_v57  ;;  %v14930_v49 = vld [vmem:[#allocation3 + $0x1a] sm:$0xff]  ;;  %v7249_v29 = vsel %vm672_vm6, %v7248_v52, %v14920_v44  ;;  %v7284_v40 = vrot.slane %v14902_v47, 4 }
 0x77d   : > { %16744 = vst [vmem:[#allocation23_spill] sm:$0xff] %v14886_v24  ;;  %v6956_v21 = vperm.slane %v6948_v43, %v9997_v57  ;;  %v7261_v60 = vsel %vm672_vm6, %v7260_v4, %v14930_v49  ;;  %v7273_v59 = vsel %vm672_vm6, %v7272_v7, %v14932_v13  ;;  %v6592_v43 = vrot.slane %v14812_v54, 4 }
 0x77e   : > { %16745 = vst [vmem:[#allocation28_spill] sm:$0xff] %v14899_v14  ;;  %v14950_v52 = vperm.slane %v7273_v59, %v9951_v16  ;;  %v14956_v4 = vsel %vm672_vm6, %v14899_v14, %v8164_v61  ;;  %v6704_v24 = vrot.slane %v14818_v19, 4 }
 0x77f   : > { %16746 = vst [vmem:[#allocation17_spill] sm:$0xff] %v14905_v31  ;;  %v14938_v31 = vperm.slane %v7249_v29, %v9951_v16  ;;  %v7285_v29 = vsel %vm672_vm6, %v7284_v40, %v14922_v22  ;;  %v6593_v54 = vsel %vm672_vm6, %v14564_v36, %v6592_v43  ;;  %v6997_v40 = vrot.slane %v14686_v9, 4 }
 0x780   : > { %16748 = vst [vmem:[#allocation39_spill] sm:$0xff] %v14915_v5  ;;  %v14947_v5 = vperm.slane %v7261_v60, %v9951_v16  ;;  %v14963_v60 = vperm.slane %v7285_v29, %v9951_v16  ;;  %v7322_v59 = vrot.slane %v14950_v52, 4  ;;  %v6999_v15 = vrot.slane %v6956_v21, 4 }
 0x781   : > { %16749 = vst [vmem:[#allocation38_spill] sm:$0xff] %v14918_v27  ;;  %v9406_v27 = vpop.permute.xlu0 %9405  ;;  %v7298_v7 = vrot.slane %v14938_v31, 4 }
 0x782   : > { %16750 = vst [vmem:[#allocation33_spill] sm:$0xff] %v14956_v4  ;;  %v9408_v42 = vunpack.i.h.bf16 %v9406_v27  ;;  %v9407_v51 = vunpack.i.l.bf16 %v9406_v27  ;;  %v6705_v4 = vsel %vm672_vm6, %v14567_v62, %v6704_v24  ;;  %v7323_v19 = vsel %vm672_vm6, %v14963_v60, %v7322_v59 }
 0x783   : > { %v7299_v61 = vsel %vm672_vm6, %v14947_v5, %v7298_v7  ;;  %v9609_v43 = vpack.i.bf16 %v6705_v4, %v6593_v54  ;;  %v7331_v2 = vperm.slane %v7323_v19, %v9997_v57  ;;  %v7250_v62 = vrot.slane %v14920_v44, 4 }
 0x784   : > { %v7307_v36 = vperm.slane %v7299_v61, %v9997_v57  ;;  %v7787_v29 = vrot.slane %v9408_v42, 4  ;;  %v7790_v27 = vsel %vm672_vm6, %v9408_v42, %v14453_v45  ;;  %v7675_v20 = vrot.slane %v9407_v51, 4 }
 0x785   : > { %v7678_v7 = vsel %vm672_vm6, %v9407_v51, %v14457_v46  ;;  %9610 = vrot.lane.b32.xlu0 %v9609_v43, %s9774_s12  ;;  %v7000_v24 = vsel %vm672_vm6, %v14686_v9, %v6999_v15  ;;  %v16751_v4 = vunpack.i.h.bf16 %v14399_v11  ;;  %v6998_v61 = vsel %vm672_vm6, %v6997_v40, %v6956_v21  ;;  %v15000_v43 = vpop.permute.xlu2 %9485 }
 0x786   : > { %v7350_v59 = vrot.slane %v7307_v36, 4  ;;  %v7348_v19 = vrot.slane %v7331_v2, 4  ;;  %v16752_v45 = vunpack.i.l.bf16 %v14399_v11  ;;  %v9413_v46 = vunpack.i.h.bf16 %v9411_v55  ;;  %16753 = vst [vmem:[#allocation32_spill] sm:$0xff] %v15000_v43 }
 0x787   : > { %v7788_v54 = vsel %vm672_vm6, %v7787_v29, %v16751_v4  ;;  %v14995_v9 = vperm.slane %v7790_v27, %v9951_v16  ;;  %v14998_v15 = vperm.slane %v7678_v7, %v9951_v16  ;;  %v9412_v27 = vunpack.i.l.bf16 %v9411_v55 }
 0x788   : > { %v7676_v42 = vsel %vm672_vm6, %v7675_v20, %v16752_v45  ;;  %v7351_v51 = vsel %vm672_vm6, %v7331_v2, %v7350_v59  ;;  %v14992_v44 = vperm.slane %v7788_v54, %v9951_v16  ;;  %v7349_v21 = vsel %vm672_vm6, %v7348_v19, %v7307_v36  ;;  %v15169_v45 = vld [vmem:[#allocation3 + $0xb2] sm:$0xff] }
 0x789   : > { %v9624_v40 = vpack.i.bf16 %v7351_v51, %v7000_v24  ;;  %v15004_v11 = vperm.slane %v7676_v42, %v9951_v16  ;;  %v7799_v20 = vrot.slane %v9413_v46, 4  ;;  %v7262_v2 = vrot.slane %v14930_v49, 4 }
 0x78a   : > { %v9619_v29 = vpack.i.bf16 %v7349_v21, %v6998_v61  ;;  %v7802_v59 = vsel %vm672_vm6, %v9413_v46, %v14571_v34  ;;  %v7286_v4 = vrot.slane %v14922_v22, 4  ;;  %v16754_v36 = vunpack.i.h.bf16 %v14529_v38 }
 0x78b   : > { %9625 = vrot.lane.b32.xlu2 %v9624_v40, %s9773_s11  ;;  %v15016_v54 = vperm.slane %v7802_v59, %v9951_v16  ;;  %v16755_v22 = vrot.slane %v14670_v35, 4  ;;  %v7251_v42 = vsel %vm672_vm6, %v14880_v58, %v7250_v62  ;;  %v7263_v46 = vsel %vm672_vm6, %v14890_v33, %v7262_v2  ;;  %v15044_v62 = vpop.permute.xlu0 %9420 }
 0x78c   : > { %v7800_v24 = vsel %vm672_vm6, %v7799_v20, %v16754_v36  ;;  %9620 = vrot.lane.b32.xlu1 %v9619_v29, %s9769_s7  ;;  %v7687_v21 = vrot.slane %v9412_v27, 4  ;;  %v7690_v40 = vsel %vm672_vm6, %v9412_v27, %v14575_v39  ;;  %v7003_v35 = vrot.slane %v14583_v53, 4  ;;  %v9436_v27 = vpop.permute.xlu1 %9435 }
 0x78d   : > { %v6982_v61 = vsel %vm672_vm6, %v16755_v22, %v14632_v8  ;;  %v15033_v51 = vperm.slane %v7800_v24, %v9951_v16  ;;  %v7271_v29 = vperm.slane %v7263_v46, %v9951_v16  ;;  %v7274_v58 = vrot.slane %v14932_v13, 4  ;;  %v15136_v19 = vpop.permute.xlu2 %9500 }
 0x78e   : > { %v15040_v20 = vperm.slane %v6982_v61, %v9997_v57  ;;  %v7259_v33 = vperm.slane %v7251_v42, %v9951_v16  ;;  %v7287_v2 = vsel %vm672_vm6, %v14902_v47, %v7286_v4  ;;  %v15051_v39 = vperm.slane %v14683_v56, %v9997_v57  ;;  %16760 = vst [vmem:[#allocation43_spill] sm:$0xff] %v15136_v19 }
 0x78f   : > { %v7296_v59 = vrot.slane %v14947_v5, 4  ;;  %v7275_v36 = vsel %vm672_vm6, %v14892_v1, %v7274_v58  ;;  %v7295_v24 = vperm.slane %v7287_v2, %v9951_v16  ;;  %v7308_v13 = vrot.slane %v7271_v29, 4 }
 0x790   : > { %16756 = vst [vmem:[#allocation37_spill] sm:$0xff] %v15051_v39  ;;  %v6995_v22 = vrot.slane %v14598_v63, 4  ;;  %v16757_v61 = vunpack.i.l.bf16 %v14529_v38  ;;  %v7283_v47 = vperm.slane %v7275_v36, %v9951_v16  ;;  %v7320_v5 = vrot.slane %v14963_v60, 4 }
 0x791   : > { %v7297_v56 = vsel %vm672_vm6, %v7296_v59, %v14938_v31  ;;  %v7309_v4 = vsel %vm672_vm6, %v7308_v13, %v7259_v33  ;;  %v7332_v46 = vrot.slane %v7295_v24, 4  ;;  %v7005_v2 = vrot.slane %v14730_v41, 4 }
 0x792   : > { %v7688_v42 = vsel %vm672_vm6, %v7687_v21, %v16757_v61  ;;  %v6996_v1 = vsel %vm672_vm6, %v15051_v39, %v6995_v22  ;;  %v15069_v58 = vperm.slane %v7297_v56, %v9997_v57  ;;  %v15072_v38 = vperm.slane %v7309_v4, %v9997_v57 }
 0x793   : > { %v7321_v21 = vsel %vm672_vm6, %v7320_v5, %v14950_v52  ;;  %v7310_v31 = vrot.slane %v7259_v33, 4  ;;  %v7333_v60 = vsel %vm672_vm6, %v7332_v46, %v7283_v47  ;;  %v7334_v13 = vrot.slane %v7283_v47, 4  ;;  %v15112_v55 = vpop.permute.xlu0 %9430 }
 0x794   : > { %16758 = vst [vmem:[#allocation41_spill] sm:$0xff] %v15069_v58  ;;  %v15079_v59 = vperm.slane %v7321_v21, %v9997_v57  ;;  %v7346_v36 = vrot.slane %v15069_v58, 4  ;;  %v7004_v22 = vsel %vm672_vm6, %v15040_v20, %v7003_v35  ;;  %v15085_v61 = vperm.slane %v7333_v60, %v9997_v57  ;;  %v15105_v60 = vld [vmem:[#allocation3 + $0x52] sm:$0xff] }
 0x795   : > { %v7354_v56 = vrot.slane %v15072_v38, 4  ;;  %v7311_v52 = vsel %vm672_vm6, %v7271_v29, %v7310_v31  ;;  %v15093_v5 = vperm.slane %v14594_v25, %v9997_v57  ;;  %v7335_v4 = vsel %vm672_vm6, %v7295_v24, %v7334_v13  ;;  %v15103_v31 = vld [vmem:[#allocation3 + $0x3a] sm:$0xff] }
 0x796   : > { %16759 = vst [vmem:[#allocation44_spill] sm:$0xff] %v15079_v59  ;;  %v7347_v33 = vsel %vm672_vm6, %v15079_v59, %v7346_v36  ;;  %v9423_v47 = vunpack.i.h.bf16 %v15044_v62  ;;  %v15100_v21 = vperm.slane %v7335_v4, %v9997_v57  ;;  %v9422_v29 = vunpack.i.l.bf16 %v15044_v62  ;;  %v15116_v4 = vpop.permute.xlu1 %9440 }
 0x797   : > { %v7355_v35 = vsel %vm672_vm6, %v15085_v61, %v7354_v56  ;;  %v9614_v46 = vpack.i.bf16 %v7347_v33, %v6996_v1  ;;  %v7006_v25 = vsel %vm672_vm6, %v7005_v2, %v15093_v5  ;;  %v15110_v24 = vperm.slane %v7311_v52, %v9997_v57  ;;  %v15125_v52 = vld [vmem:[#allocation3 + $0x9a] sm:$0xff] }
 0x798   : > { %v9634_v36 = vpack.i.bf16 %v7355_v35, %v7004_v22  ;;  %v7775_v13 = vrot.slane %v9423_v47, 4  ;;  %v7356_v1 = vrot.slane %v15100_v21, 4  ;;  %v7663_v56 = vrot.slane %v9422_v29, 4 }
 0x799   : > { %9615 = vrot.lane.b32.xlu0 %v9614_v46, %s9770_s8  ;;  %v9438_v62 = vunpack.i.h.bf16 %v9436_v27  ;;  %v9437_v33 = vunpack.i.l.bf16 %v9436_v27  ;;  %v15119_v22 = vperm.slane %v7688_v42, %v9951_v16  ;;  %v15122_v2 = vperm.slane %v7690_v40, %v9951_v16 }
 0x79a   : > { %9635 = vrot.lane.b32.xlu1 %v9634_v36, %s9771_s9  ;;  %v7360_v35 = vrot.slane %v15103_v31, 4  ;;  %v7372_v46 = vrot.slane %v15105_v60, 4  ;;  %v7357_v7 = vsel %vm672_vm6, %v7356_v1, %v15110_v24  ;;  %v15141_v1 = vperm.slane %v14648_v50, %v9997_v57 }
 0x79b   : > { %v7776_v27 = vsel %vm672_vm6, %v7775_v13, %v9438_v62  ;;  %v7777_v8 = vrot.slane %v9438_v62, 4  ;;  %v7664_v42 = vsel %vm672_vm6, %v7663_v56, %v9437_v33  ;;  %v9639_v34 = vpack.i.bf16 %v7357_v7, %v7006_v25  ;;  %v15194_v63 = vpop.permute.xlu0 %9460 }
 0x79c   : > { %v7782_v40 = vperm.slane %v7776_v27, %v9951_v16  ;;  %v7665_v49 = vrot.slane %v9437_v33, 4  ;;  %v7670_v36 = vperm.slane %v7664_v42, %v9951_v16  ;;  %v7384_v13 = vrot.slane %v15125_v52, 4  ;;  %v15152_v27 = vld [vmem:[#allocation3 + $0xa] sm:$0xff] }
 0x79d   : > { %v7778_v58 = vsel %vm672_vm6, %v9423_v47, %v7777_v8  ;;  %9640 = vrot.lane.b32.xlu2 %v9639_v34, %s9775_s13  ;;  %v16761_v25 = vrot.slane %v14992_v44, 4  ;;  %v15154_v8 = vld [vmem:[#allocation3 + $0x22] sm:$0xff]  ;;  %v7361_v34 = vsel %vm672_vm6, %v7360_v35, %v15152_v27  ;;  %v15185_v42 = vld [vmem:[#allocation3 + $0x6a] sm:$0xff]  ;;  %v7396_v39 = vrot.slane %v15169_v45, 4 }
 0x79e   : > { %v15146_v7 = vperm.slane %v7778_v58, %v9951_v16  ;;  %v7825_v62 = vrot.slane %v7782_v40, 4  ;;  %v7666_v33 = vsel %vm672_vm6, %v9422_v29, %v7665_v49  ;;  %v7713_v47 = vrot.slane %v7670_v36, 4 }
 0x79f   : > { %v7824_v56 = vsel %vm672_vm6, %v16761_v25, %v7782_v40  ;;  %v7373_v58 = vsel %vm672_vm6, %v7372_v46, %v15154_v8  ;;  %v15164_v40 = vperm.slane %v7666_v33, %v9951_v16  ;;  %v16762_v49 = vrot.slane %v15004_v11, 4 }
 0x7a0   : > { %v15173_v50 = vsel %vm672_vm6, %v14992_v44, %v7825_v62  ;;  %v15176_v35 = vperm.slane %v7824_v56, %v9997_v57  ;;  %v16765_v46 = vrot.slane %v14995_v9, 4  ;;  %v7111_v33 = vrot.slane %v15141_v1, 4 }
 0x7a1   : > { %v7712_v29 = vsel %vm672_vm6, %v16762_v49, %v7670_v36  ;;  %16763 = vst [vmem:[#allocation48_spill] sm:$0xff] %v15173_v50  ;;  %v15188_v49 = vld [vmem:[#allocation3 + $0x82] sm:$0xff]  ;;  %v7367_v44 = vperm.slane %v7361_v34, %v9951_v16  ;;  %v7379_v62 = vperm.slane %v7373_v58, %v9951_v16  ;;  %v7385_v56 = vsel %vm672_vm6, %v7384_v13, %v15185_v42 }
 0x7a2   : > { %16764 = vst [vmem:[#allocation50_spill] sm:$0xff] %v15176_v35  ;;  %v15182_v25 = vsel %vm672_vm6, %v16765_v46, %v15146_v7  ;;  %v15198_v46 = vsel %vm672_vm6, %v15004_v11, %v7713_v47  ;;  %v15201_v59 = vperm.slane %v7712_v29, %v9997_v57  ;;  %v7391_v36 = vperm.slane %v7385_v56, %v9951_v16  ;;  %v15205_v35 = vpop.permute.xlu1 %9450 }
 0x7a3   : > { %16766 = vst [vmem:[#allocation15_spill] sm:$0xff] %v15182_v25  ;;  %v7725_v34 = vrot.slane %v15164_v40, 4  ;;  %v7410_v58 = vrot.slane %v7367_v44, 4  ;;  %v7001_v13 = vrot.slane %v15040_v20, 4  ;;  %v7352_v50 = vrot.slane %v15085_v61, 4 }
 0x7a4   : > { %16767 = vst [vmem:[#allocation54_spill] sm:$0xff] %v15198_v46  ;;  %v7112_v11 = vsel %vm672_vm6, %v14720_v12, %v7111_v33  ;;  %v7397_v47 = vsel %vm672_vm6, %v7396_v39, %v15188_v49  ;;  %v7434_v29 = vrot.slane %v7391_v36, 4  ;;  %v15216_v56 = vperm.slane %v14717_v17, %v9997_v57 }
 0x7a5   : > { %16768 = vst [vmem:[#allocation55_spill] sm:$0xff] %v15201_v59  ;;  %v7403_v59 = vperm.slane %v7397_v47, %v9951_v16  ;;  %v7411_v46 = vsel %vm672_vm6, %v7379_v62, %v7410_v58  ;;  %v7002_v20 = vsel %vm672_vm6, %v7001_v13, %v14583_v53  ;;  %v7353_v61 = vsel %vm672_vm6, %v7352_v50, %v15072_v38  ;;  %v16770_v13 = vld [vmem:[#allocation47_spill] sm:$0xff] }
 0x7a6   : > { %v15225_v33 = vperm.slane %v7411_v46, %v9997_v57  ;;  %v9629_v25 = vpack.i.bf16 %v7353_v61, %v7002_v20  ;;  %v7107_v39 = vrot.slane %v14601_v6, 4  ;;  %v7408_v43 = vrot.slane %v7379_v62, 4 }
 0x7a7   : > { %v7435_v17 = vsel %vm672_vm6, %v7403_v59, %v7434_v29  ;;  %v7432_v19 = vrot.slane %v7403_v59, 4  ;;  %v9433_v47 = vunpack.i.h.bf16 %v15112_v55  ;;  %v9432_v58 = vunpack.i.l.bf16 %v15112_v55 }
 0x7a8   : > { %v15232_v14 = vperm.slane %v7435_v17, %v9997_v57  ;;  %v7462_v53 = vrot.slane %v15225_v33, 4  ;;  %9630 = vrot.lane.b32.xlu0 %v9629_v25, %s9772_s10  ;;  %v7108_v38 = vsel %vm672_vm6, %v15216_v56, %v7107_v39  ;;  %v7409_v50 = vsel %vm672_vm6, %v7408_v43, %v7367_v44  ;;  %v16771_v44 = vld [vmem:[#allocation49_spill] sm:$0xff] }
 0x7a9   : > { %v15240_v62 = vperm.slane %v7409_v50, %v9997_v57  ;;  %v7433_v59 = vsel %vm672_vm6, %v7432_v19, %v7391_v36  ;;  %v7813_v46 = vrot.slane %v9433_v47, 4  ;;  %v7700_v55 = vsel %vm672_vm6, %v16770_v13, %v9432_v58  ;;  %v16772_v19 = vld [vmem:[#allocation45_spill] sm:$0xff]  ;;  %v15257_v13 = vpop.permute.xlu0 %9475 }
 0x7aa   : > { %v7463_v29 = vsel %vm672_vm6, %v15232_v14, %v7462_v53  ;;  %v15248_v20 = vperm.slane %v7433_v59, %v9997_v57  ;;  %v7701_v25 = vrot.slane %v9432_v58, 4  ;;  %v7706_v61 = vperm.slane %v7700_v55, %v9951_v16 }
 0x7ab   : > { %16769 = vst [vmem:[#allocation56_spill] sm:$0xff] %v15240_v62  ;;  %v9659_v39 = vpack.i.bf16 %v7112_v11, %v7463_v29  ;;  %v7458_v43 = vrot.slane %v15240_v62, 4  ;;  %v7812_v17 = vsel %vm672_vm6, %v16771_v44, %v9433_v47  ;;  %v16773_v36 = vunpack.i.h.bf16 %v16772_v19  ;;  %v15269_v47 = vpop.permute.xlu1 %9465 }
 0x7ac   : > { %v16774_v53 = vrot.slane %v14998_v15, 4  ;;  %v16775_v58 = vunpack.i.l.bf16 %v16772_v19  ;;  %v7735_v55 = vrot.slane %v7706_v61, 4  ;;  %v7818_v29 = vperm.slane %v7812_v17, %v9951_v16 }
 0x7ad   : > { %v7814_v50 = vsel %vm672_vm6, %v16773_v36, %v7813_v46  ;;  %9660 = vrot.lane.b32.xlu1 %v9659_v39, %s9773_s11  ;;  %v7459_v46 = vsel %vm672_vm6, %v15248_v20, %v7458_v43  ;;  %v16777_v17 = vrot.slane %v15033_v51, 4  ;;  %v16778_v39 = vld [vmem:[#allocation21_spill] sm:$0xff]  ;;  %v16779_v43 = vrot.slane %v15146_v7, 4 }
 0x7ae   : > { %v15263_v59 = vsel %vm672_vm6, %v16774_v53, %v15164_v40  ;;  %v7702_v11 = vsel %vm672_vm6, %v16775_v58, %v7701_v25  ;;  %v16776_v40 = vrot.slane %v15119_v22, 4  ;;  %v15281_v19 = vperm.slane %v7814_v50, %v9951_v16 }
 0x7af   : > { %v15275_v44 = vperm.slane %v7702_v11, %v9951_v16  ;;  %v9649_v25 = vpack.i.bf16 %v7108_v38, %v7459_v46  ;;  %v7847_v53 = vrot.slane %v7818_v29, 4  ;;  %v7850_v58 = vsel %vm672_vm6, %v7818_v29, %v16777_v17  ;;  %v16780_v46 = vld [vmem:[#allocation27_spill] sm:$0xff] }
 0x7b0   : > { %v7738_v36 = vsel %vm672_vm6, %v7706_v61, %v16776_v40  ;;  %v4983_v62 = vrot.slane %v16778_v39, 4  ;;  %v15291_v11 = vsel %vm672_vm6, %v14995_v9, %v16779_v43  ;;  %v15295_v61 = vsel %vm672_vm6, %v14998_v15, %v7725_v34 }
 0x7b1   : > { %v7386_v50 = vrot.slane %v15185_v42, 4  ;;  %v7398_v38 = vrot.slane %v15188_v49, 4  ;;  %9650 = vrot.lane.b32.xlu2 %v9649_v25, %s9770_s8  ;;  %v15302_v29 = vsel %vm672_vm6, %v7735_v55, %v15119_v22  ;;  %v15305_v7 = vperm.slane %v7738_v36, %v9997_v57  ;;  %v16783_v25 = vld [vmem:[#allocation30_spill] sm:$0xff] }
 0x7b2   : > { %v7747_v9 = vrot.slane %v15275_v44, 4  ;;  %v5095_v40 = vrot.slane %v16780_v46, 4  ;;  %v16781_v15 = vrot.slane %v15122_v2, 4  ;;  %v15317_v49 = vsel %vm672_vm6, %v7847_v53, %v15033_v51  ;;  %v16784_v51 = vld [vmem:[#allocation20_spill] sm:$0xff] }
 0x7b3   : > { %v15320_v22 = vperm.slane %v7850_v58, %v9997_v57  ;;  %v7859_v34 = vrot.slane %v15281_v19, 4  ;;  %v16782_v55 = vrot.slane %v15016_v54, 4  ;;  %v4984_v17 = vsel %vm672_vm6, %v4983_v62, %v16783_v25 }
 0x7b4   : > { %v15313_v42 = vsel %vm672_vm6, %v15275_v44, %v16781_v15  ;;  %v9443_v44 = vunpack.i.h.bf16 %v15116_v4  ;;  %v7362_v39 = vrot.slane %v15152_v27, 4  ;;  %v5096_v53 = vsel %vm672_vm6, %v5095_v40, %v16784_v51 }
 0x7b5   : > { %v15327_v36 = vsel %vm672_vm6, %v15281_v19, %v16782_v55  ;;  %v9442_v58 = vunpack.i.l.bf16 %v15116_v4  ;;  %v7374_v43 = vrot.slane %v15154_v8, 4  ;;  %v7387_v46 = vsel %vm672_vm6, %v15125_v52, %v7386_v50  ;;  %v15353_v50 = vpop.permute.xlu2 %9510 }
 0x7b6   : > { %v15341_v19 = vperm.slane %v14587_v18, %v9997_v57  ;;  %v7363_v62 = vsel %vm672_vm6, %v15103_v31, %v7362_v39  ;;  %v7395_v15 = vperm.slane %v7387_v46, %v9951_v16  ;;  %v7399_v27 = vsel %vm672_vm6, %v15169_v45, %v7398_v38  ;;  %v15355_v18 = vpop.permute.xlu0 %9490  ;;  %v15363_v38 = vpop.permute.xlu1 %9480 }
 0x7b7   : > { %v7371_v40 = vperm.slane %v7363_v62, %v9951_v16  ;;  %v7375_v4 = vsel %vm672_vm6, %v15105_v60, %v7374_v43  ;;  %v7407_v8 = vperm.slane %v7399_v27, %v9951_v16  ;;  %v7007_v52 = vrot.slane %v15093_v5, 4 }
 0x7b8   : > { %v7383_v31 = vperm.slane %v7375_v4, %v9951_v16  ;;  %v7446_v55 = vrot.slane %v7395_v15, 4  ;;  %v7358_v25 = vrot.slane %v15110_v24, 4  ;;  %v15361_v45 = vperm.slane %v14745_v26, %v9997_v57 }
 0x7b9   : > { %v7117_v60 = vrot.slane %v14789_v30, 4  ;;  %v7422_v39 = vrot.slane %v7371_v40, 4  ;;  %v7008_v5 = vsel %vm672_vm6, %v14730_v41, %v7007_v52  ;;  %v7444_v51 = vrot.slane %v7407_v8, 4 }
 0x7ba   : > { %v7447_v43 = vsel %vm672_vm6, %v7407_v8, %v7446_v55  ;;  %v7359_v16 = vsel %vm672_vm6, %v15100_v21, %v7358_v25  ;;  %v7113_v24 = vrot.slane %v15361_v45, 4  ;;  %v7420_v46 = vrot.slane %v7383_v31, 4  ;;  %v16785_v25 = vld [vmem:[#allocation6_spill] sm:$0xff] }
 0x7bb   : > { %v7423_v26 = vsel %vm672_vm6, %v7383_v31, %v7422_v39  ;;  %v7455_v62 = vperm.slane %v7447_v43, %v9997_v57  ;;  %v9644_v27 = vpack.i.bf16 %v7359_v16, %v7008_v5  ;;  %v7445_v4 = vsel %vm672_vm6, %v7444_v51, %v7395_v15  ;;  %v16786_v16 = vld [vmem:[#allocation51_spill] sm:$0xff] }
 0x7bc   : > { %v5174_v6 = vsel %vm952_vm8, %v5096_v53, %v9443_v44  ;;  %v5167_v41 = vsel %vm952_vm8, %v4984_v17, %v9442_v58  ;;  %v7421_v52 = vsel %vm672_vm6, %v7420_v46, %v7371_v40  ;;  %v15379_v8 = vperm.slane %v7445_v4, %v9997_v57 }
 0x7bd   : > { %v7118_v21 = vsel %vm672_vm6, %v7117_v60, %v15341_v19  ;;  %v7431_v55 = vperm.slane %v7423_v26, %v9997_v57  ;;  %v7468_v31 = vrot.slane %v7455_v62, 4  ;;  %9645 = vrot.lane.b32.xlu0 %v9644_v27, %s9774_s12  ;;  %v7114_v15 = vsel %vm672_vm6, %v7113_v24, %v16785_v25 }
 0x7be   : > { %v15388_v44 = vperm.slane %v7421_v52, %v9997_v57  ;;  %v7464_v17 = vrot.slane %v15379_v8, 4  ;;  %v9453_v53 = vunpack.i.h.bf16 %v15205_v35  ;;  %v9452_v58 = vunpack.i.l.bf16 %v15205_v35  ;;  %v15420_v52 = vpop.permute.xlu2 %9525 }
 0x7bf   : > { %v15395_v40 = vsel %vm672_vm6, %v7747_v9, %v15122_v2  ;;  %v15399_v60 = vsel %vm672_vm6, %v7859_v34, %v15016_v54  ;;  %v7469_v39 = vsel %vm672_vm6, %v7468_v31, %v7431_v55  ;;  %v9463_v5 = vunpack.i.h.bf16 %v15194_v63  ;;  %v15429_v31 = vpop.permute.xlu1 %9495 }
 0x7c0   : > { %v9674_v51 = vpack.i.bf16 %v7118_v21, %v7469_v39  ;;  %v7465_v43 = vsel %vm672_vm6, %v7464_v17, %v15388_v44  ;;  %v16787_v24 = vunpack.i.l.bf16 %v16786_v16  ;;  %v16788_v46 = vrot.slane %v14784_v3, 4 }
 0x7c1   : > { %v9664_v9 = vpack.i.bf16 %v7114_v15, %v7465_v43  ;;  %v16789_v54 = vunpack.i.h.bf16 %v16786_v16  ;;  %v8178_v26 = vrot.slane %v14927_v32, 4  ;;  %v16790_v27 = vrot.slane %v14781_v0, 4  ;;  %v16791_v15 = vld [vmem:[#allocation42_spill] sm:$0xff]  ;;  %v16792_v43 = vld [vmem:[#allocation8_spill] sm:$0xff] }
 0x7c2   : > { %v5168_v35 = vsel %vm954_vm9, %v5167_v41, %v16787_v24  ;;  %v8129_v2 = vsel %vm672_vm6, %v14748_v23, %v16788_v46  ;;  %v15422_v41 = vpop.permute.xlu0 %9505  ;;  %9675 = vrot.lane.b32.xlu1 %v9674_v51, %s9775_s13  ;;  %v9462_v23 = vunpack.i.l.bf16 %v15194_v63  ;;  %v5509_v17 = vrot.slane %v16791_v15, 4 }
 0x7c3   : > { %v5175_v34 = vsel %vm954_vm9, %v5174_v6, %v16789_v54  ;;  %v8241_v4 = vsel %vm672_vm6, %v14758_v37, %v16790_v27  ;;  %v5169_v3 = vsel %vm956_vm10, %v5168_v35, %v9452_v58  ;;  %v8290_v6 = vrot.slane %v14896_v10, 4  ;;  %9665 = vrot.lane.b32.xlu2 %v9664_v9, %s9772_s10  ;;  %v16795_v27 = vld [vmem:[#allocation13_spill] sm:$0xff] }
 0x7c4   : > { %v5176_v21 = vsel %vm956_vm10, %v5175_v34, %v9453_v53  ;;  %v8137_v37 = vperm.slane %v8129_v2, %v9997_v57  ;;  %v8249_v0 = vperm.slane %v8241_v4, %v9997_v57  ;;  %v7109_v39 = vrot.slane %v14720_v12, 4 }
 0x7c5   : > { %v9513_v51 = vunpack.i.h.bf16 %v15353_v50  ;;  %v5397_v58 = vrot.slane %v16792_v43, 4  ;;  %v7460_v53 = vrot.slane %v15232_v14, 4  ;;  %v7119_v16 = vrot.slane %v15341_v19, 4 }
 0x7c6   : > { %v8179_v24 = vsel %vm672_vm6, %v8178_v26, %v8137_v37  ;;  %v8291_v35 = vsel %vm672_vm6, %v8290_v6, %v8249_v0  ;;  %v9512_v46 = vunpack.i.l.bf16 %v15353_v50  ;;  %v7110_v2 = vsel %vm672_vm6, %v7109_v39, %v15141_v1  ;;  %v16796_v1 = vld [vmem:[#allocation14_spill] sm:$0xff]  ;;  %v16797_v39 = vld [vmem:[#allocation12_spill] sm:$0xff] }
 0x7c7   : > { %v16793_v9 = vunpack.i.h.bf16 %v14769_v28  ;;  %v7461_v54 = vsel %vm672_vm6, %v7460_v53, %v15225_v33  ;;  %v7120_v14 = vsel %vm672_vm6, %v14789_v30, %v7119_v16  ;;  %v7470_v19 = vrot.slane %v7431_v55, 4 }
 0x7c8   : > { %v16794_v34 = vunpack.i.l.bf16 %v14769_v28  ;;  %v5510_v50 = vsel %vm672_vm6, %v5509_v17, %v16795_v27  ;;  %v9654_v4 = vpack.i.bf16 %v7110_v2, %v7461_v54  ;;  %v6163_v6 = vrot.slane %v16796_v1, 4  ;;  %v16802_v54 = vld [vmem:[#allocation31_spill] sm:$0xff] }
 0x7c9   : > { %v5177_v12 = vsel %vm958_vm11, %v5176_v21, %v16793_v9  ;;  %v9689_v15 = vpack.i.bf16 %v8291_v35, %v8179_v24  ;;  %v5398_v21 = vsel %vm672_vm6, %v5397_v58, %v16797_v39  ;;  %v7471_v33 = vsel %vm672_vm6, %v7455_v62, %v7470_v19 }
 0x7ca   : > { %v5170_v26 = vsel %vm958_vm11, %v5169_v3, %v16794_v34  ;;  %v9467_v43 = vunpack.i.l.bf16 %v15269_v47  ;;  %v15463_v30 = vsel %vm952_vm8, %v5510_v50, %v9513_v51  ;;  %v15466_v28 = vsel %vm952_vm8, %v5398_v21, %v9512_v46  ;;  %9655 = vrot.lane.b32.xlu0 %v9654_v4, %s9769_s7  ;;  %v16798_v3 = vld [vmem:[#allocation10_spill] sm:$0xff]  ;;  %v16800_v46 = vld [vmem:[#allocation28_spill] sm:$0xff]  ;;  %v16806_v4 = vld [vmem:[#allocation29_spill] sm:$0xff] }
 0x7cb   : > { %v9679_v55 = vpack.i.bf16 %v7120_v14, %v7471_v33  ;;  %v6275_v17 = vrot.slane %v16798_v3, 4  ;;  %9690 = vrot.lane.b32.xlu1 %v9689_v15, %s9769_s7  ;;  %v9478_v53 = vunpack.i.h.bf16 %v15257_v13  ;;  %v9477_v58 = vunpack.i.l.bf16 %v15257_v13  ;;  %v16799_v51 = vld [vmem:[#allocation22_spill] sm:$0xff] }
 0x7cc   : > { %v9468_v62 = vunpack.i.h.bf16 %v15269_v47  ;;  %v5171_v16 = vsel %vm960_vm12, %v5170_v26, %v9462_v23  ;;  %v6164_v24 = vsel %vm672_vm6, %v6163_v6, %v16799_v51  ;;  %v16801_v2 = vrot.slane %v16800_v46, 4  ;;  %v16803_v14 = vld [vmem:[#allocation26_spill] sm:$0xff]  ;;  %v15487_v47 = vpop.permute.xlu2 %9540  ;;  %v15489_v23 = vpop.permute.xlu0 %9515  ;;  %v16805_v26 = vld [vmem:[#allocation7_spill] sm:$0xff] }
 0x7cd   : > { %9680 = vrot.lane.b32.xlu2 %v9679_v55, %s9774_s12  ;;  %v5172_v35 = vsel %vm962_vm13, %v5171_v16, %v9467_v43  ;;  %v16804_v19 = vrot.slane %v16803_v14, 4  ;;  %v8184_v27 = vrot.slane %v16805_v26, 4  ;;  %v8296_v1 = vrot.slane %v16806_v4, 4  ;;  %v16807_v16 = vld [vmem:[#allocation25_spill] sm:$0xff] }
 0x7ce   : > { %v8163_v9 = vsel %vm672_vm6, %v16801_v2, %v14858_v48  ;;  %v15499_v48 = vpop.permute.xlu1 %9520  ;;  %v5178_v6 = vsel %vm960_vm12, %v5177_v12, %v9463_v5  ;;  %v7115_v15 = vrot.slane %v16785_v25, 4  ;;  %v7466_v39 = vrot.slane %v15388_v44, 4 }
 0x7cf   : > { %v8275_v13 = vsel %vm672_vm6, %v16804_v19, %v16802_v54  ;;  %v15492_v34 = vperm.slane %v8163_v9, %v9997_v57  ;;  %v8180_v21 = vrot.slane %v8137_v37, 4  ;;  %v5179_v33 = vsel %vm962_vm13, %v5178_v6, %v9468_v62  ;;  %v16811_v54 = vld [vmem:[#allocation43_spill] sm:$0xff] }
 0x7d0   : > { %v15496_v50 = vperm.slane %v8275_v13, %v9997_v57  ;;  %v8292_v3 = vrot.slane %v8249_v0, 4  ;;  %v6276_v51 = vsel %vm672_vm6, %v6275_v17, %v16807_v16  ;;  %v7116_v63 = vsel %vm672_vm6, %v15361_v45, %v7115_v15  ;;  %v16808_v17 = vld [vmem:[#allocation19_spill] sm:$0xff] }
 0x7d1   : > { %v8185_v43 = vsel %vm672_vm6, %v15492_v34, %v8184_v27  ;;  %v7467_v25 = vsel %vm672_vm6, %v15379_v8, %v7466_v39  ;;  %v8181_v44 = vsel %vm672_vm6, %v14927_v32, %v8180_v21  ;;  %v9483_v62 = vunpack.i.h.bf16 %v15363_v38  ;;  %v16813_v27 = vld [vmem:[#allocation18_spill] sm:$0xff]  ;;  %v16814_v6 = vld [vmem:[#allocation39_spill] sm:$0xff] }
 0x7d2   : > { %v8297_v55 = vsel %vm672_vm6, %v15496_v50, %v8296_v1  ;;  %v9669_v37 = vpack.i.bf16 %v7116_v63, %v7467_v25  ;;  %v8293_v12 = vsel %vm672_vm6, %v14896_v10, %v8292_v3  ;;  %v9482_v46 = vunpack.i.l.bf16 %v15363_v38  ;;  %v16818_v3 = vld [vmem:[#allocation38_spill] sm:$0xff] }
 0x7d3   : > { %v9704_v5 = vpack.i.bf16 %v8297_v55, %v8185_v43  ;;  %v9694_v0 = vpack.i.bf16 %v8293_v12, %v8181_v44  ;;  %v16809_v2 = vunpack.i.l.bf16 %v16808_v17  ;;  %v16810_v9 = vunpack.i.h.bf16 %v16808_v17  ;;  %v16820_v12 = vld [vmem:[#allocation17_spill] sm:$0xff] }
 0x7d4   : > { %v9502_v32 = vunpack.i.l.bf16 %v16811_v54  ;;  %v6354_v14 = vsel %vm952_vm8, %v6276_v51, %v9478_v53  ;;  %9670 = vrot.lane.b32.xlu0 %v9669_v37, %s9771_s9  ;;  %v6347_v38 = vsel %vm952_vm8, %v6164_v24, %v9477_v58  ;;  %v8188_v1 = vrot.slane %v16813_v27, 4  ;;  %v5181_v51 = vld [vmem:[%s15973_s3] sm:$0xf]  ;;  %v15554_v63 = vpop.permute.xlu2 %9545  ;;  %v15556_v25 = vpop.permute.xlu0 %9530 }
 0x7d5   : > { %v5173_v45 = vsel %vm964_vm14, %v5172_v35, %v16809_v2  ;;  %v5180_v8 = vsel %vm964_vm14, %v5179_v33, %v16810_v9  ;;  %9705 = vrot.lane.b32.xlu1 %v9704_v5, %s9771_s9  ;;  %9695 = vrot.lane.b32.xlu2 %v9694_v0, %s9773_s11  ;;  %v16812_v35 = vld [vmem:[#allocation33_spill] sm:$0xff]  ;;  %v8285_v15 = vperm.slane %v16814_v6, %v9997_v57  ;;  %v16817_v33 = vld [vmem:[#allocation23_spill] sm:$0xff]  ;;  %v9528_v58 = vunpack.i.h.bf16 %v15420_v52  ;;  %v16819_v5 = vld [vmem:[#allocation24_spill] sm:$0xff] }
 0x7d6   : > { %v5182_v10 = vpack.c.bf16 %v5173_v45, %v5173_v45  ;;  %v5183_v19 = vpack.c.bf16 %v5180_v8, %v5180_v8  ;;  %v8173_v13 = vperm.slane %v16812_v35, %v9997_v57  ;;  %v6355_v53 = vsel %vm954_vm9, %v6354_v14, %v9483_v62  ;;  %v16821_v0 = vld [vmem:[#allocation40_spill] sm:$0xff]  ;;  %v15565_v17 = vpop.permute.xlu1 %9535 }
 0x7d7   : > { %v8300_v43 = vrot.slane %v16817_v33, 4  ;;  %v6348_v24 = vsel %vm954_vm9, %v6347_v38, %v9482_v46  ;;  %v15549_v16 = vperm.slane %v16818_v3, %v9997_v57  ;;  %v8176_v37 = vrot.slane %v16819_v5, 4  ;;  %v16822_v45 = vld [vmem:[#allocation32_spill] sm:$0xff] }
 0x7d8   : > { %v5188_v39 = vsel %vm16815_vm0, %v5182_v10, 0  ;;  %v5191_v21 = vsel %vm16816_vm1, %v5183_v19, 0  ;;  %v8189_v55 = vsel %vm672_vm6, %v8173_v13, %v8188_v1  ;;  %v15562_v62 = vperm.slane %v16820_v12, %v9997_v57  ;;  %vm16843_vm1 = vmmov %vm16824_vm2 }
 0x7d9   : > { %5200 = vmatpush.bf16.msra.mxu2 %v5188_v39  ;;  %5213 = vmatpush.bf16.msra.mxu3 %v5191_v21  ;;  %v8301_v44 = vsel %vm672_vm6, %v8285_v15, %v8300_v43  ;;  %v8288_v46 = vrot.slane %v16821_v0, 4  ;;  %v9527_v2 = vunpack.i.l.bf16 %v15420_v52  ;;  %v16823_v9 = vunpack.i.h.bf16 %v16822_v45 }
 0x7da   : > { %v8186_v14 = vrot.slane %v8173_v13, 4  ;;  %v8298_v10 = vrot.slane %v8285_v15, 4  ;;  %v9493_v19 = vunpack.i.h.bf16 %v15355_v18  ;;  %v9719_v38 = vpack.i.bf16 %v8301_v44, %v8189_v55 }
 0x7db   : > { %v6356_v8 = vsel %vm956_vm10, %v6355_v53, %v16823_v9  ;;  %v8177_v35 = vsel %vm672_vm6, %v15549_v16, %v8176_v37  ;;  %v8289_v1 = vsel %vm672_vm6, %v15562_v62, %v8288_v46  ;;  %v16826_v6 = vunpack.i.l.bf16 %v16822_v45 }
 0x7dc   : > { %8511 = vmatmul.msk.bf16.vlgmr.msra.gmra.mxu2 %vm16824_vm2, %v5181_v51  ;;  %8512 = vmatmul.msk.bf16.vlgmr.msra.gmra.mxu3 %vm16825_vm3, %v5181_v51  ;;  %v9684_v53 = vpack.i.bf16 %v8289_v1, %v8177_v35  ;;  %v8187_v13 = vsel %vm672_vm6, %v8186_v14, %v16813_v27  ;;  %v8299_v15 = vsel %vm672_vm6, %v8298_v10, %v16817_v33  ;;  %v9492_v21 = vunpack.i.l.bf16 %v15355_v18  ;;  %v15614_v14 = vpop.permute.xlu0 %9550  ;;  %vm16848_vm2 = vmmov %vm16815_vm0 }
 0x7dd   : > { %v6349_v39 = vsel %vm956_vm10, %v6348_v24, %v16826_v6  ;;  %9720 = vrot.lane.b32.xlu1 %v9719_v38, %s9774_s12  ;;  %v9543_v43 = vunpack.i.h.bf16 %v15487_v47  ;;  %v9709_v55 = vpack.i.bf16 %v8299_v15, %v8187_v13  ;;  %v9497_v3 = vunpack.i.l.bf16 %v15429_v31  ;;  %v16828_v38 = vld [vmem:[#allocation34_spill] sm:$0xff]  ;;  %v15634_v13 = vpop.permute.xlu2 %9560  ;;  %vm16849_vm3 = vmmov %vm16815_vm0 }
 0x7de   : > { %v9542_v51 = vunpack.i.l.bf16 %v15487_v47  ;;  %9685 = vrot.lane.b32.xlu0 %v9684_v53, %s9770_s8  ;;  %v15595_v33 = vperm.slane %v15395_v40, %v9997_v57  ;;  %v9498_v18 = vunpack.i.h.bf16 %v15429_v31  ;;  %v6350_v44 = vsel %vm958_vm11, %v6349_v39, %v9492_v21  ;;  %v16830_v39 = vld [vmem:[#allocation54_spill] sm:$0xff] }
 0x7df   : > { %9710 = vrot.lane.b32.xlu2 %v9709_v55, %s9775_s13  ;;  %v15601_v37 = vsel %vm958_vm11, %v6356_v8, %v9493_v19  ;;  %v15605_v12 = vperm.slane %v15399_v60, %v9997_v57  ;;  %v15609_v46 = vperm.slane %v15263_v59, %v9997_v57  ;;  %v8182_v45 = vrot.slane %v15492_v34, 4  ;;  %v16827_v8 = vld [vmem:[#allocation15_spill] sm:$0xff]  ;;  %v15623_v59 = vpop.permute.xlu1 %9555  ;;  %v16829_v34 = vld [vmem:[#allocation9_spill] sm:$0xff] }
 0x7e0   : > { %v7767_v40 = vrot.slane %v15595_v33, 4  ;;  %v8294_v9 = vrot.slane %v15496_v50, 4  ;;  %v15617_v10 = vsel %vm960_vm12, %v6350_v44, %v9497_v3  ;;  %v7842_v19 = vperm.slane %v16827_v8, %v9997_v57  ;;  %v16831_v3 = vld [vmem:[#allocation48_spill] sm:$0xff] }
 0x7e1   : > { %v7879_v60 = vrot.slane %v15605_v12, 4  ;;  %v5812_v35 = vrot.slane %v16828_v38, 4  ;;  %v5924_v6 = vrot.slane %v16829_v34, 4  ;;  %v8183_v50 = vsel %vm672_vm6, %v8182_v45, %v16805_v26 }
 0x7e2   : > { %v7768_v1 = vsel %vm672_vm6, %v7767_v40, %v15609_v46  ;;  %v15632_v53 = vperm.slane %v16830_v39, %v9997_v57  ;;  %v8295_v21 = vsel %vm672_vm6, %v8294_v9, %v16806_v4  ;;  %v7763_v55 = vrot.slane %v15305_v7, 4 }
 0x7e3   : > { %v7880_v15 = vsel %vm672_vm6, %v7879_v60, %v7842_v19  ;;  %v15642_v44 = vperm.slane %v16831_v3, %v9997_v57  ;;  %v9699_v8 = vpack.i.bf16 %v8295_v21, %v8183_v50  ;;  %v7875_v26 = vrot.slane %v15320_v22, 4 }
 0x7e4   : > { %v9734_v40 = vpack.i.bf16 %v7880_v15, %v7768_v1  ;;  %v15647_v45 = vperm.slane %v15295_v61, %v9997_v57  ;;  %v7764_v60 = vsel %vm672_vm6, %v7763_v55, %v15632_v53  ;;  %v15653_v4 = vperm.slane %v15313_v42, %v9997_v57 }
 0x7e5   : > { %v15657_v9 = vperm.slane %v15291_v11, %v9997_v57  ;;  %v15661_v1 = vperm.slane %v15327_v36, %v9997_v57  ;;  %v7876_v61 = vsel %vm672_vm6, %v7875_v26, %v15642_v44  ;;  %v9523_v42 = vunpack.i.h.bf16 %v15499_v48  ;;  %v16832_v26 = vld [vmem:[#allocation55_spill] sm:$0xff] }
 0x7e6   : > { %9735 = vrot.lane.b32.xlu1 %v9734_v40, %s9772_s10  ;;  %9700 = vrot.lane.b32.xlu0 %v9699_v8, %s9772_s10  ;;  %v7773_v34 = vrot.slane %v15647_v45, 4  ;;  %v9522_v50 = vunpack.i.l.bf16 %v15499_v48  ;;  %v9724_v39 = vpack.i.bf16 %v7876_v61, %v7764_v60  ;;  %v9518_v15 = vunpack.i.h.bf16 %v15489_v23  ;;  %v15681_v8 = vpop.permute.xlu0 %9565 }
 0x7e7   : > { %v7885_v11 = vrot.slane %v15657_v9, 4  ;;  %v9517_v36 = vunpack.i.l.bf16 %v15489_v23  ;;  %v9548_v21 = vunpack.i.h.bf16 %v15554_v63  ;;  %v9547_v55 = vunpack.i.l.bf16 %v15554_v63 }
 0x7e8   : > { %v7774_v3 = vsel %vm672_vm6, %v15653_v4, %v7773_v34  ;;  %v15679_v40 = vperm.slane %v15302_v29, %v9997_v57  ;;  %9725 = vrot.lane.b32.xlu2 %v9724_v39, %s9769_s7  ;;  %v5589_v63 = vsel %vm954_vm9, %v15463_v30, %v9518_v15  ;;  %v7761_v60 = vrot.slane %v16832_v26, 4  ;;  %v15701_v30 = vpop.permute.xlu1 %9570 }
 0x7e9   : > { %v7886_v48 = vsel %vm672_vm6, %v15661_v1, %v7885_v11  ;;  %v5582_v23 = vsel %vm954_vm9, %v15466_v28, %v9517_v36  ;;  %v5590_v29 = vsel %vm956_vm10, %v5589_v63, %v9523_v42  ;;  %v15695_v24 = vperm.slane %v15317_v49, %v9997_v57  ;;  %v16833_v11 = vld [vmem:[#allocation50_spill] sm:$0xff]  ;;  %v15707_v57 = vpop.permute.xlu2 %9575 }
 0x7ea   : > { %v9749_v61 = vpack.i.bf16 %v7886_v48, %v7774_v3  ;;  %v5583_v34 = vsel %vm956_vm10, %v5582_v23, %v9522_v50  ;;  %v7762_v39 = vsel %vm672_vm6, %v15679_v40, %v7761_v60  ;;  %v7873_v27 = vrot.slane %v16833_v11, 4 }
 0x7eb   : > { %v7769_v28 = vrot.slane %v15609_v46, 4  ;;  %v7881_v36 = vrot.slane %v7842_v19, 4  ;;  %v9538_v15 = vunpack.i.h.bf16 %v15565_v17  ;;  %v9537_v50 = vunpack.i.l.bf16 %v15565_v17 }
 0x7ec   : > { %v9533_v42 = vunpack.i.h.bf16 %v15556_v25  ;;  %v9532_v3 = vunpack.i.l.bf16 %v15556_v25  ;;  %v7874_v49 = vsel %vm672_vm6, %v15695_v24, %v7873_v27  ;;  %v5584_v19 = vsel %vm958_vm11, %v5583_v34, %v9527_v2 }
 0x7ed   : > { %v7770_v48 = vsel %vm672_vm6, %v15595_v33, %v7769_v28  ;;  %v7882_v46 = vsel %vm672_vm6, %v15605_v12, %v7881_v36  ;;  %v9714_v17 = vpack.i.bf16 %v7874_v49, %v7762_v39  ;;  %v5591_v27 = vsel %vm958_vm11, %v5590_v29, %v9528_v58  ;;  %v16834_v12 = vld [vmem:[#allocation4_spill] sm:$0xff] }
 0x7ee   : > { %9750 = vrot.lane.b32.xlu1 %v9749_v61, %s9774_s12  ;;  %v9739_v23 = vpack.i.bf16 %v7882_v46, %v7770_v48  ;;  %v5585_v25 = vsel %vm960_vm12, %v5584_v19, %v9532_v3  ;;  %v6358_v33 = vsel %vm960_vm12, %v15601_v37, %v9498_v18  ;;  %v5925_v63 = vsel %vm672_vm6, %v5924_v6, %v16834_v12  ;;  %v16835_v61 = vld [vmem:[#allocation53_spill] sm:$0xff]  ;;  %v15739_v18 = vpop.permute.xlu0 %9580 }
 0x7ef   : > { %v5592_v2 = vsel %vm960_vm12, %v5591_v27, %v9533_v42  ;;  %v7765_v60 = vrot.slane %v15632_v53, 4  ;;  %v5813_v34 = vsel %vm672_vm6, %v5812_v35, %v16835_v61  ;;  %v6003_v52 = vsel %vm952_vm8, %v5925_v63, %v9548_v21  ;;  %9715 = vrot.lane.b32.xlu0 %v9714_v17, %s9770_s8 }
 0x7f0   : > { %v7877_v31 = vrot.slane %v15642_v44, 4  ;;  %v5586_v58 = vsel %vm962_vm13, %v5585_v25, %v9537_v50  ;;  %v5996_v37 = vsel %vm952_vm8, %v5813_v34, %v9547_v55  ;;  %9740 = vrot.lane.b32.xlu2 %v9739_v23, %s9771_s9  ;;  %v5593_v35 = vsel %vm962_vm13, %v5592_v2, %v9538_v15 }
 0x7f1   : > { %v7766_v6 = vsel %vm672_vm6, %v15305_v7, %v7765_v60  ;;  %v5587_v38 = vsel %vm964_vm14, %v5586_v58, %v9542_v51  ;;  %v5594_v21 = vsel %vm964_vm14, %v5593_v35, %v9543_v43  ;;  %v9558_v55 = vunpack.i.h.bf16 %v15623_v59 }
 0x7f2   : > { %v7878_v53 = vsel %vm672_vm6, %v15320_v22, %v7877_v31  ;;  %v5597_v44 = vpack.c.bf16 %v5587_v38, %v5587_v38  ;;  %v5598_v39 = vpack.c.bf16 %v5594_v21, %v5594_v21  ;;  %v7771_v7 = vrot.slane %v15653_v4, 4  ;;  %v16844_v38 = vld [vmem:[#allocation52_spill] sm:$0xff] }
 0x7f3   : > { %v9729_v29 = vpack.i.bf16 %v7878_v53, %v7766_v6  ;;  %v7883_v28 = vrot.slane %v15661_v1, 4  ;;  %v6352_v22 = vsel %vm962_vm13, %v15617_v10, %v9502_v32  ;;  %v16837_v36 = vunpack.i.h.bf16 %v16811_v54  ;;  %v8513_v54 = vld [vmem:[%s15973_s3 + $0x4] sm:$0xf]  ;;  %v9586_v32 = vpop.permute.xlu1 %9585  ;;  %v15777_v10 = vpop.permute.xlu2 %9590  ;;  %v16845_v53 = vld [vmem:[#allocation46_spill] sm:$0xff] }
 0x7f4   : > { %v5603_v51 = vsel %vm16836_vm4, %v5597_v44, 0  ;;  %v9553_v43 = vunpack.i.h.bf16 %v15614_v14  ;;  %v5606_v15 = vsel %vm16838_vm5, %v5598_v39, 0  ;;  %v7772_v4 = vsel %vm672_vm6, %v7771_v7, %v15647_v45  ;;  %v16847_v7 = vld [vmem:[#allocation16_spill] sm:$0xff]  ;;  %vm16850_vm4 = vmmov %vm16843_vm1 }
 0x7f5   : > { %v6359_v47 = vsel %vm962_vm13, %v6358_v33, %v16837_v36  ;;  %5615 = vmatpush.bf16.msrb.mxu0 %v5603_v51  ;;  %v7884_v1 = vsel %vm672_vm6, %v7883_v28, %v15657_v9  ;;  %v16839_v50 = vunpack.i.l.bf16 %v15422_v41  ;;  %5628 = vmatpush.bf16.msrb.mxu1 %v5606_v15  ;;  %v16840_v48 = vunpack.i.h.bf16 %v15422_v41  ;;  %vm16851_vm5 = vmmov %vm16843_vm1 }
 0x7f6   : > { %v9744_v3 = vpack.i.bf16 %v7884_v1, %v7772_v4  ;;  %v9552_v9 = vunpack.i.l.bf16 %v15614_v14  ;;  %v9563_v46 = vunpack.i.h.bf16 %v15634_v13  ;;  %v9557_v19 = vunpack.i.l.bf16 %v15623_v59  ;;  %v9596_v14 = vpop.permute.xlu0 %9595 }
 0x7f7   : > { %v6353_v42 = vsel %vm964_vm14, %v6352_v22, %v16839_v50  ;;  %v6360_v45 = vsel %vm964_vm14, %v6359_v47, %v16840_v48  ;;  %v6004_v23 = vsel %vm954_vm9, %v6003_v52, %v9553_v43  ;;  %v9562_v25 = vunpack.i.l.bf16 %v15634_v13  ;;  %9730 = vrot.lane.b32.xlu0 %v9729_v29, %s9773_s11  ;;  %v16846_v29 = vld [vmem:[#allocation11_spill] sm:$0xff] }
 0x7f8   : > { %v6363_v49 = vpack.c.bf16 %v6353_v42, %v6353_v42  ;;  %v6364_v17 = vpack.c.bf16 %v6360_v45, %v6360_v45  ;;  %v5997_v33 = vsel %vm954_vm9, %v5996_v37, %v9552_v9  ;;  %v6005_v41 = vsel %vm956_vm10, %v6004_v23, %v9558_v55  ;;  %8514 = vmatmul.msk.bf16.vlgmr.msrb.gmra.mxu0 %vm16842_vm7, %v8513_v54  ;;  %v8516_v9 = vld [vmem:[%s15973_s3 + $0x8] sm:$0xf]  ;;  %vm16853_vm7 = vmmov %vm16843_vm1 }
 0x7f9   : > { %v9578_v12 = vunpack.i.h.bf16 %v15707_v57  ;;  %v5998_v63 = vsel %vm956_vm10, %v5997_v33, %v9557_v19  ;;  %8515 = vmatmul.msk.bf16.vlgmr.msrb.gmra.mxu1 %vm16843_vm1, %v8513_v54  ;;  %v9568_v13 = vunpack.i.h.bf16 %v15681_v8  ;;  %v9577_v2 = vunpack.i.l.bf16 %v15707_v57 }
 0x7fa   : > { %v6369_v27 = vsel %vm16841_vm15, %v6363_v49, 0  ;;  %v6372_v59 = vsel %vm16815_vm0, %v6364_v17, 0  ;;  %v9573_v60 = vunpack.i.h.bf16 %v15701_v30  ;;  %v9567_v61 = vunpack.i.l.bf16 %v15681_v8  ;;  %vm16852_vm15 = vmmov %vm16843_vm1 }
 0x7fb   : > { %6381 = vmatpush.bf16.msra.mxu0 %v6369_v27  ;;  %6394 = vmatpush.bf16.msra.mxu1 %v6372_v59  ;;  %v6006_v34 = vsel %vm958_vm11, %v6005_v41, %v9563_v46  ;;  %v9572_v52 = vunpack.i.l.bf16 %v15701_v30  ;;  %v5999_v31 = vsel %vm958_vm11, %v5998_v63, %v9562_v25  ;;  %v9588_v37 = vunpack.i.h.bf16 %v9586_v32  ;;  %v9601_v15 = vpop.permute.xlu1 %9600  ;;  %v9606_v1 = vpop.permute.xlu2 %9605  ;;  %v8519_v59 = vld [vmem:[%s15973_s3 + $0xc] sm:$0xf]  ;;  %vm16854_vm1 = vmmov %vm16815_vm0 }
 0x7fc   : > { %v6007_v58 = vsel %vm960_vm12, %v6006_v34, %v9568_v13  ;;  %v6000_v6 = vsel %vm960_vm12, %v5999_v31, %v9567_v61  ;;  %v6578_v35 = vrot.slane %v16844_v38, 4  ;;  %v6690_v57 = vrot.slane %v16845_v53, 4  ;;  %v16857_v53 = vld [vmem:[#allocation37_spill] sm:$0xff] }
 0x7fd   : > { %v9583_v44 = vunpack.i.h.bf16 %v15739_v18  ;;  %v9587_v21 = vunpack.i.l.bf16 %v9586_v32  ;;  %v9582_v8 = vunpack.i.l.bf16 %v15739_v18  ;;  %v6001_v55 = vsel %vm962_vm13, %v6000_v6, %v9572_v52 }
 0x7fe   : > { %v6008_v30 = vsel %vm962_vm13, %v6007_v58, %v9573_v60  ;;  %v6579_v39 = vsel %vm672_vm6, %v6578_v35, %v16846_v29  ;;  %v6691_v28 = vsel %vm672_vm6, %v6690_v57, %v16847_v7  ;;  %v6002_v51 = vsel %vm964_vm14, %v6001_v55, %v9577_v2  ;;  %v9611_v45 = vpop.permute.xlu0 %9610  ;;  %v16859_v29 = vld [vmem:[#allocation36_spill] sm:$0xff]  ;;  %v16860_v7 = vld [vmem:[#allocation41_spill] sm:$0xff] }
 0x7ff   : > { %v6009_v22 = vsel %vm964_vm14, %v6008_v30, %v9578_v12  ;;  %v6769_v36 = vsel %vm952_vm8, %v6691_v28, %v9583_v44  ;;  %v6762_v47 = vsel %vm952_vm8, %v6579_v39, %v9582_v8  ;;  %v6012_v43 = vpack.c.bf16 %v6002_v51, %v6002_v51  ;;  %9745 = vrot.lane.b32.xlu0 %v9744_v3, %s9775_s13  ;;  %v16858_v44 = vld [vmem:[#allocation44_spill] sm:$0xff] }
 0x800   : > { %v6013_v18 = vpack.c.bf16 %v6009_v22, %v6009_v22  ;;  %v9593_v4 = vunpack.i.h.bf16 %v15777_v10  ;;  %v6770_v50 = vsel %vm954_vm9, %v6769_v36, %v9588_v37  ;;  %v6763_v42 = vsel %vm954_vm9, %v6762_v47, %v9587_v21  ;;  %v8522_v37 = vld [vmem:[%s15973_s3 + $0x10] sm:$0xf] }
 0x801   : > { %v9592_v54 = vunpack.i.l.bf16 %v15777_v10  ;;  %v6018_v32 = vsel %vm16848_vm2, %v6012_v43, 0  ;;  %v9598_v48 = vunpack.i.h.bf16 %v9596_v14  ;;  %v9603_v3 = vunpack.i.h.bf16 %v9601_v15  ;;  %vm16855_vm2 = vmmov %vm16850_vm4 }
 0x802   : > { %v6021_v49 = vsel %vm16849_vm3, %v6013_v18, 0  ;;  %6030 = vmatpush.bf16.msrb.mxu2 %v6018_v32  ;;  %v9597_v46 = vunpack.i.l.bf16 %v9596_v14  ;;  %v6771_v19 = vsel %vm956_vm10, %v6770_v50, %v9593_v4  ;;  %v9608_v17 = vunpack.i.h.bf16 %v9606_v1  ;;  %vm16856_vm3 = vmmov %vm16855_vm2 }
 0x803   : > { %6043 = vmatpush.bf16.msrb.mxu3 %v6021_v49  ;;  %v9602_v23 = vunpack.i.l.bf16 %v9601_v15  ;;  %v6764_v10 = vsel %vm956_vm10, %v6763_v42, %v9592_v54  ;;  %v6772_v25 = vsel %vm958_vm11, %v6771_v19, %v9598_v48  ;;  %v9607_v27 = vunpack.i.l.bf16 %v9606_v1  ;;  %v9626_v6 = vpop.permute.xlu2 %9625  ;;  %v9621_v38 = vpop.permute.xlu1 %9620 }
 0x804   : > { %v6765_v33 = vsel %vm958_vm11, %v6764_v10, %v9597_v46  ;;  %v6773_v41 = vsel %vm960_vm12, %v6772_v25, %v9603_v3  ;;  %v9613_v12 = vunpack.i.h.bf16 %v9611_v45  ;;  %v9612_v63 = vunpack.i.l.bf16 %v9611_v45 }
 0x805   : > { %8517 = vmatmul.msk.bf16.vlgmr.msrb.gmra.mxu2 %vm16850_vm4, %v8516_v9  ;;  %v6766_v14 = vsel %vm960_vm12, %v6765_v33, %v9602_v23  ;;  %v6774_v13 = vsel %vm962_vm13, %v6773_v41, %v9608_v17  ;;  %v6993_v57 = vrot.slane %v16857_v53, 4  ;;  %v7344_v21 = vrot.slane %v16858_v44, 4  ;;  %vm16861_vm4 = vmmov %vm16815_vm0 }
 0x806   : > { %8518 = vmatmul.msk.bf16.vlgmr.msrb.gmra.mxu3 %vm16851_vm5, %v8516_v9  ;;  %v6767_v2 = vsel %vm962_vm13, %v6766_v14, %v9607_v27  ;;  %v6775_v60 = vsel %vm964_vm14, %v6774_v13, %v9613_v12  ;;  %v9623_v43 = vunpack.i.h.bf16 %v9621_v38  ;;  %v9622_v18 = vunpack.i.l.bf16 %v9621_v38  ;;  %vm16862_vm5 = vmmov %vm16815_vm0 }
 0x807   : > { %v6768_v61 = vsel %vm964_vm14, %v6767_v2, %v9612_v63  ;;  %v6779_v34 = vpack.c.bf16 %v6775_v60, %v6775_v60  ;;  %v6994_v39 = vsel %vm672_vm6, %v6993_v57, %v16859_v29  ;;  %v7345_v28 = vsel %vm672_vm6, %v7344_v21, %v16860_v7  ;;  %v16865_v21 = vld [vmem:[#allocation35_spill] sm:$0xff] }
 0x808   : > { %8520 = vmatmul.msk.bf16.vlgmr.msra.gmra.mxu0 %vm16852_vm15, %v8519_v59  ;;  %v6778_v52 = vpack.c.bf16 %v6768_v61, %v6768_v61  ;;  %v9628_v42 = vunpack.i.h.bf16 %v9626_v6  ;;  %v9627_v54 = vunpack.i.l.bf16 %v9626_v6  ;;  %vm16863_vm15 = vmmov %vm16855_vm2  ;;  %v7456_v6 = vrot.slane %v15248_v20, 4 }
 0x809   : > { %8521 = vmatmul.msk.bf16.vlgmr.msra.gmra.mxu1 %vm16853_vm7, %v8519_v59  ;;  %v6787_v31 = vsel %vm16815_vm0, %v6779_v34, 0  ;;  %v8525_v34 = vld [vmem:[%s15973_s3 + $0x14] sm:$0xf]  ;;  %vm16864_vm7 = vmmov %vm16855_vm2 }
 0x80a   : > { %v6784_v58 = vsel %vm16854_vm1, %v6778_v52, 0  ;;  %6809 = vmatpush.bf16.msra.mxu3 %v6787_v31  ;;  %v8528_v52 = vld [vmem:[%s15973_s3 + $0x18] sm:$0xf]  ;;  %vm16867_vm1 = vmmov %vm16815_vm0 }
 0x80b   : > { %6796 = vmatpush.bf16.msra.mxu2 %v6784_v58  ;;  %v9616_v35 = vpop.permute.xlu0 %9615  ;;  %v9641_v30 = vpop.permute.xlu2 %9640 }
 0x80c   : > { %v9618_v8 = vunpack.i.h.bf16 %v9616_v35  ;;  %v9617_v55 = vunpack.i.l.bf16 %v9616_v35  ;;  %v9636_v51 = vpop.permute.xlu1 %9635  ;;  %v9643_v10 = vunpack.i.h.bf16 %v9641_v30  ;;  %v9642_v25 = vunpack.i.l.bf16 %v9641_v30 }
 0x80d   : > { %v9638_v9 = vunpack.i.h.bf16 %v9636_v51  ;;  %v9637_v3 = vunpack.i.l.bf16 %v9636_v51 }
 0x80e   : > { %v7528_v22 = vsel %vm952_vm8, %v7345_v28, %v9618_v8  ;;  %v7177_v36 = vsel %vm952_vm8, %v6994_v39, %v9617_v55  ;;  %v16866_v55 = vld [vmem:[#allocation56_spill] sm:$0xff] }
 0x80f   : > { %v7529_v15 = vsel %vm954_vm9, %v7528_v22, %v9623_v43  ;;  %v7178_v4 = vsel %vm954_vm9, %v7177_v36, %v9622_v18  ;;  %v7457_v30 = vsel %vm672_vm6, %v7456_v6, %v16866_v55 }
 0x810   : > { %v7179_v32 = vsel %vm956_vm10, %v7178_v4, %v9627_v54  ;;  %v7530_v49 = vsel %vm956_vm10, %v7529_v15, %v9628_v42 }
 0x813   : > { %v9651_v46 = vpop.permute.xlu2 %9650 }
 0x814   : > { %v9653_v38 = vunpack.i.h.bf16 %v9651_v46  ;;  %v9652_v35 = vunpack.i.l.bf16 %v9651_v46 }
 0x815   : > { %8523 = vmatmul.msk.bf16.vlgmr.msra.gmra.mxu2 %vm16855_vm2, %v8522_v37 }
 0x816   : > { %8524 = vmatmul.msk.bf16.vlgmr.msra.gmra.mxu3 %vm16856_vm3, %v8522_v37  ;;  %v7105_v37 = vrot.slane %v15216_v56, 4  ;;  %v7535_v39 = vsel %vm952_vm8, %v7457_v30, %v9652_v35  ;;  %vm16868_vm3 = vmmov %vm16855_vm2 }
 0x818   : > { %v7106_v8 = vsel %vm672_vm6, %v7105_v37, %v16865_v21 }
 0x819   : > { %v7184_v29 = vsel %vm952_vm8, %v7106_v8, %v9653_v38 }
 0x81a   : > { %v9631_v47 = vpop.permute.xlu0 %9630 }
 0x81b   : > { %v9633_v1 = vunpack.i.h.bf16 %v9631_v47  ;;  %v9632_v50 = vunpack.i.l.bf16 %v9631_v47 }
 0x81d   : > { %v7180_v48 = vsel %vm958_vm11, %v7179_v32, %v9632_v50  ;;  %v7531_v45 = vsel %vm958_vm11, %v7530_v49, %v9633_v1  ;;  %v9666_v31 = vpop.permute.xlu2 %9665 }
 0x81e   : > { %v7181_v17 = vsel %vm960_vm12, %v7180_v48, %v9637_v3  ;;  %v7532_v23 = vsel %vm960_vm12, %v7531_v45, %v9638_v9  ;;  %v9668_v43 = vunpack.i.h.bf16 %v9666_v31  ;;  %v9667_v18 = vunpack.i.l.bf16 %v9666_v31 }
 0x81f   : > { %v9661_v19 = vpop.permute.xlu1 %9660  ;;  %v7182_v12 = vsel %vm962_vm13, %v7181_v17, %v9642_v25  ;;  %v7533_v14 = vsel %vm962_vm13, %v7532_v23, %v9643_v10 }
 0x820   : > { %v9663_v28 = vunpack.i.h.bf16 %v9661_v19  ;;  %v9662_v51 = vunpack.i.l.bf16 %v9661_v19 }
 0x827   : > { %v9681_v20 = vpop.permute.xlu2 %9680 }
 0x828   : > { %v9683_v49 = vunpack.i.h.bf16 %v9681_v20  ;;  %v9682_v48 = vunpack.i.l.bf16 %v9681_v20 }
 0x82f   : > { %v9646_v27 = vpop.permute.xlu0 %9645  ;;  %v9696_v25 = vpop.permute.xlu2 %9695 }
 0x830   : > { %v9648_v33 = vunpack.i.h.bf16 %v9646_v27  ;;  %v9647_v41 = vunpack.i.l.bf16 %v9646_v27  ;;  %v9698_v6 = vunpack.i.h.bf16 %v9696_v25  ;;  %v9697_v38 = vunpack.i.l.bf16 %v9696_v25 }
 0x832   : > { %v7183_v59 = vsel %vm964_vm14, %v7182_v12, %v9647_v41  ;;  %v7534_v63 = vsel %vm964_vm14, %v7533_v14, %v9648_v33  ;;  %v8174_v33 = vrot.slane %v15549_v16, 4  ;;  %v8286_v41 = vrot.slane %v15562_v62, 4 }
 0x833   : > { %v7193_v13 = vpack.c.bf16 %v7183_v59, %v7183_v59  ;;  %v7544_v2 = vpack.c.bf16 %v7534_v63, %v7534_v63 }
 0x834   : > { %v9676_v58 = vpop.permute.xlu1 %9675 }
 0x835   : > { %v7199_v60 = vsel %vm16861_vm4, %v7193_v13, 0  ;;  %v7550_v61 = vsel %vm16862_vm5, %v7544_v2, 0  ;;  %v9678_v50 = vunpack.i.h.bf16 %v9676_v58  ;;  %v9677_v42 = vunpack.i.l.bf16 %v9676_v58  ;;  %vm16869_vm4 = vmmov %vm16815_vm0 }
 0x836   : > { %7211 = vmatpush.bf16.msrb.mxu0 %v7199_v60  ;;  %7562 = vmatpush.bf16.msrb.mxu2 %v7550_v61  ;;  %v8175_v2 = vsel %vm672_vm6, %v8174_v33, %v16819_v5  ;;  %v8287_v60 = vsel %vm672_vm6, %v8286_v41, %v16821_v0  ;;  %vm16870_vm5 = vmmov %vm16815_vm0 }
 0x839   : > { %8526 = vmatmul.msk.bf16.vlgmr.msrb.gmra.mxu0 %vm16863_vm15, %v8525_v34  ;;  %8529 = vmatmul.msk.bf16.vlgmr.msrb.gmra.mxu2 %vm16864_vm7, %v8528_v52  ;;  %v9711_v5 = vpop.permute.xlu2 %9710  ;;  %vm16871_vm15 = vmmov %vm16855_vm2 }
 0x83a   : > { %v9713_v8 = vunpack.i.h.bf16 %v9711_v5  ;;  %v9712_v55 = vunpack.i.l.bf16 %v9711_v5  ;;  %vm16872_vm7 = vmmov %vm16855_vm2 }
 0x83c   : > { %v9656_v53 = vpop.permute.xlu0 %9655 }
 0x83d   : > { %v9658_v57 = vunpack.i.h.bf16 %v9656_v53  ;;  %v9657_v44 = vunpack.i.l.bf16 %v9656_v53  ;;  %v9691_v22 = vpop.permute.xlu1 %9690 }
 0x83e   : > { %v9693_v61 = vunpack.i.h.bf16 %v9691_v22  ;;  %v9692_v31 = vunpack.i.l.bf16 %v9691_v22 }
 0x83f   : > { %v7185_v7 = vsel %vm954_vm9, %v7184_v29, %v9658_v57  ;;  %v7536_v56 = vsel %vm954_vm9, %v7535_v39, %v9657_v44 }
 0x840   : > { %v7186_v36 = vsel %vm956_vm10, %v7185_v7, %v9663_v28  ;;  %v7537_v47 = vsel %vm956_vm10, %v7536_v56, %v9662_v51 }
 0x841   : > { %v7187_v54 = vsel %vm958_vm11, %v7186_v36, %v9668_v43  ;;  %v7538_v32 = vsel %vm958_vm11, %v7537_v47, %v9667_v18 }
 0x846   : > { %v9671_v15 = vpop.permute.xlu0 %9670 }
 0x847   : > { %v9673_v4 = vunpack.i.h.bf16 %v9671_v15  ;;  %v9672_v1 = vunpack.i.l.bf16 %v9671_v15  ;;  %v9706_v27 = vpop.permute.xlu1 %9705 }
 0x848   : > { %v9707_v44 = vunpack.i.l.bf16 %v9706_v27 }
 0x849   : > { %v7188_v45 = vsel %vm960_vm12, %v7187_v54, %v9673_v4  ;;  %v7539_v9 = vsel %vm960_vm12, %v7538_v32, %v9672_v1  ;;  %v9726_v54 = vpop.permute.xlu2 %9725  ;;  %v7759_v32 = vrot.slane %v15679_v40, 4 }
 0x84a   : > { %v7189_v3 = vsel %vm962_vm13, %v7188_v45, %v9678_v50  ;;  %v7540_v46 = vsel %vm962_vm13, %v7539_v9, %v9677_v42  ;;  %v8534_v42 = vld [vmem:[%s15973_s3 + $0x20] sm:$0xf]  ;;  %v9727_v25 = vunpack.i.l.bf16 %v9726_v54 }
 0x84b   : > { %v7190_v19 = vsel %vm964_vm14, %v7189_v3, %v9683_v49  ;;  %v7541_v17 = vsel %vm964_vm14, %v7540_v46, %v9682_v48  ;;  %v7871_v49 = vrot.slane %v15695_v24, 4 }
 0x84c   : > { %v7194_v23 = vpack.c.bf16 %v7190_v19, %v7190_v19  ;;  %v7545_v10 = vpack.c.bf16 %v7541_v17, %v7541_v17  ;;  %v7760_v19 = vsel %vm672_vm6, %v7759_v32, %v16832_v26 }
 0x84d   : > { %v7872_v17 = vsel %vm672_vm6, %v7871_v49, %v16833_v11  ;;  %vm16874_vm6 = vmmov %vm16815_vm0 }
 0x84e   : > { %v7202_v12 = vsel %vm16815_vm0, %v7194_v23, 0  ;;  %v7553_v14 = vsel %vm16867_vm1, %v7545_v10, 0  ;;  %v9728_v10 = vunpack.i.h.bf16 %v9726_v54 }
 0x84f   : > { %7224 = vmatpush.bf16.msrb.mxu1 %v7202_v12  ;;  %7575 = vmatpush.bf16.msrb.mxu3 %v7553_v14  ;;  %v9721_v53 = vpop.permute.xlu1 %9720 }
 0x850   : > { %v9686_v59 = vpop.permute.xlu0 %9685  ;;  %v9723_v39 = vunpack.i.h.bf16 %v9721_v53  ;;  %v9722_v7 = vunpack.i.l.bf16 %v9721_v53 }
 0x851   : > { %v9688_v63 = vunpack.i.h.bf16 %v9686_v59  ;;  %v9687_v13 = vunpack.i.l.bf16 %v9686_v59  ;;  %v9741_v59 = vpop.permute.xlu2 %9740 }
 0x852   : > { %8527 = vmatmul.msk.bf16.vlgmr.msrb.gmra.mxu1 %vm16855_vm2, %v8525_v34  ;;  %8530 = vmatmul.msk.bf16.vlgmr.msrb.gmra.mxu3 %vm16868_vm3, %v8528_v52  ;;  %v9708_v34 = vunpack.i.h.bf16 %v9706_v27 }
 0x853   : > { %v8365_v16 = vsel %vm952_vm8, %v8287_v60, %v9688_v63  ;;  %v8358_v62 = vsel %vm952_vm8, %v8175_v2, %v9687_v13 }
 0x854   : > { %v8366_v58 = vsel %vm954_vm9, %v8365_v16, %v9693_v61  ;;  %v8359_v37 = vsel %vm954_vm9, %v8358_v62, %v9692_v31  ;;  %v9743_v16 = vunpack.i.h.bf16 %v9741_v59  ;;  %v9742_v62 = vunpack.i.l.bf16 %v9741_v59  ;;  %v16873_v31 = vld [vmem:[#allocation5_spill] sm:$0xff] }
 0x855   : > { %v8360_v52 = vsel %vm956_vm10, %v8359_v37, %v9697_v38  ;;  %v8367_v21 = vsel %vm956_vm10, %v8366_v58, %v9698_v6 }
 0x858   : > { %v9701_v35 = vpop.permute.xlu0 %9700  ;;  %v9736_v46 = vpop.permute.xlu1 %9735 }
 0x859   : > { %v9703_v0 = vunpack.i.h.bf16 %v9701_v35  ;;  %v9702_v57 = vunpack.i.l.bf16 %v9701_v35  ;;  %v9738_v63 = vunpack.i.h.bf16 %v9736_v46  ;;  %v9737_v11 = vunpack.i.l.bf16 %v9736_v46 }
 0x85b   : > { %v8361_v30 = vsel %vm958_vm11, %v8360_v52, %v9702_v57  ;;  %v8368_v29 = vsel %vm958_vm11, %v8367_v21, %v9703_v0 }
 0x85c   : > { %v8362_v56 = vsel %vm960_vm12, %v8361_v30, %v9707_v44  ;;  %v8369_v20 = vsel %vm960_vm12, %v8368_v29, %v9708_v34 }
 0x85d   : > { %v8363_v28 = vsel %vm962_vm13, %v8362_v56, %v9712_v55  ;;  %v8370_v51 = vsel %vm962_vm13, %v8369_v20, %v9713_v8  ;;  %v8531_v20 = vld [vmem:[%s15973_s3 + $0x1c] sm:$0xf] }
 0x85e   : > { %v8364_v47 = vsel %vm964_vm14, %v8363_v28, %v9722_v7  ;;  %v8371_v43 = vsel %vm964_vm14, %v8370_v51, %v9723_v39 }
 0x85f   : > { %v5202_v22 = vpop.f32.mrf.mxu2  ;;  %v5215_v36 = vpop.f32.mrf.mxu3  ;;  %v8374_v18 = vpack.c.bf16 %v8364_v47, %v8364_v47  ;;  %v8375_v15 = vpack.c.bf16 %v8371_v43, %v8371_v43 }
 0x860   : > { %v9751_v13 = vpop.permute.xlu1 %9750  ;;  %v5219_v58 = vadd.f32 %v5202_v22, %v16873_v31  ;;  %v5220_v0 = vadd.f32 %v5215_v36, %v16873_v31 }
 0x861   : > { %v8380_v4 = vsel %vm16869_vm4, %v8374_v18, 0  ;;  %v8383_v1 = vsel %vm16870_vm5, %v8375_v15, 0  ;;  %v9716_v50 = vpop.permute.xlu0 %9715  ;;  %v9753_v38 = vunpack.i.h.bf16 %v9751_v13  ;;  %v9752_v5 = vunpack.i.l.bf16 %v9751_v13 }
 0x862   : > { %8392 = vmatpush.bf16.msra.mxu2 %v8380_v4  ;;  %8405 = vmatpush.bf16.msra.mxu3 %v8383_v1  ;;  %v9718_v48 = vunpack.i.h.bf16 %v9716_v50  ;;  %v9717_v45 = vunpack.i.l.bf16 %v9716_v50 }
 0x864   : > { %v7950_v23 = vsel %vm952_vm8, %v7872_v17, %v9718_v48  ;;  %v7943_v40 = vsel %vm952_vm8, %v7760_v19, %v9717_v45  ;;  %vm16875_vm8 = vmmov %vm16815_vm0 }
 0x865   : > { %8535 = vmatmul.msk.bf16.vlgmr.msra.gmra.mxu2 %vm16871_vm15, %v8534_v42  ;;  %8536 = vmatmul.msk.bf16.vlgmr.msra.gmra.mxu3 %vm16872_vm7, %v8534_v42  ;;  %v7944_v41 = vsel %vm954_vm9, %v7943_v40, %v9727_v25  ;;  %v7951_v12 = vsel %vm954_vm9, %v7950_v23, %v9728_v10  ;;  %vm16876_vm9 = vmmov %vm16855_vm2 }
 0x867   : > { %v5204_v9 = vpop.f32.mrf.mxu2  ;;  %v5217_v3 = vpop.f32.mrf.mxu3 }
 0x869   : > { %v9731_v24 = vpop.permute.xlu0 %9730 }
 0x86a   : > { %v9733_v27 = vunpack.i.h.bf16 %v9731_v24  ;;  %v9732_v33 = vunpack.i.l.bf16 %v9731_v24 }
 0x86c   : > { %v7945_v14 = vsel %vm956_vm10, %v7944_v41, %v9732_v33  ;;  %v7952_v26 = vsel %vm956_vm10, %v7951_v12, %v9733_v27  ;;  %vm16877_vm10 = vmmov %vm16855_vm2 }
 0x86d   : > { %v7946_v2 = vsel %vm958_vm11, %v7945_v14, %v9737_v11  ;;  %v7953_v60 = vsel %vm958_vm11, %v7952_v26, %v9738_v63 }
 0x86e   : > { %v7947_v35 = vsel %vm960_vm12, %v7946_v2, %v9742_v62  ;;  %v7954_v53 = vsel %vm960_vm12, %v7953_v60, %v9743_v16 }
 0x871   : > { %v9746_v61 = vpop.permute.xlu0 %9745 }
 0x872   : > { %v9748_v37 = vunpack.i.h.bf16 %v9746_v61  ;;  %v9747_v6 = vunpack.i.l.bf16 %v9746_v61 }
 0x874   : > { %v7948_v57 = vsel %vm962_vm13, %v7947_v35, %v9747_v6  ;;  %v7955_v34 = vsel %vm962_vm13, %v7954_v53, %v9748_v37 }
 0x875   : > { %v5617_v44 = vpop.f32.mrf.mxu0  ;;  %v7949_v52 = vsel %vm964_vm14, %v7948_v57, %v9752_v5  ;;  %v7956_v21 = vsel %vm964_vm14, %v7955_v34, %v9753_v38 }
 0x876   : > { %v5634_v8 = vadd.f32 %v5617_v44, %v5219_v58  ;;  %v5630_v55 = vpop.f32.mrf.mxu1  ;;  %v7959_v30 = vpack.c.bf16 %v7949_v52, %v7949_v52  ;;  %v7960_v29 = vpack.c.bf16 %v7956_v21, %v7956_v21 }
 0x877   : > { %v5635_v39 = vadd.f32 %v5630_v55, %v5220_v0 }
 0x878   : > { %v7965_v7 = vsel %vm16874_vm6, %v7959_v30, 0  ;;  %v7968_v56 = vsel %vm16875_vm8, %v7960_v29, 0 }
 0x879   : > { %7977 = vmatpush.bf16.msra.mxu0 %v7965_v7  ;;  %7990 = vmatpush.bf16.msra.mxu1 %v7968_v56 }
 0x87c   : > { %8532 = vmatmul.msk.bf16.vlgmr.msra.gmra.mxu0 %vm16876_vm9, %v8531_v20  ;;  %8533 = vmatmul.msk.bf16.vlgmr.msra.gmra.mxu1 %vm16877_vm10, %v8531_v20 }
 0x87d   : > { %v5619_v28 = vpop.f32.mrf.mxu0 }
 0x87e   : > { %v5632_v51 = vpop.f32.mrf.mxu1 }
 0x885   : > { %v6383_v22 = vpop.f32.mrf.mxu0 }
 0x886   : > { %v6396_v36 = vpop.f32.mrf.mxu1 }
 0x888   : > { %v6032_v47 = vpop.f32.mrf.mxu2 }
 0x889   : > { %v6045_v43 = vpop.f32.mrf.mxu3  ;;  %v6049_v18 = vadd.f32 %v6032_v47, %v5634_v8 }
 0x88a   : > { %v6050_v15 = vadd.f32 %v6045_v43, %v5635_v39 }
 0x88b   : > { %v6400_v4 = vadd.f32 %v6383_v22, %v6049_v18 }
 0x88c   : > { %v6401_v1 = vadd.f32 %v6396_v36, %v6050_v15 }
 0x88d   : > { %v6385_v50 = vpop.f32.mrf.mxu0 }
 0x88e   : > { %v6398_v42 = vpop.f32.mrf.mxu1 }
 0x890   : > { %v6034_v54 = vpop.f32.mrf.mxu2 }
 0x891   : > { %v6047_v32 = vpop.f32.mrf.mxu3 }
 0x898   : > { %v6798_v49 = vpop.f32.mrf.mxu2 }
 0x899   : > { %v6811_v48 = vpop.f32.mrf.mxu3  ;;  %v6815_v45 = vadd.f32 %v6798_v49, %v6400_v4 }
 0x89a   : > { %v6816_v9 = vadd.f32 %v6811_v48, %v6401_v1 }
 0x8a0   : > { %v6800_v3 = vpop.f32.mrf.mxu2 }
 0x8a1   : > { %v6813_v46 = vpop.f32.mrf.mxu3 }
 0x8b6   : > { %v7213_v19 = vpop.f32.mrf.mxu0 }
 0x8b7   : > { %v7230_v26 = vadd.f32 %v7213_v19, %v6815_v45 }
 0x8bc   : > { %v7564_v17 = vpop.f32.mrf.mxu2 }
 0x8bd   : > { %v7581_v63 = vadd.f32 %v7564_v17, %v7230_v26 }
 0x8be   : > { %v7215_v23 = vpop.f32.mrf.mxu0 }
 0x8c4   : > { %v7566_v40 = vpop.f32.mrf.mxu2 }
 0x8cf   : > { %v7226_v24 = vpop.f32.mrf.mxu1 }
 0x8d0   : > { %v7231_v59 = vadd.f32 %v7226_v24, %v6816_v9 }
 0x8d5   : > { %v7577_v10 = vpop.f32.mrf.mxu3 }
 0x8d6   : > { %v7582_v11 = vadd.f32 %v7577_v10, %v7231_v59 }
 0x8d7   : > { %v7228_v25 = vpop.f32.mrf.mxu1 }
 0x8dd   : > { %v7579_v27 = vpop.f32.mrf.mxu3 }
 0x8e8   : > { %v8394_v33 = vpop.f32.mrf.mxu2  ;;  %v8407_v41 = vpop.f32.mrf.mxu3 }
 0x8f0   : > { %v8396_v12 = vpop.f32.mrf.mxu2  ;;  %v8409_v14 = vpop.f32.mrf.mxu3 }
 0x8f9   : > { %v7979_v13 = vpop.f32.mrf.mxu0  ;;  %v7992_v2 = vpop.f32.mrf.mxu1 }
 0x8fa   : > { %v7996_v60 = vadd.f32 %v7979_v13, %v7581_v63  ;;  %v7997_v16 = vadd.f32 %v7992_v2, %v7582_v11 }
 0x8fc   : > { %v8411_v62 = vadd.f32 %v8394_v33, %v7996_v60  ;;  %v8412_v61 = vadd.f32 %v8407_v41, %v7997_v16 }
 0x8fe   : > { %vm8413_vm11 = vcmp.gt.f32.partialorder %v8411_v62, 0.0  ;;  %v8415_v31 = vmul.f32 0.01, %v8411_v62  ;;  %vm8414_vm12 = vcmp.gt.f32.partialorder %v8412_v61, 0.0  ;;  %v8416_v58 = vmul.f32 0.01, %v8412_v61 }
 0x900   : > { %v8417_v37 = vsel %vm8413_vm11, %v8411_v62, %v8415_v31  ;;  %v8418_v6 = vsel %vm8414_vm12, %v8412_v61, %v8416_v58 }
 0x901   : > { %8419 = vst [vmem:[%s224_s20] sm:$0xff] %v8417_v37  ;;  %v7981_v38 = vpop.f32.mrf.mxu0  ;;  %v7994_v5 = vpop.f32.mrf.mxu1 }
 0x902   : > { %8420 = vst [vmem:[%s224_s20 + $0x8] sm:$0xff] %v8418_v6 }
 0x903 PF: > { %s15_s18 = sadd.s32 1, %s9760_s18  }
 0x904   : > { %p12_p4 = scmp.ge.s32.totalorder %s15_s18, 4  }
 0x906   :  { %14 = sbr.rel (!%p12_p4) target bundleno = 1 (0x1), region = 86 }

</bundles_post_ra>
